<compile_context>
chip_gen: v7x
topology: tpu7x:2x2x1
jax: 0.10.0
libtpu: 0.0.40
codegen_flags: <defaults>
</compile_context>

<pallas_src>
import functools
import jax
import jax.numpy as jnp
from jax.experimental import pallas as pl
from jax.experimental.pallas import tpu as pltpu

EPS = 1e-5  # PyTorch LayerNorm default


def _gelu(x):
    # TODO(synk): PyTorch nn.GELU default is erf-exact; tanh-approx used for a
    # guaranteed Mosaic lowering (EUP tanh).
    return jax.nn.gelu(x, approximate=True)


def _layernorm(x, g, b):
    mu = jnp.mean(x, axis=-1, keepdims=True)
    var = jnp.mean((x - mu) ** 2, axis=-1, keepdims=True)
    return (x - mu) * jax.lax.rsqrt(var + EPS) * g + b


def _dot(a, b):
    return jnp.dot(a.astype(jnp.bfloat16), b[...], preferred_element_type=jnp.float32)


# ----------------------------- kernels ------------------------------------ #

def node_kernel(vj_ref, e_ref, mask_ref, v_ref,
                w1vi, w1vje, b1, w2, b2, w3, b3, ln1g, ln1b,
                wf1, bf1, wf2, bf2, ln2g, ln2b,
                vout_ref):
    """node_messenger MLP (split Vi / fused [Vj|E] first layer) -> mask & sum_k
    (pre-w3) -> residual+LN -> FFN -> residual+LN."""
    tm, Dv = v_ref.shape
    Kn = mask_ref.shape[1]
    TK = tm * Kn
    Dh = w2.shape[0]

    v_f32 = v_ref[...]                                   # (tm, Dv) f32
    mask = mask_ref[...]                                 # (tm, Kn) f32

    # layer 0 over the (never-materialized) concat [Vi, Vj, E]:
    hi = _dot(v_f32, w1vi)                               # (tm, Dh) — once per node
    vje = jnp.concatenate([vj_ref[...], e_ref[...]], axis=-1)         # (TK, Dv+De) bf16
    hje = jnp.dot(vje, w1vje[...], preferred_element_type=jnp.float32)  # (TK, Dh)
    h = (hje.reshape(tm, Kn, Dh) + hi[:, None, :]).reshape(TK, Dh)
    h = _gelu(h + b1[...])
    h = _gelu(_dot(h, w2) + b2[...])                     # hidden layer

    # mask & sum over neighbors BEFORE the final projection (commutes with w3);
    # bias must be scaled by sum_k(mask).  Done in the (tm, Kn, Dh) view to
    # avoid a lane->sublane relayout of h.
    hsum = jnp.sum(h.reshape(tm, Kn, Dh) * mask[:, :, None], axis=1)  # (tm, Dh)
    msum = jnp.sum(mask, axis=1, keepdims=True)                       # (tm, 1)
    m = _dot(hsum, w3) + msum * b3[...]                               # (tm, Dv)

    v = _layernorm(v_f32 + m, ln1g[...], ln1b[...])                   # node_messenger_norm

    f = _gelu(_dot(v, wf1) + bf1[...])                                # ffn
    f = _dot(f, wf2) + bf2[...]
    v = _layernorm(v + f, ln2g[...], ln2b[...])                       # ffn_norm

    vout_ref[...] = v.astype(vout_ref.dtype)


def edge_kernel(vj_ref, e_ref, mask_ref, v_ref,
                w1vi, w1vje, b1, w2, b2, w3, b3, lng, lnb,
                eout_ref):
    """edge_messenger MLP (split Vi / fused [Vj|E] first layer) -> mask ->
    residual+LN."""
    tm, Dv = v_ref.shape
    Kn = mask_ref.shape[1]
    TK, De = e_ref.shape
    Dh = w2.shape[0]

    mask = mask_ref[...]                                 # (tm, Kn) f32
    e_bf = e_ref[...]                                    # (TK, De) bf16
    e_f32 = e_bf.astype(jnp.float32)                     # residual path in f32

    hi = _dot(v_ref[...], w1vi)                          # (tm, Dh) — once per node
    vje = jnp.concatenate([vj_ref[...], e_bf], axis=-1)  # (TK, Dv+De) bf16
    hje = jnp.dot(vje, w1vje[...], preferred_element_type=jnp.float32)  # (TK, Dh)
    h = (hje.reshape(tm, Kn, Dh) + hi[:, None, :]).reshape(TK, Dh)
    h = _gelu(h + b1[...])
    h = _gelu(_dot(h, w2) + b2[...])
    m = _dot(h, w3) + b3[...]                            # (TK, De)
    m = (m.reshape(tm, Kn, De) * mask[:, :, None]).reshape(TK, De)

    e_new = _layernorm(e_f32 + m, lng[...], lnb[...])    # edge_messenger_norm
    eout_ref[...] = e_new.astype(eout_ref.dtype)


# ----------------------------- wrapper ------------------------------------ #

def _round_up(x, m):
    return ((x + m - 1) // m) * m


def _full_spec(p):
    nd = p.ndim
    return pl.BlockSpec(p.shape, lambda i, _nd=nd: (0,) * _nd)


def _vmem_budget():
    """(vmem_limit_bytes, per-tile planning budget) — generation aware."""
    cap = 64 * 1024 * 1024
    try:
        cap = int(getattr(pltpu.get_tpu_info(), "vmem_capacity_bytes", cap))
    except Exception:
        pass
    if cap >= 100 * 1024 * 1024:                          # v5e / v6e: 128 MiB physical
        return 96 * 1024 * 1024, 72 * 1024 * 1024
    return 46 * 1024 * 1024, 34 * 1024 * 1024             # v7x: 64 MiB physical


def init_params(key, Dv, De):
    ks = jax.random.split(key, 12)

    def w(k, shape):
        return (0.02 * jax.random.normal(k, shape, dtype=jnp.float32)).astype(jnp.bfloat16)

    def zeros(shape):
        return jnp.zeros(shape, jnp.float32)

    def ones(shape):
        return jnp.ones(shape, jnp.float32)

    # When porting real PyTorch weights, each messenger's first Linear
    # (2*Dv + De -> Dh) must be split in the concat order [Vi, Vj, E]:
    #   w1vi  = W1.T[:Dv]       (Dv, Dh)
    #   w1vje = W1.T[Dv:]       (Dv+De, Dh)  — rows [Vj ; E] stacked.
    node = [
        w(ks[0], (Dv, Dv)),                           # w1vi
        w(ks[1], (Dv + De, Dv)),                      # w1vje (fused [Vj|E] weight)
        zeros((1, Dv)),                               # b1
        w(ks[2], (Dv, Dv)), zeros((1, Dv)),           # node_messenger hidden
        w(ks[3], (Dv, Dv)), zeros((1, Dv)),           # node_messenger out
        ones((1, Dv)), zeros((1, Dv)),                # node_messenger_norm
        w(ks[4], (Dv, 4 * Dv)), zeros((1, 4 * Dv)),   # ffn layer 0
        w(ks[5], (4 * Dv, Dv)), zeros((1, Dv)),       # ffn out
        ones((1, Dv)), zeros((1, Dv)),                # ffn_norm
    ]
    edge = [
        w(ks[6], (Dv, De)),                           # w1vi
        w(ks[7], (Dv + De, De)),                      # w1vje
        zeros((1, De)),                               # b1
        w(ks[8], (De, De)), zeros((1, De)),           # edge_messenger hidden
        w(ks[9], (De, De)), zeros((1, De)),           # edge_messenger out
        ones((1, De)), zeros((1, De)),                # edge_messenger_norm
    ]
    return node, edge


@functools.partial(jax.jit, static_argnames=("tm",))
def gnn_encoder_forward(V, E, K, edge_mask, node_params, edge_params, *, tm=512):
    Z, N, Dv = V.shape
    _, _, Kn, De = E.shape
    ZN = Z * N

    vmem_limit, vmem_budget = _vmem_budget()

    def _est(t):
        tk = t * Kn
        # double-buffered streamed blocks (Vj bf16, E bf16, mask f32, V f32, out)
        blk_node = tk * (2 * Dv + 2 * De + 4) + 2 * t * Dv * 4
        blk_edge = tk * (2 * Dv + 2 * De + 4 + 4 * De) + t * Dv * 4
        # live in-kernel intermediates: f32 activations, bf16 [Vj|E] slab, FFN hidden
        interm = (6 * tk * max(Dv, De) * 4
                  + tk * (Dv + De) * 2
                  + t * 4 * Dv * 4)
        w_bytes = 2 * sum(int(p.size) * p.dtype.itemsize
                          for p in list(node_params) + list(edge_params))
        return 2 * max(blk_node, blk_edge) + interm + w_bytes

    tm = max(16, min((int(tm) // 16) * 16, _round_up(ZN, 16)))   # bf16 sublane multiple
    while tm > 16 and _est(tm) > vmem_budget:
        tm = max(16, ((tm // 2) // 16) * 16)

    ZNp = _round_up(ZN, tm)
    pad_n = ZNp - ZN
    grid = (ZNp // tm,)

    cparams = pltpu.CompilerParams(
        dimension_semantics=("parallel",),       # megacore sharding of the node grid
        vmem_limit_bytes=vmem_limit,
    )

    def _pad_rows(x, rows):
        if rows == 0:
            return x
        return jnp.pad(x, ((0, rows),) + ((0, 0),) * (x.ndim - 1))

    mask2 = _pad_rows(edge_mask.reshape(ZN, Kn).astype(jnp.float32), pad_n)
    # E is read twice (node + edge pass) and only feeds matmuls / a residual that
    # goes straight into LayerNorm -> stream a single bf16 slab (half traffic).
    e_flat = _pad_rows(E.reshape(ZN * Kn, De).astype(jnp.bfloat16), pad_n * Kn)

    def gather_vj(Vx):
        # Vj[z,n,k,:] = Vx[z, K[z,n,k], :]; matmul-only operand -> store bf16.
        # TODO(synk): fold this gather into the kernel (scalar-prefetched K +
        # in-kernel row gather / manual DMA) to drop the HBM write+read of Vj.
        Vj = jax.vmap(lambda v, k: v[k])(Vx, K)
        return _pad_rows(Vj.astype(jnp.bfloat16).reshape(ZN * Kn, Dv), pad_n * Kn)

    def row_specs():
        return [
            pl.BlockSpec((tm * Kn, Dv), lambda i: (i, 0)),   # Vj (bf16)
            pl.BlockSpec((tm * Kn, De), lambda i: (i, 0)),   # E  (bf16)
            pl.BlockSpec((tm, Kn), lambda i: (i, 0)),        # edge_mask (f32)
            pl.BlockSpec((tm, Dv), lambda i: (i, 0)),        # V  (f32)
        ]

    # ---- node update -------------------------------------------------------
    v_flat = _pad_rows(V.reshape(ZN, Dv).astype(jnp.float32), pad_n)
    vj_flat = gather_vj(V)

    v_new_flat = pl.pallas_call(
        node_kernel,
        out_shape=jax.ShapeDtypeStruct((ZNp, Dv), jnp.float32),
        grid=grid,
        in_specs=row_specs() + [_full_spec(p) for p in node_params],
        out_specs=pl.BlockSpec((tm, Dv), lambda i: (i, 0)),
        compiler_params=cparams,
    )(vj_flat, e_flat, mask2, v_flat, *node_params)

    V_new = v_new_flat[:ZN].reshape(Z, N, Dv)

    # ---- edge update (uses updated node features) ---------------------------
    vj_flat2 = gather_vj(V_new)

    e_new_flat = pl.pallas_call(
        edge_kernel,
        out_shape=jax.ShapeDtypeStruct((ZNp * Kn, De), jnp.float32),
        grid=grid,
        in_specs=row_specs() + [_full_spec(p) for p in edge_params],
        out_specs=pl.BlockSpec((tm * Kn, De), lambda i: (i, 0)),
        compiler_params=cparams,
    )(vj_flat2, e_flat, mask2, v_new_flat, *edge_params)

    E_new = e_new_flat[:ZN * Kn].reshape(Z, N, Kn, De)
    return V_new, E_new


# ----------------------------- demo ---------------------------------------- #

if __name__ == "__main__":
    # Small graph, feature dims at the module defaults (Dv=De=128 => lane-dense).
    Z, N, Kn, Dv, De = 2, 16, 8, 128, 128

    key = jax.random.PRNGKey(0)
    k_v, k_e, k_k, k_m, k_p = jax.random.split(key, 5)

    V = jax.random.normal(k_v, (Z, N, Dv), dtype=jnp.float32)
    E = jax.random.normal(k_e, (Z, N, Kn, De), dtype=jnp.float32)
    K = jax.random.randint(k_k, (Z, N, Kn), 0, N, dtype=jnp.int32)
    edge_mask = (jax.random.uniform(k_m, (Z, N, Kn)) > 0.2).astype(jnp.float32)

    node_params, edge_params = init_params(k_p, Dv, De)

    V_out, E_out = gnn_encoder_forward(V, E, K, edge_mask, node_params, edge_params)
    jax.block_until_ready((V_out, E_out))

    assert V_out.shape == (Z, N, Dv) and E_out.shape == (Z, N, Kn, De)
    assert bool(jnp.all(jnp.isfinite(V_out))) and bool(jnp.all(jnp.isfinite(E_out)))
    print("KERNEL_OK")
</pallas_src>

<mosaic_0001>
module attributes {stable_mosaic.version = 11 : i64} {
  func.func @node_kernel(%arg0: i32, %arg1: memref<256x128xbf16, #tpu.memory_space<vmem>>, %arg2: memref<256x128xbf16, #tpu.memory_space<vmem>>, %arg3: memref<32x8xf32, #tpu.memory_space<vmem>>, %arg4: memref<32x128xf32, #tpu.memory_space<vmem>>, %arg5: memref<128x128xbf16, #tpu.memory_space<vmem>>, %arg6: memref<256x128xbf16, #tpu.memory_space<vmem>>, %arg7: memref<1x128xf32, #tpu.memory_space<vmem>>, %arg8: memref<128x128xbf16, #tpu.memory_space<vmem>>, %arg9: memref<1x128xf32, #tpu.memory_space<vmem>>, %arg10: memref<128x128xbf16, #tpu.memory_space<vmem>>, %arg11: memref<1x128xf32, #tpu.memory_space<vmem>>, %arg12: memref<1x128xf32, #tpu.memory_space<vmem>>, %arg13: memref<1x128xf32, #tpu.memory_space<vmem>>, %arg14: memref<128x512xbf16, #tpu.memory_space<vmem>>, %arg15: memref<1x512xf32, #tpu.memory_space<vmem>>, %arg16: memref<512x128xbf16, #tpu.memory_space<vmem>>, %arg17: memref<1x128xf32, #tpu.memory_space<vmem>>, %arg18: memref<1x128xf32, #tpu.memory_space<vmem>>, %arg19: memref<1x128xf32, #tpu.memory_space<vmem>>, %arg20: memref<32x128xf32, #tpu.memory_space<vmem>>) attributes {dimension_semantics = [#tpu.dimension_semantics<parallel>], iteration_bounds = array<i64: 1>, scalar_prefetch = 0 : i64, scratch_operands = 0 : i64, tpu.core_type = #tpu.core_type<tc>, window_params = [{transform_indices = @transform_0, window_bounds = array<i64: 256, 128>}, {transform_indices = @transform_1, window_bounds = array<i64: 256, 128>}, {transform_indices = @transform_2, window_bounds = array<i64: 32, 8>}, {transform_indices = @transform_3, window_bounds = array<i64: 32, 128>}, {pipeline_mode = #tpu.pipeline_mode<synchronous>, transform_indices = @transform_4, window_bounds = array<i64: 128, 128>}, {pipeline_mode = #tpu.pipeline_mode<synchronous>, transform_indices = @transform_5, window_bounds = array<i64: 256, 128>}, {pipeline_mode = #tpu.pipeline_mode<synchronous>, transform_indices = @transform_6, window_bounds = array<i64: 1, 128>}, {pipeline_mode = #tpu.pipeline_mode<synchronous>, transform_indices = @transform_7, window_bounds = array<i64: 128, 128>}, {pipeline_mode = #tpu.pipeline_mode<synchronous>, transform_indices = @transform_8, window_bounds = array<i64: 1, 128>}, {pipeline_mode = #tpu.pipeline_mode<synchronous>, transform_indices = @transform_9, window_bounds = array<i64: 128, 128>}, {pipeline_mode = #tpu.pipeline_mode<synchronous>, transform_indices = @transform_10, window_bounds = array<i64: 1, 128>}, {pipeline_mode = #tpu.pipeline_mode<synchronous>, transform_indices = @transform_11, window_bounds = array<i64: 1, 128>}, {pipeline_mode = #tpu.pipeline_mode<synchronous>, transform_indices = @transform_12, window_bounds = array<i64: 1, 128>}, {pipeline_mode = #tpu.pipeline_mode<synchronous>, transform_indices = @transform_13, window_bounds = array<i64: 128, 512>}, {pipeline_mode = #tpu.pipeline_mode<synchronous>, transform_indices = @transform_14, window_bounds = array<i64: 1, 512>}, {pipeline_mode = #tpu.pipeline_mode<synchronous>, transform_indices = @transform_15, window_bounds = array<i64: 512, 128>}, {pipeline_mode = #tpu.pipeline_mode<synchronous>, transform_indices = @transform_16, window_bounds = array<i64: 1, 128>}, {pipeline_mode = #tpu.pipeline_mode<synchronous>, transform_indices = @transform_17, window_bounds = array<i64: 1, 128>}, {pipeline_mode = #tpu.pipeline_mode<synchronous>, transform_indices = @transform_18, window_bounds = array<i64: 1, 128>}, {transform_indices = @transform_19, window_bounds = array<i64: 32, 128>}]} {
    %c0 = arith.constant 0 : index
    %c0_0 = arith.constant 0 : index
    %0 = vector.load %arg4[%c0, %c0_0] : memref<32x128xf32, #tpu.memory_space<vmem>>, vector<32x128xf32>
    %c0_1 = arith.constant 0 : index
    %c0_2 = arith.constant 0 : index
    %1 = vector.load %arg3[%c0_1, %c0_2] : memref<32x8xf32, #tpu.memory_space<vmem>>, vector<32x8xf32>
    %2 = arith.truncf %0 : vector<32x128xf32> to vector<32x128xbf16>
    %c0_3 = arith.constant 0 : index
    %c0_4 = arith.constant 0 : index
    %3 = vector.load %arg5[%c0_3, %c0_4] : memref<128x128xbf16, #tpu.memory_space<vmem>>, vector<128x128xbf16>
    %cst = arith.constant dense<0.000000e+00> : vector<32x128xf32>
    %4 = tpu.matmul %2, %3, %cst {dimension_numbers = #tpu.dot_dimension_numbers<[1], [0], [0], [1], [0, 0, 1, 1], [], []>} : vector<32x128xbf16>, vector<128x128xbf16>, vector<32x128xf32> -> vector<32x128xf32>
    %c0_5 = arith.constant 0 : index
    %c0_6 = arith.constant 0 : index
    %5 = vector.load %arg1[%c0_5, %c0_6] : memref<256x128xbf16, #tpu.memory_space<vmem>>, vector<256x128xbf16>
    %c0_7 = arith.constant 0 : index
    %c0_8 = arith.constant 0 : index
    %6 = vector.load %arg2[%c0_7, %c0_8] : memref<256x128xbf16, #tpu.memory_space<vmem>>, vector<256x128xbf16>
    %7 = tpu.concatenate %5, %6 in 1 : vector<256x128xbf16>, vector<256x128xbf16> -> vector<256x256xbf16>
    %c0_9 = arith.constant 0 : index
    %c0_10 = arith.constant 0 : index
    %8 = vector.load %arg6[%c0_9, %c0_10] : memref<256x128xbf16, #tpu.memory_space<vmem>>, vector<256x128xbf16>
    %cst_11 = arith.constant dense<0.000000e+00> : vector<256x128xf32>
    %9 = tpu.matmul %7, %8, %cst_11 {dimension_numbers = #tpu.dot_dimension_numbers<[1], [0], [0], [1], [0, 0, 1, 1], [], []>} : vector<256x256xbf16>, vector<256x128xbf16>, vector<256x128xf32> -> vector<256x128xf32>
    %10 = vector.shape_cast %9 : vector<256x128xf32> to vector<32x8x128xf32>
    %11 = vector.shape_cast %4 : vector<32x128xf32> to vector<32x1x128xf32>
    %12 = vector.broadcast %11 : vector<32x1x128xf32> to vector<32x8x128xf32>
    %13 = arith.addf %10, %12 : vector<32x8x128xf32>
    %14 = vector.shape_cast %13 : vector<32x8x128xf32> to vector<256x128xf32>
    %c0_12 = arith.constant 0 : index
    %c0_13 = arith.constant 0 : index
    %15 = vector.load %arg7[%c0_12, %c0_13] : memref<1x128xf32, #tpu.memory_space<vmem>>, vector<1x128xf32>
    %16 = vector.broadcast %15 : vector<1x128xf32> to vector<256x128xf32>
    %17 = arith.addf %14, %16 : vector<256x128xf32>
    %18 = arith.mulf %17, %17 : vector<256x128xf32>
    %19 = arith.mulf %17, %18 : vector<256x128xf32>
    %cst_14 = arith.constant 4.471500e-02 : f32
    %20 = vector.broadcast %cst_14 : f32 to vector<256x128xf32>
    %21 = arith.mulf %20, %19 : vector<256x128xf32>
    %22 = arith.addf %17, %21 : vector<256x128xf32>
    %cst_15 = arith.constant 0.797884583 : f32
    %23 = vector.broadcast %cst_15 : f32 to vector<256x128xf32>
    %24 = arith.mulf %23, %22 : vector<256x128xf32>
    %25 = math.tanh %24 : vector<256x128xf32>
    %cst_16 = arith.constant 1.000000e+00 : f32
    %26 = vector.broadcast %cst_16 : f32 to vector<256x128xf32>
    %27 = arith.addf %26, %25 : vector<256x128xf32>
    %cst_17 = arith.constant 5.000000e-01 : f32
    %28 = vector.broadcast %cst_17 : f32 to vector<256x128xf32>
    %29 = arith.mulf %28, %27 : vector<256x128xf32>
    %30 = arith.mulf %17, %29 : vector<256x128xf32>
    %31 = arith.truncf %30 : vector<256x128xf32> to vector<256x128xbf16>
    %c0_18 = arith.constant 0 : index
    %c0_19 = arith.constant 0 : index
    %32 = vector.load %arg8[%c0_18, %c0_19] : memref<128x128xbf16, #tpu.memory_space<vmem>>, vector<128x128xbf16>
    %cst_20 = arith.constant dense<0.000000e+00> : vector<256x128xf32>
    %33 = tpu.matmul %31, %32, %cst_20 {dimension_numbers = #tpu.dot_dimension_numbers<[1], [0], [0], [1], [0, 0, 1, 1], [], []>} : vector<256x128xbf16>, vector<128x128xbf16>, vector<256x128xf32> -> vector<256x128xf32>
    %c0_21 = arith.constant 0 : index
    %c0_22 = arith.constant 0 : index
    %34 = vector.load %arg9[%c0_21, %c0_22] : memref<1x128xf32, #tpu.memory_space<vmem>>, vector<1x128xf32>
    %35 = vector.broadcast %34 : vector<1x128xf32> to vector<256x128xf32>
    %36 = arith.addf %33, %35 : vector<256x128xf32>
    %37 = arith.mulf %36, %36 : vector<256x128xf32>
    %38 = arith.mulf %36, %37 : vector<256x128xf32>
    %cst_23 = arith.constant 4.471500e-02 : f32
    %39 = vector.broadcast %cst_23 : f32 to vector<256x128xf32>
    %40 = arith.mulf %39, %38 : vector<256x128xf32>
    %41 = arith.addf %36, %40 : vector<256x128xf32>
    %cst_24 = arith.constant 0.797884583 : f32
    %42 = vector.broadcast %cst_24 : f32 to vector<256x128xf32>
    %43 = arith.mulf %42, %41 : vector<256x128xf32>
    %44 = math.tanh %43 : vector<256x128xf32>
    %cst_25 = arith.constant 1.000000e+00 : f32
    %45 = vector.broadcast %cst_25 : f32 to vector<256x128xf32>
    %46 = arith.addf %45, %44 : vector<256x128xf32>
    %cst_26 = arith.constant 5.000000e-01 : f32
    %47 = vector.broadcast %cst_26 : f32 to vector<256x128xf32>
    %48 = arith.mulf %47, %46 : vector<256x128xf32>
    %49 = arith.mulf %36, %48 : vector<256x128xf32>
    %50 = vector.shape_cast %49 : vector<256x128xf32> to vector<32x8x128xf32>
    %51 = vector.shape_cast %1 : vector<32x8xf32> to vector<32x8x1xf32>
    %52 = vector.broadcast %51 : vector<32x8x1xf32> to vector<32x8x128xf32>
    %53 = arith.mulf %50, %52 : vector<32x8x128xf32>
    %cst_27 = arith.constant dense<0.000000e+00> : vector<32x128xf32>
    %54 = vector.multi_reduction <add>, %53, %cst_27 [1] : vector<32x8x128xf32> to vector<32x128xf32>
    %cst_28 = arith.constant dense<0.000000e+00> : vector<32xf32>
    %55 = vector.multi_reduction <add>, %1, %cst_28 [1] : vector<32x8xf32> to vector<32xf32>
    %56 = vector.shape_cast %55 : vector<32xf32> to vector<32x1xf32>
    %57 = arith.truncf %54 : vector<32x128xf32> to vector<32x128xbf16>
    %c0_29 = arith.constant 0 : index
    %c0_30 = arith.constant 0 : index
    %58 = vector.load %arg10[%c0_29, %c0_30] : memref<128x128xbf16, #tpu.memory_space<vmem>>, vector<128x128xbf16>
    %cst_31 = arith.constant dense<0.000000e+00> : vector<32x128xf32>
    %59 = tpu.matmul %57, %58, %cst_31 {dimension_numbers = #tpu.dot_dimension_numbers<[1], [0], [0], [1], [0, 0, 1, 1], [], []>} : vector<32x128xbf16>, vector<128x128xbf16>, vector<32x128xf32> -> vector<32x128xf32>
    %c0_32 = arith.constant 0 : index
    %c0_33 = arith.constant 0 : index
    %60 = vector.load %arg11[%c0_32, %c0_33] : memref<1x128xf32, #tpu.memory_space<vmem>>, vector<1x128xf32>
    %61 = vector.broadcast %56 : vector<32x1xf32> to vector<32x128xf32>
    %62 = vector.broadcast %60 : vector<1x128xf32> to vector<32x128xf32>
    %63 = arith.mulf %61, %62 : vector<32x128xf32>
    %64 = arith.addf %59, %63 : vector<32x128xf32>
    %65 = arith.addf %0, %64 : vector<32x128xf32>
    %c0_34 = arith.constant 0 : index
    %c0_35 = arith.constant 0 : index
    %66 = vector.load %arg12[%c0_34, %c0_35] : memref<1x128xf32, #tpu.memory_space<vmem>>, vector<1x128xf32>
    %c0_36 = arith.constant 0 : index
    %c0_37 = arith.constant 0 : index
    %67 = vector.load %arg13[%c0_36, %c0_37] : memref<1x128xf32, #tpu.memory_space<vmem>>, vector<1x128xf32>
    %cst_38 = arith.constant dense<0.000000e+00> : vector<32xf32>
    %68 = vector.multi_reduction <add>, %65, %cst_38 [1] : vector<32x128xf32> to vector<32xf32>
    %69 = vector.shape_cast %68 : vector<32xf32> to vector<32x1xf32>
    %cst_39 = arith.constant 1.280000e+02 : f32
    %70 = vector.broadcast %cst_39 : f32 to vector<32x1xf32>
    %71 = arith.divf %69, %70 : vector<32x1xf32>
    %72 = vector.broadcast %71 : vector<32x1xf32> to vector<32x128xf32>
    %73 = arith.subf %65, %72 : vector<32x128xf32>
    %74 = arith.mulf %73, %73 : vector<32x128xf32>
    %cst_40 = arith.constant dense<0.000000e+00> : vector<32xf32>
    %75 = vector.multi_reduction <add>, %74, %cst_40 [1] : vector<32x128xf32> to vector<32xf32>
    %76 = vector.shape_cast %75 : vector<32xf32> to vector<32x1xf32>
    %cst_41 = arith.constant 1.280000e+02 : f32
    %77 = vector.broadcast %cst_41 : f32 to vector<32x1xf32>
    %78 = arith.divf %76, %77 : vector<32x1xf32>
    %79 = vector.broadcast %71 : vector<32x1xf32> to vector<32x128xf32>
    %80 = arith.subf %65, %79 : vector<32x128xf32>
    %cst_42 = arith.constant 9.99999974E-6 : f32
    %81 = vector.broadcast %cst_42 : f32 to vector<32x1xf32>
    %82 = arith.addf %78, %81 : vector<32x1xf32>
    %83 = math.rsqrt %82 : vector<32x1xf32>
    %84 = vector.broadcast %83 : vector<32x1xf32> to vector<32x128xf32>
    %85 = arith.mulf %80, %84 : vector<32x128xf32>
    %86 = vector.broadcast %66 : vector<1x128xf32> to vector<32x128xf32>
    %87 = arith.mulf %85, %86 : vector<32x128xf32>
    %88 = vector.broadcast %67 : vector<1x128xf32> to vector<32x128xf32>
    %89 = arith.addf %87, %88 : vector<32x128xf32>
    %90 = arith.truncf %89 : vector<32x128xf32> to vector<32x128xbf16>
    %c0_43 = arith.constant 0 : index
    %c0_44 = arith.constant 0 : index
    %91 = vector.load %arg14[%c0_43, %c0_44] : memref<128x512xbf16, #tpu.memory_space<vmem>>, vector<128x512xbf16>
    %cst_45 = arith.constant dense<0.000000e+00> : vector<32x512xf32>
    %92 = tpu.matmul %90, %91, %cst_45 {dimension_numbers = #tpu.dot_dimension_numbers<[1], [0], [0], [1], [0, 0, 1, 1], [], []>} : vector<32x128xbf16>, vector<128x512xbf16>, vector<32x512xf32> -> vector<32x512xf32>
    %c0_46 = arith.constant 0 : index
    %c0_47 = arith.constant 0 : index
    %93 = vector.load %arg15[%c0_46, %c0_47] : memref<1x512xf32, #tpu.memory_space<vmem>>, vector<1x512xf32>
    %94 = vector.broadcast %93 : vector<1x512xf32> to vector<32x512xf32>
    %95 = arith.addf %92, %94 : vector<32x512xf32>
    %96 = arith.mulf %95, %95 : vector<32x512xf32>
    %97 = arith.mulf %95, %96 : vector<32x512xf32>
    %cst_48 = arith.constant 4.471500e-02 : f32
    %98 = vector.broadcast %cst_48 : f32 to vector<32x512xf32>
    %99 = arith.mulf %98, %97 : vector<32x512xf32>
    %100 = arith.addf %95, %99 : vector<32x512xf32>
    %cst_49 = arith.constant 0.797884583 : f32
    %101 = vector.broadcast %cst_49 : f32 to vector<32x512xf32>
    %102 = arith.mulf %101, %100 : vector<32x512xf32>
    %103 = math.tanh %102 : vector<32x512xf32>
    %cst_50 = arith.constant 1.000000e+00 : f32
    %104 = vector.broadcast %cst_50 : f32 to vector<32x512xf32>
    %105 = arith.addf %104, %103 : vector<32x512xf32>
    %cst_51 = arith.constant 5.000000e-01 : f32
    %106 = vector.broadcast %cst_51 : f32 to vector<32x512xf32>
    %107 = arith.mulf %106, %105 : vector<32x512xf32>
    %108 = arith.mulf %95, %107 : vector<32x512xf32>
    %109 = arith.truncf %108 : vector<32x512xf32> to vector<32x512xbf16>
    %c0_52 = arith.constant 0 : index
    %c0_53 = arith.constant 0 : index
    %110 = vector.load %arg16[%c0_52, %c0_53] : memref<512x128xbf16, #tpu.memory_space<vmem>>, vector<512x128xbf16>
    %cst_54 = arith.constant dense<0.000000e+00> : vector<32x128xf32>
    %111 = tpu.matmul %109, %110, %cst_54 {dimension_numbers = #tpu.dot_dimension_numbers<[1], [0], [0], [1], [0, 0, 1, 1], [], []>} : vector<32x512xbf16>, vector<512x128xbf16>, vector<32x128xf32> -> vector<32x128xf32>
    %c0_55 = arith.constant 0 : index
    %c0_56 = arith.constant 0 : index
    %112 = vector.load %arg17[%c0_55, %c0_56] : memref<1x128xf32, #tpu.memory_space<vmem>>, vector<1x128xf32>
    %113 = vector.broadcast %112 : vector<1x128xf32> to vector<32x128xf32>
    %114 = arith.addf %111, %113 : vector<32x128xf32>
    %115 = arith.addf %89, %114 : vector<32x128xf32>
    %c0_57 = arith.constant 0 : index
    %c0_58 = arith.constant 0 : index
    %116 = vector.load %arg18[%c0_57, %c0_58] : memref<1x128xf32, #tpu.memory_space<vmem>>, vector<1x128xf32>
    %c0_59 = arith.constant 0 : index
    %c0_60 = arith.constant 0 : index
    %117 = vector.load %arg19[%c0_59, %c0_60] : memref<1x128xf32, #tpu.memory_space<vmem>>, vector<1x128xf32>
    %cst_61 = arith.constant dense<0.000000e+00> : vector<32xf32>
    %118 = vector.multi_reduction <add>, %115, %cst_61 [1] : vector<32x128xf32> to vector<32xf32>
    %119 = vector.shape_cast %118 : vector<32xf32> to vector<32x1xf32>
    %cst_62 = arith.constant 1.280000e+02 : f32
    %120 = vector.broadcast %cst_62 : f32 to vector<32x1xf32>
    %121 = arith.divf %119, %120 : vector<32x1xf32>
    %122 = vector.broadcast %121 : vector<32x1xf32> to vector<32x128xf32>
    %123 = arith.subf %115, %122 : vector<32x128xf32>
    %124 = arith.mulf %123, %123 : vector<32x128xf32>
    %cst_63 = arith.constant dense<0.000000e+00> : vector<32xf32>
    %125 = vector.multi_reduction <add>, %124, %cst_63 [1] : vector<32x128xf32> to vector<32xf32>
    %126 = vector.shape_cast %125 : vector<32xf32> to vector<32x1xf32>
    %cst_64 = arith.constant 1.280000e+02 : f32
    %127 = vector.broadcast %cst_64 : f32 to vector<32x1xf32>
    %128 = arith.divf %126, %127 : vector<32x1xf32>
    %129 = vector.broadcast %121 : vector<32x1xf32> to vector<32x128xf32>
    %130 = arith.subf %115, %129 : vector<32x128xf32>
    %cst_65 = arith.constant 9.99999974E-6 : f32
    %131 = vector.broadcast %cst_65 : f32 to vector<32x1xf32>
    %132 = arith.addf %128, %131 : vector<32x1xf32>
    %133 = math.rsqrt %132 : vector<32x1xf32>
    %134 = vector.broadcast %133 : vector<32x1xf32> to vector<32x128xf32>
    %135 = arith.mulf %130, %134 : vector<32x128xf32>
    %136 = vector.broadcast %116 : vector<1x128xf32> to vector<32x128xf32>
    %137 = arith.mulf %135, %136 : vector<32x128xf32>
    %138 = vector.broadcast %117 : vector<1x128xf32> to vector<32x128xf32>
    %139 = arith.addf %137, %138 : vector<32x128xf32>
    %c0_66 = arith.constant 0 : index
    %c0_67 = arith.constant 0 : index
    %140 = vector.load %arg20[%c0_66, %c0_67] : memref<32x128xf32, #tpu.memory_space<vmem>>, vector<32x128xf32>
    tpu.vector_store %arg20[%c0_66, %c0_67], %139 {strides = array<i32>} : memref<32x128xf32, #tpu.memory_space<vmem>>, vector<32x128xf32>,
    return
  }
  func.func @transform_0(%arg0: i32) -> (i32, i32) {
    %c0_i32 = arith.constant 0 : i32
    %c0_i32_0 = arith.constant 0 : i32
    return %arg0, %c0_i32 : i32, i32
  }
  func.func @transform_1(%arg0: i32) -> (i32, i32) {
    %c0_i32 = arith.constant 0 : i32
    %c0_i32_0 = arith.constant 0 : i32
    return %arg0, %c0_i32 : i32, i32
  }
  func.func @transform_2(%arg0: i32) -> (i32, i32) {
    %c0_i32 = arith.constant 0 : i32
    %c0_i32_0 = arith.constant 0 : i32
    return %arg0, %c0_i32 : i32, i32
  }
  func.func @transform_3(%arg0: i32) -> (i32, i32) {
    %c0_i32 = arith.constant 0 : i32
    %c0_i32_0 = arith.constant 0 : i32
    return %arg0, %c0_i32 : i32, i32
  }
  func.func @transform_4(%arg0: i32) -> (i32, i32) {
    %c0_i32 = arith.constant 0 : i32
    %c0_i32_0 = arith.constant 0 : i32
    %c0_i32_1 = arith.constant 0 : i32
    return %c0_i32, %c0_i32_0 : i32, i32
  }
  func.func @transform_5(%arg0: i32) -> (i32, i32) {
    %c0_i32 = arith.constant 0 : i32
    %c0_i32_0 = arith.constant 0 : i32
    %c0_i32_1 = arith.constant 0 : i32
    return %c0_i32, %c0_i32_0 : i32, i32
  }
  func.func @transform_6(%arg0: i32) -> (i32, i32) {
    %c0_i32 = arith.constant 0 : i32
    %c0_i32_0 = arith.constant 0 : i32
    %c0_i32_1 = arith.constant 0 : i32
    return %c0_i32, %c0_i32_0 : i32, i32
  }
  func.func @transform_7(%arg0: i32) -> (i32, i32) {
    %c0_i32 = arith.constant 0 : i32
    %c0_i32_0 = arith.constant 0 : i32
    %c0_i32_1 = arith.constant 0 : i32
    return %c0_i32, %c0_i32_0 : i32, i32
  }
  func.func @transform_8(%arg0: i32) -> (i32, i32) {
    %c0_i32 = arith.constant 0 : i32
    %c0_i32_0 = arith.constant 0 : i32
    %c0_i32_1 = arith.constant 0 : i32
    return %c0_i32, %c0_i32_0 : i32, i32
  }
  func.func @transform_9(%arg0: i32) -> (i32, i32) {
    %c0_i32 = arith.constant 0 : i32
    %c0_i32_0 = arith.constant 0 : i32
    %c0_i32_1 = arith.constant 0 : i32
    return %c0_i32, %c0_i32_0 : i32, i32
  }
  func.func @transform_10(%arg0: i32) -> (i32, i32) {
    %c0_i32 = arith.constant 0 : i32
    %c0_i32_0 = arith.constant 0 : i32
    %c0_i32_1 = arith.constant 0 : i32
    return %c0_i32, %c0_i32_0 : i32, i32
  }
  func.func @transform_11(%arg0: i32) -> (i32, i32) {
    %c0_i32 = arith.constant 0 : i32
    %c0_i32_0 = arith.constant 0 : i32
    %c0_i32_1 = arith.constant 0 : i32
    return %c0_i32, %c0_i32_0 : i32, i32
  }
  func.func @transform_12(%arg0: i32) -> (i32, i32) {
    %c0_i32 = arith.constant 0 : i32
    %c0_i32_0 = arith.constant 0 : i32
    %c0_i32_1 = arith.constant 0 : i32
    return %c0_i32, %c0_i32_0 : i32, i32
  }
  func.func @transform_13(%arg0: i32) -> (i32, i32) {
    %c0_i32 = arith.constant 0 : i32
    %c0_i32_0 = arith.constant 0 : i32
    %c0_i32_1 = arith.constant 0 : i32
    return %c0_i32, %c0_i32_0 : i32, i32
  }
  func.func @transform_14(%arg0: i32) -> (i32, i32) {
    %c0_i32 = arith.constant 0 : i32
    %c0_i32_0 = arith.constant 0 : i32
    %c0_i32_1 = arith.constant 0 : i32
    return %c0_i32, %c0_i32_0 : i32, i32
  }
  func.func @transform_15(%arg0: i32) -> (i32, i32) {
    %c0_i32 = arith.constant 0 : i32
    %c0_i32_0 = arith.constant 0 : i32
    %c0_i32_1 = arith.constant 0 : i32
    return %c0_i32, %c0_i32_0 : i32, i32
  }
  func.func @transform_16(%arg0: i32) -> (i32, i32) {
    %c0_i32 = arith.constant 0 : i32
    %c0_i32_0 = arith.constant 0 : i32
    %c0_i32_1 = arith.constant 0 : i32
    return %c0_i32, %c0_i32_0 : i32, i32
  }
  func.func @transform_17(%arg0: i32) -> (i32, i32) {
    %c0_i32 = arith.constant 0 : i32
    %c0_i32_0 = arith.constant 0 : i32
    %c0_i32_1 = arith.constant 0 : i32
    return %c0_i32, %c0_i32_0 : i32, i32
  }
  func.func @transform_18(%arg0: i32) -> (i32, i32) {
    %c0_i32 = arith.constant 0 : i32
    %c0_i32_0 = arith.constant 0 : i32
    %c0_i32_1 = arith.constant 0 : i32
    return %c0_i32, %c0_i32_0 : i32, i32
  }
  func.func @transform_19(%arg0: i32) -> (i32, i32) {
    %c0_i32 = arith.constant 0 : i32
    %c0_i32_0 = arith.constant 0 : i32
    return %arg0, %c0_i32 : i32, i32
  }
}

module attributes {stable_mosaic.version = 11 : i64} {
  func.func @edge_kernel(%arg0: i32, %arg1: memref<256x128xbf16, #tpu.memory_space<vmem>>, %arg2: memref<256x128xbf16, #tpu.memory_space<vmem>>, %arg3: memref<32x8xf32, #tpu.memory_space<vmem>>, %arg4: memref<32x128xf32, #tpu.memory_space<vmem>>, %arg5: memref<128x128xbf16, #tpu.memory_space<vmem>>, %arg6: memref<256x128xbf16, #tpu.memory_space<vmem>>, %arg7: memref<1x128xf32, #tpu.memory_space<vmem>>, %arg8: memref<128x128xbf16, #tpu.memory_space<vmem>>, %arg9: memref<1x128xf32, #tpu.memory_space<vmem>>, %arg10: memref<128x128xbf16, #tpu.memory_space<vmem>>, %arg11: memref<1x128xf32, #tpu.memory_space<vmem>>, %arg12: memref<1x128xf32, #tpu.memory_space<vmem>>, %arg13: memref<1x128xf32, #tpu.memory_space<vmem>>, %arg14: memref<256x128xf32, #tpu.memory_space<vmem>>) attributes {dimension_semantics = [#tpu.dimension_semantics<parallel>], iteration_bounds = array<i64: 1>, scalar_prefetch = 0 : i64, scratch_operands = 0 : i64, tpu.core_type = #tpu.core_type<tc>, window_params = [{transform_indices = @transform_0, window_bounds = array<i64: 256, 128>}, {transform_indices = @transform_1, window_bounds = array<i64: 256, 128>}, {transform_indices = @transform_2, window_bounds = array<i64: 32, 8>}, {transform_indices = @transform_3, window_bounds = array<i64: 32, 128>}, {pipeline_mode = #tpu.pipeline_mode<synchronous>, transform_indices = @transform_4, window_bounds = array<i64: 128, 128>}, {pipeline_mode = #tpu.pipeline_mode<synchronous>, transform_indices = @transform_5, window_bounds = array<i64: 256, 128>}, {pipeline_mode = #tpu.pipeline_mode<synchronous>, transform_indices = @transform_6, window_bounds = array<i64: 1, 128>}, {pipeline_mode = #tpu.pipeline_mode<synchronous>, transform_indices = @transform_7, window_bounds = array<i64: 128, 128>}, {pipeline_mode = #tpu.pipeline_mode<synchronous>, transform_indices = @transform_8, window_bounds = array<i64: 1, 128>}, {pipeline_mode = #tpu.pipeline_mode<synchronous>, transform_indices = @transform_9, window_bounds = array<i64: 128, 128>}, {pipeline_mode = #tpu.pipeline_mode<synchronous>, transform_indices = @transform_10, window_bounds = array<i64: 1, 128>}, {pipeline_mode = #tpu.pipeline_mode<synchronous>, transform_indices = @transform_11, window_bounds = array<i64: 1, 128>}, {pipeline_mode = #tpu.pipeline_mode<synchronous>, transform_indices = @transform_12, window_bounds = array<i64: 1, 128>}, {transform_indices = @transform_13, window_bounds = array<i64: 256, 128>}]} {
    %c0 = arith.constant 0 : index
    %c0_0 = arith.constant 0 : index
    %0 = vector.load %arg3[%c0, %c0_0] : memref<32x8xf32, #tpu.memory_space<vmem>>, vector<32x8xf32>
    %c0_1 = arith.constant 0 : index
    %c0_2 = arith.constant 0 : index
    %1 = vector.load %arg2[%c0_1, %c0_2] : memref<256x128xbf16, #tpu.memory_space<vmem>>, vector<256x128xbf16>
    %2 = arith.extf %1 : vector<256x128xbf16> to vector<256x128xf32>
    %c0_3 = arith.constant 0 : index
    %c0_4 = arith.constant 0 : index
    %3 = vector.load %arg4[%c0_3, %c0_4] : memref<32x128xf32, #tpu.memory_space<vmem>>, vector<32x128xf32>
    %4 = arith.truncf %3 : vector<32x128xf32> to vector<32x128xbf16>
    %c0_5 = arith.constant 0 : index
    %c0_6 = arith.constant 0 : index
    %5 = vector.load %arg5[%c0_5, %c0_6] : memref<128x128xbf16, #tpu.memory_space<vmem>>, vector<128x128xbf16>
    %cst = arith.constant dense<0.000000e+00> : vector<32x128xf32>
    %6 = tpu.matmul %4, %5, %cst {dimension_numbers = #tpu.dot_dimension_numbers<[1], [0], [0], [1], [0, 0, 1, 1], [], []>} : vector<32x128xbf16>, vector<128x128xbf16>, vector<32x128xf32> -> vector<32x128xf32>
    %c0_7 = arith.constant 0 : index
    %c0_8 = arith.constant 0 : index
    %7 = vector.load %arg1[%c0_7, %c0_8] : memref<256x128xbf16, #tpu.memory_space<vmem>>, vector<256x128xbf16>
    %8 = tpu.concatenate %7, %1 in 1 : vector<256x128xbf16>, vector<256x128xbf16> -> vector<256x256xbf16>
    %c0_9 = arith.constant 0 : index
    %c0_10 = arith.constant 0 : index
    %9 = vector.load %arg6[%c0_9, %c0_10] : memref<256x128xbf16, #tpu.memory_space<vmem>>, vector<256x128xbf16>
    %cst_11 = arith.constant dense<0.000000e+00> : vector<256x128xf32>
    %10 = tpu.matmul %8, %9, %cst_11 {dimension_numbers = #tpu.dot_dimension_numbers<[1], [0], [0], [1], [0, 0, 1, 1], [], []>} : vector<256x256xbf16>, vector<256x128xbf16>, vector<256x128xf32> -> vector<256x128xf32>
    %11 = vector.shape_cast %10 : vector<256x128xf32> to vector<32x8x128xf32>
    %12 = vector.shape_cast %6 : vector<32x128xf32> to vector<32x1x128xf32>
    %13 = vector.broadcast %12 : vector<32x1x128xf32> to vector<32x8x128xf32>
    %14 = arith.addf %11, %13 : vector<32x8x128xf32>
    %15 = vector.shape_cast %14 : vector<32x8x128xf32> to vector<256x128xf32>
    %c0_12 = arith.constant 0 : index
    %c0_13 = arith.constant 0 : index
    %16 = vector.load %arg7[%c0_12, %c0_13] : memref<1x128xf32, #tpu.memory_space<vmem>>, vector<1x128xf32>
    %17 = vector.broadcast %16 : vector<1x128xf32> to vector<256x128xf32>
    %18 = arith.addf %15, %17 : vector<256x128xf32>
    %19 = arith.mulf %18, %18 : vector<256x128xf32>
    %20 = arith.mulf %18, %19 : vector<256x128xf32>
    %cst_14 = arith.constant 4.471500e-02 : f32
    %21 = vector.broadcast %cst_14 : f32 to vector<256x128xf32>
    %22 = arith.mulf %21, %20 : vector<256x128xf32>
    %23 = arith.addf %18, %22 : vector<256x128xf32>
    %cst_15 = arith.constant 0.797884583 : f32
    %24 = vector.broadcast %cst_15 : f32 to vector<256x128xf32>
    %25 = arith.mulf %24, %23 : vector<256x128xf32>
    %26 = math.tanh %25 : vector<256x128xf32>
    %cst_16 = arith.constant 1.000000e+00 : f32
    %27 = vector.broadcast %cst_16 : f32 to vector<256x128xf32>
    %28 = arith.addf %27, %26 : vector<256x128xf32>
    %cst_17 = arith.constant 5.000000e-01 : f32
    %29 = vector.broadcast %cst_17 : f32 to vector<256x128xf32>
    %30 = arith.mulf %29, %28 : vector<256x128xf32>
    %31 = arith.mulf %18, %30 : vector<256x128xf32>
    %32 = arith.truncf %31 : vector<256x128xf32> to vector<256x128xbf16>
    %c0_18 = arith.constant 0 : index
    %c0_19 = arith.constant 0 : index
    %33 = vector.load %arg8[%c0_18, %c0_19] : memref<128x128xbf16, #tpu.memory_space<vmem>>, vector<128x128xbf16>
    %cst_20 = arith.constant dense<0.000000e+00> : vector<256x128xf32>
    %34 = tpu.matmul %32, %33, %cst_20 {dimension_numbers = #tpu.dot_dimension_numbers<[1], [0], [0], [1], [0, 0, 1, 1], [], []>} : vector<256x128xbf16>, vector<128x128xbf16>, vector<256x128xf32> -> vector<256x128xf32>
    %c0_21 = arith.constant 0 : index
    %c0_22 = arith.constant 0 : index
    %35 = vector.load %arg9[%c0_21, %c0_22] : memref<1x128xf32, #tpu.memory_space<vmem>>, vector<1x128xf32>
    %36 = vector.broadcast %35 : vector<1x128xf32> to vector<256x128xf32>
    %37 = arith.addf %34, %36 : vector<256x128xf32>
    %38 = arith.mulf %37, %37 : vector<256x128xf32>
    %39 = arith.mulf %37, %38 : vector<256x128xf32>
    %cst_23 = arith.constant 4.471500e-02 : f32
    %40 = vector.broadcast %cst_23 : f32 to vector<256x128xf32>
    %41 = arith.mulf %40, %39 : vector<256x128xf32>
    %42 = arith.addf %37, %41 : vector<256x128xf32>
    %cst_24 = arith.constant 0.797884583 : f32
    %43 = vector.broadcast %cst_24 : f32 to vector<256x128xf32>
    %44 = arith.mulf %43, %42 : vector<256x128xf32>
    %45 = math.tanh %44 : vector<256x128xf32>
    %cst_25 = arith.constant 1.000000e+00 : f32
    %46 = vector.broadcast %cst_25 : f32 to vector<256x128xf32>
    %47 = arith.addf %46, %45 : vector<256x128xf32>
    %cst_26 = arith.constant 5.000000e-01 : f32
    %48 = vector.broadcast %cst_26 : f32 to vector<256x128xf32>
    %49 = arith.mulf %48, %47 : vector<256x128xf32>
    %50 = arith.mulf %37, %49 : vector<256x128xf32>
    %51 = arith.truncf %50 : vector<256x128xf32> to vector<256x128xbf16>
    %c0_27 = arith.constant 0 : index
    %c0_28 = arith.constant 0 : index
    %52 = vector.load %arg10[%c0_27, %c0_28] : memref<128x128xbf16, #tpu.memory_space<vmem>>, vector<128x128xbf16>
    %cst_29 = arith.constant dense<0.000000e+00> : vector<256x128xf32>
    %53 = tpu.matmul %51, %52, %cst_29 {dimension_numbers = #tpu.dot_dimension_numbers<[1], [0], [0], [1], [0, 0, 1, 1], [], []>} : vector<256x128xbf16>, vector<128x128xbf16>, vector<256x128xf32> -> vector<256x128xf32>
    %c0_30 = arith.constant 0 : index
    %c0_31 = arith.constant 0 : index
    %54 = vector.load %arg11[%c0_30, %c0_31] : memref<1x128xf32, #tpu.memory_space<vmem>>, vector<1x128xf32>
    %55 = vector.broadcast %54 : vector<1x128xf32> to vector<256x128xf32>
    %56 = arith.addf %53, %55 : vector<256x128xf32>
    %57 = vector.shape_cast %56 : vector<256x128xf32> to vector<32x8x128xf32>
    %58 = vector.shape_cast %0 : vector<32x8xf32> to vector<32x8x1xf32>
    %59 = vector.broadcast %58 : vector<32x8x1xf32> to vector<32x8x128xf32>
    %60 = arith.mulf %57, %59 : vector<32x8x128xf32>
    %61 = vector.shape_cast %60 : vector<32x8x128xf32> to vector<256x128xf32>
    %62 = arith.addf %2, %61 : vector<256x128xf32>
    %c0_32 = arith.constant 0 : index
    %c0_33 = arith.constant 0 : index
    %63 = vector.load %arg12[%c0_32, %c0_33] : memref<1x128xf32, #tpu.memory_space<vmem>>, vector<1x128xf32>
    %c0_34 = arith.constant 0 : index
    %c0_35 = arith.constant 0 : index
    %64 = vector.load %arg13[%c0_34, %c0_35] : memref<1x128xf32, #tpu.memory_space<vmem>>, vector<1x128xf32>
    %cst_36 = arith.constant dense<0.000000e+00> : vector<256xf32>
    %65 = vector.multi_reduction <add>, %62, %cst_36 [1] : vector<256x128xf32> to vector<256xf32>
    %66 = vector.shape_cast %65 : vector<256xf32> to vector<256x1xf32>
    %cst_37 = arith.constant 1.280000e+02 : f32
    %67 = vector.broadcast %cst_37 : f32 to vector<256x1xf32>
    %68 = arith.divf %66, %67 : vector<256x1xf32>
    %69 = vector.broadcast %68 : vector<256x1xf32> to vector<256x128xf32>
    %70 = arith.subf %62, %69 : vector<256x128xf32>
    %71 = arith.mulf %70, %70 : vector<256x128xf32>
    %cst_38 = arith.constant dense<0.000000e+00> : vector<256xf32>
    %72 = vector.multi_reduction <add>, %71, %cst_38 [1] : vector<256x128xf32> to vector<256xf32>
    %73 = vector.shape_cast %72 : vector<256xf32> to vector<256x1xf32>
    %cst_39 = arith.constant 1.280000e+02 : f32
    %74 = vector.broadcast %cst_39 : f32 to vector<256x1xf32>
    %75 = arith.divf %73, %74 : vector<256x1xf32>
    %76 = vector.broadcast %68 : vector<256x1xf32> to vector<256x128xf32>
    %77 = arith.subf %62, %76 : vector<256x128xf32>
    %cst_40 = arith.constant 9.99999974E-6 : f32
    %78 = vector.broadcast %cst_40 : f32 to vector<256x1xf32>
    %79 = arith.addf %75, %78 : vector<256x1xf32>
    %80 = math.rsqrt %79 : vector<256x1xf32>
    %81 = vector.broadcast %80 : vector<256x1xf32> to vector<256x128xf32>
    %82 = arith.mulf %77, %81 : vector<256x128xf32>
    %83 = vector.broadcast %63 : vector<1x128xf32> to vector<256x128xf32>
    %84 = arith.mulf %82, %83 : vector<256x128xf32>
    %85 = vector.broadcast %64 : vector<1x128xf32> to vector<256x128xf32>
    %86 = arith.addf %84, %85 : vector<256x128xf32>
    %c0_41 = arith.constant 0 : index
    %c0_42 = arith.constant 0 : index
    %87 = vector.load %arg14[%c0_41, %c0_42] : memref<256x128xf32, #tpu.memory_space<vmem>>, vector<256x128xf32>
    tpu.vector_store %arg14[%c0_41, %c0_42], %86 {strides = array<i32>} : memref<256x128xf32, #tpu.memory_space<vmem>>, vector<256x128xf32>,
    return
  }
  func.func @transform_0(%arg0: i32) -> (i32, i32) {
    %c0_i32 = arith.constant 0 : i32
    %c0_i32_0 = arith.constant 0 : i32
    return %arg0, %c0_i32 : i32, i32
  }
  func.func @transform_1(%arg0: i32) -> (i32, i32) {
    %c0_i32 = arith.constant 0 : i32
    %c0_i32_0 = arith.constant 0 : i32
    return %arg0, %c0_i32 : i32, i32
  }
  func.func @transform_2(%arg0: i32) -> (i32, i32) {
    %c0_i32 = arith.constant 0 : i32
    %c0_i32_0 = arith.constant 0 : i32
    return %arg0, %c0_i32 : i32, i32
  }
  func.func @transform_3(%arg0: i32) -> (i32, i32) {
    %c0_i32 = arith.constant 0 : i32
    %c0_i32_0 = arith.constant 0 : i32
    return %arg0, %c0_i32 : i32, i32
  }
  func.func @transform_4(%arg0: i32) -> (i32, i32) {
    %c0_i32 = arith.constant 0 : i32
    %c0_i32_0 = arith.constant 0 : i32
    %c0_i32_1 = arith.constant 0 : i32
    return %c0_i32, %c0_i32_0 : i32, i32
  }
  func.func @transform_5(%arg0: i32) -> (i32, i32) {
    %c0_i32 = arith.constant 0 : i32
    %c0_i32_0 = arith.constant 0 : i32
    %c0_i32_1 = arith.constant 0 : i32
    return %c0_i32, %c0_i32_0 : i32, i32
  }
  func.func @transform_6(%arg0: i32) -> (i32, i32) {
    %c0_i32 = arith.constant 0 : i32
    %c0_i32_0 = arith.constant 0 : i32
    %c0_i32_1 = arith.constant 0 : i32
    return %c0_i32, %c0_i32_0 : i32, i32
  }
  func.func @transform_7(%arg0: i32) -> (i32, i32) {
    %c0_i32 = arith.constant 0 : i32
    %c0_i32_0 = arith.constant 0 : i32
    %c0_i32_1 = arith.constant 0 : i32
    return %c0_i32, %c0_i32_0 : i32, i32
  }
  func.func @transform_8(%arg0: i32) -> (i32, i32) {
    %c0_i32 = arith.constant 0 : i32
    %c0_i32_0 = arith.constant 0 : i32
    %c0_i32_1 = arith.constant 0 : i32
    return %c0_i32, %c0_i32_0 : i32, i32
  }
  func.func @transform_9(%arg0: i32) -> (i32, i32) {
    %c0_i32 = arith.constant 0 : i32
    %c0_i32_0 = arith.constant 0 : i32
    %c0_i32_1 = arith.constant 0 : i32
    return %c0_i32, %c0_i32_0 : i32, i32
  }
  func.func @transform_10(%arg0: i32) -> (i32, i32) {
    %c0_i32 = arith.constant 0 : i32
    %c0_i32_0 = arith.constant 0 : i32
    %c0_i32_1 = arith.constant 0 : i32
    return %c0_i32, %c0_i32_0 : i32, i32
  }
  func.func @transform_11(%arg0: i32) -> (i32, i32) {
    %c0_i32 = arith.constant 0 : i32
    %c0_i32_0 = arith.constant 0 : i32
    %c0_i32_1 = arith.constant 0 : i32
    return %c0_i32, %c0_i32_0 : i32, i32
  }
  func.func @transform_12(%arg0: i32) -> (i32, i32) {
    %c0_i32 = arith.constant 0 : i32
    %c0_i32_0 = arith.constant 0 : i32
    %c0_i32_1 = arith.constant 0 : i32
    return %c0_i32, %c0_i32_0 : i32, i32
  }
  func.func @transform_13(%arg0: i32) -> (i32, i32) {
    %c0_i32 = arith.constant 0 : i32
    %c0_i32_0 = arith.constant 0 : i32
    return %arg0, %c0_i32 : i32, i32
  }
}

</mosaic_0001>

<bundles_post_ra>
// kernel: gnn_encoder_forward.3
= control target key start
LH: loop header
LB: loop body
LE: loop exit
PB: predicated region body
PF: predicated region fallthrough
CT: control target
= control target key end

     0   :  { %s5224_s0 = inlined_call_operand.vmem [shape: bf16[256,128], index: 0, kind: input, shape index: {}]   ;;  %s5225_s1 = inlined_call_operand.vmem [shape: bf16[256,128], index: 1, kind: input, shape index: {}]   ;;  %s5226_s2 = inlined_call_operand.vmem [shape: f32[32,8], index: 2, kind: input, shape index: {}]   ;;  %s5227_s3 = inlined_call_operand.vmem [shape: f32[32,128], index: 3, kind: input, shape index: {}]   ;;  %s5228_s4 = inlined_call_operand.vmem [shape: bf16[128,128], index: 4, kind: input, shape index: {}]   ;;  %s5229_s5 = inlined_call_operand.vmem [shape: bf16[256,128], index: 5, kind: input, shape index: {}]   ;;  %s5230_s6 = inlined_call_operand.vmem [shape: f32[1,128], index: 6, kind: input, shape index: {}]   ;;  %s5231_s7 = inlined_call_operand.vmem [shape: bf16[128,128], index: 7, kind: input, shape index: {}]   ;;  %s5232_s8 = inlined_call_operand.vmem [shape: f32[1,128], index: 8, kind: input, shape index: {}]   ;;  %s5233_s9 = inlined_call_operand.vmem [shape: bf16[128,128], index: 9, kind: input, shape index: {}]   ;;  %s5234_s10 = inlined_call_operand.vmem [shape: f32[1,128], index: 10, kind: input, shape index: {}]   ;;  %s5235_s11 = inlined_call_operand.vmem [shape: f32[1,128], index: 11, kind: input, shape index: {}]   ;;  %s5236_s12 = inlined_call_operand.vmem [shape: f32[1,128], index: 12, kind: input, shape index: {}]   ;;  %s5237_s13 = inlined_call_operand.hbm [shape: f32[256,128], index: 13, kind: output, shape index: {}]  }
   0x1   :  { %v3399_v0 = vld [vmem:[%s5228_s4] sm:$0xff]   ;;  %v3402_v3 = vld [vmem:[%s5228_s4 + $0x8] sm:$0xff]   ;;  %v3405_v6 = vld [vmem:[%s5228_s4 + $0x10] sm:$0xff]  }
   0x2   :  { %v3400_v1 = vld [vmem:[%s5229_s5 + $0x40] sm:$0xff]   ;;  %3263 = vmatprep.subr.bf16.mxu0 %v3399_v0  ;;  %v3403_v4 = vld [vmem:[%s5229_s5 + $0x48] sm:$0xff]   ;;  %v3406_v7 = vld [vmem:[%s5229_s5 + $0x50] sm:$0xff]  }
   0x3   :  { %v3401_v2 = vld [vmem:[%s5229_s5] sm:$0xff]   ;;  %3103 = vmatprep.subr.bf16.mxu1 %v3400_v1  ;;  %3264 = vmatpush3.bf16.msra.mxu0 %v3399_v0  ;;  %v3404_v5 = vld [vmem:[%s5229_s5 + $0x8] sm:$0xff]   ;;  %v3407_v8 = vld [vmem:[%s5229_s5 + $0x10] sm:$0xff]  }
   0x4   :  { %3104 = vmatpush3.bf16.msra.mxu1 %v3401_v2  ;;  %3265 = vmatprep.subr.bf16.mxu0 %v3402_v3  ;;  %v3408_v9 = vld [vmem:[%s5228_s4 + $0x18] sm:$0xff]   ;;  %v3411_v12 = vld [vmem:[%s5228_s4 + $0x20] sm:$0xff]   ;;  %v3414_v15 = vld [vmem:[%s5228_s4 + $0x28] sm:$0xff]  }
   0x5   :  { %3105 = vmatprep.subr.bf16.mxu1 %v3403_v4  ;;  %v3409_v10 = vld [vmem:[%s5229_s5 + $0x58] sm:$0xff]   ;;  %v3412_v13 = vld [vmem:[%s5229_s5 + $0x60] sm:$0xff]   ;;  %v3415_v16 = vld [vmem:[%s5229_s5 + $0x68] sm:$0xff]  }
   0x6   :  { %v3410_v11 = vld [vmem:[%s5229_s5 + $0x18] sm:$0xff]   ;;  %v3413_v14 = vld [vmem:[%s5229_s5 + $0x20] sm:$0xff]   ;;  %v3416_v17 = vld [vmem:[%s5229_s5 + $0x28] sm:$0xff]  }
   0x7   :  { %3266 = vmatpush3.bf16.msra.mxu0 %v3402_v3  ;;  %v3417_v18 = vld [vmem:[%s5228_s4 + $0x30] sm:$0xff]   ;;  %v3420_v21 = vld [vmem:[%s5228_s4 + $0x38] sm:$0xff]   ;;  %v114_v22 = vld [vmem:[%s5227_s3] sm:$0xff] }
   0x8   :  { %3106 = vmatpush3.bf16.msra.mxu1 %v3404_v5  ;;  %3267 = vmatprep.subr.bf16.mxu0 %v3405_v6  ;;  %v3418_v19 = vld [vmem:[%s5229_s5 + $0x70] sm:$0xff]   ;;  %v115_v23 = vld [vmem:[%s5227_s3 + $0x8] sm:$0xff]  ;;  %v50_v24 = vld [vmem:[%s5225_s1] sm:$0xff]  }
   0x9   :  { %3107 = vmatprep.subr.bf16.mxu1 %v3406_v7  ;;  %v3419_v20 = vld [vmem:[%s5229_s5 + $0x30] sm:$0xff]   ;;  %v3421_v25 = vld [vmem:[%s5229_s5 + $0x78] sm:$0xff]   ;;  %v118_v26 = vpack.c.bf16 %v115_v23, %v114_v22  ;;  %617 = vmatprep.mubr.bf16.mxu1 %v50_v24  ;;  %v52_v30 = vld [vmem:[%s5225_s1 + $0x8] sm:$0xff]  }
   0xa   :  { %v116_v27 = vld [vmem:[%s5227_s3 + $0x10] sm:$0xff]  ;;  %v117_v28 = vld [vmem:[%s5227_s3 + $0x18] sm:$0xff]  ;;  %v3424_v32 = vld [vmem:[%s5224_s0] sm:$0xff]  }
   0xb   :  { %3268 = vmatpush3.bf16.msra.mxu0 %v3405_v6  ;;  %3279 = vmatprep.mubr.bf16.mxu0 %v118_v26  ;;  %v3422_v29 = vld [vmem:[%s5229_s5 + $0x38] sm:$0xff]   ;;  %v119_v31 = vpack.c.bf16 %v117_v28, %v116_v27  ;;  %v54_v33 = vld [vmem:[%s5225_s1 + $0x10] sm:$0xff]   ;;  %v3426_v34 = vld [vmem:[%s5224_s0 + $0x8] sm:$0xff]  }
   0xc   :  { %3108 = vmatpush3.bf16.msra.mxu1 %v3407_v8  ;;  %3269 = vmatprep.subr.bf16.mxu0 %v3408_v9  ;;  %v56_v35 = vld [vmem:[%s5225_s1 + $0x18] sm:$0xff]   ;;  %v3428_v36 = vld [vmem:[%s5224_s0 + $0x10] sm:$0xff]   ;;  %v58_v37 = vld [vmem:[%s5225_s1 + $0x20] sm:$0xff]  }
   0xd   :  { %3109 = vmatprep.subr.bf16.mxu1 %v3409_v10  ;;  %v3430_v38 = vld [vmem:[%s5224_s0 + $0x18] sm:$0xff]  }
   0xf   :  { %3270 = vmatpush3.bf16.msra.mxu0 %v3408_v9 }
  0x10   :  { %3110 = vmatpush3.bf16.msra.mxu1 %v3410_v11  ;;  %3271 = vmatprep.subr.bf16.mxu0 %v3411_v12 }
  0x11   :  { %3111 = vmatprep.subr.bf16.mxu1 %v3412_v13 }
  0x13   :  { %3272 = vmatpush3.bf16.msra.mxu0 %v3411_v12 }
  0x14   :  { %3112 = vmatpush3.bf16.msra.mxu1 %v3413_v14  ;;  %3273 = vmatprep.subr.bf16.mxu0 %v3414_v15 }
  0x15   :  { %3113 = vmatprep.subr.bf16.mxu1 %v3415_v16 }
  0x17   :  { %3274 = vmatpush3.bf16.msra.mxu0 %v3414_v15 }
  0x18   :  { %3114 = vmatpush3.bf16.msra.mxu1 %v3416_v17  ;;  %3275 = vmatprep.subr.bf16.mxu0 %v3417_v18 }
  0x19   :  { %3115 = vmatprep.subr.bf16.mxu1 %v3418_v19 }
  0x1b   :  { %3276 = vmatpush3.bf16.msra.mxu0 %v3417_v18 }
  0x1c   :  { %3116 = vmatpush3.bf16.msra.mxu1 %v3419_v20  ;;  %3277 = vmatprep.subr.bf16.mxu0 %v3420_v21 }
  0x1d   :  { %3117 = vmatprep.subr.bf16.mxu1 %v3421_v25 }
  0x1f   :  { %3278 = vmatpush3.bf16.msra.mxu0 %v3420_v21 }
  0x20   :  { %3118 = vmatpush3.bf16.msra.mxu1 %v3422_v29 }
  0x22   :  { %3280 = vmatmul.mubr.bf16.vlgmr.msra.gmra.mrb[0].mxu0 %v119_v31 }
  0x23   :  { %618 = vmatmul.mubr.bf16.vlgmr.msra.gmra.mrb[0].mxu1 %v3424_v32 }
  0x24   :  { %625 = vmatprep.mubr.bf16.mxu1 %v52_v30 }
  0x2b   :  { %626 = vmatmul.mubr.bf16.gmra.mrb[4].mxu1 %v3426_v34 }
  0x2c   :  { %633 = vmatprep.mubr.bf16.mxu1 %v54_v33 }
  0x33   :  { %634 = vmatmul.mubr.bf16.gmra.mrb[8].mxu1 %v3428_v36 }
  0x34   :  { %641 = vmatprep.mubr.bf16.mxu1 %v56_v35 }
  0x35   :  { %18 = vsyncpa [#allocation3], 0  ;;  %v60_v39 = vld [vmem:[%s5225_s1 + $0x28] sm:$0xff]   ;;  %v3432_v40 = vld [vmem:[%s5224_s0 + $0x20] sm:$0xff]   ;;  %v3720_v6 = vmov 1966171168   ;;  %v754_v8 = vlaneseq }
  0x36   :  { %v62_v41 = vld [vmem:[%s5225_s1 + $0x30] sm:$0xff]   ;;  %v3434_v42 = vld [vmem:[%s5224_s0 + $0x28] sm:$0xff]   ;;  %v64_v43 = vld [vmem:[%s5225_s1 + $0x38] sm:$0xff]   ;;  %v752_v7 = vunpack.c.l.s4 %v3720_v6 }
  0x37   :  { %v3436_v44 = vld [vmem:[%s5224_s0 + $0x30] sm:$0xff]   ;;  %v66_v45 = vld [vmem:[%s5225_s1 + $0x40] sm:$0xff]   ;;  %v3438_v46 = vld [vmem:[%s5224_s0 + $0x38] sm:$0xff]   ;;  %v3998_v10 = vshrl.u32 %v754_v8, 7 }
  0x38   :  { %v68_v47 = vld [vmem:[%s5225_s1 + $0x48] sm:$0xff]   ;;  %v3440_v48 = vld [vmem:[%s5224_s0 + $0x40] sm:$0xff]   ;;  %v70_v49 = vld [vmem:[%s5225_s1 + $0x50] sm:$0xff]   ;;  %v753_v9 = vunpack.c.0.s8 %v752_v7 }
  0x39   :  { %v3442_v50 = vld [vmem:[%s5224_s0 + $0x48] sm:$0xff]   ;;  %v72_v51 = vld [vmem:[%s5225_s1 + $0x58] sm:$0xff]   ;;  %v3444_v52 = vld [vmem:[%s5224_s0 + $0x50] sm:$0xff]   ;;  %v4005_v17 = vsub.s32 0, %v3998_v10 }
  0x3a   :  { %v74_v53 = vld [vmem:[%s5225_s1 + $0x60] sm:$0xff]   ;;  %v3446_v54 = vld [vmem:[%s5224_s0 + $0x58] sm:$0xff]   ;;  %v76_v55 = vld [vmem:[%s5225_s1 + $0x68] sm:$0xff]   ;;  %v4001_v11 = vsub.s32 %v753_v9, %v3998_v10 }
  0x3b   :  { %642 = vmatmul.mubr.bf16.gmra.mrb[12].mxu1 %v3430_v38  ;;  %v3448_v56 = vld [vmem:[%s5224_s0 + $0x60] sm:$0xff]   ;;  %v78_v57 = vld [vmem:[%s5225_s1 + $0x70] sm:$0xff]   ;;  %v3450_v59 = vld [vmem:[%s5224_s0 + $0x68] sm:$0xff]  }
  0x3c   :  { %649 = vmatprep.mubr.bf16.mxu1 %v58_v37  ;;  %v3455_v58 = vld [vmem:[%s5231_s7] sm:$0xff]   ;;  %v3456_v60 = vld [vmem:[%s5231_s7 + $0x8] sm:$0xff]   ;;  %v80_v61 = vld [vmem:[%s5225_s1 + $0x78] sm:$0xff]  }
  0x3d   :  { %3283 = vmatprep.subr.bf16.mxu0 %v3455_v58  ;;  %3379 = vmatprep.subr.bf16.mxu1 %v3455_v58  ;;  %v3457_v62 = vld [vmem:[%s5231_s7 + $0x10] sm:$0xff]   ;;  %v3458_v0 = vld [vmem:[%s5231_s7 + $0x18] sm:$0xff]   ;;  %v3459_v1 = vld [vmem:[%s5231_s7 + $0x20] sm:$0xff]  }
  0x3e   :  { %3284 = vmatpush3.bf16.msra.mxu0 %v3455_v58  ;;  %3387 = vmatpush3.bf16.msra.mxu1 %v3455_v58  ;;  %v3452_v63 = vld [vmem:[%s5224_s0 + $0x70] sm:$0xff]   ;;  %v3454_v2 = vld [vmem:[%s5224_s0 + $0x78] sm:$0xff]   ;;  %v3460_v3 = vld [vmem:[%s5231_s7 + $0x28] sm:$0xff]  }
  0x3f   :  { %3285 = vmatprep.subr.bf16.mxu0 %v3456_v60  ;;  %3380 = vmatprep.subr.bf16.mxu1 %v3456_v60  ;;  %v3461_v4 = vld [vmem:[%s5231_s7 + $0x30] sm:$0xff]   ;;  %v3462_v5 = vld [vmem:[%s5231_s7 + $0x38] sm:$0xff]  }
  0x42   :  { %3286 = vmatpush3.bf16.msra.mxu0 %v3456_v60  ;;  %3388 = vmatpush3.bf16.msra.mxu1 %v3456_v60 }
  0x43   :  { %650 = vmatmul.mubr.bf16.gmra.mrb[16].mxu1 %v3432_v40  ;;  %3287 = vmatprep.subr.bf16.mxu0 %v3457_v62 }
  0x44   :  { %657 = vmatprep.mubr.bf16.mxu1 %v60_v39  ;;  %3381 = vmatprep.subr.bf16.mxu1 %v3457_v62 }
  0x46   :  { %3288 = vmatpush3.bf16.msra.mxu0 %v3457_v62  ;;  %3389 = vmatpush3.bf16.msra.mxu1 %v3457_v62 }
  0x47   :  { %3289 = vmatprep.subr.bf16.mxu0 %v3458_v0  ;;  %3382 = vmatprep.subr.bf16.mxu1 %v3458_v0 }
  0x4a   :  { %3290 = vmatpush3.bf16.msra.mxu0 %v3458_v0  ;;  %3390 = vmatpush3.bf16.msra.mxu1 %v3458_v0 }
  0x4b   :  { %658 = vmatmul.mubr.bf16.gmra.mrb[20].mxu1 %v3434_v42  ;;  %3291 = vmatprep.subr.bf16.mxu0 %v3459_v1 }
  0x4c   :  { %665 = vmatprep.mubr.bf16.mxu1 %v62_v41  ;;  %3383 = vmatprep.subr.bf16.mxu1 %v3459_v1  ;;  %v4034_v41 = vld [vmem:[%s5230_s6] ss:$0 sm:$0xff] }
  0x4e   :  { %3292 = vmatpush3.bf16.msra.mxu0 %v3459_v1  ;;  %3391 = vmatpush3.bf16.msra.mxu1 %v3459_v1 }
  0x4f   :  { %3293 = vmatprep.subr.bf16.mxu0 %v3460_v3  ;;  %3384 = vmatprep.subr.bf16.mxu1 %v3460_v3 }
  0x52   :  { %3294 = vmatpush3.bf16.msra.mxu0 %v3460_v3  ;;  %3392 = vmatpush3.bf16.msra.mxu1 %v3460_v3 }
  0x53   :  { %666 = vmatmul.mubr.bf16.gmra.mrb[24].mxu1 %v3436_v44  ;;  %3295 = vmatprep.subr.bf16.mxu0 %v3461_v4 }
  0x54   :  { %673 = vmatprep.mubr.bf16.mxu1 %v64_v43  ;;  %3385 = vmatprep.subr.bf16.mxu1 %v3461_v4 }
  0x56   :  { %3296 = vmatpush3.bf16.msra.mxu0 %v3461_v4  ;;  %3393 = vmatpush3.bf16.msra.mxu1 %v3461_v4 }
  0x57   :  { %3297 = vmatprep.subr.bf16.mxu0 %v3462_v5  ;;  %3386 = vmatprep.subr.bf16.mxu1 %v3462_v5 }
  0x5a   :  { %3298 = vmatpush3.bf16.msra.mxu0 %v3462_v5  ;;  %3394 = vmatpush3.bf16.msra.mxu1 %v3462_v5 }
  0x5b   :  { %674 = vmatmul.mubr.bf16.gmra.mrb[28].mxu1 %v3438_v46 }
  0x5c   :  { %681 = vmatprep.mubr.bf16.mxu1 %v66_v45 }
  0x63   :  { %682 = vmatmul.mubr.bf16.gmra.mrb[32].mxu1 %v3440_v48 }
  0x64   :  { %689 = vmatprep.mubr.bf16.mxu1 %v68_v47 }
  0x6b   :  { %690 = vmatmul.mubr.bf16.gmra.mrb[36].mxu1 %v3442_v50 }
  0x6c   :  { %697 = vmatprep.mubr.bf16.mxu1 %v70_v49 }
  0x73   :  { %698 = vmatmul.mubr.bf16.gmra.mrb[40].mxu1 %v3444_v52 }
  0x74   :  { %705 = vmatprep.mubr.bf16.mxu1 %v72_v51 }
  0x7b   :  { %706 = vmatmul.mubr.bf16.gmra.mrb[44].mxu1 %v3446_v54 }
  0x7c   :  { %713 = vmatprep.mubr.bf16.mxu1 %v74_v53 }
  0x83   :  { %714 = vmatmul.mubr.bf16.gmra.mrb[48].mxu1 %v3448_v56 }
  0x84   :  { %721 = vmatprep.mubr.bf16.mxu1 %v76_v55 }
  0x8b   :  { %722 = vmatmul.mubr.bf16.gmra.mrb[52].mxu1 %v3450_v59 }
  0x8c   :  { %729 = vmatprep.mubr.bf16.mxu1 %v78_v57 }
  0x93   :  { %730 = vmatmul.mubr.bf16.gmra.mrb[56].mxu1 %v3452_v63 }
  0x94   :  { %737 = vmatprep.mubr.bf16.mxu1 %v80_v61 }
  0x9b   :  { %738 = vmatmul.mubr.bf16.gmra.mrb[60].mxu1 %v3454_v2 }
  0xf5   :  { %v3281_v12 = vpop.f32.mrb[0].mxu0 }
  0xf6   :  { %v848_v13 = vcombine.high %v3281_v12, %v3281_v12  ;;  %v855_v14 = vrot.slane %v3281_v12, %v4001_v11  ;;  %v3119_v15 = vpop.f32.mrb[0].mxu1  ;;  %v218_v16 = vpop.f32.mrb[1].mxu0 }
  0xf7   :  { %v750_v18 = vcombine.high %v218_v16, %v218_v16  ;;  %v757_v19 = vrot.slane %v218_v16, %v4001_v11  ;;  %v3120_v20 = vpop.f32.mrb[1].mxu1  ;;  %v3282_v21 = vpop.f32.mrb[2].mxu0 }
  0xf8   :  { %v4009_v22 = vrot.slane %v848_v13, %v4001_v11  ;;  %v863_v23 = vcombine.high %v855_v14, %v855_v14  ;;  %v4012_v24 = vrot.slane %v855_v14, %v4001_v11  ;;  %v3121_v25 = vadd.f32 %v3120_v20, %v3119_v15  ;;  %v3122_v26 = vpop.f32.mrb[2].mxu1  ;;  %v4014_v27 = vpop.f32.mrb[3].mxu0 }
  0xf9   :  { %v765_v28 = vcombine.high %v757_v19, %v757_v19  ;;  %v773_v29 = vrot.slane %v757_v19, %v4001_v11  ;;  %v3123_v30 = vpop.f32.mrb[3].mxu1  ;;  %v897_v31 = vcombine.high %v3282_v21, %v3282_v21  ;;  %v764_v34 = vrot.slane %v750_v18, %v4001_v11 }
  0xfa   :  { %v4019_v32 = vrot.slane %v4009_v22, %v4001_v11  ;;  %v4022_v33 = vrot.slane %v863_v23, %v4001_v11  ;;  %v3124_v38 = vadd.f32 %v3123_v30, %v3122_v26  ;;  %v904_v39 = vrot.slane %v3282_v21, %v4001_v11 }
  0xfb   :  { %v787_v35 = vrot.slane %v765_v28, %v4001_v11  ;;  %v795_v36 = vcombine.high %v773_v29, %v773_v29  ;;  %v949_v37 = vrot.slane %v773_v29, %v4005_v17  ;;  %v4029_v40 = vrot.slane %v897_v31, %v4001_v11 }
  0xfc   :  { %v912_v47 = vcombine.high %v904_v39, %v904_v39  ;;  %v4039_v50 = vrot.slane %v904_v39, %v4001_v11  ;;  %v766_v51 = vcombine.high %v764_v34, %v764_v34  ;;  %v780_v60 = vrot.slane %v764_v34, %v4001_v11 }
  0xfd   :  { %v953_v42 = vrot.slane %v787_v35, %v4005_v17  ;;  %v797_v43 = vcombine.high %v787_v35, %v787_v35  ;;  %v1106_v44 = vadd.f32 %v3121_v25, %v949_v37  ;;  %v957_v46 = vrot.slane %v795_v36, %v4005_v17 }
  0xfe   :  { %v3125_v45 = vpop.f32.mrb[4].mxu1  ;;  %v4050_v58 = vrot.slane %v4029_v40, %v4001_v11  ;;  %v4053_v59 = vrot.slane %v912_v47, %v4001_v11  ;;  %v794_v4 = vrot.slane %v766_v51, %v4001_v11  ;;  %v965_v12 = vrot.slane %v780_v60, %v4005_v17 }
  0xff   :  { %v1107_v48 = vadd.f32 %v3124_v38, %v953_v42  ;;  %v3126_v49 = vpop.f32.mrb[5].mxu1  ;;  %v4042_v52 = vadd.f32 %v4034_v41, %v1106_v44  ;;  %v961_v55 = vrot.slane %v797_v43, %v4005_v17  ;;  %v796_v23 = vcombine.high %v780_v60, %v780_v60 }
 0x100   :  { %v3127_v53 = vadd.f32 %v3126_v49, %v3125_v45  ;;  %v3128_v54 = vpop.f32.mrb[6].mxu1  ;;  %v969_v20 = vrot.slane %v794_v4, %v4005_v17  ;;  %v798_v31 = vcombine.high %v794_v4, %v794_v4  ;;  %v806_v34 = vrot.slane %v4014_v27, %v4001_v11 }
 0x101   :  { %v4046_v56 = vadd.f32 %v4034_v41, %v1107_v48  ;;  %v3129_v57 = vpop.f32.mrb[7].mxu1  ;;  %v1177_v61 = vmul.f32 %v4042_v52, %v4042_v52  ;;  %v864_v43 = vcombine.high %v4009_v22, %v4009_v22  ;;  %v973_v44 = vrot.slane %v796_v23, %v4005_v17 }
 0x102   :  { %v1108_v62 = vadd.f32 %v3127_v53, %v957_v46  ;;  %v3130_v63 = vadd.f32 %v3129_v57, %v3128_v54  ;;  %v977_v54 = vrot.slane %v798_v31, %v4005_v17  ;;  %v799_v22 = vcombine.high %v4014_v27, %v4014_v27 }
 0x103   :  { %v1178_v0 = vmul.f32 %v4046_v56, %v4046_v56  ;;  %v1209_v1 = vmul.f32 %v1177_v61, %v4042_v52 }
 0x104   :  { %v4062_v2 = vadd.f32 %v4034_v41, %v1108_v62  ;;  %v1109_v3 = vadd.f32 %v3130_v63, %v961_v55  ;;  %v814_v55 = vcombine.high %v806_v34, %v806_v34 }
 0x105   :  { %v1210_v5 = vmul.f32 %v1178_v0, %v4046_v56  ;;  %v1241_v6 = vmul.f32 0.044715, %v1209_v1  ;;  %v822_v1 = vrot.slane %v806_v34, %v4001_v11 }
 0x106   :  { %v1179_v7 = vmul.f32 %v4062_v2, %v4062_v2  ;;  %v4069_v8 = vadd.f32 %v4034_v41, %v1109_v3  ;;  %v3131_v9 = vpop.f32.mrb[8].mxu1 }
 0x107   :  { %v1242_v13 = vmul.f32 0.044715, %v1210_v5  ;;  %v3132_v14 = vpop.f32.mrb[9].mxu1  ;;  %v1273_v25 = vadd.f32 %v1241_v6, %v4042_v52  ;;  %v4103_v6 = vrot.slane %v799_v22, %v4001_v11 }
 0x108   :  { %v1211_v15 = vmul.f32 %v1179_v7, %v4062_v2  ;;  %v1180_v16 = vmul.f32 %v4069_v8, %v4069_v8  ;;  %v3133_v18 = vadd.f32 %v3132_v14, %v3131_v9  ;;  %v3134_v19 = vpop.f32.mrb[10].mxu1  ;;  %v836_v7 = vrot.slane %v814_v55, %v4001_v11 }
 0x109   :  { %v3135_v21 = vpop.f32.mrb[11].mxu1  ;;  %v1274_v35 = vadd.f32 %v1242_v13, %v4046_v56  ;;  %v1305_v36 = vmul.f32 0.7978846, %v1273_v25  ;;  %v4107_v9 = vrot.slane %v864_v43, %v4001_v11 }
 0x10a   :  { %v1243_v26 = vmul.f32 0.044715, %v1211_v15  ;;  %v1212_v28 = vmul.f32 %v1180_v16, %v4069_v8  ;;  %v1110_v29 = vadd.f32 %v3133_v18, %v965_v12  ;;  %v3136_v30 = vadd.f32 %v3135_v21, %v3134_v19 }
 0x10b   :  { %v1306_v45 = vmul.f32 0.7978846, %v1274_v35  ;;  %3487 = vtanh.f32 %v1305_v36  ;;  %v844_v16 = vcombine.high %v822_v1, %v822_v1  ;;  %v985_v31 = vrot.slane %v836_v7, %v4005_v17 }
 0x10c   :  { %v1275_v37 = vadd.f32 %v1243_v26, %v4062_v2  ;;  %v1244_v38 = vmul.f32 0.044715, %v1212_v28  ;;  %v4083_v39 = vadd.f32 %v4034_v41, %v1110_v29  ;;  %v1111_v42 = vadd.f32 %v3136_v30, %v969_v20 }
 0x10d   :  { %3489 = vtanh.f32 %v1306_v45  ;;  %v981_v20 = vrot.slane %v822_v1, %v4005_v17  ;;  %v913_v28 = vcombine.high %v4029_v40, %v4029_v40  ;;  %v815_v29 = vcombine.high %v4103_v6, %v4103_v6 }
 0x10e   :  { %v1307_v46 = vmul.f32 0.7978846, %v1275_v37  ;;  %v1276_v47 = vadd.f32 %v1244_v38, %v4069_v8  ;;  %v1181_v48 = vmul.f32 %v4083_v39, %v4083_v39  ;;  %v4092_v49 = vadd.f32 %v4034_v41, %v1111_v42  ;;  %v3137_v51 = vpop.f32.mrb[12].mxu1 }
 0x10f   :  { %v3138_v53 = vpop.f32.mrb[13].mxu1  ;;  %v989_v45 = vrot.slane %v844_v16, %v4005_v17  ;;  %v846_v40 = vcombine.high %v836_v7, %v836_v7 }
 0x110   :  { %3491 = vtanh.f32 %v1307_v46  ;;  %v1308_v57 = vmul.f32 0.7978846, %v1276_v47  ;;  %v1213_v60 = vmul.f32 %v1181_v48, %v4083_v39  ;;  %v1182_v61 = vmul.f32 %v4092_v49, %v4092_v49  ;;  %v3140_v62 = vpop.f32.mrb[14].mxu1 }
 0x111   :  { %v3139_v63 = vadd.f32 %v3138_v53, %v3137_v51  ;;  %v3141_v0 = vpop.f32.mrb[15].mxu1  ;;  %v993_v16 = vrot.slane %v846_v40, %v4005_v17  ;;  %v4155_v40 = vrot.slane %v913_v28, %v4001_v11 }
 0x112   :  { %3493 = vtanh.f32 %v1308_v57  ;;  %v1245_v3 = vmul.f32 0.044715, %v1213_v60  ;;  %v1214_v4 = vmul.f32 %v1182_v61, %v4092_v49  ;;  %v3142_v5 = vadd.f32 %v3141_v0, %v3140_v62 }
 0x113   :  { %v1112_v27 = vadd.f32 %v3139_v63, %v973_v44 }
 0x114   :  { %v1246_v12 = vmul.f32 0.044715, %v1214_v4  ;;  %v1113_v13 = vadd.f32 %v3142_v5, %v977_v54  ;;  %v1277_v14 = vadd.f32 %v1245_v3, %v4083_v39 }
 0x115   :  { %v4111_v15 = vadd.f32 %v4034_v41, %v1112_v27  ;;  %v3488_v25 = vpop.eup %3487 }
 0x116   :  { %v4114_v18 = vadd.f32 %v4034_v41, %v1113_v13  ;;  %v3143_v19 = vpop.f32.mrb[16].mxu1  ;;  %v1278_v21 = vadd.f32 %v1246_v12, %v4092_v49  ;;  %v1309_v23 = vmul.f32 0.7978846, %v1277_v14  ;;  %v1369_v37 = vadd.f32 1.0, %v3488_v25 }
 0x117   :  { %v1183_v26 = vmul.f32 %v4111_v15, %v4111_v15  ;;  %v3144_v30 = vpop.f32.mrb[17].mxu1  ;;  %v3490_v42 = vpop.eup %3489  ;;  %v4144_v14 = vrot.slane %v4103_v6, %v4001_v11 }
 0x118   :  { %v1184_v34 = vmul.f32 %v4114_v18, %v4114_v18  ;;  %v3145_v35 = vadd.f32 %v3144_v30, %v3143_v19  ;;  %v3146_v36 = vpop.f32.mrb[18].mxu1  ;;  %v1310_v38 = vmul.f32 0.7978846, %v1278_v21  ;;  %3495 = vtanh.f32 %v1309_v23 }
 0x119   :  { %v1215_v43 = vmul.f32 %v1183_v26, %v4111_v15  ;;  %v3147_v44 = vpop.f32.mrb[19].mxu1  ;;  %v1370_v53 = vadd.f32 1.0, %v3490_v42  ;;  %v1401_v22 = vmul.f32 0.5, %v1369_v37 }
 0x11a   :  { %v3492_v46 = vpop.eup %3491  ;;  %v1216_v47 = vmul.f32 %v1184_v34, %v4114_v18  ;;  %v1114_v48 = vadd.f32 %v3145_v35, %v981_v20  ;;  %v3148_v51 = vadd.f32 %v3147_v44, %v3146_v36  ;;  %3497 = vtanh.f32 %v1310_v38 }
 0x11b   :  { %v1247_v54 = vmul.f32 0.044715, %v1215_v43  ;;  %v1371_v55 = vadd.f32 1.0, %v3492_v46  ;;  %v1402_v63 = vmul.f32 0.5, %v1370_v53  ;;  %v1433_v0 = vmul.f32 %v1401_v22, %v4042_v52 }
 0x11c   :  { %v3494_v57 = vpop.eup %3493  ;;  %v1248_v60 = vmul.f32 0.044715, %v1216_v47  ;;  %v4131_v61 = vadd.f32 %v4034_v41, %v1114_v48  ;;  %v1115_v62 = vadd.f32 %v3148_v51, %v985_v31  ;;  %v843_v44 = vrot.slane %v815_v29, %v4001_v11 }
 0x11d   :  { %v1372_v1 = vadd.f32 1.0, %v3494_v57  ;;  %v1403_v3 = vmul.f32 0.5, %v1371_v55  ;;  %v1279_v4 = vadd.f32 %v1247_v54, %v4111_v15  ;;  %v1434_v12 = vmul.f32 %v1402_v63, %v4046_v56 }
 0x11e   :  { %v1185_v5 = vmul.f32 %v4131_v61, %v4131_v61  ;;  %v4138_v27 = vadd.f32 %v4034_v41, %v1115_v62  ;;  %v3149_v7 = vpop.f32.mrb[20].mxu1  ;;  %v1280_v13 = vadd.f32 %v1248_v60, %v4114_v18  ;;  %v997_v11 = vrot.slane %v4144_v14, %v4005_v17 }
 0x11f   :  { %v3150_v52 = vpop.f32.mrb[21].mxu1  ;;  %v1404_v19 = vmul.f32 0.5, %v1372_v1  ;;  %v1311_v20 = vmul.f32 0.7978846, %v1279_v4  ;;  %v1465_v30 = vpack.c.bf16 %v1434_v12, %v1433_v0  ;;  %v1435_v31 = vmul.f32 %v1403_v3, %v4062_v2 }
 0x120   :  { %v1217_v21 = vmul.f32 %v1185_v5, %v4131_v61  ;;  %v1186_v23 = vmul.f32 %v4138_v27, %v4138_v27  ;;  %v3151_v25 = vadd.f32 %v3150_v52, %v3149_v7  ;;  %v3152_v26 = vpop.f32.mrb[22].mxu1  ;;  %v1312_v6 = vmul.f32 0.7978846, %v1280_v13 }
 0x121   :  { %v3153_v56 = vpop.f32.mrb[23].mxu1  ;;  %v1436_v34 = vmul.f32 %v1404_v19, %v4069_v8  ;;  %3499 = vtanh.f32 %v1311_v20  ;;  %3299 = vmatprep.mubr.bf16.mxu0 %v1465_v30  ;;  %v1001_v22 = vrot.slane %v843_v44, %v4005_v17  ;;  %v845_v5 = vcombine.high %v4144_v14, %v4144_v14 }
 0x122   :  { %v1249_v35 = vmul.f32 0.044715, %v1217_v21  ;;  %v1218_v36 = vmul.f32 %v1186_v23, %v4138_v27  ;;  %v1116_v37 = vadd.f32 %v3151_v25, %v989_v45  ;;  %v3154_v38 = vadd.f32 %v3153_v56, %v3152_v26  ;;  %v3496_v42 = vpop.eup %3495 }
 0x123   :  { %v1466_v43 = vpack.c.bf16 %v1436_v34, %v1435_v31  ;;  %3501 = vtanh.f32 %v1312_v6  ;;  %v1373_v47 = vadd.f32 1.0, %v3496_v42  ;;  %v847_v23 = vcombine.high %v843_v44, %v843_v44 }
 0x124   :  { %v1250_v46 = vmul.f32 0.044715, %v1218_v36  ;;  %v4158_v2 = vadd.f32 %v4034_v41, %v1116_v37  ;;  %v1117_v8 = vadd.f32 %v3154_v38, %v993_v16  ;;  %v3498_v48 = vpop.eup %3497  ;;  %v1281_v45 = vadd.f32 %v1249_v35, %v4131_v61 }
 0x125   :  { %3300 = vmatmul.mubr.bf16.vlgmr.msra.gmra.mrb[4].mxu0 %v1466_v43  ;;  %v1374_v28 = vadd.f32 1.0, %v3498_v48  ;;  %v1405_v55 = vmul.f32 0.5, %v1373_v47  ;;  %v1009_v38 = vrot.slane %v847_v23, %v4005_v17 }
 0x126   :  { %v1187_v51 = vmul.f32 %v4158_v2, %v4158_v2  ;;  %v4164_v53 = vadd.f32 %v4034_v41, %v1117_v8  ;;  %v3155_v29 = vpop.f32.mrb[24].mxu1  ;;  %v1282_v57 = vadd.f32 %v1250_v46, %v4138_v27  ;;  %v1313_v60 = vmul.f32 0.7978846, %v1281_v45 }
 0x127   :  { %v3156_v54 = vpop.f32.mrb[25].mxu1  ;;  %v1406_v3 = vmul.f32 0.5, %v1374_v28  ;;  %v1437_v20 = vmul.f32 %v1405_v55, %v4083_v39 }
 0x128   :  { %v1219_v62 = vmul.f32 %v1187_v51, %v4158_v2  ;;  %v1188_v63 = vmul.f32 %v4164_v53, %v4164_v53  ;;  %v3157_v0 = vadd.f32 %v3156_v54, %v3155_v29  ;;  %v3158_v1 = vpop.f32.mrb[26].mxu1  ;;  %v1314_v7 = vmul.f32 0.7978846, %v1282_v57 }
 0x129   :  { %v3159_v4 = vpop.f32.mrb[27].mxu1  ;;  %3503 = vtanh.f32 %v1313_v60  ;;  %v1438_v21 = vmul.f32 %v1406_v3, %v4092_v49  ;;  %v1005_v49 = vrot.slane %v845_v5, %v4005_v17 }
 0x12a   :  { %v1251_v12 = vmul.f32 0.044715, %v1219_v62  ;;  %v1220_v13 = vmul.f32 %v1188_v63, %v4164_v53  ;;  %v1118_v52 = vadd.f32 %v3157_v0, %v997_v11  ;;  %v3160_v16 = vadd.f32 %v3159_v4, %v3158_v1 }
 0x12b   :  { %v3500_v19 = vpop.eup %3499  ;;  %3505 = vtanh.f32 %v1314_v7  ;;  %v1467_v31 = vpack.c.bf16 %v1438_v21, %v1437_v20 }
 0x12c   :  { %v1252_v25 = vmul.f32 0.044715, %v1220_v13  ;;  %v4179_v26 = vadd.f32 %v4034_v41, %v1118_v52  ;;  %v1119_v30 = vadd.f32 %v3160_v16, %v1001_v22  ;;  %v1375_v14 = vadd.f32 1.0, %v3500_v19 }
 0x12d   :  { %v3502_v56 = vpop.eup %3501  ;;  %v1283_v34 = vadd.f32 %v1251_v12, %v4158_v2  ;;  %3303 = vmatprep.mubr.bf16.mxu0 %v1467_v31  ;;  %v1013_v52 = vrot.slane %v4012_v24, %v4005_v17  ;;  %v1017_v31 = vrot.slane %v4022_v33, %v4005_v17 }
 0x12e   :  { %v1189_v6 = vmul.f32 %v4179_v26, %v4179_v26  ;;  %v4185_v35 = vadd.f32 %v4034_v41, %v1119_v30  ;;  %v3161_v39 = vpop.f32.mrb[28].mxu1  ;;  %v1376_v36 = vadd.f32 1.0, %v3502_v56  ;;  %v1407_v42 = vmul.f32 0.5, %v1375_v14 }
 0x12f   :  { %v3162_v37 = vpop.f32.mrb[29].mxu1  ;;  %v1284_v43 = vadd.f32 %v1252_v25, %v4164_v53  ;;  %v1315_v44 = vmul.f32 0.7978846, %v1283_v34 }
 0x130   :  { %v1221_v46 = vmul.f32 %v1189_v6, %v4179_v26  ;;  %v1190_v8 = vmul.f32 %v4185_v35, %v4185_v35  ;;  %v3163_v47 = vadd.f32 %v3162_v37, %v3161_v39  ;;  %v3164_v48 = vpop.f32.mrb[30].mxu1  ;;  %v1408_v45 = vmul.f32 0.5, %v1376_v36 }
 0x131   :  { %v3165_v51 = vpop.f32.mrb[31].mxu1  ;;  %v1316_v29 = vmul.f32 0.7978846, %v1284_v43  ;;  %3507 = vtanh.f32 %v1315_v44  ;;  %v1439_v57 = vmul.f32 %v1407_v42, %v4111_v15 }
 0x132   :  { %v1253_v11 = vmul.f32 0.044715, %v1221_v46  ;;  %v1222_v28 = vmul.f32 %v1190_v8, %v4185_v35  ;;  %v1120_v54 = vadd.f32 %v3163_v47, %v1005_v49  ;;  %v3166_v22 = vadd.f32 %v3165_v51, %v3164_v48 }
 0x133   :  { %v3504_v55 = vpop.eup %3503  ;;  %v1440_v60 = vmul.f32 %v1408_v45, %v4114_v18  ;;  %3509 = vtanh.f32 %v1316_v29  ;;  %v895_v51 = vcombine.high %v4022_v33, %v4022_v33 }
 0x134   :  { %v1254_v62 = vmul.f32 0.044715, %v1222_v28  ;;  %v4197_v63 = vadd.f32 %v4034_v41, %v1120_v54  ;;  %v1121_v0 = vadd.f32 %v3166_v22, %v1009_v38  ;;  %v1377_v1 = vadd.f32 1.0, %v3504_v55 }
 0x135   :  { %v3506_v3 = vpop.eup %3505  ;;  %v1468_v4 = vpack.c.bf16 %v1440_v60, %v1439_v57  ;;  %v1285_v5 = vadd.f32 %v1253_v11, %v4179_v26  ;;  %v893_v38 = vcombine.high %v4012_v24, %v4012_v24 }
 0x136   :  { %v1191_v7 = vmul.f32 %v4197_v63, %v4197_v63  ;;  %v4203_v12 = vadd.f32 %v4034_v41, %v1121_v0  ;;  %v3167_v15 = vpop.f32.mrb[32].mxu1  ;;  %v1378_v13 = vadd.f32 1.0, %v3506_v3  ;;  %v1409_v16 = vmul.f32 0.5, %v1377_v1 }
 0x137   :  { %3304 = vmatmul.mubr.bf16.gmra.mrb[8].mxu0 %v1468_v4  ;;  %v3168_v18 = vpop.f32.mrb[33].mxu1  ;;  %v1286_v19 = vadd.f32 %v1254_v62, %v4185_v35  ;;  %v1317_v20 = vmul.f32 0.7978846, %v1285_v5  ;;  %v1021_v54 = vrot.slane %v893_v38, %v4005_v17  ;;  %v1025_v4 = vrot.slane %v895_v51, %v4005_v17 }
 0x138   :  { %v1223_v21 = vmul.f32 %v1191_v7, %v4197_v63  ;;  %v1192_v23 = vmul.f32 %v4203_v12, %v4203_v12  ;;  %v3169_v25 = vadd.f32 %v3168_v18, %v3167_v15  ;;  %v3170_v30 = vpop.f32.mrb[34].mxu1  ;;  %v1410_v14 = vmul.f32 0.5, %v1378_v13 }
 0x139   :  { %v3171_v56 = vpop.f32.mrb[35].mxu1  ;;  %v1318_v34 = vmul.f32 0.7978846, %v1286_v19  ;;  %3511 = vtanh.f32 %v1317_v20  ;;  %v1441_v42 = vmul.f32 %v1409_v16, %v4131_v61 }
 0x13a   :  { %v1255_v6 = vmul.f32 0.044715, %v1223_v21  ;;  %v1224_v39 = vmul.f32 %v1192_v23, %v4203_v12  ;;  %v1122_v49 = vadd.f32 %v3169_v25, %v1013_v52  ;;  %v3172_v36 = vadd.f32 %v3171_v56, %v3170_v30 }
 0x13b   :  { %v3508_v37 = vpop.eup %3507  ;;  %v1442_v43 = vmul.f32 %v1410_v14, %v4138_v27  ;;  %3513 = vtanh.f32 %v1318_v34 }
 0x13c   :  { %v1256_v44 = vmul.f32 0.044715, %v1224_v39  ;;  %v4219_v46 = vadd.f32 %v4034_v41, %v1122_v49  ;;  %v1123_v8 = vadd.f32 %v3172_v36, %v1017_v31  ;;  %v1379_v47 = vadd.f32 1.0, %v3508_v37 }
 0x13d   :  { %v3510_v48 = vpop.eup %3509  ;;  %v1469_v45 = vpack.c.bf16 %v1442_v43, %v1441_v42  ;;  %v1287_v29 = vadd.f32 %v1255_v6, %v4197_v63  ;;  %v1029_v39 = vrot.slane %v4019_v32, %v4005_v17 }
 0x13e   :  { %v1193_v24 = vmul.f32 %v4219_v46, %v4219_v46  ;;  %v4227_v61 = vadd.f32 %v4034_v41, %v1123_v8  ;;  %v3173_v27 = vpop.f32.mrb[36].mxu1  ;;  %v1380_v11 = vadd.f32 1.0, %v3510_v48  ;;  %v1411_v22 = vmul.f32 0.5, %v1379_v47 }
 0x13f   :  { %3307 = vmatprep.mubr.bf16.mxu0 %v1469_v45  ;;  %v3174_v28 = vpop.f32.mrb[37].mxu1  ;;  %v1288_v55 = vadd.f32 %v1256_v44, %v4203_v12  ;;  %v1319_v57 = vmul.f32 0.7978846, %v1287_v29  ;;  %v1033_v48 = vrot.slane %v4107_v9, %v4005_v17 }
 0x140   :  { %v1225_v33 = vmul.f32 %v1193_v24, %v4219_v46  ;;  %v1194_v60 = vmul.f32 %v4227_v61, %v4227_v61  ;;  %v3175_v62 = vadd.f32 %v3174_v28, %v3173_v27  ;;  %v3176_v0 = vpop.f32.mrb[38].mxu1  ;;  %v1412_v1 = vmul.f32 0.5, %v1380_v11 }
 0x141   :  { %v3177_v3 = vpop.f32.mrb[39].mxu1  ;;  %v1320_v5 = vmul.f32 0.7978846, %v1288_v55  ;;  %3515 = vtanh.f32 %v1319_v57  ;;  %v1443_v16 = vmul.f32 %v1411_v22, %v4158_v2  ;;  %v894_v22 = vcombine.high %v4019_v32, %v4019_v32 }
 0x142   :  { %v1257_v7 = vmul.f32 0.044715, %v1225_v33  ;;  %v1226_v15 = vmul.f32 %v1194_v60, %v4227_v61  ;;  %v1124_v13 = vadd.f32 %v3175_v62, %v1021_v54  ;;  %v3178_v18 = vadd.f32 %v3177_v3, %v3176_v0 }
 0x143   :  { %v3512_v52 = vpop.eup %3511  ;;  %v1444_v19 = vmul.f32 %v1412_v1, %v4164_v53  ;;  %3517 = vtanh.f32 %v1320_v5  ;;  %v896_v1 = vcombine.high %v4107_v9, %v4107_v9 }
 0x144   :  { %v1258_v20 = vmul.f32 0.044715, %v1226_v15  ;;  %v4239_v21 = vadd.f32 %v4034_v41, %v1124_v13  ;;  %v1125_v23 = vadd.f32 %v3178_v18, %v1025_v4  ;;  %v1381_v25 = vadd.f32 1.0, %v3512_v52 }
 0x145   :  { %v3514_v30 = vpop.eup %3513  ;;  %v1470_v14 = vpack.c.bf16 %v1444_v19, %v1443_v16  ;;  %v1289_v56 = vadd.f32 %v1257_v7, %v4219_v46  ;;  %v1037_v7 = vrot.slane %v894_v22, %v4005_v17 }
 0x146   :  { %v1195_v31 = vmul.f32 %v4239_v21, %v4239_v21  ;;  %v4245_v34 = vadd.f32 %v4034_v41, %v1125_v23  ;;  %v3179_v2 = vpop.f32.mrb[40].mxu1  ;;  %v1382_v6 = vadd.f32 1.0, %v3514_v30  ;;  %v1413_v49 = vmul.f32 0.5, %v1381_v25 }
 0x147   :  { %3308 = vmatmul.mubr.bf16.gmra.mrb[12].mxu0 %v1470_v14  ;;  %v3180_v53 = vpop.f32.mrb[41].mxu1  ;;  %v1290_v36 = vadd.f32 %v1258_v20, %v4227_v61  ;;  %v1321_v37 = vmul.f32 0.7978846, %v1289_v56  ;;  %v1041_v25 = vrot.slane %v896_v1, %v4005_v17 }
 0x148   :  { %v1227_v38 = vmul.f32 %v1195_v31, %v4239_v21  ;;  %v1196_v42 = vmul.f32 %v4245_v34, %v4245_v34  ;;  %v3181_v43 = vadd.f32 %v3180_v53, %v3179_v2  ;;  %v3182_v44 = vpop.f32.mrb[42].mxu1  ;;  %v1414_v8 = vmul.f32 0.5, %v1382_v6 }
 0x149   :  { %v3183_v47 = vpop.f32.mrb[43].mxu1  ;;  %v1322_v45 = vmul.f32 0.7978846, %v1290_v36  ;;  %3519 = vtanh.f32 %v1321_v37  ;;  %v1445_v28 = vmul.f32 %v1413_v49, %v4179_v26 }
 0x14a   :  { %v1259_v51 = vmul.f32 0.044715, %v1227_v38  ;;  %v1228_v29 = vmul.f32 %v1196_v42, %v4245_v34  ;;  %v1126_v24 = vadd.f32 %v3181_v43, %v1029_v39  ;;  %v3184_v27 = vadd.f32 %v3183_v47, %v3182_v44 }
 0x14b   :  { %v3516_v11 = vpop.eup %3515  ;;  %v1446_v54 = vmul.f32 %v1414_v8, %v4185_v35  ;;  %3521 = vtanh.f32 %v1322_v45  ;;  %v1045_v45 = vrot.slane %v4039_v50, %v4005_v17 }
 0x14c   :  { %v1260_v55 = vmul.f32 0.044715, %v1228_v29  ;;  %v4261_v57 = vadd.f32 %v4034_v41, %v1126_v24  ;;  %v1127_v33 = vadd.f32 %v3184_v27, %v1033_v48  ;;  %v1383_v60 = vadd.f32 1.0, %v3516_v11 }
 0x14d   :  { %v3518_v62 = vpop.eup %3517  ;;  %v1471_v0 = vpack.c.bf16 %v1446_v54, %v1445_v28  ;;  %v1291_v3 = vadd.f32 %v1259_v51, %v4239_v21 }
 0x14e   :  { %v1197_v26 = vmul.f32 %v4261_v57, %v4261_v57  ;;  %v4269_v35 = vadd.f32 %v4034_v41, %v1127_v33  ;;  %v3185_v32 = vpop.f32.mrb[44].mxu1  ;;  %v1384_v4 = vadd.f32 1.0, %v3518_v62  ;;  %v1415_v15 = vmul.f32 0.5, %v1383_v60 }
 0x14f   :  { %3311 = vmatprep.mubr.bf16.mxu0 %v1471_v0  ;;  %v3186_v5 = vpop.f32.mrb[45].mxu1  ;;  %v1292_v13 = vadd.f32 %v1260_v55, %v4245_v34  ;;  %v1323_v18 = vmul.f32 0.7978846, %v1291_v3  ;;  %v1049_v33 = vrot.slane %v4053_v59, %v4005_v17 }
 0x150   :  { %v1229_v9 = vmul.f32 %v1197_v26, %v4261_v57  ;;  %v1198_v52 = vmul.f32 %v4269_v35, %v4269_v35  ;;  %v3187_v16 = vadd.f32 %v3186_v5, %v3185_v32  ;;  %v3188_v19 = vpop.f32.mrb[46].mxu1  ;;  %v1416_v20 = vmul.f32 0.5, %v1384_v4 }
 0x151   :  { %v3189_v23 = vpop.f32.mrb[47].mxu1  ;;  %v1324_v30 = vmul.f32 0.7978846, %v1292_v13  ;;  %3523 = vtanh.f32 %v1323_v18  ;;  %v1447_v53 = vmul.f32 %v1415_v15, %v4197_v63  ;;  %v942_v32 = vcombine.high %v4039_v50, %v4039_v50 }
 0x152   :  { %v1261_v14 = vmul.f32 0.044715, %v1229_v9  ;;  %v1230_v56 = vmul.f32 %v1198_v52, %v4269_v35  ;;  %v1128_v31 = vadd.f32 %v3187_v16, %v1037_v7  ;;  %v3190_v2 = vadd.f32 %v3189_v23, %v3188_v19 }
 0x153   :  { %v3520_v6 = vpop.eup %3519  ;;  %v1448_v39 = vmul.f32 %v1416_v20, %v4203_v12  ;;  %3525 = vtanh.f32 %v1324_v30  ;;  %v944_v16 = vcombine.high %v4053_v59, %v4053_v59 }
 0x154   :  { %v1262_v49 = vmul.f32 0.044715, %v1230_v56  ;;  %v4281_v36 = vadd.f32 %v4034_v41, %v1128_v31  ;;  %v1129_v37 = vadd.f32 %v3190_v2, %v1041_v25  ;;  %v1385_v38 = vadd.f32 1.0, %v3520_v6 }
 0x155   :  { %v3522_v42 = vpop.eup %3521  ;;  %v1472_v43 = vpack.c.bf16 %v1448_v39, %v1447_v53  ;;  %v1293_v44 = vadd.f32 %v1261_v14, %v4261_v57  ;;  %v1053_v25 = vrot.slane %v942_v32, %v4005_v17 }
 0x156   :  { %v1199_v8 = vmul.f32 %v4281_v36, %v4281_v36  ;;  %v4287_v47 = vadd.f32 %v4034_v41, %v1129_v37  ;;  %v3191_v63 = vpop.f32.mrb[48].mxu1  ;;  %v1386_v48 = vadd.f32 1.0, %v3522_v42  ;;  %v1417_v51 = vmul.f32 0.5, %v1385_v38 }
 0x157   :  { %3312 = vmatmul.mubr.bf16.gmra.mrb[16].mxu0 %v1472_v43  ;;  %v3192_v12 = vpop.f32.mrb[49].mxu1  ;;  %v1294_v29 = vadd.f32 %v1262_v49, %v4269_v35  ;;  %v1325_v24 = vmul.f32 0.7978846, %v1293_v44  ;;  %v1057_v49 = vrot.slane %v944_v16, %v4005_v17 }
 0x158   :  { %v1231_v27 = vmul.f32 %v1199_v8, %v4281_v36  ;;  %v1200_v11 = vmul.f32 %v4287_v47, %v4287_v47  ;;  %v3193_v28 = vadd.f32 %v3192_v12, %v3191_v63  ;;  %v3194_v54 = vpop.f32.mrb[50].mxu1  ;;  %v1418_v22 = vmul.f32 0.5, %v1386_v48 }
 0x159   :  { %v3195_v55 = vpop.f32.mrb[51].mxu1  ;;  %v1326_v60 = vmul.f32 0.7978846, %v1294_v29  ;;  %3527 = vtanh.f32 %v1325_v24  ;;  %v1449_v4 = vmul.f32 %v1417_v51, %v4219_v46 }
 0x15a   :  { %v1263_v62 = vmul.f32 0.044715, %v1231_v27  ;;  %v1232_v0 = vmul.f32 %v1200_v11, %v4287_v47  ;;  %v1130_v1 = vadd.f32 %v3193_v28, %v1045_v45  ;;  %v3196_v3 = vadd.f32 %v3195_v55, %v3194_v54 }
 0x15b   :  { %v3524_v26 = vpop.eup %3523  ;;  %v1450_v5 = vmul.f32 %v1418_v22, %v4227_v61  ;;  %3529 = vtanh.f32 %v1326_v60  ;;  %v1061_v55 = vrot.slane %v4050_v58, %v4005_v17 }
 0x15c   :  { %v1264_v7 = vmul.f32 0.044715, %v1232_v0  ;;  %v4303_v15 = vadd.f32 %v4034_v41, %v1130_v1  ;;  %v1131_v13 = vadd.f32 %v3196_v3, %v1049_v33  ;;  %v1387_v18 = vadd.f32 1.0, %v3524_v26 }
 0x15d   :  { %v3526_v9 = vpop.eup %3525  ;;  %v1473_v52 = vpack.c.bf16 %v1450_v5, %v1449_v4  ;;  %v1295_v19 = vadd.f32 %v1263_v62, %v4281_v36  ;;  %v1065_v5 = vrot.slane %v4155_v40, %v4005_v17 }
 0x15e   :  { %v1201_v50 = vmul.f32 %v4303_v15, %v4303_v15  ;;  %v4311_v46 = vadd.f32 %v4034_v41, %v1131_v13  ;;  %v3197_v61 = vpop.f32.mrb[52].mxu1  ;;  %v1388_v20 = vadd.f32 1.0, %v3526_v9  ;;  %v1419_v30 = vmul.f32 0.5, %v1387_v18 }
 0x15f   :  { %3315 = vmatprep.mubr.bf16.mxu0 %v1473_v52  ;;  %v3198_v23 = vpop.f32.mrb[53].mxu1  ;;  %v1296_v14 = vadd.f32 %v1264_v7, %v4287_v47  ;;  %v1327_v56 = vmul.f32 0.7978846, %v1295_v19 }
 0x160   :  { %v1233_v59 = vmul.f32 %v1201_v50, %v4303_v15  ;;  %v1202_v31 = vmul.f32 %v4311_v46, %v4311_v46  ;;  %v3199_v2 = vadd.f32 %v3198_v23, %v3197_v61  ;;  %v3200_v6 = vpop.f32.mrb[54].mxu1  ;;  %v1420_v53 = vmul.f32 0.5, %v1388_v20 }
 0x161   :  { %v3201_v39 = vpop.f32.mrb[55].mxu1  ;;  %v1328_v37 = vmul.f32 0.7978846, %v1296_v14  ;;  %3531 = vtanh.f32 %v1327_v56  ;;  %v1451_v63 = vmul.f32 %v1419_v30, %v4239_v21  ;;  %v943_v56 = vcombine.high %v4050_v58, %v4050_v58 }
 0x162   :  { %v1265_v38 = vmul.f32 0.044715, %v1233_v59  ;;  %v1234_v42 = vmul.f32 %v1202_v31, %v4311_v46  ;;  %v1132_v43 = vadd.f32 %v3199_v2, %v1053_v25  ;;  %v3202_v44 = vadd.f32 %v3201_v39, %v3200_v6 }
 0x163   :  { %v3528_v8 = vpop.eup %3527  ;;  %v1452_v48 = vmul.f32 %v1420_v53, %v4245_v34  ;;  %3533 = vtanh.f32 %v1328_v37  ;;  %v945_v59 = vcombine.high %v4155_v40, %v4155_v40 }
 0x164   :  { %v1266_v12 = vmul.f32 0.044715, %v1234_v42  ;;  %v4323_v45 = vadd.f32 %v4034_v41, %v1132_v43  ;;  %v1133_v51 = vadd.f32 %v3202_v44, %v1057_v49  ;;  %v1389_v29 = vadd.f32 1.0, %v3528_v8 }
 0x165   :  { %v3530_v24 = vpop.eup %3529  ;;  %v1474_v27 = vpack.c.bf16 %v1452_v48, %v1451_v63  ;;  %v1297_v11 = vadd.f32 %v1265_v38, %v4303_v15  ;;  %v1069_v44 = vrot.slane %v943_v56, %v4005_v17 }
 0x166   :  { %v1203_v28 = vmul.f32 %v4323_v45, %v4323_v45  ;;  %v4329_v54 = vadd.f32 %v4034_v41, %v1133_v51  ;;  %v3203_v21 = vpop.f32.mrb[56].mxu1  ;;  %v1390_v22 = vadd.f32 1.0, %v3530_v24  ;;  %v1421_v33 = vmul.f32 0.5, %v1389_v29 }
 0x167   :  { %3316 = vmatmul.mubr.bf16.gmra.mrb[20].mxu0 %v1474_v27  ;;  %v3204_v34 = vpop.f32.mrb[57].mxu1  ;;  %v1298_v60 = vadd.f32 %v1266_v12, %v4311_v46  ;;  %v1329_v62 = vmul.f32 0.7978846, %v1297_v11 }
 0x168   :  { %v1235_v0 = vmul.f32 %v1203_v28, %v4323_v45  ;;  %v1204_v1 = vmul.f32 %v4329_v54, %v4329_v54  ;;  %v3205_v3 = vadd.f32 %v3204_v34, %v3203_v21  ;;  %v3206_v26 = vpop.f32.mrb[58].mxu1  ;;  %v1422_v32 = vmul.f32 0.5, %v1390_v22 }
 0x169   :  { %v3207_v4 = vpop.f32.mrb[59].mxu1  ;;  %v1330_v7 = vmul.f32 0.7978846, %v1298_v60  ;;  %3535 = vtanh.f32 %v1329_v62  ;;  %v1453_v19 = vmul.f32 %v1421_v33, %v4261_v57  ;;  %v3679_v33 = vld [vmem:[%s5230_s6] ss:$0 sm:$0xff] }
 0x16a   :  { %v1267_v13 = vmul.f32 0.044715, %v1235_v0  ;;  %v1236_v18 = vmul.f32 %v1204_v1, %v4329_v54  ;;  %v1134_v9 = vadd.f32 %v3205_v3, %v1061_v55  ;;  %v3208_v52 = vadd.f32 %v3207_v4, %v3206_v26 }
 0x16b   :  { %v3532_v16 = vpop.eup %3531  ;;  %v1454_v50 = vmul.f32 %v1422_v32, %v4269_v35  ;;  %3537 = vtanh.f32 %v1330_v7 }
 0x16c   :  { %v1299_v61 = vadd.f32 %v1267_v13, %v4323_v45  ;;  %v1268_v20 = vmul.f32 0.044715, %v1236_v18  ;;  %v4344_v23 = vadd.f32 %v4034_v41, %v1134_v9  ;;  %v1135_v25 = vadd.f32 %v3208_v52, %v1065_v5 }
 0x16d   :  { %v3534_v30 = vpop.eup %3533  ;;  %v1475_v14 = vpack.c.bf16 %v1454_v50, %v1453_v19  ;;  %v1391_v31 = vadd.f32 1.0, %v3532_v16 }
 0x16e   :  { %v1331_v57 = vmul.f32 0.7978846, %v1299_v61  ;;  %v1300_v35 = vadd.f32 %v1268_v20, %v4329_v54  ;;  %v1205_v2 = vmul.f32 %v4344_v23, %v4344_v23  ;;  %v4354_v6 = vadd.f32 %v4034_v41, %v1135_v25  ;;  %v3209_v53 = vpop.f32.mrb[60].mxu1  ;;  %v3463_v25 = vld [vmem:[%s5233_s9] sm:$0xff]  }
 0x16f   :  { %3319 = vmatprep.mubr.bf16.mxu0 %v1475_v14  ;;  %v3210_v39 = vpop.f32.mrb[61].mxu1  ;;  %v1392_v49 = vadd.f32 1.0, %v3534_v30  ;;  %v1423_v37 = vmul.f32 0.5, %v1391_v31  ;;  %v1073_v41 = vrot.slane %v945_v59, %v4005_v17  ;;  %3331 = vmatprep.subr.bf16.mxu0 %v3463_v25 }
 0x170   :  { %3539 = vtanh.f32 %v1331_v57  ;;  %v1332_v58 = vmul.f32 0.7978846, %v1300_v35  ;;  %v1237_v38 = vmul.f32 %v1205_v2, %v4344_v23  ;;  %v1206_v40 = vmul.f32 %v4354_v6, %v4354_v6  ;;  %v3212_v42 = vpop.f32.mrb[62].mxu1  ;;  %3332 = vmatpush3.bf16.msra.mxu0 %v3463_v25  ;;  %v3464_v57 = vld [vmem:[%s5233_s9 + $0x8] sm:$0xff]  }
 0x171   :  { %v3211_v43 = vadd.f32 %v3210_v39, %v3209_v53  ;;  %v3213_v8 = vpop.f32.mrb[63].mxu1  ;;  %v1424_v63 = vmul.f32 0.5, %v1392_v49  ;;  %v1455_v27 = vmul.f32 %v1423_v37, %v4281_v36  ;;  %3333 = vmatprep.subr.bf16.mxu0 %v3464_v57 }
 0x172   :  { %3541 = vtanh.f32 %v1332_v58  ;;  %v1269_v48 = vmul.f32 0.044715, %v1237_v38  ;;  %v1238_v12 = vmul.f32 %v1206_v40, %v4354_v6  ;;  %v3214_v51 = vadd.f32 %v3213_v8, %v3212_v42  ;;  %v3465_v58 = vld [vmem:[%s5233_s9 + $0x10] sm:$0xff]  }
 0x173   :  { %v3536_v29 = vpop.eup %3535  ;;  %v1136_v24 = vadd.f32 %v3211_v43, %v1069_v44  ;;  %v1456_v11 = vmul.f32 %v1424_v63, %v4287_v47 }
 0x174   :  { %v1270_v28 = vmul.f32 0.044715, %v1238_v12  ;;  %v1137_v21 = vadd.f32 %v3214_v51, %v1073_v41  ;;  %v1393_v22 = vadd.f32 1.0, %v3536_v29  ;;  %v1301_v34 = vadd.f32 %v1269_v48, %v4344_v23  ;;  %3334 = vmatpush3.bf16.msra.mxu0 %v3464_v57  ;;  %v3467_v48 = vld [vmem:[%s5233_s9 + $0x20] sm:$0xff]  }
 0x175   :  { %v3538_v55 = vpop.eup %3537  ;;  %v4368_v60 = vadd.f32 %v3679_v33, %v1136_v24  ;;  %v1476_v62 = vpack.c.bf16 %v1456_v11, %v1455_v27  ;;  %3335 = vmatprep.subr.bf16.mxu0 %v3465_v58  ;;  %v3469_v11 = vld [vmem:[%s5233_s9 + $0x30] sm:$0xff]  }
 0x176   :  { %v4370_v0 = vadd.f32 %v3679_v33, %v1137_v21  ;;  %v1394_v1 = vadd.f32 1.0, %v3538_v55  ;;  %v1425_v3 = vmul.f32 0.5, %v1393_v22  ;;  %v1302_v36 = vadd.f32 %v1270_v28, %v4354_v6  ;;  %v3470_v28 = vld [vmem:[%s5233_s9 + $0x38] sm:$0xff]   ;;  %v4416_v21 = vld [vmem:[%s5232_s8] ss:$0 sm:$0xff] }
 0x177   :  { %v1207_v47 = vmul.f32 %v4368_v60, %v4368_v60  ;;  %3320 = vmatmul.mubr.bf16.gmra.mrb[24].mxu0 %v1476_v62  ;;  %v1333_v26 = vmul.f32 0.7978846, %v1301_v34 }
 0x178   :  { %v1208_v32 = vmul.f32 %v4370_v0, %v4370_v0  ;;  %v1426_v4 = vmul.f32 0.5, %v1394_v1  ;;  %v1334_v5 = vmul.f32 0.7978846, %v1302_v36  ;;  %v1457_v9 = vmul.f32 %v1425_v3, %v4303_v15  ;;  %3336 = vmatpush3.bf16.msra.mxu0 %v3465_v58 }
 0x179   :  { %v1239_v7 = vmul.f32 %v1207_v47, %v4368_v60  ;;  %3543 = vtanh.f32 %v1333_v26  ;;  %v4430_v3 = vsub.s32 2, %v3998_v10  ;;  %v4440_v26 = vld [vmem:[%s5226_s2] sm:$0xff] }
 0x17a   :  { %v3540_v13 = vpop.eup %3539  ;;  %v1240_v18 = vmul.f32 %v1208_v32, %v4370_v0  ;;  %v1458_v52 = vmul.f32 %v1426_v4, %v4311_v46  ;;  %3545 = vtanh.f32 %v1334_v5  ;;  %v4443_v32 = vsub.s32 3, %v3998_v10 }
 0x17b   :  { %v1395_v16 = vadd.f32 1.0, %v3540_v13  ;;  %v1271_v19 = vmul.f32 0.044715, %v1239_v7  ;;  %v4446_v4 = vsub.s32 1, %v3998_v10  ;;  %v2266_v13 = vrot.slane %v4440_v26, %v4430_v3 }
 0x17c   :  { %v3542_v50 = vpop.eup %3541  ;;  %v1272_v61 = vmul.f32 0.044715, %v1240_v18  ;;  %v1477_v20 = vpack.c.bf16 %v1458_v52, %v1457_v9  ;;  %v2252_v18 = vrot.slane %v4440_v26, %v4005_v17 }
 0x17d   :  { %v1427_v30 = vmul.f32 0.5, %v1395_v16  ;;  %v1396_v14 = vadd.f32 1.0, %v3542_v50  ;;  %v1303_v56 = vadd.f32 %v1271_v19, %v4368_v60  ;;  %2268 = vbcast.lane.b32.xlu1 %v2266_v13, 256  ;;  %v2273_v50 = vrot.slane %v4440_v26, %v4443_v32 }
 0x17e   :  { %3323 = vmatprep.mubr.bf16.mxu1 %v1477_v20  ;;  %v1304_v59 = vadd.f32 %v1272_v61, %v4370_v0  ;;  %2254 = vbcast.lane.b32.xlu0 %v2252_v18, 256  ;;  %v2259_v61 = vrot.slane %v4440_v26, %v4446_v4 }
 0x17f   :  { %v1428_v15 = vmul.f32 0.5, %v1396_v14  ;;  %v1335_v46 = vmul.f32 0.7978846, %v1303_v56  ;;  %v1459_v35 = vmul.f32 %v1427_v30, %v4323_v45  ;;  %v3466_v45 = vld [vmem:[%s5233_s9 + $0x18] sm:$0xff]  }
 0x180   :  { %v1336_v31 = vmul.f32 0.7978846, %v1304_v59  ;;  %3337 = vmatprep.subr.bf16.mxu0 %v3466_v45 }
 0x181   :  { %v1460_v2 = vmul.f32 %v1428_v15, %v4329_v54  ;;  %3547 = vtanh.f32 %v1335_v46  ;;  %3338 = vmatpush3.bf16.msra.mxu0 %v3466_v45  ;;  %2275 = vbcast.lane.b32.xlu1 %v2273_v50, 256  ;;  %v4483_v45 = vsub.s32 6, %v3998_v10 }
 0x182   :  { %3549 = vtanh.f32 %v1336_v31  ;;  %3339 = vmatprep.subr.bf16.mxu0 %v3467_v48  ;;  %2261 = vbcast.lane.b32.xlu0 %v2259_v61, 256 }
 0x183   :  { %v3544_v53 = vpop.eup %3543  ;;  %v1478_v39 = vpack.c.bf16 %v1460_v2, %v1459_v35 }
 0x184   :  { %v3546_v49 = vpop.eup %3545  ;;  %v1397_v37 = vadd.f32 1.0, %v3544_v53  ;;  %v4469_v53 = vsub.s32 4, %v3998_v10 }
 0x185   :  { %3324 = vmatmul.mubr.bf16.vlgmr.msra.gmra.mrb[64].mxu1 %v1478_v39  ;;  %v1398_v38 = vadd.f32 1.0, %v3546_v49  ;;  %3340 = vmatpush3.bf16.msra.mxu0 %v3467_v48 }
 0x186   :  { %v1429_v40 = vmul.f32 0.5, %v1397_v37  ;;  %v2280_v58 = vrot.slane %v4440_v26, %v4469_v53 }
 0x187   :  { %v1430_v42 = vmul.f32 0.5, %v1398_v38  ;;  %v4477_v38 = vsub.s32 5, %v3998_v10 }
 0x188   :  { %v1461_v54 = vmul.f32 %v1429_v40, %v4344_v23  ;;  %v3468_v23 = vld [vmem:[%s5233_s9 + $0x28] sm:$0xff]   ;;  %2282 = vbcast.lane.b32.xlu0 %v2280_v58, 256 }
 0x189   :  { %v1462_v43 = vmul.f32 %v1430_v42, %v4354_v6  ;;  %3341 = vmatprep.subr.bf16.mxu0 %v3468_v23 }
 0x18a   :  { %3342 = vmatpush3.bf16.msra.mxu0 %v3468_v23 }
 0x18b   :  { %v3548_v44 = vpop.eup %3547  ;;  %v1479_v8 = vpack.c.bf16 %v1462_v43, %v1461_v54  ;;  %3343 = vmatprep.subr.bf16.mxu0 %v3469_v11  ;;  %v4486_v54 = vsub.s32 7, %v3998_v10 }
 0x18c   :  { %v3550_v41 = vpop.eup %3549  ;;  %v1399_v63 = vadd.f32 1.0, %v3548_v44 }
 0x18d   :  { %3327 = vmatprep.mubr.bf16.mxu1 %v1479_v8  ;;  %v1400_v12 = vadd.f32 1.0, %v3550_v41  ;;  %v2287_v41 = vrot.slane %v4440_v26, %v4477_v38 }
 0x18e   :  { %v1431_v51 = vmul.f32 0.5, %v1399_v63  ;;  %3344 = vmatpush3.bf16.msra.mxu0 %v3469_v11  ;;  %v4498_v63 = vld [vmem:[%s5226_s2 + $0x8] sm:$0xff] }
 0x18f   :  { %v1432_v29 = vmul.f32 0.5, %v1400_v12  ;;  %3345 = vmatprep.subr.bf16.mxu0 %v3470_v28  ;;  %v2294_v12 = vrot.slane %v4440_v26, %v4483_v45  ;;  %2289 = vbcast.lane.b32.xlu1 %v2287_v41, 256 }
 0x190   :  { %v1463_v6 = vmul.f32 %v1431_v51, %v4368_v60 }
 0x191   :  { %v1464_v24 = vmul.f32 %v1432_v29, %v4370_v0  ;;  %2296 = vbcast.lane.b32.xlu0 %v2294_v12, 256 }
 0x192   :  { %3346 = vmatpush3.bf16.msra.mxu0 %v3470_v28 }
 0x193   :  { %v1480_v27 = vpack.c.bf16 %v1464_v24, %v1463_v6  ;;  %v2301_v6 = vrot.slane %v4440_v26, %v4486_v54 }
 0x195   :  { %3328 = vmatmul.mubr.bf16.gmra.mrb[68].mxu1 %v1480_v27  ;;  %2303 = vbcast.lane.b32.xlu1 %v2301_v6, 256 }
 0x1f8   :  { %v3301_v22 = vpop.f32.mrb[4].mxu0 }
 0x1f9   :  { %v4419_v34 = vadd.f32 %v3301_v22, %v4416_v21  ;;  %v1586_v55 = vpop.f32.mrb[5].mxu0  ;;  %v2308_v22 = vrot.slane %v4498_v63, %v4005_v17 }
 0x1fa   :  { %v4422_v33 = vadd.f32 %v4416_v21, %v1586_v55  ;;  %v3302_v60 = vpop.f32.mrb[6].mxu0 }
 0x1fb   :  { %v1715_v62 = vmul.f32 %v4419_v34, %v4419_v34  ;;  %v4427_v0 = vadd.f32 %v3302_v60, %v4416_v21  ;;  %v1589_v1 = vpop.f32.mrb[7].mxu0  ;;  %2310 = vbcast.lane.b32.xlu0 %v2308_v22, 256 }
 0x1fc   :  { %v1713_v36 = vmul.f32 %v4422_v33, %v4422_v33  ;;  %v4435_v47 = vadd.f32 %v4416_v21, %v1589_v1 }
 0x1fd   :  { %v1747_v5 = vmul.f32 %v1715_v62, %v4419_v34  ;;  %v1716_v7 = vmul.f32 %v4427_v0, %v4427_v0 }
 0x1fe   :  { %v1745_v9 = vmul.f32 %v1713_v36, %v4422_v33  ;;  %v1714_v52 = vmul.f32 %v4435_v47, %v4435_v47  ;;  %v2315_v36 = vrot.slane %v4498_v63, %v4446_v4 }
 0x1ff   :  { %v1779_v16 = vmul.f32 0.044715, %v1747_v5  ;;  %v1748_v19 = vmul.f32 %v1716_v7, %v4427_v0 }
 0x200   :  { %v1777_v20 = vmul.f32 0.044715, %v1745_v9  ;;  %v1746_v25 = vmul.f32 %v1714_v52, %v4435_v47  ;;  %2317 = vbcast.lane.b32.xlu1 %v2315_v36, 256 }
 0x201   :  { %v1811_v30 = vadd.f32 %v1779_v16, %v4419_v34  ;;  %v1780_v14 = vmul.f32 0.044715, %v1748_v19 }
 0x202   :  { %v1809_v56 = vadd.f32 %v1777_v20, %v4422_v33  ;;  %v1778_v59 = vmul.f32 0.044715, %v1746_v25  ;;  %v2322_v25 = vrot.slane %v4498_v63, %v4430_v3 }
 0x203   :  { %v1843_v15 = vmul.f32 0.7978846, %v1811_v30  ;;  %v1812_v46 = vadd.f32 %v1780_v14, %v4427_v0 }
 0x204   :  { %v1841_v31 = vmul.f32 0.7978846, %v1809_v56  ;;  %v1810_v57 = vadd.f32 %v1778_v59, %v4435_v47  ;;  %v2329_v59 = vrot.slane %v4498_v63, %v4443_v32  ;;  %2324 = vbcast.lane.b32.xlu0 %v2322_v25, 256 }
 0x205   :  { %3551 = vtanh.f32 %v1843_v15  ;;  %v1844_v35 = vmul.f32 0.7978846, %v1812_v46 }
 0x206   :  { %3553 = vtanh.f32 %v1841_v31  ;;  %v1842_v2 = vmul.f32 0.7978846, %v1810_v57  ;;  %2331 = vbcast.lane.b32.xlu1 %v2329_v59, 256 }
 0x207   :  { %3555 = vtanh.f32 %v1844_v35 }
 0x208   :  { %3557 = vtanh.f32 %v1842_v2 }
 0x20a   :  { %v3305_v39 = vpop.f32.mrb[8].mxu0 }
 0x20b   :  { %v4472_v49 = vadd.f32 %v3305_v39, %v4416_v21  ;;  %v1602_v37 = vpop.f32.mrb[9].mxu0 }
 0x20c   :  { %v4480_v40 = vadd.f32 %v4416_v21, %v1602_v37  ;;  %v3306_v42 = vpop.f32.mrb[10].mxu0 }
 0x20d   :  { %v1719_v43 = vmul.f32 %v4472_v49, %v4472_v49  ;;  %v4491_v44 = vadd.f32 %v3306_v42, %v4416_v21  ;;  %v1605_v8 = vpop.f32.mrb[11].mxu0 }
 0x20e   :  { %v1717_v10 = vmul.f32 %v4480_v40, %v4480_v40  ;;  %v4503_v48 = vadd.f32 %v4416_v21, %v1605_v8 }
 0x20f   :  { %v3552_v51 = vpop.eup %3551  ;;  %v1751_v29 = vmul.f32 %v1719_v43, %v4472_v49  ;;  %v1720_v23 = vmul.f32 %v4491_v44, %v4491_v44 }
 0x210   :  { %v3554_v24 = vpop.eup %3553  ;;  %v1907_v27 = vadd.f32 1.0, %v3552_v51  ;;  %v1749_v11 = vmul.f32 %v1717_v10, %v4480_v40  ;;  %v1718_v28 = vmul.f32 %v4503_v48, %v4503_v48 }
 0x211   :  { %v3556_v55 = vpop.eup %3555  ;;  %v1783_v60 = vmul.f32 0.044715, %v1751_v29  ;;  %v1752_v62 = vmul.f32 %v1720_v23, %v4491_v44  ;;  %v1905_v1 = vadd.f32 1.0, %v3554_v24  ;;  %v2350_v29 = vrot.slane %v4498_v63, %v4483_v45 }
 0x212   :  { %v3558_v26 = vpop.eup %3557  ;;  %v1939_v5 = vmul.f32 0.5, %v1907_v27  ;;  %v1908_v7 = vadd.f32 1.0, %v3556_v55  ;;  %v1781_v13 = vmul.f32 0.044715, %v1749_v11  ;;  %v1750_v18 = vmul.f32 %v1718_v28, %v4503_v48  ;;  %v4563_v28 = vld [vmem:[%s5226_s2 + $0x10] sm:$0xff] }
 0x213   :  { %v1815_v9 = vadd.f32 %v1783_v60, %v4472_v49  ;;  %v1784_v52 = vmul.f32 0.044715, %v1752_v62  ;;  %v1906_v16 = vadd.f32 1.0, %v3558_v26  ;;  %v1937_v19 = vmul.f32 0.5, %v1905_v1 }
 0x214   :  { %v1940_v50 = vmul.f32 0.5, %v1908_v7  ;;  %v1813_v61 = vadd.f32 %v1781_v13, %v4480_v40  ;;  %v1782_v20 = vmul.f32 0.044715, %v1750_v18  ;;  %v1971_v15 = vmul.f32 %v1939_v5, %v4419_v34 }
 0x215   :  { %v1847_v30 = vmul.f32 0.7978846, %v1815_v9  ;;  %v1816_v14 = vadd.f32 %v1784_v52, %v4491_v44  ;;  %v1938_v56 = vmul.f32 0.5, %v1906_v16  ;;  %v1969_v2 = vmul.f32 %v1937_v19, %v4422_v33 }
 0x216   :  { %v1972_v46 = vmul.f32 %v1940_v50, %v4427_v0  ;;  %v1845_v31 = vmul.f32 0.7978846, %v1813_v61  ;;  %v1814_v57 = vadd.f32 %v1782_v20, %v4503_v48  ;;  %v2336_v34 = vrot.slane %v4498_v63, %v4469_v53 }
 0x217   :  { %3559 = vtanh.f32 %v1847_v30  ;;  %v1848_v35 = vmul.f32 0.7978846, %v1816_v14  ;;  %v1970_v39 = vmul.f32 %v1938_v56, %v4435_v47  ;;  %v2343_v33 = vrot.slane %v4498_v63, %v4477_v38 }
 0x218   :  { %v2002_v37 = vpack.c.bf16 %v1972_v46, %v1971_v15  ;;  %3561 = vtanh.f32 %v1845_v31  ;;  %v1846_v58 = vmul.f32 0.7978846, %v1814_v57  ;;  %2338 = vbcast.lane.b32.xlu0 %v2336_v34, 256  ;;  %v2357_v11 = vrot.slane %v4498_v63, %v4486_v54 }
 0x219   :  { %3563 = vtanh.f32 %v1848_v35  ;;  %v2001_v42 = vpack.c.bf16 %v1970_v39, %v1969_v2  ;;  %2345 = vbcast.lane.b32.xlu1 %v2343_v33, 256  ;;  %v2364_v36 = vrot.slane %v4563_v28, %v4005_v17  ;;  %v2371_v13 = vrot.slane %v4563_v28, %v4446_v4 }
 0x21a   :  { %3565 = vtanh.f32 %v1846_v58  ;;  %v3309_v0 = vpop.f32.mrb[12].mxu0  ;;  %v2378_v19 = vrot.slane %v4563_v28, %v4430_v3  ;;  %v2385_v39 = vrot.slane %v4563_v28, %v4443_v32 }
 0x21b   :  { %v4536_v43 = vadd.f32 %v3309_v0, %v4416_v21  ;;  %v1618_v8 = vpop.f32.mrb[13].mxu0  ;;  %3347 = vmatprep.mubr.bf16.mxu0 %v2001_v42 }
 0x21c   :  { %v4541_v47 = vadd.f32 %v4416_v21, %v1618_v8  ;;  %v3310_v41 = vpop.f32.mrb[14].mxu0  ;;  %3348 = vmatmul.mubr.bf16.vlgmr.msra.gmra.mrb[28].mxu0 %v2002_v37  ;;  %2352 = vbcast.lane.b32.xlu0 %v2350_v29, 256  ;;  %v2392_v8 = vrot.slane %v4563_v28, %v4469_v53 }
 0x21d   :  { %v1723_v10 = vmul.f32 %v4536_v43, %v4536_v43  ;;  %v4546_v12 = vadd.f32 %v3310_v41, %v4416_v21  ;;  %v1621_v51 = vpop.f32.mrb[15].mxu0  ;;  %2359 = vbcast.lane.b32.xlu1 %v2357_v11, 256 }
 0x21e   :  { %v1721_v23 = vmul.f32 %v4541_v47, %v4541_v47  ;;  %v4553_v6 = vadd.f32 %v4416_v21, %v1621_v51 }
 0x21f   :  { %v1755_v24 = vmul.f32 %v1723_v10, %v4536_v43  ;;  %v1724_v27 = vmul.f32 %v4546_v12, %v4546_v12 }
 0x220   :  { %v1753_v22 = vmul.f32 %v1721_v23, %v4541_v47  ;;  %v1722_v55 = vmul.f32 %v4553_v6, %v4553_v6  ;;  %2366 = vbcast.lane.b32.xlu0 %v2364_v36, 256 }
 0x221   :  { %v3560_v60 = vpop.eup %3559  ;;  %v1787_v62 = vmul.f32 0.044715, %v1755_v24  ;;  %v1756_v1 = vmul.f32 %v1724_v27, %v4546_v12  ;;  %2373 = vbcast.lane.b32.xlu1 %v2371_v13, 256  ;;  %v2406_v27 = vrot.slane %v4563_v28, %v4483_v45 }
 0x222   :  { %v3562_v26 = vpop.eup %3561  ;;  %v1785_v63 = vmul.f32 0.044715, %v1753_v22  ;;  %v1754_v5 = vmul.f32 %v1722_v55, %v4553_v6  ;;  %v1911_v7 = vadd.f32 1.0, %v3560_v60 }
 0x223   :  { %v3564_v18 = vpop.eup %3563  ;;  %v1819_v9 = vadd.f32 %v1787_v62, %v4536_v43  ;;  %v1788_v52 = vmul.f32 0.044715, %v1756_v1  ;;  %v1909_v16 = vadd.f32 1.0, %v3562_v26  ;;  %v2413_v62 = vrot.slane %v4563_v28, %v4486_v54  ;;  %v4616_v1 = vld [vmem:[%s5226_s2 + $0x18] sm:$0xff] }
 0x224   :  { %v3566_v50 = vpop.eup %3565  ;;  %v1817_v61 = vadd.f32 %v1785_v63, %v4541_v47  ;;  %v1786_v20 = vmul.f32 0.044715, %v1754_v5  ;;  %v1912_v25 = vadd.f32 1.0, %v3564_v18  ;;  %v1943_v30 = vmul.f32 0.5, %v1911_v7  ;;  %2380 = vbcast.lane.b32.xlu0 %v2378_v19, 256 }
 0x225   :  { %v1851_v14 = vmul.f32 0.7978846, %v1819_v9  ;;  %v1820_v56 = vadd.f32 %v1788_v52, %v4546_v12  ;;  %v1910_v59 = vadd.f32 1.0, %v3566_v50  ;;  %v1941_v15 = vmul.f32 0.5, %v1909_v16  ;;  %2387 = vbcast.lane.b32.xlu1 %v2385_v39, 256 }
 0x226   :  { %v1849_v46 = vmul.f32 0.7978846, %v1817_v61  ;;  %v1818_v31 = vadd.f32 %v1786_v20, %v4553_v6  ;;  %v1944_v57 = vmul.f32 0.5, %v1912_v25  ;;  %v1975_v58 = vmul.f32 %v1943_v30, %v4472_v49 }
 0x227   :  { %3567 = vtanh.f32 %v1851_v14  ;;  %v1852_v35 = vmul.f32 0.7978846, %v1820_v56  ;;  %v1942_v2 = vmul.f32 0.5, %v1910_v59  ;;  %v1973_v34 = vmul.f32 %v1941_v15, %v4480_v40 }
 0x228   :  { %3569 = vtanh.f32 %v1849_v46  ;;  %v1850_v37 = vmul.f32 0.7978846, %v1818_v31  ;;  %v1976_v42 = vmul.f32 %v1944_v57, %v4491_v44  ;;  %v2399_v49 = vrot.slane %v4563_v28, %v4477_v38  ;;  %2394 = vbcast.lane.b32.xlu0 %v2392_v8, 256 }
 0x229   :  { %3571 = vtanh.f32 %v1852_v35  ;;  %v1974_v0 = vmul.f32 %v1942_v2, %v4503_v48  ;;  %v2420_v13 = vrot.slane %v4616_v1, %v4005_v17  ;;  %v2427_v16 = vrot.slane %v4616_v1, %v4446_v4 }
 0x22a   :  { %3573 = vtanh.f32 %v1850_v37  ;;  %v3313_v33 = vpop.f32.mrb[16].mxu0  ;;  %v2004_v41 = vpack.c.bf16 %v1976_v42, %v1975_v58  ;;  %2401 = vbcast.lane.b32.xlu1 %v2399_v49, 256  ;;  %v2434_v25 = vrot.slane %v4616_v1, %v4430_v3  ;;  %v2441_v3 = vrot.slane %v4616_v1, %v4443_v32 }
 0x22b   :  { %v4589_v10 = vadd.f32 %v3313_v33, %v4416_v21  ;;  %v1634_v51 = vpop.f32.mrb[17].mxu0  ;;  %v2003_v29 = vpack.c.bf16 %v1974_v0, %v1973_v34  ;;  %v2448_v33 = vrot.slane %v4616_v1, %v4469_v53 }
 0x22c   :  { %v4594_v40 = vadd.f32 %v4416_v21, %v1634_v51  ;;  %v3314_v44 = vpop.f32.mrb[18].mxu0  ;;  %2408 = vbcast.lane.b32.xlu0 %v2406_v27, 256 }
 0x22d   :  { %v1727_v48 = vmul.f32 %v4589_v10, %v4589_v10  ;;  %v4599_v23 = vadd.f32 %v3314_v44, %v4416_v21  ;;  %v1637_v24 = vpop.f32.mrb[19].mxu0  ;;  %3351 = vmatprep.mubr.bf16.mxu0 %v2003_v29 }
 0x22e   :  { %v1725_v11 = vmul.f32 %v4594_v40, %v4594_v40  ;;  %v4606_v22 = vadd.f32 %v4416_v21, %v1637_v24  ;;  %3352 = vmatmul.mubr.bf16.gmra.mrb[32].mxu0 %v2004_v41  ;;  %2415 = vbcast.lane.b32.xlu1 %v2413_v62, 256 }
 0x22f   :  { %v1759_v55 = vmul.f32 %v1727_v48, %v4589_v10  ;;  %v1728_v60 = vmul.f32 %v4599_v23, %v4599_v23  ;;  %v2462_v48 = vrot.slane %v4616_v1, %v4483_v45 }
 0x230   :  { %v1757_v36 = vmul.f32 %v1725_v11, %v4594_v40  ;;  %v1726_v26 = vmul.f32 %v4606_v22, %v4606_v22  ;;  %2422 = vbcast.lane.b32.xlu0 %v2420_v13, 256 }
 0x231   :  { %v3568_v63 = vpop.eup %3567  ;;  %v1791_v5 = vmul.f32 0.044715, %v1759_v55  ;;  %v1760_v7 = vmul.f32 %v1728_v60, %v4599_v23  ;;  %v2469_v55 = vrot.slane %v4616_v1, %v4486_v54 }
 0x232   :  { %v3570_v18 = vpop.eup %3569  ;;  %v1789_v28 = vmul.f32 0.044715, %v1757_v36  ;;  %v1758_v9 = vmul.f32 %v1726_v26, %v4606_v22  ;;  %v1915_v52 = vadd.f32 1.0, %v3568_v63  ;;  %2429 = vbcast.lane.b32.xlu1 %v2427_v16, 256 }
 0x233   :  { %v3572_v19 = vpop.eup %3571  ;;  %v1823_v50 = vadd.f32 %v1791_v5, %v4589_v10  ;;  %v1792_v61 = vmul.f32 0.044715, %v1760_v7  ;;  %v1913_v20 = vadd.f32 1.0, %v3570_v18 }
 0x234   :  { %v3574_v30 = vpop.eup %3573  ;;  %v1821_v17 = vadd.f32 %v1789_v28, %v4594_v40  ;;  %v1790_v14 = vmul.f32 0.044715, %v1758_v9  ;;  %v1916_v56 = vadd.f32 1.0, %v3572_v19  ;;  %v1947_v59 = vmul.f32 0.5, %v1915_v52  ;;  %2436 = vbcast.lane.b32.xlu0 %v2434_v25, 256 }
 0x235   :  { %v1855_v15 = vmul.f32 0.7978846, %v1823_v50  ;;  %v1824_v46 = vadd.f32 %v1792_v61, %v4599_v23  ;;  %v1914_v31 = vadd.f32 1.0, %v3574_v30  ;;  %v1945_v4 = vmul.f32 0.5, %v1913_v20 }
 0x236   :  { %v1853_v57 = vmul.f32 0.7978846, %v1821_v17  ;;  %v1822_v35 = vadd.f32 %v1790_v14, %v4606_v22  ;;  %v1948_v2 = vmul.f32 0.5, %v1916_v56  ;;  %v1979_v42 = vmul.f32 %v1947_v59, %v4536_v43  ;;  %2443 = vbcast.lane.b32.xlu1 %v2441_v3, 256 }
 0x237   :  { %3575 = vtanh.f32 %v1855_v15  ;;  %v1856_v39 = vmul.f32 0.7978846, %v1824_v46  ;;  %v1946_v37 = vmul.f32 0.5, %v1914_v31  ;;  %v1977_v0 = vmul.f32 %v1945_v4, %v4541_v47 }
 0x238   :  { %3577 = vtanh.f32 %v1853_v57  ;;  %v1854_v58 = vmul.f32 0.7978846, %v1822_v35  ;;  %v1980_v34 = vmul.f32 %v1948_v2, %v4546_v12  ;;  %v2455_v43 = vrot.slane %v4616_v1, %v4477_v38  ;;  %2450 = vbcast.lane.b32.xlu0 %v2448_v33, 256 }
 0x239   :  { %3579 = vtanh.f32 %v1856_v39  ;;  %v1978_v8 = vmul.f32 %v1946_v37, %v4553_v6 }
 0x23a   :  { %3581 = vtanh.f32 %v1854_v58  ;;  %v3317_v41 = vpop.f32.mrb[20].mxu0  ;;  %v2006_v51 = vpack.c.bf16 %v1980_v34, %v1979_v42  ;;  %2457 = vbcast.lane.b32.xlu1 %v2455_v43, 256 }
 0x23b   :  { %v4642_v32 = vadd.f32 %v3317_v41, %v4416_v21  ;;  %v1650_v29 = vpop.f32.mrb[21].mxu0  ;;  %v2005_v49 = vpack.c.bf16 %v1978_v8, %v1977_v0 }
 0x23c   :  { %v4647_v47 = vadd.f32 %v4416_v21, %v1650_v29  ;;  %v3318_v12 = vpop.f32.mrb[22].mxu0  ;;  %2464 = vbcast.lane.b32.xlu0 %v2462_v48, 256 }
 0x23d   :  { %v1731_v6 = vmul.f32 %v4642_v32, %v4642_v32  ;;  %v4652_v53 = vadd.f32 %v3318_v12, %v4416_v21  ;;  %v1653_v44 = vpop.f32.mrb[23].mxu0  ;;  %3355 = vmatprep.mubr.bf16.mxu0 %v2005_v49 }
 0x23e   :  { %v1729_v24 = vmul.f32 %v4647_v47, %v4647_v47  ;;  %v4659_v38 = vadd.f32 %v4416_v21, %v1653_v44  ;;  %3356 = vmatmul.mubr.bf16.gmra.mrb[36].mxu0 %v2006_v51  ;;  %2471 = vbcast.lane.b32.xlu1 %v2469_v55, 256 }
 0x23f   :  { %v1763_v27 = vmul.f32 %v1731_v6, %v4642_v32  ;;  %v1732_v11 = vmul.f32 %v4652_v53, %v4652_v53 }
 0x240   :  { %v1761_v60 = vmul.f32 %v1729_v24, %v4647_v47  ;;  %v1730_v45 = vmul.f32 %v4659_v38, %v4659_v38 }
 0x241   :  { %v3576_v62 = vpop.eup %3575  ;;  %v1795_v36 = vmul.f32 0.044715, %v1763_v27  ;;  %v1764_v26 = vmul.f32 %v1732_v11, %v4652_v53 }
 0x242   :  { %v3578_v63 = vpop.eup %3577  ;;  %v1793_v5 = vmul.f32 0.044715, %v1761_v60  ;;  %v1762_v7 = vmul.f32 %v1730_v45, %v4659_v38  ;;  %v1919_v13 = vadd.f32 1.0, %v3576_v62 }
 0x243   :  { %v3580_v18 = vpop.eup %3579  ;;  %v1827_v28 = vadd.f32 %v1795_v36, %v4642_v32  ;;  %v1796_v9 = vmul.f32 0.044715, %v1764_v26  ;;  %v1917_v54 = vadd.f32 1.0, %v3578_v63 }
 0x244   :  { %v3582_v1 = vpop.eup %3581  ;;  %v1825_v52 = vadd.f32 %v1793_v5, %v4647_v47  ;;  %v1794_v16 = vmul.f32 0.044715, %v1762_v7  ;;  %v1920_v19 = vadd.f32 1.0, %v3580_v18  ;;  %v1951_v50 = vmul.f32 0.5, %v1919_v13 }
 0x245   :  { %v1859_v61 = vmul.f32 0.7978846, %v1827_v28  ;;  %v1828_v20 = vadd.f32 %v1796_v9, %v4652_v53  ;;  %v1918_v25 = vadd.f32 1.0, %v3582_v1  ;;  %v1949_v30 = vmul.f32 0.5, %v1917_v54 }
 0x246   :  { %v1857_v17 = vmul.f32 0.7978846, %v1825_v52  ;;  %v1826_v14 = vadd.f32 %v1794_v16, %v4659_v38  ;;  %v1952_v56 = vmul.f32 0.5, %v1920_v19  ;;  %v1983_v31 = vmul.f32 %v1951_v50, %v4589_v10 }
 0x247   :  { %3583 = vtanh.f32 %v1859_v61  ;;  %v1860_v59 = vmul.f32 0.7978846, %v1828_v20  ;;  %v1950_v15 = vmul.f32 0.5, %v1918_v25  ;;  %v1981_v57 = vmul.f32 %v1949_v30, %v4594_v40 }
 0x248   :  { %3585 = vtanh.f32 %v1857_v17  ;;  %v1858_v46 = vmul.f32 0.7978846, %v1826_v14  ;;  %v1984_v4 = vmul.f32 %v1952_v56, %v4599_v23 }
 0x249   :  { %3587 = vtanh.f32 %v1860_v59  ;;  %v1982_v35 = vmul.f32 %v1950_v15, %v4606_v22 }
 0x24a   :  { %3589 = vtanh.f32 %v1858_v46  ;;  %v3321_v2 = vpop.f32.mrb[24].mxu0  ;;  %v2008_v39 = vpack.c.bf16 %v1984_v4, %v1983_v31 }
 0x24b   :  { %v4680_v37 = vadd.f32 %v3321_v2, %v4416_v21  ;;  %v1666_v3 = vpop.f32.mrb[25].mxu0  ;;  %v2007_v58 = vpack.c.bf16 %v1982_v35, %v1981_v57 }
 0x24c   :  { %v4683_v42 = vadd.f32 %v4416_v21, %v1666_v3  ;;  %v3322_v34 = vpop.f32.mrb[26].mxu0 }
 0x24d   :  { %v1735_v10 = vmul.f32 %v4680_v37, %v4680_v37  ;;  %v4688_v23 = vadd.f32 %v3322_v34, %v4416_v21  ;;  %v1669_v40 = vpop.f32.mrb[27].mxu0  ;;  %3359 = vmatprep.mubr.bf16.mxu0 %v2007_v58 }
 0x24e   :  { %v1733_v22 = vmul.f32 %v4683_v42, %v4683_v42  ;;  %v4693_v0 = vadd.f32 %v4416_v21, %v1669_v40  ;;  %3360 = vmatmul.mubr.bf16.gmra.mrb[40].mxu0 %v2008_v39 }
 0x24f   :  { %v1767_v8 = vmul.f32 %v1735_v10, %v4680_v37  ;;  %v1736_v33 = vmul.f32 %v4688_v23, %v4688_v23 }
 0x250   :  { %v1765_v41 = vmul.f32 %v1733_v22, %v4683_v42  ;;  %v1734_v51 = vmul.f32 %v4693_v0, %v4693_v0 }
 0x251   :  { %v3584_v29 = vpop.eup %3583  ;;  %v1799_v49 = vmul.f32 0.044715, %v1767_v8  ;;  %v1768_v43 = vmul.f32 %v1736_v33, %v4688_v23 }
 0x252   :  { %v3586_v12 = vpop.eup %3585  ;;  %v1797_v6 = vmul.f32 0.044715, %v1765_v41  ;;  %v1766_v44 = vmul.f32 %v1734_v51, %v4693_v0  ;;  %v1923_v48 = vadd.f32 1.0, %v3584_v29 }
 0x253   :  { %v3588_v24 = vpop.eup %3587  ;;  %v1831_v27 = vadd.f32 %v1799_v49, %v4680_v37  ;;  %v1800_v11 = vmul.f32 0.044715, %v1768_v43  ;;  %v1921_v55 = vadd.f32 1.0, %v3586_v12 }
 0x254   :  { %v3590_v60 = vpop.eup %3589  ;;  %v1829_v45 = vadd.f32 %v1797_v6, %v4683_v42  ;;  %v1798_v62 = vmul.f32 0.044715, %v1766_v44  ;;  %v1924_v36 = vadd.f32 1.0, %v3588_v24  ;;  %v1955_v26 = vmul.f32 0.5, %v1923_v48 }
 0x255   :  { %v1863_v63 = vmul.f32 0.7978846, %v1831_v27  ;;  %v1832_v5 = vadd.f32 %v1800_v11, %v4688_v23  ;;  %v1922_v7 = vadd.f32 1.0, %v3590_v60  ;;  %v1953_v13 = vmul.f32 0.5, %v1921_v55 }
 0x256   :  { %v1861_v18 = vmul.f32 0.7978846, %v1829_v45  ;;  %v1830_v28 = vadd.f32 %v1798_v62, %v4693_v0  ;;  %v1956_v9 = vmul.f32 0.5, %v1924_v36  ;;  %v1987_v19 = vmul.f32 %v1955_v26, %v4642_v32 }
 0x257   :  { %3591 = vtanh.f32 %v1863_v63  ;;  %v1864_v54 = vmul.f32 0.7978846, %v1832_v5  ;;  %v1954_v1 = vmul.f32 0.5, %v1922_v7  ;;  %v1985_v25 = vmul.f32 %v1953_v13, %v4647_v47 }
 0x258   :  { %3593 = vtanh.f32 %v1861_v18  ;;  %v1862_v52 = vmul.f32 0.7978846, %v1830_v28  ;;  %v3325_v16 = vpop.f32.mrb[64].mxu1  ;;  %v1988_v50 = vmul.f32 %v1956_v9, %v4652_v53 }
 0x259   :  { %3595 = vtanh.f32 %v1864_v54  ;;  %v4710_v61 = vadd.f32 %v3325_v16, %v4416_v21  ;;  %v1682_v20 = vpop.f32.mrb[65].mxu1  ;;  %v1986_v30 = vmul.f32 %v1954_v1, %v4659_v38 }
 0x25a   :  { %3597 = vtanh.f32 %v1862_v52  ;;  %v4715_v17 = vadd.f32 %v4416_v21, %v1682_v20  ;;  %v3326_v14 = vpop.f32.mrb[66].mxu1  ;;  %v2010_v56 = vpack.c.bf16 %v1988_v50, %v1987_v19 }
 0x25b   :  { %v1739_v32 = vmul.f32 %v4710_v61, %v4710_v61  ;;  %v4720_v53 = vadd.f32 %v3326_v14, %v4416_v21  ;;  %v1685_v59 = vpop.f32.mrb[67].mxu1  ;;  %v2009_v15 = vpack.c.bf16 %v1986_v30, %v1985_v25 }
 0x25c   :  { %v1737_v46 = vmul.f32 %v4715_v17, %v4715_v17  ;;  %v4725_v47 = vadd.f32 %v4416_v21, %v1685_v59 }
 0x25d   :  { %v1771_v38 = vmul.f32 %v1739_v32, %v4710_v61  ;;  %v1740_v31 = vmul.f32 %v4720_v53, %v4720_v53  ;;  %3363 = vmatprep.mubr.bf16.mxu0 %v2009_v15 }
 0x25e   :  { %v1769_v4 = vmul.f32 %v1737_v46, %v4715_v17  ;;  %v1738_v57 = vmul.f32 %v4725_v47, %v4725_v47  ;;  %3364 = vmatmul.mubr.bf16.gmra.mrb[44].mxu0 %v2010_v56 }
 0x25f   :  { %v1803_v35 = vmul.f32 0.044715, %v1771_v38  ;;  %v1772_v2 = vmul.f32 %v1740_v31, %v4720_v53 }
 0x260   :  { %v1801_v39 = vmul.f32 0.044715, %v1769_v4  ;;  %v1770_v3 = vmul.f32 %v1738_v57, %v4725_v47 }
 0x261   :  { %v3592_v58 = vpop.eup %3591  ;;  %v1835_v34 = vadd.f32 %v1803_v35, %v4710_v61  ;;  %v1804_v10 = vmul.f32 0.044715, %v1772_v2 }
 0x262   :  { %v3594_v40 = vpop.eup %3593  ;;  %v1833_v22 = vadd.f32 %v1801_v39, %v4715_v17  ;;  %v1802_v8 = vmul.f32 0.044715, %v1770_v3  ;;  %v1927_v33 = vadd.f32 1.0, %v3592_v58 }
 0x263   :  { %v3596_v41 = vpop.eup %3595  ;;  %v1867_v51 = vmul.f32 0.7978846, %v1835_v34  ;;  %v1836_v29 = vadd.f32 %v1804_v10, %v4720_v53  ;;  %v1925_v49 = vadd.f32 1.0, %v3594_v40 }
 0x264   :  { %v3598_v43 = vpop.eup %3597  ;;  %v1865_v12 = vmul.f32 0.7978846, %v1833_v22  ;;  %v1834_v6 = vadd.f32 %v1802_v8, %v4725_v47  ;;  %v1928_v44 = vadd.f32 1.0, %v3596_v41  ;;  %v1959_v48 = vmul.f32 0.5, %v1927_v33 }
 0x265   :  { %3599 = vtanh.f32 %v1867_v51  ;;  %v1868_v24 = vmul.f32 0.7978846, %v1836_v29  ;;  %v1926_v27 = vadd.f32 1.0, %v3598_v43  ;;  %v1957_v11 = vmul.f32 0.5, %v1925_v49 }
 0x266   :  { %3601 = vtanh.f32 %v1865_v12  ;;  %v1866_v55 = vmul.f32 0.7978846, %v1834_v6  ;;  %v1960_v60 = vmul.f32 0.5, %v1928_v44  ;;  %v1991_v36 = vmul.f32 %v1959_v48, %v4680_v37 }
 0x267   :  { %3603 = vtanh.f32 %v1868_v24  ;;  %v1958_v45 = vmul.f32 0.5, %v1926_v27  ;;  %v1989_v7 = vmul.f32 %v1957_v11, %v4683_v42 }
 0x268   :  { %3605 = vtanh.f32 %v1866_v55  ;;  %v3329_v62 = vpop.f32.mrb[68].mxu1  ;;  %v1992_v26 = vmul.f32 %v1960_v60, %v4688_v23 }
 0x269   :  { %v4742_v63 = vadd.f32 %v3329_v62, %v4416_v21  ;;  %v1698_v5 = vpop.f32.mrb[69].mxu1  ;;  %v1990_v13 = vmul.f32 %v1958_v45, %v4693_v0 }
 0x26a   :  { %v4747_v18 = vadd.f32 %v4416_v21, %v1698_v5  ;;  %v3330_v28 = vpop.f32.mrb[70].mxu1  ;;  %v2012_v9 = vpack.c.bf16 %v1992_v26, %v1991_v36 }
 0x26b   :  { %v1743_v54 = vmul.f32 %v4742_v63, %v4742_v63  ;;  %v1710_v37 = vadd.f32 %v3330_v28, %v4416_v21  ;;  %v1701_v1 = vpop.f32.mrb[71].mxu1  ;;  %v2011_v23 = vpack.c.bf16 %v1990_v13, %v1989_v7  ;;  %v2255_v28 = vpop.permute.xlu0 %2254 }
 0x26c   :  { %v1741_v52 = vmul.f32 %v4747_v18, %v4747_v18  ;;  %v1702_v16 = vadd.f32 %v4416_v21, %v1701_v1  ;;  %v2269_v1 = vpop.permute.xlu1 %2268 }
 0x26d   :  { %v1775_v42 = vmul.f32 %v1743_v54, %v4742_v63  ;;  %v1744_v0 = vmul.f32 %v1710_v37, %v1710_v37  ;;  %3367 = vmatprep.mubr.bf16.mxu0 %v2011_v23 }
 0x26e   :  { %v1773_v19 = vmul.f32 %v1741_v52, %v4747_v18  ;;  %v1742_v50 = vmul.f32 %v1702_v16, %v1702_v16  ;;  %3368 = vmatmul.mubr.bf16.gmra.mrb[48].mxu0 %v2012_v9  ;;  %v4768_v9 = vld [vmem:[%s5234_s10] ss:$0 sm:$0xff] }
 0x26f   :  { %v3600_v20 = vpop.eup %3599  ;;  %v1807_v25 = vmul.f32 0.044715, %v1775_v42  ;;  %v1776_v30 = vmul.f32 %v1744_v0, %v1710_v37 }
 0x270   :  { %v3602_v14 = vpop.eup %3601  ;;  %v1805_v56 = vmul.f32 0.044715, %v1773_v19  ;;  %v1774_v32 = vmul.f32 %v1742_v50, %v1702_v16  ;;  %v1931_v59 = vadd.f32 1.0, %v3600_v20  ;;  %v2262_v20 = vpop.permute.xlu0 %2261 }
 0x271   :  { %v3604_v15 = vpop.eup %3603  ;;  %v1839_v46 = vadd.f32 %v1807_v25, %v4742_v63  ;;  %v1808_v38 = vmul.f32 0.044715, %v1776_v30  ;;  %v1929_v21 = vadd.f32 1.0, %v3602_v14 }
 0x272   :  { %v3606_v31 = vpop.eup %3605  ;;  %v1837_v4 = vadd.f32 %v1805_v56, %v4747_v18  ;;  %v1806_v57 = vmul.f32 0.044715, %v1774_v32  ;;  %v1932_v35 = vadd.f32 1.0, %v3604_v15  ;;  %v1963_v2 = vmul.f32 0.5, %v1931_v59  ;;  %v2276_v59 = vpop.permute.xlu1 %2275 }
 0x273   :  { %v1871_v39 = vmul.f32 0.7978846, %v1839_v46  ;;  %v1840_v3 = vadd.f32 %v1808_v38, %v1710_v37  ;;  %v1930_v58 = vadd.f32 1.0, %v3606_v31  ;;  %v1961_v34 = vmul.f32 0.5, %v1929_v21 }
 0x274   :  { %v1869_v10 = vmul.f32 0.7978846, %v1837_v4  ;;  %v1838_v40 = vadd.f32 %v1806_v57, %v1702_v16  ;;  %v1964_v22 = vmul.f32 0.5, %v1932_v35  ;;  %v1995_v51 = vmul.f32 %v1963_v2, %v4710_v61  ;;  %v2283_v4 = vpop.permute.xlu0 %2282 }
 0x275   :  { %3607 = vtanh.f32 %v1871_v39  ;;  %v1872_v8 = vmul.f32 0.7978846, %v1840_v3  ;;  %v1962_v33 = vmul.f32 0.5, %v1930_v58  ;;  %v1993_v49 = vmul.f32 %v1961_v34, %v4715_v17  ;;  %v3682_v34 = vld [vmem:[%s5225_s1 + $0x18] sm:$0xff]  }
 0x276   :  { %3609 = vtanh.f32 %v1869_v10  ;;  %v1870_v41 = vmul.f32 0.7978846, %v1838_v40  ;;  %v1996_v29 = vmul.f32 %v1964_v22, %v4720_v53  ;;  %v2290_v35 = vpop.permute.xlu1 %2289  ;;  %v88_v10 = vunpack.c.l.bf16 %v3682_v34 }
 0x277   :  { %3611 = vtanh.f32 %v1872_v8  ;;  %v1994_v43 = vmul.f32 %v1962_v33, %v4725_v47 }
 0x278   :  { %3613 = vtanh.f32 %v1870_v41  ;;  %v2014_v12 = vpack.c.bf16 %v1996_v29, %v1995_v51  ;;  %v2297_v39 = vpop.permute.xlu0 %2296  ;;  %v89_v29 = vunpack.c.h.bf16 %v3682_v34 }
 0x279   :  { %v2013_v6 = vpack.c.bf16 %v1994_v43, %v1993_v49 }
 0x27a   :  { %v2304_v8 = vpop.permute.xlu1 %2303 }
 0x27b   :  { %3371 = vmatprep.mubr.bf16.mxu0 %v2013_v6 }
 0x27c   :  { %3372 = vmatmul.mubr.bf16.gmra.mrb[52].mxu0 %v2014_v12 }
 0x27f   :  { %v3608_v44 = vpop.eup %3607 }
 0x280   :  { %v3610_v48 = vpop.eup %3609  ;;  %v1935_v24 = vadd.f32 1.0, %v3608_v44  ;;  %v3683_v44 = vld [vmem:[%s5225_s1 + $0x10] sm:$0xff]  }
 0x281   :  { %v3612_v27 = vpop.eup %3611  ;;  %v1933_v11 = vadd.f32 1.0, %v3610_v48  ;;  %v86_v48 = vunpack.c.l.bf16 %v3683_v44 }
 0x282   :  { %v3614_v55 = vpop.eup %3613  ;;  %v1936_v60 = vadd.f32 1.0, %v3612_v27  ;;  %v1967_v61 = vmul.f32 0.5, %v1935_v24 }
 0x283   :  { %v1934_v45 = vadd.f32 1.0, %v3614_v55  ;;  %v1965_v53 = vmul.f32 0.5, %v1933_v11  ;;  %v87_v11 = vunpack.c.h.bf16 %v3683_v44 }
 0x284   :  { %v1968_v62 = vmul.f32 0.5, %v1936_v60  ;;  %v1999_v17 = vmul.f32 %v1967_v61, %v4742_v63  ;;  %v3680_v63 = vld [vmem:[%s5225_s1 + $0x8] sm:$0xff]   ;;  %v2311_v60 = vpop.permute.xlu0 %2310 }
 0x285   :  { %v1966_v36 = vmul.f32 0.5, %v1934_v45  ;;  %v1997_v26 = vmul.f32 %v1965_v53, %v4747_v18  ;;  %v84_v18 = vunpack.c.l.bf16 %v3680_v63  ;;  %v85_v31 = vunpack.c.h.bf16 %v3680_v63  ;;  %v2318_v45 = vpop.permute.xlu1 %2317 }
 0x286   :  { %v2000_v47 = vmul.f32 %v1968_v62, %v1710_v37  ;;  %v3681_v37 = vld [vmem:[%s5225_s1] sm:$0xff]  }
 0x287   :  { %v1998_v5 = vmul.f32 %v1966_v36, %v1702_v16  ;;  %v82_v16 = vunpack.c.l.bf16 %v3681_v37  ;;  %v83_v25 = vunpack.c.h.bf16 %v3681_v37 }
 0x288   :  { %v2016_v7 = vpack.c.bf16 %v2000_v47, %v1999_v17  ;;  %v2325_v62 = vpop.permute.xlu0 %2324  ;;  %v3684_v47 = vld [vmem:[%s5225_s1 + $0x28] sm:$0xff]  }
 0x289   :  { %v2015_v13 = vpack.c.bf16 %v1998_v5, %v1997_v26  ;;  %v92_v26 = vunpack.c.l.bf16 %v3684_v47 }
 0x28b   :  { %3375 = vmatprep.mubr.bf16.mxu0 %v2015_v13  ;;  %v2332_v13 = vpop.permute.xlu1 %2331 }
 0x28c   :  { %3376 = vmatmul.mubr.bf16.gmra.mrb[56].mxu0 %v2016_v7 }
 0x2ef   :  { %v3349_v54 = vpop.f32.mrb[28].mxu0 }
 0x2f0   :  { %v2131_v23 = vadd.f32 %v3349_v54, %v4768_v9  ;;  %v2122_v52 = vpop.f32.mrb[29].mxu0 }
 0x2f1   :  { %v2123_v42 = vadd.f32 %v4768_v9, %v2122_v52  ;;  %v3350_v0 = vpop.f32.mrb[30].mxu0 }
 0x2f2   :  { %v2475_v19 = vmul.f32 %v2269_v1, %v2131_v23  ;;  %v2125_v50 = vpop.f32.mrb[31].mxu0  ;;  %v2134_v56 = vadd.f32 %v3350_v0, %v4768_v9  ;;  %v93_v23 = vunpack.c.h.bf16 %v3684_v47 }
 0x2f3   :  { %v2473_v30 = vmul.f32 %v2255_v28, %v2123_v42  ;;  %v2126_v14 = vadd.f32 %v4768_v9, %v2125_v50 }
 0x2f4   :  { %v4780_v32 = vadd.f32 %v2475_v19, %v84_v18  ;;  %v2476_v21 = vmul.f32 %v2276_v59, %v2134_v56 }
 0x2f5   :  { %v2474_v15 = vmul.f32 %v2262_v20, %v2126_v14  ;;  %v4782_v46 = vadd.f32 %v2473_v30, %v82_v16  ;;  %v3685_v16 = vld [vmem:[%s5225_s1 + $0x20] sm:$0xff]   ;;  %v2346_v14 = vpop.permute.xlu1 %2345 }
 0x2f6   :  { %2543 = vadd.xlane.f32.xlu0 %v4780_v32  ;;  %v4789_v57 = vadd.f32 %v2476_v21, %v85_v31  ;;  %v90_v42 = vunpack.c.l.bf16 %v3685_v16  ;;  %v91_v50 = vunpack.c.h.bf16 %v3685_v16  ;;  %v3686_v31 = vld [vmem:[%s5225_s1 + $0x38] sm:$0xff]  }
 0x2f7   :  { %v4785_v38 = vadd.f32 %v2474_v15, %v83_v25  ;;  %v2339_v25 = vpop.permute.xlu0 %2338 }
 0x2f9   :  { %2541 = vadd.xlane.f32.xlu1 %v4785_v38 }
 0x2fa   :  { %2539 = vadd.xlane.f32.xlu0 %v4782_v46 }
 0x2fb   :  { %v2353_v59 = vpop.permute.xlu0 %2352 }
 0x2fe   :  { %2545 = vadd.xlane.f32.xlu0 %v4789_v57 }
 0x2ff   :  { %v2367_v44 = vpop.permute.xlu0 %2366 }
 0x301   :  { %v3353_v2 = vpop.f32.mrb[32].mxu0 }
 0x302   :  { %v2147_v3 = vadd.f32 %v3353_v2, %v4768_v9  ;;  %v2138_v58 = vpop.f32.mrb[33].mxu0 }
 0x303   :  { %v2139_v40 = vadd.f32 %v4768_v9, %v2138_v58  ;;  %v3354_v22 = vpop.f32.mrb[34].mxu0 }
 0x304   :  { %v2150_v33 = vadd.f32 %v3354_v22, %v4768_v9  ;;  %v2479_v41 = vmul.f32 %v2297_v39, %v2147_v3  ;;  %v2141_v51 = vpop.f32.mrb[35].mxu0  ;;  %v2360_v39 = vpop.permute.xlu1 %2359 }
 0x305   :  { %v2142_v49 = vadd.f32 %v4768_v9, %v2141_v51  ;;  %v2477_v43 = vmul.f32 %v2283_v4, %v2139_v40  ;;  %v96_v4 = vunpack.c.l.bf16 %v3686_v31 }
 0x306   :  { %v2480_v12 = vmul.f32 %v2304_v8, %v2150_v33  ;;  %v4799_v6 = vadd.f32 %v2479_v41, %v88_v10  ;;  %v97_v10 = vunpack.c.h.bf16 %v3686_v31  ;;  %v3687_v41 = vld [vmem:[%s5225_s1 + $0x30] sm:$0xff]  }
 0x307   :  { %v2478_v24 = vmul.f32 %v2290_v35, %v2142_v49  ;;  %v4808_v55 = vadd.f32 %v2477_v43, %v86_v48  ;;  %v94_v51 = vunpack.c.l.bf16 %v3687_v41  ;;  %v95_v43 = vunpack.c.h.bf16 %v3687_v41 }
 0x308   :  { %2551 = vadd.xlane.f32.xlu1 %v4799_v6  ;;  %v4805_v27 = vadd.f32 %v2480_v12, %v89_v29 }
 0x309   :  { %v4811_v61 = vadd.f32 %v2478_v24, %v87_v11  ;;  %v2374_v24 = vpop.permute.xlu1 %2373 }
 0x30a   :  { %2553 = vadd.xlane.f32.xlu0 %v4805_v27 }
 0x30c   :  { %2547 = vadd.xlane.f32.xlu1 %v4808_v55 }
 0x30e   :  { %2549 = vadd.xlane.f32.xlu0 %v4811_v61 }
 0x311   :  { %v3357_v53 = vpop.f32.mrb[36].mxu0 }
 0x312   :  { %v2163_v36 = vadd.f32 %v3357_v53, %v4768_v9  ;;  %v2154_v17 = vpop.f32.mrb[37].mxu0 }
 0x313   :  { %v2155_v5 = vadd.f32 %v4768_v9, %v2154_v17  ;;  %v3358_v7 = vpop.f32.mrb[38].mxu0 }
 0x314   :  { %v2166_v28 = vadd.f32 %v3358_v7, %v4768_v9  ;;  %v2483_v54 = vmul.f32 %v2325_v62, %v2163_v36  ;;  %v2157_v1 = vpop.f32.mrb[39].mxu0  ;;  %v3688_v62 = vld [vmem:[%s5225_s1 + $0x48] sm:$0xff]  }
 0x315   :  { %v2158_v52 = vadd.f32 %v4768_v9, %v2157_v1  ;;  %v2481_v63 = vmul.f32 %v2311_v60, %v2155_v5  ;;  %v2381_v60 = vpop.permute.xlu0 %2380  ;;  %v100_v36 = vunpack.c.l.bf16 %v3688_v62 }
 0x316   :  { %v2484_v18 = vmul.f32 %v2332_v13, %v2166_v28  ;;  %v4821_v37 = vadd.f32 %v2483_v54, %v92_v26  ;;  %v2388_v26 = vpop.permute.xlu1 %2387  ;;  %v101_v28 = vunpack.c.h.bf16 %v3688_v62 }
 0x317   :  { %v2482_v0 = vmul.f32 %v2318_v45, %v2158_v52  ;;  %v4830_v20 = vadd.f32 %v2481_v63, %v90_v42  ;;  %v3689_v63 = vld [vmem:[%s5225_s1 + $0x40] sm:$0xff]  }
 0x318   :  { %2559 = vadd.xlane.f32.xlu1 %v4821_v37  ;;  %v4827_v19 = vadd.f32 %v2484_v18, %v93_v23  ;;  %v98_v18 = vunpack.c.l.bf16 %v3689_v63 }
 0x319   :  { %v4833_v30 = vadd.f32 %v2482_v0, %v91_v50  ;;  %v99_v0 = vunpack.c.h.bf16 %v3689_v63 }
 0x31a   :  { %2561 = vadd.xlane.f32.xlu0 %v4827_v19 }
 0x31c   :  { %2555 = vadd.xlane.f32.xlu1 %v4830_v20 }
 0x31e   :  { %2557 = vadd.xlane.f32.xlu0 %v4833_v30 }
 0x321   :  { %v3361_v56 = vpop.f32.mrb[40].mxu0 }
 0x322   :  { %v2179_v15 = vadd.f32 %v3361_v56, %v4768_v9  ;;  %v2170_v21 = vpop.f32.mrb[41].mxu0  ;;  %v2402_v56 = vpop.permute.xlu1 %2401 }
 0x323   :  { %v2171_v35 = vadd.f32 %v4768_v9, %v2170_v21  ;;  %v3362_v2 = vpop.f32.mrb[42].mxu0 }
 0x324   :  { %v2182_v3 = vadd.f32 %v3362_v2, %v4768_v9  ;;  %v2487_v58 = vmul.f32 %v2353_v59, %v2179_v15  ;;  %v2173_v34 = vpop.f32.mrb[43].mxu0 }
 0x325   :  { %v2174_v40 = vadd.f32 %v4768_v9, %v2173_v34  ;;  %v2485_v22 = vmul.f32 %v2339_v25, %v2171_v35  ;;  %v2395_v25 = vpop.permute.xlu0 %2394 }
 0x326   :  { %v2488_v8 = vmul.f32 %v2360_v39, %v2182_v3  ;;  %v4843_v33 = vadd.f32 %v2487_v58, %v96_v4  ;;  %v3690_v4 = vld [vmem:[%s5225_s1 + $0x58] sm:$0xff]   ;;  %v2416_v3 = vpop.permute.xlu1 %2415 }
 0x327   :  { %v2486_v29 = vmul.f32 %v2346_v14, %v2174_v40  ;;  %v4852_v12 = vadd.f32 %v2485_v22, %v94_v51  ;;  %v104_v35 = vunpack.c.l.bf16 %v3690_v4  ;;  %v105_v40 = vunpack.c.h.bf16 %v3690_v4 }
 0x328   :  { %2567 = vadd.xlane.f32.xlu1 %v4843_v33  ;;  %v4849_v49 = vadd.f32 %v2488_v8, %v97_v10 }
 0x329   :  { %v4855_v48 = vadd.f32 %v2486_v29, %v95_v43  ;;  %v2409_v15 = vpop.permute.xlu0 %2408  ;;  %v3691_v29 = vld [vmem:[%s5225_s1 + $0x50] sm:$0xff]  }
 0x32a   :  { %2569 = vadd.xlane.f32.xlu0 %v4849_v49  ;;  %v102_v43 = vunpack.c.l.bf16 %v3691_v29 }
 0x32c   :  { %2563 = vadd.xlane.f32.xlu1 %v4852_v12 }
 0x32e   :  { %2565 = vadd.xlane.f32.xlu0 %v4855_v48 }
 0x331   :  { %v3365_v11 = vpop.f32.mrb[44].mxu0 }
 0x332   :  { %v2195_v45 = vadd.f32 %v3365_v11, %v4768_v9  ;;  %v2186_v53 = vpop.f32.mrb[45].mxu0  ;;  %v103_v11 = vunpack.c.h.bf16 %v3691_v29 }
 0x333   :  { %v2187_v17 = vadd.f32 %v4768_v9, %v2186_v53  ;;  %v3366_v47 = vpop.f32.mrb[46].mxu0  ;;  %v2430_v53 = vpop.permute.xlu1 %2429 }
 0x334   :  { %v2198_v5 = vadd.f32 %v3366_v47, %v4768_v9  ;;  %v2491_v7 = vmul.f32 %v2381_v60, %v2195_v45  ;;  %v2189_v13 = vpop.f32.mrb[47].mxu0  ;;  %v2423_v60 = vpop.permute.xlu0 %2422 }
 0x335   :  { %v2190_v54 = vadd.f32 %v4768_v9, %v2189_v13  ;;  %v2489_v1 = vmul.f32 %v2367_v44, %v2187_v17 }
 0x336   :  { %v2492_v23 = vmul.f32 %v2388_v26, %v2198_v5  ;;  %v4865_v52 = vadd.f32 %v2491_v7, %v100_v36  ;;  %v3692_v5 = vld [vmem:[%s5225_s1 + $0x68] sm:$0xff]  }
 0x337   :  { %v2490_v16 = vmul.f32 %v2374_v24, %v2190_v54  ;;  %v4874_v50 = vadd.f32 %v2489_v1, %v98_v18  ;;  %v108_v7 = vunpack.c.l.bf16 %v3692_v5  ;;  %v2444_v54 = vpop.permute.xlu1 %2443  ;;  %v109_v18 = vunpack.c.h.bf16 %v3692_v5  ;;  %v3695_v5 = vld [vmem:[%s5225_s1 + $0x78] sm:$0xff]  }
 0x338   :  { %2575 = vadd.xlane.f32.xlu1 %v4865_v52  ;;  %v4871_v42 = vadd.f32 %v2492_v23, %v101_v28  ;;  %v2437_v17 = vpop.permute.xlu0 %2436 }
 0x339   :  { %v4877_v14 = vadd.f32 %v2490_v16, %v99_v0 }
 0x33a   :  { %2577 = vadd.xlane.f32.xlu0 %v4871_v42 }
 0x33c   :  { %2571 = vadd.xlane.f32.xlu1 %v4874_v50 }
 0x33e   :  { %2573 = vadd.xlane.f32.xlu0 %v4877_v14 }
 0x341   :  { %v3369_v59 = vpop.f32.mrb[48].mxu0 }
 0x342   :  { %v2211_v21 = vadd.f32 %v3369_v59, %v4768_v9  ;;  %v2202_v31 = vpop.f32.mrb[49].mxu0  ;;  %v3693_v59 = vld [vmem:[%s5225_s1 + $0x60] sm:$0xff]  }
 0x343   :  { %v2203_v2 = vadd.f32 %v4768_v9, %v2202_v31  ;;  %v3370_v39 = vpop.f32.mrb[50].mxu0  ;;  %v107_v4 = vunpack.c.h.bf16 %v3693_v59 }
 0x344   :  { %v2214_v58 = vadd.f32 %v3370_v39, %v4768_v9  ;;  %v2495_v34 = vmul.f32 %v2409_v15, %v2211_v21  ;;  %v2205_v10 = vpop.f32.mrb[51].mxu0  ;;  %v106_v15 = vunpack.c.l.bf16 %v3693_v59  ;;  %v2451_v39 = vpop.permute.xlu0 %2450 }
 0x345   :  { %v2206_v22 = vadd.f32 %v4768_v9, %v2205_v10  ;;  %v2493_v8 = vmul.f32 %v2395_v25, %v2203_v2 }
 0x346   :  { %v2496_v41 = vmul.f32 %v2416_v3, %v2214_v58  ;;  %v4887_v51 = vadd.f32 %v2495_v34, %v104_v35  ;;  %v2458_v3 = vpop.permute.xlu1 %2457 }
 0x347   :  { %v2494_v44 = vmul.f32 %v2402_v56, %v2206_v22  ;;  %v4896_v45 = vadd.f32 %v2493_v8, %v102_v43  ;;  %v3694_v8 = vld [vmem:[%s5225_s1 + $0x70] sm:$0xff]  }
 0x348   :  { %2583 = vadd.xlane.f32.xlu1 %v4887_v51  ;;  %v4893_v24 = vadd.f32 %v2496_v41, %v105_v40  ;;  %v110_v41 = vunpack.c.l.bf16 %v3694_v8  ;;  %v2465_v29 = vpop.permute.xlu0 %2464 }
 0x349   :  { %v4899_v62 = vadd.f32 %v2494_v44, %v103_v11 }
 0x34a   :  { %2585 = vadd.xlane.f32.xlu0 %v4893_v24 }
 0x34c   :  { %2579 = vadd.xlane.f32.xlu1 %v4896_v45 }
 0x34e   :  { %2581 = vadd.xlane.f32.xlu0 %v4899_v62 }
 0x34f   :  { %v3373_v36 = vpop.f32.mrb[52].mxu0 }
 0x350   :  { %v2227_v47 = vadd.f32 %v3373_v36, %v4768_v9  ;;  %v2218_v26 = vpop.f32.mrb[53].mxu0  ;;  %v2472_v36 = vpop.permute.xlu1 %2471 }
 0x351   :  { %v2219_v13 = vadd.f32 %v4768_v9, %v2218_v26  ;;  %v3374_v28 = vpop.f32.mrb[54].mxu0 }
 0x352   :  { %v2230_v1 = vadd.f32 %v3374_v28, %v4768_v9  ;;  %v2499_v23 = vmul.f32 %v2437_v17, %v2227_v47  ;;  %v2221_v63 = vpop.f32.mrb[55].mxu0 }
 0x353   :  { %v2222_v16 = vadd.f32 %v4768_v9, %v2221_v63  ;;  %v2497_v0 = vmul.f32 %v2423_v60, %v2219_v13 }
 0x354   :  { %v2500_v25 = vmul.f32 %v2444_v54, %v2230_v1  ;;  %v4909_v56 = vadd.f32 %v2499_v23, %v108_v7  ;;  %v112_v7 = vunpack.c.l.bf16 %v3695_v5  ;;  %v113_v54 = vunpack.c.h.bf16 %v3695_v5 }
 0x355   :  { %v2498_v21 = vmul.f32 %v2430_v53, %v2222_v16  ;;  %v4918_v35 = vadd.f32 %v2497_v0, %v106_v15  ;;  %v111_v53 = vunpack.c.h.bf16 %v3694_v8 }
 0x356   :  { %2591 = vadd.xlane.f32.xlu1 %v4909_v56  ;;  %v4915_v31 = vadd.f32 %v2500_v25, %v109_v18 }
 0x357   :  { %v4921_v2 = vadd.f32 %v2498_v21, %v107_v4 }
 0x358   :  { %2593 = vadd.xlane.f32.xlu0 %v4915_v31 }
 0x35a   :  { %2587 = vadd.xlane.f32.xlu1 %v4918_v35 }
 0x35c   :  { %2589 = vadd.xlane.f32.xlu0 %v4921_v2 }
 0x35f   :  { %v3377_v58 = vpop.f32.mrb[56].mxu0 }
 0x360   :  { %v2234_v34 = vpop.f32.mrb[57].mxu0  ;;  %v2243_v10 = vadd.f32 %v3377_v58, %v4768_v9 }
 0x361   :  { %v2235_v40 = vadd.f32 %v4768_v9, %v2234_v34  ;;  %v3378_v22 = vpop.f32.mrb[58].mxu0 }
 0x362   :  { %v2237_v43 = vpop.f32.mrb[59].mxu0  ;;  %v2246_v11 = vadd.f32 %v3378_v22, %v4768_v9  ;;  %v2503_v17 = vmul.f32 %v2465_v29, %v2243_v10 }
 0x363   :  { %v2501_v44 = vmul.f32 %v2451_v39, %v2235_v40  ;;  %v2238_v60 = vadd.f32 %v4768_v9, %v2237_v43 }
 0x364   :  { %v2504_v13 = vmul.f32 %v2472_v36, %v2246_v11  ;;  %v4940_v9 = vadd.f32 %v2503_v17, %v112_v7 }
 0x365   :  { %v2502_v47 = vmul.f32 %v2458_v3, %v2238_v60  ;;  %v4931_v26 = vadd.f32 %v2501_v44, %v110_v41 }
 0x366   :  { %v4943_v1 = vadd.f32 %v2504_v13, %v113_v54 }
 0x367   :  { %2595 = vadd.xlane.f32.xlu1 %v4931_v26  ;;  %v4937_v28 = vadd.f32 %v2502_v47, %v111_v53 }
 0x369   :  { %2597 = vadd.xlane.f32.xlu0 %v4937_v28 }
 0x36b   :  { %2599 = vadd.xlane.f32.xlu1 %v4940_v9 }
 0x36d   :  { %2601 = vadd.xlane.f32.xlu0 %v4943_v1 }
 0x383   :  { %v2544_v23 = vpop.xlane.xlu0 %2543 }
 0x384   :  { %v2606_v63 = vmul.f32 0.0078125, %v2544_v23 }
 0x386   :  { %v4947_v18 = vsub.f32 %v4780_v32, %v2606_v63  ;;  %v2542_v59 = vpop.xlane.xlu1 %2541 }
 0x387   :  { %v2540_v16 = vpop.xlane.xlu0 %2539  ;;  %v2605_v4 = vmul.f32 0.0078125, %v2542_v59 }
 0x388   :  { %v2604_v0 = vmul.f32 0.0078125, %v2540_v16  ;;  %v2670_v25 = vmul.f32 %v4947_v18, %v4947_v18 }
 0x389   :  { %v4960_v32 = vsub.f32 %v4785_v38, %v2605_v4 }
 0x38a   :  { %v4952_v15 = vsub.f32 %v4782_v46, %v2604_v0  ;;  %2704 = vadd.xlane.f32.xlu1 %v2670_v25 }
 0x38b   :  { %v2546_v21 = vpop.xlane.xlu0 %2545  ;;  %v2669_v46 = vmul.f32 %v4960_v32, %v4960_v32 }
 0x38c   :  { %v2607_v39 = vmul.f32 0.0078125, %v2546_v21  ;;  %v2668_v3 = vmul.f32 %v4952_v15, %v4952_v15 }
 0x38e   :  { %v4957_v58 = vsub.f32 %v4789_v57, %v2607_v39  ;;  %2700 = vadd.xlane.f32.xlu1 %v2668_v3 }
 0x390   :  { %v2671_v34 = vmul.f32 %v4957_v58, %v4957_v58 }
 0x392   :  { %2706 = vadd.xlane.f32.xlu0 %v2671_v34 }
 0x395   :  { %v2552_v10 = vpop.xlane.xlu1 %2551 }
 0x396   :  { %v2610_v40 = vmul.f32 0.0078125, %v2552_v10  ;;  %2702 = vadd.xlane.f32.xlu0 %v2669_v46 }
 0x397   :  { %v2554_v22 = vpop.xlane.xlu0 %2553 }
 0x398   :  { %v4967_v8 = vsub.f32 %v4799_v6, %v2610_v40  ;;  %v2611_v57 = vmul.f32 0.0078125, %v2554_v22 }
 0x399   :  { %v2548_v41 = vpop.xlane.xlu1 %2547 }
 0x39a   :  { %v4970_v29 = vsub.f32 %v4805_v27, %v2611_v57  ;;  %v2608_v38 = vmul.f32 0.0078125, %v2548_v41  ;;  %v2674_v43 = vmul.f32 %v4967_v8, %v4967_v8 }
 0x39b   :  { %v2550_v44 = vpop.xlane.xlu0 %2549 }
 0x39c   :  { %v4975_v11 = vsub.f32 %v4808_v55, %v2608_v38  ;;  %v2609_v60 = vmul.f32 0.0078125, %v2550_v44  ;;  %2712 = vadd.xlane.f32.xlu1 %v2674_v43  ;;  %v2675_v53 = vmul.f32 %v4970_v29, %v4970_v29 }
 0x39e   :  { %v4980_v6 = vsub.f32 %v4811_v61, %v2609_v60  ;;  %2714 = vadd.xlane.f32.xlu0 %v2675_v53  ;;  %v2672_v27 = vmul.f32 %v4975_v11, %v4975_v11 }
 0x3a0   :  { %2708 = vadd.xlane.f32.xlu1 %v2672_v27  ;;  %v2673_v36 = vmul.f32 %v4980_v6, %v4980_v6 }
 0x3a2   :  { %2710 = vadd.xlane.f32.xlu0 %v2673_v36 }
 0x3a5   :  { %v2560_v17 = vpop.xlane.xlu1 %2559 }
 0x3a6   :  { %v2614_v55 = vmul.f32 0.0078125, %v2560_v17 }
 0x3a7   :  { %v2562_v47 = vpop.xlane.xlu0 %2561 }
 0x3a8   :  { %v4987_v5 = vsub.f32 %v4821_v37, %v2614_v55  ;;  %v2615_v7 = vmul.f32 0.0078125, %v2562_v47 }
 0x3a9   :  { %v2556_v13 = vpop.xlane.xlu1 %2555 }
 0x3aa   :  { %v4990_v61 = vsub.f32 %v4827_v19, %v2615_v7  ;;  %v2612_v54 = vmul.f32 0.0078125, %v2556_v13  ;;  %v2678_v23 = vmul.f32 %v4987_v5, %v4987_v5 }
 0x3ab   :  { %v2558_v63 = vpop.xlane.xlu0 %2557 }
 0x3ac   :  { %v4995_v16 = vsub.f32 %v4830_v20, %v2612_v54  ;;  %v2613_v0 = vmul.f32 0.0078125, %v2558_v63  ;;  %2720 = vadd.xlane.f32.xlu1 %v2678_v23  ;;  %v2679_v25 = vmul.f32 %v4990_v61, %v4990_v61 }
 0x3ae   :  { %v5000_v37 = vsub.f32 %v4833_v30, %v2613_v0  ;;  %2722 = vadd.xlane.f32.xlu0 %v2679_v25  ;;  %v2676_v19 = vmul.f32 %v4995_v16, %v4995_v16 }
 0x3b0   :  { %2716 = vadd.xlane.f32.xlu1 %v2676_v19  ;;  %v2677_v59 = vmul.f32 %v5000_v37, %v5000_v37 }
 0x3b2   :  { %2718 = vadd.xlane.f32.xlu0 %v2677_v59 }
 0x3b5   :  { %v2568_v21 = vpop.xlane.xlu1 %2567 }
 0x3b6   :  { %v2618_v20 = vmul.f32 0.0078125, %v2568_v21 }
 0x3b7   :  { %v2570_v4 = vpop.xlane.xlu0 %2569 }
 0x3b8   :  { %v5007_v39 = vsub.f32 %v4843_v33, %v2618_v20  ;;  %v2619_v3 = vmul.f32 0.0078125, %v2570_v4 }
 0x3b9   :  { %v2564_v34 = vpop.xlane.xlu1 %2563 }
 0x3ba   :  { %v5010_v30 = vsub.f32 %v4849_v49, %v2619_v3  ;;  %v2616_v46 = vmul.f32 0.0078125, %v2564_v34  ;;  %v2682_v10 = vmul.f32 %v5007_v39, %v5007_v39 }
 0x3bb   :  { %v2566_v40 = vpop.xlane.xlu0 %2565 }
 0x3bc   :  { %v5015_v22 = vsub.f32 %v4852_v12, %v2616_v46  ;;  %v2617_v57 = vmul.f32 0.0078125, %v2566_v40  ;;  %2728 = vadd.xlane.f32.xlu1 %v2682_v10  ;;  %v2683_v41 = vmul.f32 %v5010_v30, %v5010_v30 }
 0x3be   :  { %v5020_v33 = vsub.f32 %v4855_v48, %v2617_v57  ;;  %2730 = vadd.xlane.f32.xlu0 %v2683_v41  ;;  %v2680_v49 = vmul.f32 %v5015_v22, %v5015_v22 }
 0x3c0   :  { %2724 = vadd.xlane.f32.xlu1 %v2680_v49  ;;  %v2681_v38 = vmul.f32 %v5020_v33, %v5020_v33 }
 0x3c2   :  { %2726 = vadd.xlane.f32.xlu0 %v2681_v38 }
 0x3c5   :  { %v2576_v43 = vpop.xlane.xlu1 %2575 }
 0x3c6   :  { %v2622_v12 = vmul.f32 0.0078125, %v2576_v43 }
 0x3c7   :  { %v2578_v44 = vpop.xlane.xlu0 %2577 }
 0x3c8   :  { %v5027_v60 = vsub.f32 %v4865_v52, %v2622_v12  ;;  %v2623_v53 = vmul.f32 0.0078125, %v2578_v44 }
 0x3c9   :  { %v2572_v27 = vpop.xlane.xlu1 %2571 }
 0x3ca   :  { %v5030_v48 = vsub.f32 %v4871_v42, %v2623_v53  ;;  %v2620_v36 = vmul.f32 0.0078125, %v2572_v27  ;;  %v2686_v17 = vmul.f32 %v5027_v60, %v5027_v60 }
 0x3cb   :  { %v2574_v55 = vpop.xlane.xlu0 %2573 }
 0x3cc   :  { %v5035_v47 = vsub.f32 %v4874_v50, %v2620_v36  ;;  %v2621_v7 = vmul.f32 0.0078125, %v2574_v55  ;;  %2736 = vadd.xlane.f32.xlu1 %v2686_v17  ;;  %v2687_v13 = vmul.f32 %v5030_v48, %v5030_v48 }
 0x3ce   :  { %v5040_v52 = vsub.f32 %v4877_v14, %v2621_v7  ;;  %2738 = vadd.xlane.f32.xlu0 %v2687_v13  ;;  %v2684_v42 = vmul.f32 %v5035_v47, %v5035_v47 }
 0x3d0   :  { %2732 = vadd.xlane.f32.xlu1 %v2684_v42  ;;  %v2685_v54 = vmul.f32 %v5040_v52, %v5040_v52 }
 0x3d2   :  { %2734 = vadd.xlane.f32.xlu0 %v2685_v54 }
 0x3d5   :  { %v2584_v23 = vpop.xlane.xlu1 %2583 }
 0x3d6   :  { %v2626_v50 = vmul.f32 0.0078125, %v2584_v23 }
 0x3d7   :  { %v2586_v63 = vpop.xlane.xlu0 %2585 }
 0x3d8   :  { %v5047_v0 = vsub.f32 %v4887_v51, %v2626_v50  ;;  %v2627_v25 = vmul.f32 0.0078125, %v2586_v63 }
 0x3d9   :  { %v2580_v19 = vpop.xlane.xlu1 %2579 }
 0x3da   :  { %v5050_v14 = vsub.f32 %v4893_v24, %v2627_v25  ;;  %v2624_v59 = vmul.f32 0.0078125, %v2580_v19  ;;  %v2690_v21 = vmul.f32 %v5047_v0, %v5047_v0 }
 0x3db   :  { %v2582_v20 = vpop.xlane.xlu0 %2581 }
 0x3dc   :  { %v5055_v4 = vsub.f32 %v4896_v45, %v2624_v59  ;;  %v2625_v3 = vmul.f32 0.0078125, %v2582_v20  ;;  %2744 = vadd.xlane.f32.xlu1 %v2690_v21  ;;  %v2691_v34 = vmul.f32 %v5050_v14, %v5050_v14 }
 0x3de   :  { %v5060_v51 = vsub.f32 %v4899_v62, %v2625_v3  ;;  %2746 = vadd.xlane.f32.xlu0 %v2691_v34  ;;  %v2688_v24 = vmul.f32 %v5055_v4, %v5055_v4 }
 0x3e0   :  { %2740 = vadd.xlane.f32.xlu1 %v2688_v24  ;;  %v2689_v46 = vmul.f32 %v5060_v51, %v5060_v51 }
 0x3e2   :  { %2742 = vadd.xlane.f32.xlu0 %v2689_v46 }
 0x3e3   :  { %v2592_v10 = vpop.xlane.xlu1 %2591 }
 0x3e4   :  { %v2630_v45 = vmul.f32 0.0078125, %v2592_v10 }
 0x3e5   :  { %v2594_v40 = vpop.xlane.xlu0 %2593 }
 0x3e6   :  { %v5067_v57 = vsub.f32 %v4909_v56, %v2630_v45  ;;  %v2631_v41 = vmul.f32 0.0078125, %v2594_v40 }
 0x3e7   :  { %v2588_v49 = vpop.xlane.xlu1 %2587 }
 0x3e8   :  { %v5070_v62 = vsub.f32 %v4915_v31, %v2631_v41  ;;  %v2628_v38 = vmul.f32 0.0078125, %v2588_v49  ;;  %v2694_v43 = vmul.f32 %v5067_v57, %v5067_v57  ;;  %v5109_v49 = vld [vmem:[%s5235_s11] ss:$0 sm:$0xff]  ;;  %s3721_s11 = smov [#allocation2]  }
 0x3e9   :  { %v2590_v12 = vpop.xlane.xlu0 %2589 }
 0x3ea   :  { %v5075_v44 = vsub.f32 %v4918_v35, %v2628_v38  ;;  %v2629_v53 = vmul.f32 0.0078125, %v2590_v12  ;;  %2752 = vadd.xlane.f32.xlu1 %v2694_v43  ;;  %v2695_v27 = vmul.f32 %v5070_v62, %v5070_v62  ;;  %v5115_v12 = vld [vmem:[%s5236_s12] ss:$0 sm:$0xff]  ;;  %s3005_s12 = sshll.u32 %s3721_s11, 4  ;;  %s3006_s12 = int_to_ptr.vmem [resolvable:$true] %s3005_s12 }
 0x3eb   :  { %s3696_s20 = scalar_lea.vmem %s3006_s12, 4096  ;;  %p3701_p1 = scmp.lt.s32.totalorder %s3006_s12, %s3006_s12 }
 0x3ec   :  { %v5080_v56 = vsub.f32 %v4921_v2, %v2629_v53  ;;  %2754 = vadd.xlane.f32.xlu0 %v2695_v27  ;;  %v2692_v31 = vmul.f32 %v5075_v44, %v5075_v44  ;;  %p3697_p0 = scmp.ne.s32.totalorder %s3006_s12, %s3696_s20  ;;  %p3702_p2 = scmp.lt.s32.totalorder %s3696_s20, %s3696_s20 }
 0x3ee   :  { %2748 = vadd.xlane.f32.xlu1 %v2692_v31  ;;  %v2693_v36 = vmul.f32 %v5080_v56, %v5080_v56  ;;  %p3703_p3 = por %p3702_p2, %p3701_p1 }
 0x3f0   :  { %2750 = vadd.xlane.f32.xlu0 %v2693_v36  ;;  %p3704_p4 = pnand %p3703_p3, %p3697_p0 }
 0x3f4   :  { %v2596_v17 = vpop.xlane.xlu1 %2595 }
 0x3f5   :  { %v2632_v35 = vmul.f32 0.0078125, %v2596_v17 }
 0x3f6   :  { %v2598_v55 = vpop.xlane.xlu0 %2597 }
 0x3f7   :  { %v5087_v7 = vsub.f32 %v4931_v26, %v2632_v35  ;;  %v2633_v13 = vmul.f32 0.0078125, %v2598_v55 }
 0x3f8   :  { %v2600_v42 = vpop.xlane.xlu1 %2599 }
 0x3f9   :  { %v5090_v2 = vsub.f32 %v4937_v28, %v2633_v13  ;;  %v2634_v54 = vmul.f32 0.0078125, %v2600_v42  ;;  %v2696_v23 = vmul.f32 %v5087_v7, %v5087_v7 }
 0x3fa   :  { %v2602_v50 = vpop.xlane.xlu0 %2601 }
 0x3fb   :  { %v5095_v63 = vsub.f32 %v4940_v9, %v2634_v54  ;;  %v2635_v25 = vmul.f32 0.0078125, %v2602_v50  ;;  %2756 = vadd.xlane.f32.xlu1 %v2696_v23  ;;  %v2697_v19 = vmul.f32 %v5090_v2, %v5090_v2 }
 0x3fd   :  { %v5100_v26 = vsub.f32 %v4943_v1, %v2635_v25  ;;  %2758 = vadd.xlane.f32.xlu0 %v2697_v19  ;;  %v2698_v28 = vmul.f32 %v5095_v63, %v5095_v63 }
 0x3ff   :  { %2760 = vadd.xlane.f32.xlu1 %v2698_v28  ;;  %v2699_v59 = vmul.f32 %v5100_v26, %v5100_v26 }
 0x401   :  { %2762 = vadd.xlane.f32.xlu0 %v2699_v59 }
 0x417   :  { %v2705_v21 = vpop.xlane.xlu1 %2704 }
 0x418   :  { %v2766_v9 = vmul.f32 0.0078125, %v2705_v21 }
 0x41a   :  { %v2798_v20 = vadd.f32 1e-05, %v2766_v9 }
 0x41b   :  { %v2701_v3 = vpop.xlane.xlu1 %2700 }
 0x41c   :  { %3615 = vrsqrt.f32 %v2798_v20  ;;  %v2764_v34 = vmul.f32 0.0078125, %v2701_v3 }
 0x41e   :  { %v2796_v24 = vadd.f32 1e-05, %v2764_v34 }
 0x41f   :  { %v2707_v46 = vpop.xlane.xlu0 %2706 }
 0x420   :  { %3617 = vrsqrt.f32 %v2796_v24  ;;  %v2767_v1 = vmul.f32 0.0078125, %v2707_v46 }
 0x422   :  { %v2799_v10 = vadd.f32 1e-05, %v2767_v1 }
 0x423   :  { %v2703_v45 = vpop.xlane.xlu0 %2702 }
 0x424   :  { %3619 = vrsqrt.f32 %v2799_v10  ;;  %v2765_v40 = vmul.f32 0.0078125, %v2703_v45 }
 0x426   :  { %v3616_v41 = vpop.eup %3615  ;;  %v2797_v38 = vadd.f32 1e-05, %v2765_v40 }
 0x427   :  { %v2862_v43 = vmul.f32 %v3616_v41, %v4947_v18 }
 0x428   :  { %3621 = vrsqrt.f32 %v2797_v38 }
 0x429   :  { %v2900_v53 = vmul.f32 %v5109_v49, %v2862_v43  ;;  %v2713_v27 = vpop.xlane.xlu1 %2712 }
 0x42a   :  { %v3618_v31 = vpop.eup %3617  ;;  %v2770_v36 = vmul.f32 0.0078125, %v2713_v27 }
 0x42b   :  { %v2938_v17 = vadd.f32 %v5115_v12, %v2900_v53  ;;  %v2860_v35 = vmul.f32 %v3618_v31, %v4952_v15  ;;  %v2715_v55 = vpop.xlane.xlu0 %2714 }
 0x42c   :  { %v2802_v13 = vadd.f32 1e-05, %v2770_v36  ;;  %v2771_v42 = vmul.f32 0.0078125, %v2715_v55 }
 0x42d   :  { %2970 = vst [vmem:[#allocation2 + $0x10] sm:$0xff] %v2938_v17  ;;  %v2898_v18 = vmul.f32 %v5109_v49, %v2860_v35  ;;  %v2709_v54 = vpop.xlane.xlu1 %2708 }
 0x42e   :  { %v3620_v23 = vpop.eup %3619  ;;  %3623 = vrsqrt.f32 %v2802_v13  ;;  %v2803_v50 = vadd.f32 1e-05, %v2771_v42  ;;  %v2768_v25 = vmul.f32 0.0078125, %v2709_v54 }
 0x42f   :  { %v2936_v19 = vadd.f32 %v5115_v12, %v2898_v18  ;;  %v2863_v28 = vmul.f32 %v3620_v23, %v4957_v58  ;;  %v2711_v59 = vpop.xlane.xlu0 %2710 }
 0x430   :  { %3625 = vrsqrt.f32 %v2803_v50  ;;  %v2800_v21 = vadd.f32 1e-05, %v2768_v25  ;;  %v2769_v9 = vmul.f32 0.0078125, %v2711_v59 }
 0x431   :  { %2968 = vst [vmem:[#allocation2] sm:$0xff] %v2936_v19  ;;  %v2901_v15 = vmul.f32 %v5109_v49, %v2863_v28 }
 0x432   :  { %v3622_v20 = vpop.eup %3621  ;;  %3627 = vrsqrt.f32 %v2800_v21  ;;  %v2801_v3 = vadd.f32 1e-05, %v2769_v9 }
 0x433   :  { %v2939_v34 = vadd.f32 %v5115_v12, %v2901_v15  ;;  %v2861_v24 = vmul.f32 %v3622_v20, %v4960_v32 }
 0x434   :  { %3629 = vrsqrt.f32 %v2801_v3 }
 0x435   :  { %2971 = vst [vmem:[#allocation2 + $0x18] sm:$0xff] %v2939_v34  ;;  %v2899_v46 = vmul.f32 %v5109_v49, %v2861_v24 }
 0x437   :  { %v2937_v58 = vadd.f32 %v5115_v12, %v2899_v46 }
 0x438   :  { %v3624_v1 = vpop.eup %3623 }
 0x439   :  { %2969 = vst [vmem:[#allocation2 + $0x8] sm:$0xff] %v2937_v58  ;;  %v2866_v10 = vmul.f32 %v3624_v1, %v4967_v8  ;;  %v2721_v45 = vpop.xlane.xlu1 %2720 }
 0x43a   :  { %v3626_v40 = vpop.eup %3625  ;;  %v2774_v41 = vmul.f32 0.0078125, %v2721_v45 }
 0x43b   :  { %v2904_v38 = vmul.f32 %v5109_v49, %v2866_v10  ;;  %v2867_v43 = vmul.f32 %v3626_v40, %v4970_v29  ;;  %v2723_v53 = vpop.xlane.xlu0 %2722 }
 0x43c   :  { %v3628_v27 = vpop.eup %3627  ;;  %v2806_v32 = vadd.f32 1e-05, %v2774_v41  ;;  %v2775_v31 = vmul.f32 0.0078125, %v2723_v53 }
 0x43d   :  { %v2942_v36 = vadd.f32 %v5115_v12, %v2904_v38  ;;  %v2905_v17 = vmul.f32 %v5109_v49, %v2867_v43  ;;  %v2864_v35 = vmul.f32 %v3628_v27, %v4975_v11  ;;  %v2717_v55 = vpop.xlane.xlu1 %2716 }
 0x43e   :  { %v3630_v13 = vpop.eup %3629  ;;  %3631 = vrsqrt.f32 %v2806_v32  ;;  %v2807_v8 = vadd.f32 1e-05, %v2775_v31  ;;  %v2772_v42 = vmul.f32 0.0078125, %v2717_v55 }
 0x43f   :  { %2974 = vst [vmem:[#allocation2 + $0x30] sm:$0xff] %v2942_v36  ;;  %v2943_v18 = vadd.f32 %v5115_v12, %v2905_v17  ;;  %v2902_v29 = vmul.f32 %v5109_v49, %v2864_v35  ;;  %v2865_v54 = vmul.f32 %v3630_v13, %v4980_v6  ;;  %v2719_v23 = vpop.xlane.xlu0 %2718 }
 0x440   :  { %3633 = vrsqrt.f32 %v2807_v8  ;;  %v2804_v50 = vadd.f32 1e-05, %v2772_v42  ;;  %v2773_v25 = vmul.f32 0.0078125, %v2719_v23 }
 0x441   :  { %2975 = vst [vmem:[#allocation2 + $0x38] sm:$0xff] %v2943_v18  ;;  %v2940_v19 = vadd.f32 %v5115_v12, %v2902_v29  ;;  %v2903_v11 = vmul.f32 %v5109_v49, %v2865_v54 }
 0x442   :  { %3635 = vrsqrt.f32 %v2804_v50  ;;  %v2805_v28 = vadd.f32 1e-05, %v2773_v25 }
 0x443   :  { %2972 = vst [vmem:[#allocation2 + $0x20] sm:$0xff] %v2940_v19  ;;  %v2941_v59 = vadd.f32 %v5115_v12, %v2903_v11 }
 0x444   :  { %3637 = vrsqrt.f32 %v2805_v28 }
 0x445   :  { %2973 = vst [vmem:[#allocation2 + $0x28] sm:$0xff] %v2941_v59 }
 0x448   :  { %v3632_v21 = vpop.eup %3631 }
 0x449   :  { %v2870_v9 = vmul.f32 %v3632_v21, %v4987_v5  ;;  %v2729_v6 = vpop.xlane.xlu1 %2728 }
 0x44a   :  { %v3634_v15 = vpop.eup %3633  ;;  %v2778_v20 = vmul.f32 0.0078125, %v2729_v6 }
 0x44b   :  { %v2908_v3 = vmul.f32 %v5109_v49, %v2870_v9  ;;  %v2871_v34 = vmul.f32 %v3634_v15, %v4990_v61  ;;  %v2731_v24 = vpop.xlane.xlu0 %2730 }
 0x44c   :  { %v3636_v46 = vpop.eup %3635  ;;  %v2810_v58 = vadd.f32 1e-05, %v2778_v20  ;;  %v2779_v1 = vmul.f32 0.0078125, %v2731_v24 }
 0x44d   :  { %v2946_v10 = vadd.f32 %v5115_v12, %v2908_v3  ;;  %v2909_v45 = vmul.f32 %v5109_v49, %v2871_v34  ;;  %v2868_v40 = vmul.f32 %v3636_v46, %v4995_v16  ;;  %v2725_v41 = vpop.xlane.xlu1 %2724 }
 0x44e   :  { %v3638_v38 = vpop.eup %3637  ;;  %3639 = vrsqrt.f32 %v2810_v58  ;;  %v2811_v5 = vadd.f32 1e-05, %v2779_v1  ;;  %v2776_v43 = vmul.f32 0.0078125, %v2725_v41 }
 0x44f   :  { %2978 = vst [vmem:[#allocation2 + $0x50] sm:$0xff] %v2946_v10  ;;  %v2947_v53 = vadd.f32 %v5115_v12, %v2909_v45  ;;  %v2906_v61 = vmul.f32 %v5109_v49, %v2868_v40  ;;  %v2869_v27 = vmul.f32 %v3638_v38, %v5000_v37  ;;  %v2727_v32 = vpop.xlane.xlu0 %2726 }
 0x450   :  { %3641 = vrsqrt.f32 %v2811_v5  ;;  %v2808_v31 = vadd.f32 1e-05, %v2776_v43  ;;  %v2777_v36 = vmul.f32 0.0078125, %v2727_v32 }
 0x451   :  { %2979 = vst [vmem:[#allocation2 + $0x58] sm:$0xff] %v2947_v53  ;;  %v2944_v17 = vadd.f32 %v5115_v12, %v2906_v61  ;;  %v2907_v16 = vmul.f32 %v5109_v49, %v2869_v27 }
 0x452   :  { %3643 = vrsqrt.f32 %v2808_v31  ;;  %v2809_v35 = vadd.f32 1e-05, %v2777_v36 }
 0x453   :  { %2976 = vst [vmem:[#allocation2 + $0x40] sm:$0xff] %v2944_v17  ;;  %v2945_v55 = vadd.f32 %v5115_v12, %v2907_v16 }
 0x454   :  { %3645 = vrsqrt.f32 %v2809_v35 }
 0x455   :  { %2977 = vst [vmem:[#allocation2 + $0x48] sm:$0xff] %v2945_v55 }
 0x458   :  { %v3640_v13 = vpop.eup %3639 }
 0x459   :  { %v2874_v8 = vmul.f32 %v3640_v13, %v5007_v39  ;;  %v2737_v37 = vpop.xlane.xlu1 %2736 }
 0x45a   :  { %v3642_v42 = vpop.eup %3641  ;;  %v2782_v18 = vmul.f32 0.0078125, %v2737_v37 }
 0x45b   :  { %v2912_v29 = vmul.f32 %v5109_v49, %v2874_v8  ;;  %v2875_v54 = vmul.f32 %v3642_v42, %v5010_v30  ;;  %v2739_v23 = vpop.xlane.xlu0 %2738 }
 0x45c   :  { %v3644_v50 = vpop.eup %3643  ;;  %v2814_v25 = vadd.f32 1e-05, %v2782_v18  ;;  %v2783_v19 = vmul.f32 0.0078125, %v2739_v23 }
 0x45d   :  { %v2950_v11 = vadd.f32 %v5115_v12, %v2912_v29  ;;  %v2913_v28 = vmul.f32 %v5109_v49, %v2875_v54  ;;  %v2872_v59 = vmul.f32 %v3644_v50, %v5015_v22  ;;  %v2733_v21 = vpop.xlane.xlu1 %2732 }
 0x45e   :  { %v3646_v9 = vpop.eup %3645  ;;  %3647 = vrsqrt.f32 %v2814_v25  ;;  %v2815_v39 = vadd.f32 1e-05, %v2783_v19  ;;  %v2780_v6 = vmul.f32 0.0078125, %v2733_v21 }
 0x45f   :  { %2982 = vst [vmem:[#allocation2 + $0x70] sm:$0xff] %v2950_v11  ;;  %v2951_v15 = vadd.f32 %v5115_v12, %v2913_v28  ;;  %v2910_v30 = vmul.f32 %v5109_v49, %v2872_v59  ;;  %v2873_v20 = vmul.f32 %v3646_v9, %v5020_v33  ;;  %v2735_v3 = vpop.xlane.xlu0 %2734 }
 0x460   :  { %3649 = vrsqrt.f32 %v2815_v39  ;;  %v2812_v34 = vadd.f32 1e-05, %v2780_v6  ;;  %v2781_v24 = vmul.f32 0.0078125, %v2735_v3 }
 0x461   :  { %2983 = vst [vmem:[#allocation2 + $0x78] sm:$0xff] %v2951_v15  ;;  %v2948_v46 = vadd.f32 %v5115_v12, %v2910_v30  ;;  %v2911_v22 = vmul.f32 %v5109_v49, %v2873_v20 }
 0x462   :  { %3651 = vrsqrt.f32 %v2812_v34  ;;  %v2813_v58 = vadd.f32 1e-05, %v2781_v24 }
 0x463   :  { %2980 = vst [vmem:[#allocation2 + $0x60] sm:$0xff] %v2948_v46  ;;  %v2949_v1 = vadd.f32 %v5115_v12, %v2911_v22 }
 0x464   :  { %3653 = vrsqrt.f32 %v2813_v58 }
 0x465   :  { %2981 = vst [vmem:[#allocation2 + $0x68] sm:$0xff] %v2949_v1 }
 0x468   :  { %v3648_v10 = vpop.eup %3647 }
 0x469   :  { %v2878_v45 = vmul.f32 %v3648_v10, %v5027_v60  ;;  %v2745_v33 = vpop.xlane.xlu1 %2744 }
 0x46a   :  { %v3650_v40 = vpop.eup %3649  ;;  %v2786_v41 = vmul.f32 0.0078125, %v2745_v33 }
 0x46b   :  { %v2916_v38 = vmul.f32 %v5109_v49, %v2878_v45  ;;  %v2879_v5 = vmul.f32 %v3650_v40, %v5030_v48  ;;  %v2747_v43 = vpop.xlane.xlu0 %2746 }
 0x46c   :  { %v3652_v53 = vpop.eup %3651  ;;  %v2818_v61 = vadd.f32 1e-05, %v2786_v41  ;;  %v2787_v27 = vmul.f32 0.0078125, %v2747_v43 }
 0x46d   :  { %v2954_v32 = vadd.f32 %v5115_v12, %v2916_v38  ;;  %v2917_v31 = vmul.f32 %v5109_v49, %v2879_v5  ;;  %v2876_v36 = vmul.f32 %v3652_v53, %v5035_v47  ;;  %v2741_v17 = vpop.xlane.xlu1 %2740 }
 0x46e   :  { %v3654_v16 = vpop.eup %3653  ;;  %3655 = vrsqrt.f32 %v2818_v61  ;;  %v2819_v60 = vadd.f32 1e-05, %v2787_v27  ;;  %v2784_v35 = vmul.f32 0.0078125, %v2741_v17 }
 0x46f   :  { %2986 = vst [vmem:[#allocation2 + $0x90] sm:$0xff] %v2954_v32  ;;  %v2955_v55 = vadd.f32 %v5115_v12, %v2917_v31  ;;  %v2914_v48 = vmul.f32 %v5109_v49, %v2876_v36  ;;  %v2877_v13 = vmul.f32 %v3654_v16, %v5040_v52  ;;  %v2743_v8 = vpop.xlane.xlu0 %2742 }
 0x470   :  { %3657 = vrsqrt.f32 %v2819_v60  ;;  %v2816_v37 = vadd.f32 1e-05, %v2784_v35  ;;  %v2785_v42 = vmul.f32 0.0078125, %v2743_v8 }
 0x471   :  { %2987 = vst [vmem:[#allocation2 + $0x98] sm:$0xff] %v2955_v55  ;;  %v2952_v18 = vadd.f32 %v5115_v12, %v2914_v48  ;;  %v2915_v47 = vmul.f32 %v5109_v49, %v2877_v13 }
 0x472   :  { %3659 = vrsqrt.f32 %v2816_v37  ;;  %v2817_v29 = vadd.f32 1e-05, %v2785_v42 }
 0x473   :  { %2984 = vst [vmem:[#allocation2 + $0x80] sm:$0xff] %v2952_v18  ;;  %v2953_v54 = vadd.f32 %v5115_v12, %v2915_v47 }
 0x474   :  { %3661 = vrsqrt.f32 %v2817_v29 }
 0x475   :  { %2985 = vst [vmem:[#allocation2 + $0x88] sm:$0xff] %v2953_v54 }
 0x477   :  { %v2753_v23 = vpop.xlane.xlu1 %2752 }
 0x478   :  { %v3656_v50 = vpop.eup %3655  ;;  %v2790_v25 = vmul.f32 0.0078125, %v2753_v23 }
 0x479   :  { %v2882_v52 = vmul.f32 %v3656_v50, %v5047_v0  ;;  %v2755_v19 = vpop.xlane.xlu0 %2754 }
 0x47a   :  { %v3658_v11 = vpop.eup %3657  ;;  %v2822_v28 = vadd.f32 1e-05, %v2790_v25  ;;  %v2791_v59 = vmul.f32 0.0078125, %v2755_v19 }
 0x47b   :  { %v2920_v21 = vmul.f32 %v5109_v49, %v2882_v52  ;;  %v2883_v9 = vmul.f32 %v3658_v11, %v5050_v14  ;;  %v2749_v39 = vpop.xlane.xlu1 %2748 }
 0x47c   :  { %v3660_v6 = vpop.eup %3659  ;;  %3663 = vrsqrt.f32 %v2822_v28  ;;  %v2823_v15 = vadd.f32 1e-05, %v2791_v59  ;;  %v2788_v30 = vmul.f32 0.0078125, %v2749_v39 }
 0x47d   :  { %v2958_v20 = vadd.f32 %v5115_v12, %v2920_v21  ;;  %v2921_v3 = vmul.f32 %v5109_v49, %v2883_v9  ;;  %v2880_v34 = vmul.f32 %v3660_v6, %v5055_v4  ;;  %v2751_v0 = vpop.xlane.xlu0 %2750 }
 0x47e   :  { %v3662_v24 = vpop.eup %3661  ;;  %3665 = vrsqrt.f32 %v2823_v15  ;;  %v2820_v46 = vadd.f32 1e-05, %v2788_v30  ;;  %v2789_v22 = vmul.f32 0.0078125, %v2751_v0 }
 0x47f   :  { %2990 = vst [vmem:[#allocation2 + $0xb0] sm:$0xff] %v2958_v20  ;;  %v2959_v58 = vadd.f32 %v5115_v12, %v2921_v3  ;;  %v2918_v14 = vmul.f32 %v5109_v49, %v2880_v34  ;;  %v2881_v1 = vmul.f32 %v3662_v24, %v5060_v51 }
 0x480   :  { %3667 = vrsqrt.f32 %v2820_v46  ;;  %v2821_v10 = vadd.f32 1e-05, %v2789_v22 }
 0x481   :  { %2991 = vst [vmem:[#allocation2 + $0xb8] sm:$0xff] %v2959_v58  ;;  %v2956_v45 = vadd.f32 %v5115_v12, %v2918_v14  ;;  %v2919_v33 = vmul.f32 %v5109_v49, %v2881_v1 }
 0x482   :  { %3669 = vrsqrt.f32 %v2821_v10 }
 0x483   :  { %2988 = vst [vmem:[#allocation2 + $0xa0] sm:$0xff] %v2956_v45  ;;  %v2957_v4 = vadd.f32 %v5115_v12, %v2919_v33 }
 0x485   :  { %2989 = vst [vmem:[#allocation2 + $0xa8] sm:$0xff] %v2957_v4 }
 0x486   :  { %v3664_v40 = vpop.eup %3663 }
 0x487   :  { %v2886_v41 = vmul.f32 %v3664_v40, %v5067_v57 }
 0x488   :  { %v3666_v38 = vpop.eup %3665  ;;  %v2757_v5 = vpop.xlane.xlu1 %2756 }
 0x489   :  { %v2924_v43 = vmul.f32 %v5109_v49, %v2886_v41  ;;  %v2887_v51 = vmul.f32 %v3666_v38, %v5070_v62  ;;  %v2792_v53 = vmul.f32 0.0078125, %v2757_v5 }
 0x48a   :  { %v3668_v61 = vpop.eup %3667  ;;  %v2759_v27 = vpop.xlane.xlu0 %2758 }
 0x48b   :  { %v2962_v32 = vadd.f32 %v5115_v12, %v2924_v43  ;;  %v2925_v31 = vmul.f32 %v5109_v49, %v2887_v51  ;;  %v2884_v36 = vmul.f32 %v3668_v61, %v5075_v44  ;;  %v2824_v17 = vadd.f32 1e-05, %v2792_v53 }
 0x48c   :  { %v3670_v16 = vpop.eup %3669  ;;  %v2793_v60 = vmul.f32 0.0078125, %v2759_v27  ;;  %v2761_v35 = vpop.xlane.xlu1 %2760 }
 0x48d   :  { %2994 = vst [vmem:[#allocation2 + $0xd0] sm:$0xff] %v2962_v32  ;;  %v2963_v57 = vadd.f32 %v5115_v12, %v2925_v31  ;;  %v2922_v55 = vmul.f32 %v5109_v49, %v2884_v36  ;;  %v2885_v62 = vmul.f32 %v3670_v16, %v5080_v56  ;;  %3671 = vrsqrt.f32 %v2824_v17 }
 0x48e   :  { %v2825_v48 = vadd.f32 1e-05, %v2793_v60  ;;  %v2794_v13 = vmul.f32 0.0078125, %v2761_v35  ;;  %v2763_v8 = vpop.xlane.xlu0 %2762 }
 0x48f   :  { %2995 = vst [vmem:[#allocation2 + $0xd8] sm:$0xff] %v2963_v57  ;;  %v2960_v37 = vadd.f32 %v5115_v12, %v2922_v55  ;;  %v2923_v44 = vmul.f32 %v5109_v49, %v2885_v62  ;;  %v2795_v42 = vmul.f32 0.0078125, %v2763_v8 }
 0x490   :  { %3673 = vrsqrt.f32 %v2825_v48  ;;  %v2826_v18 = vadd.f32 1e-05, %v2794_v13 }
 0x491   :  { %2992 = vst [vmem:[#allocation2 + $0xc0] sm:$0xff] %v2960_v37  ;;  %v2961_v47 = vadd.f32 %v5115_v12, %v2923_v44  ;;  %v2827_v29 = vadd.f32 1e-05, %v2795_v42 }
 0x492   :  { %3675 = vrsqrt.f32 %v2826_v18 }
 0x493   :  { %2993 = vst [vmem:[#allocation2 + $0xc8] sm:$0xff] %v2961_v47  ;;  %3677 = vrsqrt.f32 %v2827_v29 }
 0x497   :  { %v3672_v56 = vpop.eup %3671 }
 0x498   :  { %v2888_v54 = vmul.f32 %v3672_v56, %v5087_v7 }
 0x49a   :  { %v3674_v23 = vpop.eup %3673  ;;  %v2926_v50 = vmul.f32 %v5109_v49, %v2888_v54 }
 0x49b   :  { %v2889_v25 = vmul.f32 %v3674_v23, %v5090_v2 }
 0x49c   :  { %v3676_v52 = vpop.eup %3675  ;;  %v2964_v19 = vadd.f32 %v5115_v12, %v2926_v50 }
 0x49d   :  { %v3678_v11 = vpop.eup %3677  ;;  %v2927_v28 = vmul.f32 %v5109_v49, %v2889_v25  ;;  %v2890_v59 = vmul.f32 %v3676_v52, %v5095_v63 }
 0x49e   :  { %2996 = vst [vmem:[#allocation2 + $0xe0] sm:$0xff] %v2964_v19  ;;  %v2891_v21 = vmul.f32 %v3678_v11, %v5100_v26 }
 0x49f   :  { %v2965_v9 = vadd.f32 %v5115_v12, %v2927_v28  ;;  %v2928_v7 = vmul.f32 %v5109_v49, %v2890_v59 }
 0x4a0   :  { %v2929_v39 = vmul.f32 %v5109_v49, %v2891_v21 }
 0x4a1   :  { %2997 = vst [vmem:[#allocation2 + $0xe8] sm:$0xff] %v2965_v9  ;;  %v2966_v2 = vadd.f32 %v5115_v12, %v2928_v7 }
 0x4a2   :  { %v2967_v6 = vadd.f32 %v5115_v12, %v2929_v39 }
 0x4a3   :  { %2998 = vst [vmem:[#allocation2 + $0xf0] sm:$0xff] %v2966_v2 }
 0x4a4   :  { %2999 = vst [vmem:[#allocation2 + $0xf8] sm:$0xff] %v2967_v6 }
 0x4a5   :  { %3707 = shalt.err (!%p3704_p4)
}
 0x4a6   :  { %s3708_s23 = scalar_lea.hbm %s5237_s13, 4096 }
 0x4a7   :  { %p3709_p5 = scmp.ne.s32.totalorder %s5237_s13, %s3708_s23  ;;  %p3712_p6 = scmp.lt.u32.totalorder %s3708_s23, %s5237_s13 }
 0x4a9   :  { %p3714_p7 = pnand %p3712_p6, %p3709_p5 }
 0x4ab   :  { %3717 = shalt.err (!%p3714_p7)
}
 0x4ac   :  { %s3722_s0 = smov 128   ;;  %s3723_s8 = smov 8  }
 0x4ad   :  { %3011 = dma.vmem_to_hbm [thread:$0]  %s3006_s12, 4096, %s5237_s13, [#allocation3], %s3722_s0, %s3722_s0, %s3723_s8  }
 0x4ae   :  { %3718 = dma.done.wait [#allocation3], 4096  }
 0x4af   :  { %3719 = vsyncadd [#allocation3], 4294963200 }
 0x4b0   :  { %3015 = vsyncpa [#allocation3], 1 }

// kernel: gnn_encoder_forward.2
= control target key start
LH: loop header
LB: loop body
LE: loop exit
PB: predicated region body
PF: predicated region fallthrough
CT: control target
= control target key end

     0   :  { %vm2570_vm0 = vcmask 1041409   ;;  %vm2572_vm1 = vcmask 1042434   ;;  %vm2574_vm2 = vcmask 1043459   ;;  %vm2576_vm3 = vcmask 1044484   ;;  %s6181_s4 = inlined_call_operand.vmem [shape: bf16[128,128], index: 4, kind: input, shape index: {}]   ;;  %s6182_s5 = inlined_call_operand.vmem [shape: bf16[256,128], index: 5, kind: input, shape index: {}]   ;;  %s6183_s3 = inlined_call_operand.vmem [shape: f32[32,128], index: 3, kind: input, shape index: {}]   ;;  %s6184_s1 = inlined_call_operand.vmem [shape: bf16[256,128], index: 1, kind: input, shape index: {}]   ;;  %s6185_s0 = inlined_call_operand.vmem [shape: bf16[256,128], index: 0, kind: input, shape index: {}]   ;;  %s6186_s7 = inlined_call_operand.vmem [shape: bf16[128,128], index: 7, kind: input, shape index: {}]   ;;  %s6187_s6 = inlined_call_operand.vmem [shape: f32[1,128], index: 6, kind: input, shape index: {}]   ;;  %s6188_s2 = inlined_call_operand.vmem [shape: f32[32,8], index: 2, kind: input, shape index: {}]   ;;  %s6189_s8 = inlined_call_operand.vmem [shape: f32[1,128], index: 8, kind: input, shape index: {}]   ;;  %s6190_s9 = inlined_call_operand.vmem [shape: bf16[128,128], index: 9, kind: input, shape index: {}]   ;;  %s6191_s10 = inlined_call_operand.vmem [shape: f32[1,128], index: 10, kind: input, shape index: {}]   ;;  %s6192_s13 = inlined_call_operand.vmem [shape: bf16[128,512], index: 13, kind: input, shape index: {}]   ;;  %s6193_s11 = inlined_call_operand.vmem [shape: f32[1,128], index: 11, kind: input, shape index: {}]   ;;  %s6194_s12 = inlined_call_operand.vmem [shape: f32[1,128], index: 12, kind: input, shape index: {}]   ;;  %s6195_s15 = inlined_call_operand.vmem [shape: bf16[512,128], index: 15, kind: input, shape index: {}]   ;;  %s6196_s14 = inlined_call_operand.vmem [shape: f32[1,512], index: 14, kind: input, shape index: {}]   ;;  %s6197_s16 = inlined_call_operand.vmem [shape: f32[1,128], index: 16, kind: input, shape index: {}]   ;;  %s6198_s17 = inlined_call_operand.vmem [shape: f32[1,128], index: 17, kind: input, shape index: {}]   ;;  %s6199_s18 = inlined_call_operand.vmem [shape: f32[1,128], index: 18, kind: input, shape index: {}]   ;;  %s6200_s19 = inlined_call_operand.vmem [shape: f32[32,128], index: 19, kind: output, shape index: {}]  }
   0x1   :  { %6206 = sst [smem:[#allocation2_spill]] %s6181_s4  ;;  %v4161_v31 = vld [vmem:[%s6185_s0] sm:$0xff]   ;;  %v4163_v33 = vld [vmem:[%s6185_s0 + $0x8] sm:$0xff]   ;;  %v4165_v35 = vld [vmem:[%s6185_s0 + $0x10] sm:$0xff]   ;;  %vm2578_vm4 = vcmask 1045509   ;;  %vm2580_vm5 = vcmask 1046534  }
   0x2   :  { %6207 = sst [smem:[#allocation3_spill]] %s6182_s5  ;;  %s6211_s20 = sld [smem:[#allocation2_spill]]  ;;  %v4167_v37 = vld [vmem:[%s6185_s0 + $0x18] sm:$0xff]   ;;  %v4169_v39 = vld [vmem:[%s6185_s0 + $0x20] sm:$0xff]   ;;  %v4171_v41 = vld [vmem:[%s6185_s0 + $0x28] sm:$0xff]   ;;  %vm2582_vm6 = vcmask 1047559  }
   0x3   :  { %6208 = sst [smem:[#allocation4_spill]] %s6183_s3  ;;  %v4173_v43 = vld [vmem:[%s6185_s0 + $0x30] sm:$0xff]   ;;  %v4175_v45 = vld [vmem:[%s6185_s0 + $0x38] sm:$0xff]   ;;  %v4177_v47 = vld [vmem:[%s6185_s0 + $0x40] sm:$0xff]   ;;  %vm2434_vm7 = vcmask 64512  }
   0x4   :  { %6209 = sst [smem:[#allocation5_spill]] %s6184_s1  ;;  %s6213_s22 = sld [smem:[#allocation4_spill]]  ;;  %v4179_v49 = vld [vmem:[%s6185_s0 + $0x48] sm:$0xff]   ;;  %v4181_v51 = vld [vmem:[%s6185_s0 + $0x50] sm:$0xff]   ;;  %v4183_v53 = vld [vmem:[%s6185_s0 + $0x58] sm:$0xff]  }
   0x5   :  { %6210 = sst [smem:[#allocation6_spill]] %s6195_s15  ;;  %s6212_s15 = sld [smem:[#allocation3_spill]]  ;;  %v4185_v55 = vld [vmem:[%s6185_s0 + $0x60] sm:$0xff]   ;;  %v4187_v57 = vld [vmem:[%s6185_s0 + $0x68] sm:$0xff]   ;;  %v4194_v61 = vld [vmem:[%s6186_s7 + $0x10] sm:$0xff]  }
   0x6   :  { %s6214_s27 = sld [smem:[#allocation5_spill]]  ;;  %v4192_v58 = vld [vmem:[%s6186_s7] sm:$0xff]   ;;  %v4193_v60 = vld [vmem:[%s6186_s7 + $0x8] sm:$0xff]   ;;  %v4189_v62 = vld [vmem:[%s6185_s0 + $0x70] sm:$0xff]   ;;  %s6215_s21 = sld [smem:[#allocation6_spill]] }
   0x8   :  { %v4136_v0 = vld [vmem:[%s6211_s20] sm:$0xff]   ;;  %v4139_v3 = vld [vmem:[%s6211_s20 + $0x8] sm:$0xff]   ;;  %v4142_v6 = vld [vmem:[%s6211_s20 + $0x10] sm:$0xff]  }
   0x9   :  { %4046 = vmatprep.subr.bf16.mxu0 %v4136_v0  ;;  %v4145_v9 = vld [vmem:[%s6211_s20 + $0x18] sm:$0xff]   ;;  %v4148_v12 = vld [vmem:[%s6211_s20 + $0x20] sm:$0xff]   ;;  %v4151_v15 = vld [vmem:[%s6211_s20 + $0x28] sm:$0xff]  }
   0xa   :  { %4047 = vmatpush3.bf16.msra.mxu0 %v4136_v0  ;;  %v4154_v18 = vld [vmem:[%s6211_s20 + $0x30] sm:$0xff]   ;;  %v4157_v21 = vld [vmem:[%s6211_s20 + $0x38] sm:$0xff]   ;;  %v63_v22 = vld [vmem:[%s6213_s22] sm:$0xff] }
   0xb   :  { %v4137_v1 = vld [vmem:[%s6212_s15 + $0x40] sm:$0xff]   ;;  %v4140_v4 = vld [vmem:[%s6212_s15 + $0x48] sm:$0xff]   ;;  %4048 = vmatprep.subr.bf16.mxu0 %v4139_v3  ;;  %v4143_v7 = vld [vmem:[%s6212_s15 + $0x50] sm:$0xff]  }
   0xc   :  { %v4138_v2 = vld [vmem:[%s6212_s15] sm:$0xff]   ;;  %3844 = vmatprep.subr.bf16.mxu1 %v4137_v1  ;;  %v4141_v5 = vld [vmem:[%s6212_s15 + $0x8] sm:$0xff]   ;;  %v4144_v8 = vld [vmem:[%s6212_s15 + $0x10] sm:$0xff]  }
   0xd   :  { %3845 = vmatpush3.bf16.msra.mxu1 %v4138_v2  ;;  %v4146_v10 = vld [vmem:[%s6212_s15 + $0x58] sm:$0xff]   ;;  %v4149_v13 = vld [vmem:[%s6212_s15 + $0x60] sm:$0xff]   ;;  %v4152_v16 = vld [vmem:[%s6212_s15 + $0x68] sm:$0xff]  }
   0xe   :  { %3846 = vmatprep.subr.bf16.mxu1 %v4140_v4  ;;  %4049 = vmatpush3.bf16.msra.mxu0 %v4139_v3  ;;  %v4147_v11 = vld [vmem:[%s6212_s15 + $0x18] sm:$0xff]   ;;  %v4150_v14 = vld [vmem:[%s6212_s15 + $0x20] sm:$0xff]   ;;  %v4153_v17 = vld [vmem:[%s6212_s15 + $0x28] sm:$0xff]  }
   0xf   :  { %4050 = vmatprep.subr.bf16.mxu0 %v4142_v6  ;;  %v4155_v19 = vld [vmem:[%s6212_s15 + $0x70] sm:$0xff]   ;;  %v64_v23 = vld [vmem:[%s6213_s22 + $0x8] sm:$0xff]  ;;  %v4158_v24 = vld [vmem:[%s6212_s15 + $0x78] sm:$0xff]  }
  0x10   :  { %v4156_v20 = vld [vmem:[%s6212_s15 + $0x30] sm:$0xff]   ;;  %v71_v25 = vpack.c.bf16 %v64_v23, %v63_v22  ;;  %v4160_v26 = vld [vmem:[%s6214_s27] sm:$0xff]   ;;  %v66_v28 = vld [vmem:[%s6213_s22 + $0x18] sm:$0xff] }
  0x11   :  { %3847 = vmatpush3.bf16.msra.mxu1 %v4141_v5  ;;  %v65_v27 = vld [vmem:[%s6213_s22 + $0x10] sm:$0xff]  ;;  %v4159_v29 = vld [vmem:[%s6212_s15 + $0x38] sm:$0xff]   ;;  %602 = vmatprep.mubr.bf16.mxu1 %v4160_v26  ;;  %v4162_v32 = vld [vmem:[%s6214_s27 + $0x8] sm:$0xff]  }
  0x12   :  { %3848 = vmatprep.subr.bf16.mxu1 %v4143_v7  ;;  %4051 = vmatpush3.bf16.msra.mxu0 %v4142_v6  ;;  %v72_v30 = vpack.c.bf16 %v66_v28, %v65_v27  ;;  %v4164_v34 = vld [vmem:[%s6214_s27 + $0x10] sm:$0xff]   ;;  %v4166_v36 = vld [vmem:[%s6214_s27 + $0x18] sm:$0xff]   ;;  %v4168_v38 = vld [vmem:[%s6214_s27 + $0x20] sm:$0xff]   ;;  %v4474_v6 = vmov 1966171168  }
  0x13   :  { %4052 = vmatprep.subr.bf16.mxu0 %v4145_v9  ;;  %4062 = vmatprep.mubr.bf16.mxu0 %v71_v25  ;;  %v4170_v40 = vld [vmem:[%s6214_s27 + $0x28] sm:$0xff]   ;;  %v4172_v42 = vld [vmem:[%s6214_s27 + $0x30] sm:$0xff]   ;;  %v4174_v44 = vld [vmem:[%s6214_s27 + $0x38] sm:$0xff]   ;;  %v737_v7 = vunpack.c.l.s4 %v4474_v6 }
  0x14   :  { %v4176_v46 = vld [vmem:[%s6214_s27 + $0x40] sm:$0xff]   ;;  %v4178_v48 = vld [vmem:[%s6214_s27 + $0x48] sm:$0xff]   ;;  %v4180_v50 = vld [vmem:[%s6214_s27 + $0x50] sm:$0xff]  }
  0x15   :  { %3849 = vmatpush3.bf16.msra.mxu1 %v4144_v8  ;;  %v4182_v52 = vld [vmem:[%s6214_s27 + $0x58] sm:$0xff]   ;;  %v4184_v54 = vld [vmem:[%s6214_s27 + $0x60] sm:$0xff]   ;;  %v4186_v56 = vld [vmem:[%s6214_s27 + $0x68] sm:$0xff]   ;;  %v739_v8 = vlaneseq }
  0x16   :  { %3850 = vmatprep.subr.bf16.mxu1 %v4146_v10  ;;  %4053 = vmatpush3.bf16.msra.mxu0 %v4145_v9  ;;  %v4188_v59 = vld [vmem:[%s6214_s27 + $0x70] sm:$0xff]   ;;  %v4190_v63 = vld [vmem:[%s6214_s27 + $0x78] sm:$0xff]   ;;  %v4196_v1 = vld [vmem:[%s6186_s7 + $0x20] sm:$0xff]   ;;  %v738_v9 = vunpack.c.0.s8 %v737_v7 }
  0x17   :  { %4054 = vmatprep.subr.bf16.mxu0 %v4148_v12  ;;  %v4195_v0 = vld [vmem:[%s6186_s7 + $0x18] sm:$0xff]   ;;  %v4197_v3 = vld [vmem:[%s6186_s7 + $0x28] sm:$0xff]   ;;  %v4198_v4 = vld [vmem:[%s6186_s7 + $0x30] sm:$0xff]   ;;  %v4780_v10 = vshrl.u32 %v739_v8, 7 }
  0x18   :  { %v4191_v2 = vld [vmem:[%s6185_s0 + $0x78] sm:$0xff]  }
  0x19   :  { %3851 = vmatpush3.bf16.msra.mxu1 %v4147_v11  ;;  %v4199_v5 = vld [vmem:[%s6186_s7 + $0x38] sm:$0xff]   ;;  %v4783_v11 = vsub.s32 %v738_v9, %v4780_v10 }
  0x1a   :  { %3852 = vmatprep.subr.bf16.mxu1 %v4149_v13  ;;  %4055 = vmatpush3.bf16.msra.mxu0 %v4148_v12 }
  0x1b   :  { %4056 = vmatprep.subr.bf16.mxu0 %v4151_v15 }
  0x1d   :  { %3853 = vmatpush3.bf16.msra.mxu1 %v4150_v14 }
  0x1e   :  { %3854 = vmatprep.subr.bf16.mxu1 %v4152_v16  ;;  %4057 = vmatpush3.bf16.msra.mxu0 %v4151_v15 }
  0x1f   :  { %4058 = vmatprep.subr.bf16.mxu0 %v4154_v18 }
  0x21   :  { %3855 = vmatpush3.bf16.msra.mxu1 %v4153_v17  ;;  %v4787_v17 = vsub.s32 0, %v4780_v10 }
  0x22   :  { %3856 = vmatprep.subr.bf16.mxu1 %v4155_v19  ;;  %4059 = vmatpush3.bf16.msra.mxu0 %v4154_v18 }
  0x23   :  { %4060 = vmatprep.subr.bf16.mxu0 %v4157_v21 }
  0x25   :  { %3857 = vmatpush3.bf16.msra.mxu1 %v4156_v20 }
  0x26   :  { %3858 = vmatprep.subr.bf16.mxu1 %v4158_v24  ;;  %4061 = vmatpush3.bf16.msra.mxu0 %v4157_v21 }
  0x27   :  { %4066 = vmatprep.subr.bf16.mxu0 %v4192_v58 }
  0x29   :  { %3859 = vmatpush3.bf16.msra.mxu1 %v4159_v29  ;;  %4063 = vmatmul.mubr.bf16.vlgmr.msra.gmra.mrb[0].mxu0 %v72_v30 }
  0x2a   :  { %4067 = vmatpush3.bf16.msra.mxu0 %v4192_v58 }
  0x2b   :  { %4068 = vmatprep.subr.bf16.mxu0 %v4193_v60 }
  0x2c   :  { %603 = vmatmul.mubr.bf16.vlgmr.msra.gmra.mrb[0].mxu1 %v4161_v31 }
  0x2d   :  { %610 = vmatprep.mubr.bf16.mxu1 %v4162_v32 }
  0x2e   :  { %4069 = vmatpush3.bf16.msra.mxu0 %v4193_v60 }
  0x2f   :  { %4070 = vmatprep.subr.bf16.mxu0 %v4194_v61 }
  0x32   :  { %4071 = vmatpush3.bf16.msra.mxu0 %v4194_v61 }
  0x33   :  { %4072 = vmatprep.subr.bf16.mxu0 %v4195_v0 }
  0x34   :  { %611 = vmatmul.mubr.bf16.gmra.mrb[4].mxu1 %v4163_v33 }
  0x35   :  { %618 = vmatprep.mubr.bf16.mxu1 %v4164_v34 }
  0x36   :  { %4073 = vmatpush3.bf16.msra.mxu0 %v4195_v0 }
  0x37   :  { %4074 = vmatprep.subr.bf16.mxu0 %v4196_v1 }
  0x3a   :  { %4075 = vmatpush3.bf16.msra.mxu0 %v4196_v1 }
  0x3b   :  { %4076 = vmatprep.subr.bf16.mxu0 %v4197_v3 }
  0x3c   :  { %619 = vmatmul.mubr.bf16.gmra.mrb[8].mxu1 %v4165_v35 }
  0x3d   :  { %626 = vmatprep.mubr.bf16.mxu1 %v4166_v36 }
  0x3e   :  { %4077 = vmatpush3.bf16.msra.mxu0 %v4197_v3 }
  0x3f   :  { %4078 = vmatprep.subr.bf16.mxu0 %v4198_v4 }
  0x42   :  { %4079 = vmatpush3.bf16.msra.mxu0 %v4198_v4 }
  0x43   :  { %4080 = vmatprep.subr.bf16.mxu0 %v4199_v5 }
  0x44   :  { %627 = vmatmul.mubr.bf16.gmra.mrb[12].mxu1 %v4167_v37 }
  0x45   :  { %634 = vmatprep.mubr.bf16.mxu1 %v4168_v38 }
  0x46   :  { %4081 = vmatpush3.bf16.msra.mxu0 %v4199_v5 }
  0x4c   :  { %635 = vmatmul.mubr.bf16.gmra.mrb[16].mxu1 %v4169_v39 }
  0x4d   :  { %642 = vmatprep.mubr.bf16.mxu1 %v4170_v40 }
  0x54   :  { %643 = vmatmul.mubr.bf16.gmra.mrb[20].mxu1 %v4171_v41  ;;  %v4816_v41 = vld [vmem:[%s6187_s6] ss:$0 sm:$0xff] }
  0x55   :  { %650 = vmatprep.mubr.bf16.mxu1 %v4172_v42 }
  0x5c   :  { %651 = vmatmul.mubr.bf16.gmra.mrb[24].mxu1 %v4173_v43 }
  0x5d   :  { %658 = vmatprep.mubr.bf16.mxu1 %v4174_v44 }
  0x64   :  { %659 = vmatmul.mubr.bf16.gmra.mrb[28].mxu1 %v4175_v45 }
  0x65   :  { %666 = vmatprep.mubr.bf16.mxu1 %v4176_v46 }
  0x6c   :  { %667 = vmatmul.mubr.bf16.gmra.mrb[32].mxu1 %v4177_v47 }
  0x6d   :  { %674 = vmatprep.mubr.bf16.mxu1 %v4178_v48 }
  0x74   :  { %675 = vmatmul.mubr.bf16.gmra.mrb[36].mxu1 %v4179_v49 }
  0x75   :  { %682 = vmatprep.mubr.bf16.mxu1 %v4180_v50 }
  0x7c   :  { %683 = vmatmul.mubr.bf16.gmra.mrb[40].mxu1 %v4181_v51 }
  0x7d   :  { %690 = vmatprep.mubr.bf16.mxu1 %v4182_v52 }
  0x84   :  { %691 = vmatmul.mubr.bf16.gmra.mrb[44].mxu1 %v4183_v53 }
  0x85   :  { %698 = vmatprep.mubr.bf16.mxu1 %v4184_v54 }
  0x8c   :  { %699 = vmatmul.mubr.bf16.gmra.mrb[48].mxu1 %v4185_v55 }
  0x8d   :  { %706 = vmatprep.mubr.bf16.mxu1 %v4186_v56 }
  0x94   :  { %707 = vmatmul.mubr.bf16.gmra.mrb[52].mxu1 %v4187_v57 }
  0x95   :  { %714 = vmatprep.mubr.bf16.mxu1 %v4188_v59 }
  0x9c   :  { %715 = vmatmul.mubr.bf16.gmra.mrb[56].mxu1 %v4189_v62 }
  0x9d   :  { %722 = vmatprep.mubr.bf16.mxu1 %v4190_v63 }
  0xa4   :  { %723 = vmatmul.mubr.bf16.gmra.mrb[60].mxu1 %v4191_v2 }
  0xfc   :  { %v4064_v12 = vpop.f32.mrb[0].mxu0 }
  0xfd   :  { %v833_v13 = vcombine.high %v4064_v12, %v4064_v12  ;;  %v840_v14 = vrot.slane %v4064_v12, %v4783_v11  ;;  %v171_v16 = vpop.f32.mrb[1].mxu0 }
  0xfe   :  { %v735_v18 = vcombine.high %v171_v16, %v171_v16  ;;  %v742_v19 = vrot.slane %v171_v16, %v4783_v11  ;;  %v4065_v21 = vpop.f32.mrb[2].mxu0 }
  0xff   :  { %v3860_v15 = vpop.f32.mrb[0].mxu1  ;;  %v4791_v22 = vrot.slane %v833_v13, %v4783_v11  ;;  %v848_v23 = vcombine.high %v840_v14, %v840_v14  ;;  %v4794_v24 = vrot.slane %v840_v14, %v4783_v11  ;;  %v4796_v27 = vpop.f32.mrb[3].mxu0  ;;  %v882_v31 = vcombine.high %v4065_v21, %v4065_v21 }
 0x100   :  { %v3861_v20 = vpop.f32.mrb[1].mxu1  ;;  %v750_v28 = vcombine.high %v742_v19, %v742_v19  ;;  %v758_v29 = vrot.slane %v742_v19, %v4783_v11  ;;  %v749_v34 = vrot.slane %v735_v18, %v4783_v11  ;;  %v889_v39 = vrot.slane %v4065_v21, %v4783_v11 }
 0x101   :  { %v3862_v25 = vadd.f32 %v3861_v20, %v3860_v15  ;;  %v3863_v26 = vpop.f32.mrb[2].mxu1  ;;  %v4801_v32 = vrot.slane %v4791_v22, %v4783_v11  ;;  %v4804_v33 = vrot.slane %v848_v23, %v4783_v11  ;;  %v4811_v40 = vrot.slane %v882_v31, %v4783_v11 }
 0x102   :  { %v3864_v30 = vpop.f32.mrb[3].mxu1  ;;  %v772_v35 = vrot.slane %v750_v28, %v4783_v11  ;;  %v780_v36 = vcombine.high %v758_v29, %v758_v29  ;;  %v934_v37 = vrot.slane %v758_v29, %v4787_v17  ;;  %v897_v47 = vcombine.high %v889_v39, %v889_v39 }
 0x103   :  { %v3865_v38 = vadd.f32 %v3864_v30, %v3863_v26  ;;  %v4821_v50 = vrot.slane %v889_v39, %v4783_v11  ;;  %v751_v51 = vcombine.high %v749_v34, %v749_v34  ;;  %v4832_v58 = vrot.slane %v4811_v40, %v4783_v11 }
 0x104   :  { %v938_v42 = vrot.slane %v772_v35, %v4787_v17  ;;  %v782_v43 = vcombine.high %v772_v35, %v772_v35  ;;  %v1091_v44 = vadd.f32 %v3862_v25, %v934_v37  ;;  %v942_v46 = vrot.slane %v780_v36, %v4787_v17 }
 0x105   :  { %v4835_v59 = vrot.slane %v897_v47, %v4783_v11  ;;  %v765_v60 = vrot.slane %v749_v34, %v4783_v11  ;;  %v779_v4 = vrot.slane %v751_v51, %v4783_v11  ;;  %v791_v34 = vrot.slane %v4796_v27, %v4783_v11 }
 0x106   :  { %v1092_v48 = vadd.f32 %v3865_v38, %v938_v42  ;;  %v4824_v52 = vadd.f32 %v4816_v41, %v1091_v44  ;;  %v946_v55 = vrot.slane %v782_v43, %v4787_v17  ;;  %v849_v43 = vcombine.high %v4791_v22, %v4791_v22 }
 0x107   :  { %v3866_v45 = vpop.f32.mrb[4].mxu1  ;;  %v950_v12 = vrot.slane %v765_v60, %v4787_v17  ;;  %v954_v20 = vrot.slane %v779_v4, %v4787_v17  ;;  %v781_v23 = vcombine.high %v765_v60, %v765_v60  ;;  %v783_v31 = vcombine.high %v779_v4, %v779_v4 }
 0x108   :  { %v3867_v49 = vpop.f32.mrb[5].mxu1  ;;  %v4828_v56 = vadd.f32 %v4816_v41, %v1092_v48  ;;  %v1162_v61 = vmul.f32 %v4824_v52, %v4824_v52  ;;  %v784_v22 = vcombine.high %v4796_v27, %v4796_v27 }
 0x109   :  { %v3868_v53 = vadd.f32 %v3867_v49, %v3866_v45  ;;  %v3869_v54 = vpop.f32.mrb[6].mxu1  ;;  %v958_v44 = vrot.slane %v781_v23, %v4787_v17 }
 0x10a   :  { %v3870_v57 = vpop.f32.mrb[7].mxu1  ;;  %v1163_v0 = vmul.f32 %v4828_v56, %v4828_v56  ;;  %v1194_v1 = vmul.f32 %v1162_v61, %v4824_v52 }
 0x10b   :  { %v1093_v62 = vadd.f32 %v3868_v53, %v942_v46  ;;  %v3871_v63 = vadd.f32 %v3870_v57, %v3869_v54  ;;  %v962_v54 = vrot.slane %v783_v31, %v4787_v17 }
 0x10c   :  { %v1195_v5 = vmul.f32 %v1163_v0, %v4828_v56  ;;  %v1226_v6 = vmul.f32 0.044715, %v1194_v1  ;;  %v807_v1 = vrot.slane %v791_v34, %v4783_v11 }
 0x10d   :  { %v4844_v2 = vadd.f32 %v4816_v41, %v1093_v62  ;;  %v1094_v3 = vadd.f32 %v3871_v63, %v946_v55  ;;  %v799_v55 = vcombine.high %v791_v34, %v791_v34 }
 0x10e   :  { %v1227_v13 = vmul.f32 0.044715, %v1195_v5  ;;  %v1258_v25 = vadd.f32 %v1226_v6, %v4824_v52  ;;  %v798_v6 = vrot.slane %v784_v22, %v4783_v11 }
 0x10f   :  { %v1164_v7 = vmul.f32 %v4844_v2, %v4844_v2  ;;  %v4851_v8 = vadd.f32 %v4816_v41, %v1094_v3  ;;  %v3872_v9 = vpop.f32.mrb[8].mxu1 }
 0x110   :  { %v3873_v14 = vpop.f32.mrb[9].mxu1  ;;  %v1259_v35 = vadd.f32 %v1227_v13, %v4828_v56  ;;  %v1290_v36 = vmul.f32 0.7978846, %v1258_v25  ;;  %v966_v25 = vrot.slane %v807_v1, %v4787_v17  ;;  %v800_v31 = vcombine.high %v798_v6, %v798_v6 }
 0x111   :  { %v1196_v15 = vmul.f32 %v1164_v7, %v4844_v2  ;;  %v1165_v16 = vmul.f32 %v4851_v8, %v4851_v8  ;;  %v3874_v18 = vadd.f32 %v3873_v14, %v3872_v9  ;;  %v3875_v19 = vpop.f32.mrb[10].mxu1  ;;  %v821_v7 = vrot.slane %v799_v55, %v4783_v11 }
 0x112   :  { %v3876_v21 = vpop.f32.mrb[11].mxu1  ;;  %v1291_v45 = vmul.f32 0.7978846, %v1259_v35  ;;  %4288 = vtanh.f32 %v1290_v36  ;;  %v4887_v9 = vrot.slane %v849_v43, %v4783_v11  ;;  %v4907_v34 = vrot.slane %v798_v6, %v4783_v11 }
 0x113   :  { %v1228_v26 = vmul.f32 0.044715, %v1196_v15  ;;  %v1197_v28 = vmul.f32 %v1165_v16, %v4851_v8  ;;  %v1095_v29 = vadd.f32 %v3874_v18, %v950_v12  ;;  %v3877_v30 = vadd.f32 %v3876_v21, %v3875_v19 }
 0x114   :  { %4290 = vtanh.f32 %v1291_v45  ;;  %v878_v12 = vcombine.high %v4794_v24, %v4794_v24  ;;  %v898_v18 = vcombine.high %v4811_v40, %v4811_v40  ;;  %v927_v19 = vcombine.high %v4821_v50, %v4821_v50 }
 0x115   :  { %v1260_v37 = vadd.f32 %v1228_v26, %v4844_v2  ;;  %v1229_v38 = vmul.f32 0.044715, %v1197_v28  ;;  %v4865_v39 = vadd.f32 %v4816_v41, %v1095_v29  ;;  %v1096_v42 = vadd.f32 %v3877_v30, %v954_v20 }
 0x116   :  { %v829_v20 = vcombine.high %v807_v1, %v807_v1  ;;  %v970_v36 = vrot.slane %v821_v7, %v4787_v17  ;;  %v830_v40 = vcombine.high %v4907_v34, %v4907_v34 }
 0x117   :  { %v1292_v46 = vmul.f32 0.7978846, %v1260_v37  ;;  %v1261_v47 = vadd.f32 %v1229_v38, %v4851_v8  ;;  %v1166_v48 = vmul.f32 %v4865_v39, %v4865_v39  ;;  %v4874_v49 = vadd.f32 %v4816_v41, %v1096_v42  ;;  %v3878_v51 = vpop.f32.mrb[12].mxu1 }
 0x118   :  { %v3879_v53 = vpop.f32.mrb[13].mxu1 }
 0x119   :  { %4292 = vtanh.f32 %v1292_v46  ;;  %v1293_v57 = vmul.f32 0.7978846, %v1261_v47  ;;  %v1198_v60 = vmul.f32 %v1166_v48, %v4865_v39  ;;  %v1167_v61 = vmul.f32 %v4874_v49, %v4874_v49  ;;  %v3881_v62 = vpop.f32.mrb[14].mxu1 }
 0x11a   :  { %v3880_v63 = vadd.f32 %v3879_v53, %v3878_v51  ;;  %v3882_v0 = vpop.f32.mrb[15].mxu1  ;;  %v974_v48 = vrot.slane %v829_v20, %v4787_v17  ;;  %v831_v51 = vcombine.high %v821_v7, %v821_v7 }
 0x11b   :  { %4294 = vtanh.f32 %v1293_v57  ;;  %v1230_v3 = vmul.f32 0.044715, %v1198_v60  ;;  %v1199_v4 = vmul.f32 %v1167_v61, %v4874_v49  ;;  %v3883_v5 = vadd.f32 %v3882_v0, %v3881_v62 }
 0x11c   :  { %v1097_v27 = vadd.f32 %v3880_v63, %v958_v44  ;;  %v4289_v29 = vpop.eup %4288 }
 0x11d   :  { %v1231_v13 = vmul.f32 0.044715, %v1199_v4  ;;  %v1098_v14 = vadd.f32 %v3883_v5, %v962_v54  ;;  %v1262_v15 = vadd.f32 %v1230_v3, %v4865_v39  ;;  %v1354_v43 = vadd.f32 1.0, %v4289_v29 }
 0x11e   :  { %v4893_v16 = vadd.f32 %v4816_v41, %v1097_v27  ;;  %v4291_v45 = vpop.eup %4290 }
 0x11f   :  { %v4900_v21 = vadd.f32 %v4816_v41, %v1098_v14  ;;  %v3884_v23 = vpop.f32.mrb[16].mxu1  ;;  %v1263_v26 = vadd.f32 %v1231_v13, %v4874_v49  ;;  %v1294_v28 = vmul.f32 0.7978846, %v1262_v15  ;;  %v1355_v57 = vadd.f32 1.0, %v4291_v45 }
 0x120   :  { %v1168_v30 = vmul.f32 %v4893_v16, %v4893_v16  ;;  %v3885_v35 = vpop.f32.mrb[17].mxu1  ;;  %v1386_v61 = vmul.f32 0.5, %v1354_v43 }
 0x121   :  { %v1169_v37 = vmul.f32 %v4900_v21, %v4900_v21  ;;  %v3886_v38 = vadd.f32 %v3885_v35, %v3884_v23  ;;  %v3887_v42 = vpop.f32.mrb[18].mxu1  ;;  %v1295_v44 = vmul.f32 0.7978846, %v1263_v26  ;;  %4296 = vtanh.f32 %v1294_v28 }
 0x122   :  { %v1200_v46 = vmul.f32 %v1168_v30, %v4893_v16  ;;  %v3888_v47 = vpop.f32.mrb[19].mxu1  ;;  %v1387_v4 = vmul.f32 0.5, %v1355_v57  ;;  %v1418_v5 = vmul.f32 %v1386_v61, %v4824_v52  ;;  %v978_v26 = vrot.slane %v831_v51, %v4787_v17  ;;  %v4951_v57 = vld [vmem:[%s6188_s2] sm:$0xff] }
 0x123   :  { %v4293_v53 = vpop.eup %4292  ;;  %v1201_v54 = vmul.f32 %v1169_v37, %v4900_v21  ;;  %v1099_v22 = vadd.f32 %v3886_v38, %v966_v25  ;;  %v3889_v55 = vadd.f32 %v3888_v47, %v3887_v42  ;;  %4298 = vtanh.f32 %v1295_v44 }
 0x124   :  { %v1232_v60 = vmul.f32 0.044715, %v1200_v46  ;;  %v1356_v62 = vadd.f32 1.0, %v4293_v53  ;;  %v1419_v20 = vmul.f32 %v1387_v4, %v4828_v56  ;;  %v4929_v52 = vrot.slane %v800_v31, %v4783_v11 }
 0x125   :  { %v4295_v63 = vpop.eup %4294  ;;  %v1233_v0 = vmul.f32 0.044715, %v1201_v54  ;;  %v4916_v1 = vadd.f32 %v4816_v41, %v1099_v22  ;;  %v1100_v3 = vadd.f32 %v3889_v55, %v970_v36  ;;  %v998_v54 = vrot.slane %v4794_v24, %v4787_v17 }
 0x126   :  { %v1357_v27 = vadd.f32 1.0, %v4295_v63  ;;  %v1388_v6 = vmul.f32 0.5, %v1356_v62  ;;  %v1264_v7 = vadd.f32 %v1232_v60, %v4893_v16  ;;  %v1450_v38 = vpack.c.bf16 %v1419_v20, %v1418_v5 }
 0x127   :  { %v1170_v13 = vmul.f32 %v4916_v1, %v4916_v1  ;;  %v4923_v14 = vadd.f32 %v4816_v41, %v1100_v3  ;;  %v3890_v15 = vpop.f32.mrb[20].mxu1  ;;  %v1265_v23 = vadd.f32 %v1233_v0, %v4900_v21  ;;  %v982_v61 = vrot.slane %v4907_v34, %v4787_v17 }
 0x128   :  { %v3891_v25 = vpop.f32.mrb[21].mxu1  ;;  %v1389_v28 = vmul.f32 0.5, %v1357_v27  ;;  %v1296_v29 = vmul.f32 0.7978846, %v1264_v7  ;;  %v1420_v56 = vmul.f32 %v1388_v6, %v4844_v2  ;;  %4082 = vmatprep.mubr.bf16.mxu0 %v1450_v38  ;;  %v4943_v2 = vrot.slane %v898_v18, %v4783_v11 }
 0x129   :  { %v1202_v30 = vmul.f32 %v1170_v13, %v4916_v1  ;;  %v1171_v35 = vmul.f32 %v4923_v14, %v4923_v14  ;;  %v3892_v36 = vadd.f32 %v3891_v25, %v3890_v15  ;;  %v3893_v37 = vpop.f32.mrb[22].mxu1  ;;  %v1297_v44 = vmul.f32 0.7978846, %v1265_v23 }
 0x12a   :  { %v3894_v42 = vpop.f32.mrb[23].mxu1  ;;  %v1421_v43 = vmul.f32 %v1389_v28, %v4851_v8  ;;  %4300 = vtanh.f32 %v1296_v29  ;;  %v986_v11 = vrot.slane %v4929_v52, %v4787_v17  ;;  %v832_v27 = vcombine.high %v4929_v52, %v4929_v52 }
 0x12b   :  { %v1234_v45 = vmul.f32 0.044715, %v1202_v30  ;;  %v1203_v31 = vmul.f32 %v1171_v35, %v4923_v14  ;;  %v1101_v46 = vadd.f32 %v3892_v36, %v974_v48  ;;  %v3895_v47 = vadd.f32 %v3894_v42, %v3893_v37  ;;  %v4297_v51 = vpop.eup %4296 }
 0x12c   :  { %v1451_v53 = vpack.c.bf16 %v1421_v43, %v1420_v56  ;;  %4302 = vtanh.f32 %v1297_v44  ;;  %v1358_v48 = vadd.f32 1.0, %v4297_v51  ;;  %v1989_v34 = vrot.slane %v4951_v57, %v4787_v17 }
 0x12d   :  { %v1235_v8 = vmul.f32 0.044715, %v1203_v31  ;;  %v4946_v22 = vadd.f32 %v4816_v41, %v1101_v46  ;;  %v1102_v55 = vadd.f32 %v3895_v47, %v978_v26  ;;  %v4299_v60 = vpop.eup %4298  ;;  %v1266_v18 = vadd.f32 %v1234_v45, %v4916_v1 }
 0x12e   :  { %4083 = vmatmul.mubr.bf16.vlgmr.msra.gmra.mrb[4].mxu0 %v1451_v53  ;;  %v1359_v3 = vadd.f32 1.0, %v4299_v60  ;;  %v1390_v4 = vmul.f32 0.5, %v1358_v48  ;;  %1991 = vbcast.lane.b32.xlu0 %v1989_v34, 256  ;;  %v4975_v52 = vsub.s32 1, %v4780_v10  ;;  %v1002_v51 = vrot.slane %v4804_v33, %v4787_v17 }
 0x12f   :  { %v1172_v62 = vmul.f32 %v4946_v22, %v4946_v22  ;;  %v4963_v63 = vadd.f32 %v4816_v41, %v1102_v55  ;;  %v3896_v0 = vpop.f32.mrb[24].mxu1  ;;  %v1267_v6 = vadd.f32 %v1235_v8, %v4923_v14  ;;  %v1298_v7 = vmul.f32 0.7978846, %v1266_v18 }
 0x130   :  { %v3897_v5 = vpop.f32.mrb[25].mxu1  ;;  %v1391_v25 = vmul.f32 0.5, %v1359_v3  ;;  %v1422_v28 = vmul.f32 %v1390_v4, %v4865_v39  ;;  %v1996_v56 = vrot.slane %v4951_v57, %v4975_v52  ;;  %v4982_v39 = vsub.s32 2, %v4780_v10 }
 0x131   :  { %v1204_v13 = vmul.f32 %v1172_v62, %v4946_v22  ;;  %v1173_v15 = vmul.f32 %v4963_v63, %v4963_v63  ;;  %v3898_v20 = vadd.f32 %v3897_v5, %v3896_v0  ;;  %v3899_v23 = vpop.f32.mrb[26].mxu1  ;;  %v1299_v29 = vmul.f32 0.7978846, %v1267_v6 }
 0x132   :  { %v3900_v26 = vpop.f32.mrb[27].mxu1  ;;  %4304 = vtanh.f32 %v1298_v7  ;;  %v1423_v42 = vmul.f32 %v1391_v25, %v4874_v49  ;;  %1998 = vbcast.lane.b32.xlu0 %v1996_v56, 256  ;;  %v2003_v53 = vrot.slane %v4951_v57, %v4982_v39  ;;  %v990_v60 = vrot.slane %v830_v40, %v4787_v17 }
 0x133   :  { %v1236_v30 = vmul.f32 0.044715, %v1204_v13  ;;  %v1205_v35 = vmul.f32 %v1173_v15, %v4963_v63  ;;  %v1103_v36 = vadd.f32 %v3898_v20, %v982_v61  ;;  %v3901_v37 = vadd.f32 %v3900_v26, %v3899_v23  ;;  %v5011_v13 = vld [vmem:[%s6188_s2 + $0x18] sm:$0xff] }
 0x134   :  { %v4301_v38 = vpop.eup %4300  ;;  %4306 = vtanh.f32 %v1299_v29  ;;  %v1452_v47 = vpack.c.bf16 %v1423_v42, %v1422_v28  ;;  %v994_v62 = vrot.slane %v832_v27, %v4787_v17  ;;  %v5017_v27 = vrot.slane %v878_v12, %v4787_v17 }
 0x135   :  { %v1237_v43 = vmul.f32 0.044715, %v1205_v35  ;;  %v4985_v44 = vadd.f32 %v4816_v41, %v1103_v36  ;;  %v1104_v45 = vadd.f32 %v3901_v37, %v986_v11  ;;  %v1360_v31 = vadd.f32 1.0, %v4301_v38  ;;  %v5001_v11 = vld [vmem:[%s6188_s2 + $0x10] sm:$0xff] }
 0x136   :  { %v4303_v46 = vpop.eup %4302  ;;  %v1268_v49 = vadd.f32 %v1236_v30, %v4946_v22  ;;  %4086 = vmatprep.mubr.bf16.mxu0 %v1452_v47  ;;  %2005 = vbcast.lane.b32.xlu0 %v2003_v53, 256  ;;  %v2101_v23 = vrot.slane %v5001_v11, %v4787_v17  ;;  %v5025_v30 = vld [vmem:[%s6188_s2 + $0x8] sm:$0xff]  ;;  %v2157_v37 = vrot.slane %v5011_v13, %v4787_v17  ;;  %v5036_v47 = vsub.s32 3, %v4780_v10 }
 0x137   :  { %v1174_v8 = vmul.f32 %v4985_v44, %v4985_v44  ;;  %v4995_v55 = vadd.f32 %v4816_v41, %v1104_v45  ;;  %v3902_v48 = vpop.f32.mrb[28].mxu1  ;;  %v1361_v61 = vadd.f32 1.0, %v4303_v46  ;;  %v1392_v0 = vmul.f32 0.5, %v1360_v31 }
 0x138   :  { %v3903_v18 = vpop.f32.mrb[29].mxu1  ;;  %v1269_v3 = vadd.f32 %v1237_v43, %v4963_v63  ;;  %v1300_v4 = vmul.f32 0.7978846, %v1268_v49 }
 0x139   :  { %v1206_v5 = vmul.f32 %v1174_v8, %v4985_v44  ;;  %v1175_v6 = vmul.f32 %v4995_v55, %v4995_v55  ;;  %v3904_v40 = vadd.f32 %v3903_v18, %v3902_v48  ;;  %v3905_v7 = vpop.f32.mrb[30].mxu1  ;;  %v1393_v34 = vmul.f32 0.5, %v1361_v61 }
 0x13a   :  { %v3906_v15 = vpop.f32.mrb[31].mxu1  ;;  %v1301_v20 = vmul.f32 0.7978846, %v1269_v3  ;;  %4308 = vtanh.f32 %v1300_v4  ;;  %v1424_v12 = vmul.f32 %v1392_v0, %v4893_v16  ;;  %2103 = vbcast.lane.b32.xlu0 %v2101_v23, 256  ;;  %v2045_v16 = vrot.slane %v5025_v30, %v4787_v17 }
 0x13b   :  { %v1238_v25 = vmul.f32 0.044715, %v1206_v5  ;;  %v1207_v26 = vmul.f32 %v1175_v6, %v4995_v55  ;;  %v1105_v28 = vadd.f32 %v3904_v40, %v990_v60  ;;  %v3907_v29 = vadd.f32 %v3906_v15, %v3905_v7 }
 0x13c   :  { %v4305_v35 = vpop.eup %4304  ;;  %v1425_v36 = vmul.f32 %v1393_v34, %v4900_v21  ;;  %4310 = vtanh.f32 %v1301_v20  ;;  %v880_v48 = vcombine.high %v4804_v33, %v4804_v33  ;;  %2047 = vbcast.lane.b32.xlu1 %v2045_v16, 256  ;;  %v2052_v0 = vrot.slane %v5025_v30, %v4975_v52 }
 0x13d   :  { %v1239_v38 = vmul.f32 0.044715, %v1207_v26  ;;  %v5032_v42 = vadd.f32 %v4816_v41, %v1105_v28  ;;  %v1106_v56 = vadd.f32 %v3907_v29, %v994_v62  ;;  %v1362_v43 = vadd.f32 1.0, %v4305_v35 }
 0x13e   :  { %v4307_v45 = vpop.eup %4306  ;;  %v1453_v31 = vpack.c.bf16 %v1425_v36, %v1424_v12  ;;  %v1270_v46 = vadd.f32 %v1238_v25, %v4985_v44  ;;  %v1014_v34 = vrot.slane %v4801_v32, %v4787_v17  ;;  %2159 = vbcast.lane.b32.xlu0 %v2157_v37, 256  ;;  %v2010_v20 = vrot.slane %v4951_v57, %v5036_v47 }
 0x13f   :  { %v1176_v21 = vmul.f32 %v5032_v42, %v5032_v42  ;;  %v5043_v49 = vadd.f32 %v4816_v41, %v1106_v56  ;;  %v3908_v53 = vpop.f32.mrb[32].mxu1  ;;  %v1363_v8 = vadd.f32 1.0, %v4307_v45  ;;  %v1394_v61 = vmul.f32 0.5, %v1362_v43 }
 0x140   :  { %4087 = vmatmul.mubr.bf16.gmra.mrb[8].mxu0 %v1453_v31  ;;  %v3909_v60 = vpop.f32.mrb[33].mxu1  ;;  %v1271_v18 = vadd.f32 %v1239_v38, %v4995_v55  ;;  %v1302_v62 = vmul.f32 0.7978846, %v1270_v46  ;;  %2054 = vbcast.lane.b32.xlu1 %v2052_v0, 256  ;;  %v2059_v36 = vrot.slane %v5025_v30, %v4982_v39  ;;  %v5075_v45 = vsub.s32 4, %v4780_v10 }
 0x141   :  { %v1208_v3 = vmul.f32 %v1176_v21, %v5032_v42  ;;  %v1177_v4 = vmul.f32 %v5043_v49, %v5043_v49  ;;  %v3910_v5 = vadd.f32 %v3909_v60, %v3908_v53  ;;  %v3911_v6 = vpop.f32.mrb[34].mxu1  ;;  %v1395_v40 = vmul.f32 0.5, %v1363_v8 }
 0x142   :  { %v3912_v7 = vpop.f32.mrb[35].mxu1  ;;  %v1303_v15 = vmul.f32 0.7978846, %v1271_v18  ;;  %4312 = vtanh.f32 %v1302_v62  ;;  %v1426_v35 = vmul.f32 %v1394_v61, %v4916_v1  ;;  %2012 = vbcast.lane.b32.xlu0 %v2010_v20, 256  ;;  %v879_v16 = vcombine.high %v4801_v32, %v4801_v32 }
 0x143   :  { %v1240_v23 = vmul.f32 0.044715, %v1208_v3  ;;  %v1209_v25 = vmul.f32 %v1177_v4, %v5043_v49  ;;  %v1107_v26 = vadd.f32 %v3910_v5, %v998_v54  ;;  %v3913_v28 = vadd.f32 %v3912_v7, %v3911_v6 }
 0x144   :  { %v4309_v29 = vpop.eup %4308  ;;  %v1427_v12 = vmul.f32 %v1395_v40, %v4923_v14  ;;  %4314 = vtanh.f32 %v1303_v15  ;;  %v2115_v14 = vrot.slane %v5001_v11, %v4982_v39  ;;  %2061 = vbcast.lane.b32.xlu1 %v2059_v36, 256  ;;  %v2108_v61 = vrot.slane %v5001_v11, %v4975_v52 }
 0x145   :  { %v1241_v37 = vmul.f32 0.044715, %v1209_v25  ;;  %v5066_v38 = vadd.f32 %v4816_v41, %v1107_v26  ;;  %v1108_v24 = vadd.f32 %v3913_v28, %v1002_v51  ;;  %v1364_v54 = vadd.f32 1.0, %v4309_v29 }
 0x146   :  { %v4311_v56 = vpop.eup %4310  ;;  %v1454_v43 = vpack.c.bf16 %v1427_v12, %v1426_v35  ;;  %v1272_v1 = vadd.f32 %v1240_v23, %v5032_v42  ;;  %v1010_v6 = vrot.slane %v880_v48, %v4787_v17  ;;  %2117 = vbcast.lane.b32.xlu0 %v2115_v14, 256  ;;  %v2017_v7 = vrot.slane %v4951_v57, %v5075_v45 }
 0x147   :  { %v1178_v31 = vmul.f32 %v5066_v38, %v5066_v38  ;;  %v5080_v46 = vadd.f32 %v4816_v41, %v1108_v24  ;;  %v3914_v33 = vpop.f32.mrb[36].mxu1  ;;  %v1365_v51 = vadd.f32 1.0, %v4311_v56  ;;  %v1396_v53 = vmul.f32 0.5, %v1364_v54 }
 0x148   :  { %4090 = vmatprep.mubr.bf16.mxu0 %v1454_v43  ;;  %v3915_v21 = vpop.f32.mrb[37].mxu1  ;;  %v1273_v8 = vadd.f32 %v1241_v37, %v5043_v49  ;;  %v1304_v60 = vmul.f32 0.7978846, %v1272_v1  ;;  %2110 = vbcast.lane.b32.xlu1 %v2108_v61, 256  ;;  %v2164_v48 = vrot.slane %v5011_v13, %v4975_v52  ;;  %v1018_v14 = vrot.slane %v4887_v9, %v4787_v17 }
 0x149   :  { %v1210_v18 = vmul.f32 %v1178_v31, %v5066_v38  ;;  %v1179_v62 = vmul.f32 %v5080_v46, %v5080_v46  ;;  %v3916_v0 = vadd.f32 %v3915_v21, %v3914_v33  ;;  %v3917_v3 = vpop.f32.mrb[38].mxu1  ;;  %v1397_v4 = vmul.f32 0.5, %v1365_v51 }
 0x14a   :  { %v3918_v5 = vpop.f32.mrb[39].mxu1  ;;  %v1305_v40 = vmul.f32 0.7978846, %v1273_v8  ;;  %4316 = vtanh.f32 %v1304_v60  ;;  %v1428_v28 = vmul.f32 %v1396_v53, %v4946_v22  ;;  %2019 = vbcast.lane.b32.xlu0 %v2017_v7, 256  ;;  %v2122_v22 = vrot.slane %v5001_v11, %v5036_v47 }
 0x14b   :  { %v1242_v15 = vmul.f32 0.044715, %v1210_v18  ;;  %v1211_v20 = vmul.f32 %v1179_v62, %v5080_v46  ;;  %v1109_v23 = vadd.f32 %v3916_v0, %v5017_v27  ;;  %v3919_v25 = vadd.f32 %v3918_v5, %v3917_v3 }
 0x14c   :  { %v4313_v26 = vpop.eup %4312  ;;  %v1429_v29 = vmul.f32 %v1397_v4, %v4963_v63  ;;  %4318 = vtanh.f32 %v1305_v40  ;;  %v5106_v63 = vsub.s32 5, %v4780_v10  ;;  %2166 = vbcast.lane.b32.xlu1 %v2164_v48, 256  ;;  %v2066_v8 = vrot.slane %v5025_v30, %v5036_v47 }
 0x14d   :  { %v1243_v35 = vmul.f32 0.044715, %v1211_v20  ;;  %v5100_v12 = vadd.f32 %v4816_v41, %v1109_v23  ;;  %v1110_v36 = vadd.f32 %v3919_v25, %v1010_v6  ;;  %v1366_v37 = vadd.f32 1.0, %v4313_v26 }
 0x14e   :  { %v4315_v24 = vpop.eup %4314  ;;  %v1455_v54 = vpack.c.bf16 %v1429_v29, %v1428_v28  ;;  %v1274_v27 = vadd.f32 %v1242_v15, %v5066_v38  ;;  %v881_v4 = vcombine.high %v4887_v9, %v4887_v9  ;;  %2124 = vbcast.lane.b32.xlu0 %v2122_v22, 256  ;;  %v2024_v6 = vrot.slane %v4951_v57, %v5106_v63 }
 0x14f   :  { %v1180_v56 = vmul.f32 %v5100_v12, %v5100_v12  ;;  %v5111_v43 = vadd.f32 %v4816_v41, %v1110_v36  ;;  %v3920_v1 = vpop.f32.mrb[40].mxu1  ;;  %v1367_v31 = vadd.f32 1.0, %v4315_v24  ;;  %v1398_v51 = vmul.f32 0.5, %v1366_v37 }
 0x150   :  { %4091 = vmatmul.mubr.bf16.gmra.mrb[12].mxu0 %v1455_v54  ;;  %v3921_v33 = vpop.f32.mrb[41].mxu1  ;;  %v1275_v21 = vadd.f32 %v1243_v35, %v5080_v46  ;;  %v1306_v53 = vmul.f32 0.7978846, %v1274_v27  ;;  %2068 = vbcast.lane.b32.xlu1 %v2066_v8, 256  ;;  %v2171_v9 = vrot.slane %v5011_v13, %v4982_v39  ;;  %v1022_v22 = vrot.slane %v879_v16, %v4787_v17 }
 0x151   :  { %v1212_v60 = vmul.f32 %v1180_v56, %v5100_v12  ;;  %v1181_v61 = vmul.f32 %v5111_v43, %v5111_v43  ;;  %v3922_v18 = vadd.f32 %v3921_v33, %v3920_v1  ;;  %v3923_v62 = vpop.f32.mrb[42].mxu1  ;;  %v1399_v0 = vmul.f32 0.5, %v1367_v31 }
 0x152   :  { %v3924_v3 = vpop.f32.mrb[43].mxu1  ;;  %v1307_v5 = vmul.f32 0.7978846, %v1275_v21  ;;  %4320 = vtanh.f32 %v1306_v53  ;;  %v1430_v25 = vmul.f32 %v1398_v51, %v4985_v44  ;;  %2026 = vbcast.lane.b32.xlu0 %v2024_v6, 256  ;;  %v2129_v44 = vrot.slane %v5001_v11, %v5075_v45 }
 0x153   :  { %v1244_v40 = vmul.f32 0.044715, %v1212_v60  ;;  %v1213_v7 = vmul.f32 %v1181_v61, %v5111_v43  ;;  %v1111_v15 = vadd.f32 %v3922_v18, %v1014_v34  ;;  %v3925_v20 = vadd.f32 %v3924_v3, %v3923_v62 }
 0x154   :  { %v4317_v23 = vpop.eup %4316  ;;  %v1431_v26 = vmul.f32 %v1399_v0, %v4995_v55  ;;  %4322 = vtanh.f32 %v1307_v5  ;;  %v5140_v55 = vsub.s32 6, %v4780_v10  ;;  %2173 = vbcast.lane.b32.xlu1 %v2171_v9, 256  ;;  %v2073_v51 = vrot.slane %v5025_v30, %v5075_v45 }
 0x155   :  { %v1245_v28 = vmul.f32 0.044715, %v1213_v7  ;;  %v5134_v29 = vadd.f32 %v4816_v41, %v1111_v15  ;;  %v1112_v48 = vadd.f32 %v3925_v20, %v1018_v14  ;;  %v1368_v35 = vadd.f32 1.0, %v4317_v23 }
 0x156   :  { %v4319_v36 = vpop.eup %4318  ;;  %v1456_v37 = vpack.c.bf16 %v1431_v26, %v1430_v25  ;;  %v1276_v34 = vadd.f32 %v1244_v40, %v5100_v12  ;;  %v1026_v61 = vrot.slane %v881_v4, %v4787_v17  ;;  %2131 = vbcast.lane.b32.xlu0 %v2129_v44, 256  ;;  %v2031_v62 = vrot.slane %v4951_v57, %v5140_v55 }
 0x157   :  { %v1182_v24 = vmul.f32 %v5134_v29, %v5134_v29  ;;  %v5145_v54 = vadd.f32 %v4816_v41, %v1112_v48  ;;  %v3926_v27 = vpop.f32.mrb[44].mxu1  ;;  %v1369_v56 = vadd.f32 1.0, %v4319_v36  ;;  %v1400_v14 = vmul.f32 0.5, %v1368_v35 }
 0x158   :  { %4094 = vmatprep.mubr.bf16.mxu0 %v1456_v37  ;;  %v3927_v1 = vpop.f32.mrb[45].mxu1  ;;  %v1277_v31 = vadd.f32 %v1245_v28, %v5111_v43  ;;  %v1308_v33 = vmul.f32 0.7978846, %v1276_v34  ;;  %2075 = vbcast.lane.b32.xlu1 %v2073_v51, 256  ;;  %v2178_v4 = vrot.slane %v5011_v13, %v5036_v47  ;;  %v1030_v34 = vrot.slane %v4821_v50, %v4787_v17 }
 0x159   :  { %v1214_v21 = vmul.f32 %v1182_v24, %v5134_v29  ;;  %v1183_v53 = vmul.f32 %v5145_v54, %v5145_v54  ;;  %v3928_v8 = vadd.f32 %v3927_v1, %v3926_v27  ;;  %v3929_v60 = vpop.f32.mrb[46].mxu1  ;;  %v1401_v32 = vmul.f32 0.5, %v1369_v56 }
 0x15a   :  { %v3930_v16 = vpop.f32.mrb[47].mxu1  ;;  %v1309_v18 = vmul.f32 0.7978846, %v1277_v31  ;;  %4324 = vtanh.f32 %v1308_v33  ;;  %v1432_v7 = vmul.f32 %v1400_v14, %v5032_v42  ;;  %2033 = vbcast.lane.b32.xlu0 %v2031_v62, 256  ;;  %v2136_v42 = vrot.slane %v5001_v11, %v5106_v63 }
 0x15b   :  { %v1246_v0 = vmul.f32 0.044715, %v1214_v21  ;;  %v1215_v3 = vmul.f32 %v1183_v53, %v5145_v54  ;;  %v1113_v5 = vadd.f32 %v3928_v8, %v1022_v22  ;;  %v3931_v6 = vadd.f32 %v3930_v16, %v3929_v60 }
 0x15c   :  { %v4321_v40 = vpop.eup %4320  ;;  %v1433_v15 = vmul.f32 %v1401_v32, %v5043_v49  ;;  %4326 = vtanh.f32 %v1309_v18  ;;  %v5172_v49 = vsub.s32 7, %v4780_v10  ;;  %2180 = vbcast.lane.b32.xlu1 %v2178_v4, 256  ;;  %v2080_v10 = vrot.slane %v5025_v30, %v5106_v63 }
 0x15d   :  { %v1247_v20 = vmul.f32 0.044715, %v1215_v3  ;;  %v5166_v23 = vadd.f32 %v4816_v41, %v1113_v5  ;;  %v1114_v25 = vadd.f32 %v3931_v6, %v1026_v61  ;;  %v1370_v26 = vadd.f32 1.0, %v4321_v40 }
 0x15e   :  { %v4323_v9 = vpop.eup %4322  ;;  %v1457_v28 = vpack.c.bf16 %v1433_v15, %v1432_v7  ;;  %v1278_v48 = vadd.f32 %v1246_v0, %v5134_v29  ;;  %v1034_v53 = vrot.slane %v4835_v59, %v4787_v17  ;;  %2138 = vbcast.lane.b32.xlu0 %v2136_v42, 256  ;;  %v2038_v60 = vrot.slane %v4951_v57, %v5172_v49 }
 0x15f   :  { %v1184_v35 = vmul.f32 %v5166_v23, %v5166_v23  ;;  %v5177_v36 = vadd.f32 %v4816_v41, %v1114_v25  ;;  %v3932_v37 = vpop.f32.mrb[48].mxu1  ;;  %v1371_v44 = vadd.f32 1.0, %v4323_v9  ;;  %v1402_v27 = vmul.f32 0.5, %v1370_v26 }
 0x160   :  { %4095 = vmatmul.mubr.bf16.gmra.mrb[16].mxu0 %v1457_v28  ;;  %v3933_v24 = vpop.f32.mrb[49].mxu1  ;;  %v1279_v22 = vadd.f32 %v1247_v20, %v5145_v54  ;;  %v1310_v56 = vmul.f32 0.7978846, %v1278_v48  ;;  %2082 = vbcast.lane.b32.xlu1 %v2080_v10, 256  ;;  %v2185_v5 = vrot.slane %v5011_v13, %v5075_v45  ;;  %v929_v20 = vcombine.high %v4835_v59, %v4835_v59 }
 0x161   :  { %v1216_v1 = vmul.f32 %v1184_v35, %v5166_v23  ;;  %v1185_v14 = vmul.f32 %v5177_v36, %v5177_v36  ;;  %v3934_v31 = vadd.f32 %v3933_v24, %v3932_v37  ;;  %v3935_v33 = vpop.f32.mrb[50].mxu1  ;;  %v1403_v51 = vmul.f32 0.5, %v1371_v44 }
 0x162   :  { %v3936_v21 = vpop.f32.mrb[51].mxu1  ;;  %v1311_v8 = vmul.f32 0.7978846, %v1279_v22  ;;  %4328 = vtanh.f32 %v1310_v56  ;;  %v1434_v0 = vmul.f32 %v1402_v27, %v5066_v38  ;;  %2040 = vbcast.lane.b32.xlu0 %v2038_v60, 256  ;;  %v1038_v9 = vrot.slane %v927_v19, %v4787_v17 }
 0x163   :  { %v1248_v32 = vmul.f32 0.044715, %v1216_v1  ;;  %v1217_v16 = vmul.f32 %v1185_v14, %v5177_v36  ;;  %v1115_v61 = vadd.f32 %v3934_v31, %v1030_v34  ;;  %v3937_v18 = vadd.f32 %v3936_v21, %v3935_v33 }
 0x164   :  { %v4325_v62 = vpop.eup %4324  ;;  %v1435_v3 = vmul.f32 %v1403_v51, %v5080_v46  ;;  %4330 = vtanh.f32 %v1311_v8  ;;  %v2143_v46 = vrot.slane %v5001_v11, %v5140_v55  ;;  %2187 = vbcast.lane.b32.xlu1 %v2185_v5, 256  ;;  %v2087_v37 = vrot.slane %v5025_v30, %v5140_v55 }
 0x165   :  { %v1249_v6 = vmul.f32 0.044715, %v1217_v16  ;;  %v5197_v40 = vadd.f32 %v4816_v41, %v1115_v61  ;;  %v1116_v57 = vadd.f32 %v3937_v18, %v1034_v53  ;;  %v1372_v7 = vadd.f32 1.0, %v4325_v62 }
 0x166   :  { %v4327_v15 = vpop.eup %4326  ;;  %v1458_v4 = vpack.c.bf16 %v1435_v3, %v1434_v0  ;;  %v1280_v38 = vadd.f32 %v1248_v32, %v5166_v23  ;;  %v1042_v22 = vrot.slane %v929_v20, %v4787_v17  ;;  %2145 = vbcast.lane.b32.xlu0 %v2143_v46, 256  ;;  %v2150_v10 = vrot.slane %v5001_v11, %v5172_v49 }
 0x167   :  { %v1186_v45 = vmul.f32 %v5197_v40, %v5197_v40  ;;  %v5207_v25 = vadd.f32 %v4816_v41, %v1116_v57  ;;  %v3938_v26 = vpop.f32.mrb[52].mxu1  ;;  %v1373_v28 = vadd.f32 1.0, %v4327_v15  ;;  %v1404_v48 = vmul.f32 0.5, %v1372_v7 }
 0x168   :  { %4098 = vmatprep.mubr.bf16.mxu0 %v1458_v4  ;;  %v3939_v59 = vpop.f32.mrb[53].mxu1  ;;  %v1281_v42 = vadd.f32 %v1249_v6, %v5177_v36  ;;  %v1312_v35 = vmul.f32 0.7978846, %v1280_v38  ;;  %2089 = vbcast.lane.b32.xlu1 %v2087_v37, 256  ;;  %v2192_v8 = vrot.slane %v5011_v13, %v5106_v63  ;;  %v1046_v0 = vrot.slane %v4832_v58, %v4787_v17 }
 0x169   :  { %v1218_v34 = vmul.f32 %v1186_v45, %v5197_v40  ;;  %v1187_v44 = vmul.f32 %v5207_v25, %v5207_v25  ;;  %v3940_v24 = vadd.f32 %v3939_v59, %v3938_v26  ;;  %v3941_v27 = vpop.f32.mrb[54].mxu1  ;;  %v1405_v50 = vmul.f32 0.5, %v1373_v28 }
 0x16a   :  { %v3942_v19 = vpop.f32.mrb[55].mxu1  ;;  %v1313_v56 = vmul.f32 0.7978846, %v1281_v42  ;;  %4332 = vtanh.f32 %v1312_v35  ;;  %v1436_v21 = vmul.f32 %v1404_v48, %v5100_v12  ;;  %2152 = vbcast.lane.b32.xlu0 %v2150_v10, 256  ;;  %v2094_v15 = vrot.slane %v5025_v30, %v5172_v49 }
 0x16b   :  { %v1250_v1 = vmul.f32 0.044715, %v1218_v34  ;;  %v1219_v14 = vmul.f32 %v1187_v44, %v5207_v25  ;;  %v1117_v31 = vadd.f32 %v3940_v24, %v1038_v9  ;;  %v3943_v33 = vadd.f32 %v3942_v19, %v3941_v27 }
 0x16c   :  { %v4329_v51 = vpop.eup %4328  ;;  %v1437_v53 = vmul.f32 %v1405_v50, %v5111_v43  ;;  %4334 = vtanh.f32 %v1313_v56  ;;  %v5236_v43 = vld [vmem:[%s6187_s6] ss:$0 sm:$0xff]  ;;  %2194 = vbcast.lane.b32.xlu1 %v2192_v8, 256  ;;  %v1050_v9 = vrot.slane %v4943_v2, %v4787_v17  ;;  %v928_v44 = vcombine.high %v4832_v58, %v4832_v58 }
 0x16d   :  { %v1251_v60 = vmul.f32 0.044715, %v1219_v14  ;;  %v5228_v32 = vadd.f32 %v4816_v41, %v1117_v31  ;;  %v1118_v11 = vadd.f32 %v3943_v33, %v1042_v22  ;;  %v1374_v16 = vadd.f32 1.0, %v4329_v51 }
 0x16e   :  { %v4331_v61 = vpop.eup %4330  ;;  %v1459_v18 = vpack.c.bf16 %v1437_v53, %v1436_v21  ;;  %v1282_v62 = vadd.f32 %v1250_v1, %v5197_v40  ;;  %v930_v10 = vcombine.high %v4943_v2, %v4943_v2  ;;  %v1054_v33 = vrot.slane %v928_v44, %v4787_v17 }
 0x16f   :  { %v1188_v12 = vmul.f32 %v5228_v32, %v5228_v32  ;;  %v5239_v63 = vadd.f32 %v5236_v43, %v1118_v11  ;;  %v3944_v41 = vpop.f32.mrb[56].mxu1  ;;  %v1375_v3 = vadd.f32 1.0, %v4331_v61  ;;  %v1406_v6 = vmul.f32 0.5, %v1374_v16 }
 0x170   :  { %4099 = vmatmul.mubr.bf16.gmra.mrb[20].mxu0 %v1459_v18  ;;  %v3945_v5 = vpop.f32.mrb[57].mxu1  ;;  %v1283_v57 = vadd.f32 %v1251_v60, %v5207_v25  ;;  %v1314_v7 = vmul.f32 0.7978846, %v1282_v62  ;;  %2096 = vbcast.lane.b32.xlu1 %v2094_v15, 256  ;;  %v1058_v18 = vrot.slane %v930_v10, %v4787_v17 }
 0x171   :  { %v1220_v4 = vmul.f32 %v1188_v12, %v5228_v32  ;;  %v1189_v20 = vmul.f32 %v5239_v63, %v5239_v63  ;;  %v3946_v38 = vadd.f32 %v3945_v5, %v3944_v41  ;;  %v3947_v46 = vpop.f32.mrb[58].mxu1  ;;  %v1407_v45 = vmul.f32 0.5, %v1375_v3 }
 0x172   :  { %v3948_v26 = vpop.f32.mrb[59].mxu1  ;;  %v1315_v28 = vmul.f32 0.7978846, %v1283_v57  ;;  %4336 = vtanh.f32 %v1314_v7  ;;  %v1438_v37 = vmul.f32 %v1406_v6, %v5134_v29 }
 0x173   :  { %v1252_v59 = vmul.f32 0.044715, %v1220_v4  ;;  %v1221_v48 = vmul.f32 %v1189_v20, %v5239_v63  ;;  %v1119_v42 = vadd.f32 %v3946_v38, %v1046_v0  ;;  %v3949_v35 = vadd.f32 %v3948_v26, %v3947_v46 }
 0x174   :  { %v4333_v30 = vpop.eup %4332  ;;  %v1439_v34 = vmul.f32 %v1407_v45, %v5145_v54  ;;  %4338 = vtanh.f32 %v1315_v28 }
 0x175   :  { %v1253_v24 = vmul.f32 0.044715, %v1221_v48  ;;  %v5257_v27 = vadd.f32 %v5236_v43, %v1119_v42  ;;  %v1120_v50 = vadd.f32 %v3949_v35, %v1050_v9  ;;  %v1376_v19 = vadd.f32 1.0, %v4333_v30 }
 0x176   :  { %v4335_v22 = vpop.eup %4334  ;;  %v1460_v56 = vpack.c.bf16 %v1439_v34, %v1438_v37  ;;  %v1284_v29 = vadd.f32 %v1252_v59, %v5228_v32 }
 0x177   :  { %v1190_v54 = vmul.f32 %v5257_v27, %v5257_v27  ;;  %v5265_v58 = vadd.f32 %v5236_v43, %v1120_v50  ;;  %v3950_v1 = vpop.f32.mrb[60].mxu1  ;;  %v1377_v14 = vadd.f32 1.0, %v4335_v22  ;;  %v1408_v51 = vmul.f32 0.5, %v1376_v19 }
 0x178   :  { %4102 = vmatprep.mubr.bf16.mxu0 %v1460_v56  ;;  %v3951_v31 = vpop.f32.mrb[61].mxu1  ;;  %v1285_v21 = vadd.f32 %v1253_v24, %v5239_v63  ;;  %v1316_v53 = vmul.f32 0.7978846, %v1284_v29 }
 0x179   :  { %v1222_v2 = vmul.f32 %v1190_v54, %v5257_v27  ;;  %v1191_v8 = vmul.f32 %v5265_v58, %v5265_v58  ;;  %v3952_v60 = vadd.f32 %v3951_v31, %v3950_v1  ;;  %v3953_v11 = vpop.f32.mrb[62].mxu1  ;;  %v1409_v16 = vmul.f32 0.5, %v1377_v14 }
 0x17a   :  { %v3954_v61 = vpop.f32.mrb[63].mxu1  ;;  %v1317_v62 = vmul.f32 0.7978846, %v1285_v21  ;;  %4340 = vtanh.f32 %v1316_v53  ;;  %v1440_v6 = vmul.f32 %v1408_v51, %v5166_v23 }
 0x17b   :  { %v1254_v12 = vmul.f32 0.044715, %v1222_v2  ;;  %v1223_v41 = vmul.f32 %v1191_v8, %v5265_v58  ;;  %v1121_v0 = vadd.f32 %v3952_v60, %v1054_v33  ;;  %v3955_v3 = vadd.f32 %v3954_v61, %v3953_v11 }
 0x17c   :  { %v4337_v5 = vpop.eup %4336  ;;  %v1441_v57 = vmul.f32 %v1409_v16, %v5177_v36  ;;  %4342 = vtanh.f32 %v1317_v62 }
 0x17d   :  { %v1255_v7 = vmul.f32 0.044715, %v1223_v41  ;;  %v1160_v15 = vadd.f32 %v5236_v43, %v1121_v0  ;;  %v1122_v4 = vadd.f32 %v3955_v3, %v1058_v18  ;;  %v1378_v20 = vadd.f32 1.0, %v4337_v5 }
 0x17e   :  { %v4339_v38 = vpop.eup %4338  ;;  %v1461_v46 = vpack.c.bf16 %v1441_v57, %v1440_v6  ;;  %v1286_v45 = vadd.f32 %v1254_v12, %v5257_v27  ;;  %v2199_v6 = vrot.slane %v5011_v13, %v5140_v55 }
 0x17f   :  { %v1192_v26 = vmul.f32 %v1160_v15, %v1160_v15  ;;  %v1161_v9 = vadd.f32 %v5236_v43, %v1122_v4  ;;  %v1379_v28 = vadd.f32 1.0, %v4339_v38  ;;  %v1410_v59 = vmul.f32 0.5, %v1378_v20 }
 0x180   :  { %4103 = vmatmul.mubr.bf16.gmra.mrb[24].mxu0 %v1461_v46  ;;  %v1287_v23 = vadd.f32 %v1255_v7, %v5265_v58  ;;  %v1318_v48 = vmul.f32 0.7978846, %v1286_v45  ;;  %2201 = vbcast.lane.b32.xlu1 %v2199_v6, 256 }
 0x181   :  { %v1224_v36 = vmul.f32 %v1192_v26, %v1160_v15  ;;  %v1193_v42 = vmul.f32 %v1161_v9, %v1161_v9  ;;  %v1411_v35 = vmul.f32 0.5, %v1379_v28  ;;  %v1442_v44 = vmul.f32 %v1410_v59, %v5197_v40 }
 0x182   :  { %v1319_v30 = vmul.f32 0.7978846, %v1287_v23  ;;  %4344 = vtanh.f32 %v1318_v48 }
 0x183   :  { %v1256_v37 = vmul.f32 0.044715, %v1224_v36  ;;  %v1225_v34 = vmul.f32 %v1193_v42, %v1161_v9  ;;  %v1443_v24 = vmul.f32 %v1411_v35, %v5207_v25 }
 0x184   :  { %v4341_v50 = vpop.eup %4340  ;;  %4346 = vtanh.f32 %v1319_v30 }
 0x185   :  { %v1257_v43 = vmul.f32 0.044715, %v1225_v34  ;;  %v1462_v19 = vpack.c.bf16 %v1443_v24, %v1442_v44  ;;  %v1380_v22 = vadd.f32 1.0, %v4341_v50  ;;  %v1288_v56 = vadd.f32 %v1256_v37, %v1160_v15 }
 0x186   :  { %v4343_v10 = vpop.eup %4342 }
 0x187   :  { %4106 = vmatprep.mubr.bf16.mxu0 %v1462_v19  ;;  %v1381_v29 = vadd.f32 1.0, %v4343_v10  ;;  %v1412_v54 = vmul.f32 0.5, %v1380_v22  ;;  %v1289_v1 = vadd.f32 %v1257_v43, %v1161_v9  ;;  %v1320_v14 = vmul.f32 0.7978846, %v1288_v56 }
 0x189   :  { %v1413_v31 = vmul.f32 0.5, %v1381_v29  ;;  %v1321_v33 = vmul.f32 0.7978846, %v1289_v1  ;;  %4348 = vtanh.f32 %v1320_v14  ;;  %v1444_v51 = vmul.f32 %v1412_v54, %v5228_v32 }
 0x18b   :  { %v1445_v40 = vmul.f32 %v1413_v31, %v5239_v63  ;;  %4350 = vtanh.f32 %v1321_v33 }
 0x18c   :  { %v4345_v25 = vpop.eup %4344 }
 0x18d   :  { %v1463_v21 = vpack.c.bf16 %v1445_v40, %v1444_v51  ;;  %v1382_v53 = vadd.f32 1.0, %v4345_v25 }
 0x18e   :  { %v4347_v2 = vpop.eup %4346 }
 0x18f   :  { %4107 = vmatmul.mubr.bf16.gmra.mrb[28].mxu0 %v1463_v21  ;;  %v1383_v8 = vadd.f32 1.0, %v4347_v2  ;;  %v1414_v60 = vmul.f32 0.5, %v1382_v53 }
 0x191   :  { %v1415_v11 = vmul.f32 0.5, %v1383_v8  ;;  %v1446_v61 = vmul.f32 %v1414_v60, %v5257_v27  ;;  %v2206_v27 = vrot.slane %v5011_v13, %v5172_v49 }
 0x193   :  { %v4349_v16 = vpop.eup %4348  ;;  %v1447_v18 = vmul.f32 %v1415_v11, %v5265_v58  ;;  %2208 = vbcast.lane.b32.xlu1 %v2206_v27, 256 }
 0x194   :  { %v1384_v62 = vadd.f32 1.0, %v4349_v16 }
 0x195   :  { %v4351_v12 = vpop.eup %4350  ;;  %v1464_v41 = vpack.c.bf16 %v1447_v18, %v1446_v61 }
 0x196   :  { %v1385_v32 = vadd.f32 1.0, %v4351_v12  ;;  %v1416_v0 = vmul.f32 0.5, %v1384_v62 }
 0x197   :  { %4110 = vmatprep.mubr.bf16.mxu0 %v1464_v41 }
 0x198   :  { %v1417_v63 = vmul.f32 0.5, %v1385_v32  ;;  %v1448_v3 = vmul.f32 %v1416_v0, %v1160_v15  ;;  %v5301_v15 = vld [vmem:[%s6189_s8] ss:$0 sm:$0xff] }
 0x19a   :  { %v1449_v5 = vmul.f32 %v1417_v63, %v1161_v9 }
 0x19c   :  { %v1465_v57 = vpack.c.bf16 %v1449_v5, %v1448_v3 }
 0x19e   :  { %4111 = vmatmul.mubr.bf16.gmra.mrb[32].mxu0 %v1465_v57 }
 0x1a0   :  { %v5290_v58 = vpop.permute.xlu0 %1991 }
 0x1a4   :  { %v5292_v7 = vpop.permute.xlu0 %1998 }
 0x1a8   :  { %v5294_v4 = vpop.permute.xlu0 %2005 }
 0x1ac   :  { %v5296_v20 = vpop.permute.xlu0 %2103 }
 0x1b0   :  { %v5303_v55 = vpop.permute.xlu0 %2159 }
 0x1b4   :  { %v5324_v42 = vpop.permute.xlu0 %2012 }
 0x1b8   :  { %v5334_v29 = vpop.permute.xlu0 %2117 }
 0x1bc   :  { %v5337_v33 = vpop.permute.xlu0 %2019 }
 0x1c0   :  { %v5358_v12 = vpop.permute.xlu0 %2124 }
 0x201   :  { %v4084_v38 = vpop.f32.mrb[4].mxu0 }
 0x202   :  { %v5306_v46 = vadd.f32 %v4084_v38, %v5301_v15  ;;  %v1571_v13 = vpop.f32.mrb[5].mxu0 }
 0x203   :  { %v5309_v49 = vadd.f32 %v5301_v15, %v1571_v13  ;;  %v4085_v45 = vpop.f32.mrb[6].mxu0 }
 0x204   :  { %v1700_v26 = vmul.f32 %v5306_v46, %v5306_v46  ;;  %v5314_v9 = vadd.f32 %v4085_v45, %v5301_v15  ;;  %v1574_v28 = vpop.f32.mrb[7].mxu0 }
 0x205   :  { %v1698_v59 = vmul.f32 %v5309_v49, %v5309_v49  ;;  %v5319_v23 = vadd.f32 %v5301_v15, %v1574_v28  ;;  %v5365_v28 = vpop.permute.xlu1 %2047 }
 0x206   :  { %v1732_v48 = vmul.f32 %v1700_v26, %v5306_v46  ;;  %v1701_v36 = vmul.f32 %v5314_v9, %v5314_v9 }
 0x207   :  { %v1730_v35 = vmul.f32 %v1698_v59, %v5309_v49  ;;  %v1699_v30 = vmul.f32 %v5319_v23, %v5319_v23 }
 0x208   :  { %v1764_v37 = vmul.f32 0.044715, %v1732_v48  ;;  %v1733_v34 = vmul.f32 %v1701_v36, %v5314_v9 }
 0x209   :  { %v1762_v44 = vmul.f32 0.044715, %v1730_v35  ;;  %v1731_v24 = vmul.f32 %v1699_v30, %v5319_v23 }
 0x20a   :  { %v1796_v50 = vadd.f32 %v1764_v37, %v5306_v46  ;;  %v1765_v43 = vmul.f32 0.044715, %v1733_v34 }
 0x20b   :  { %v1794_v19 = vadd.f32 %v1762_v44, %v5309_v49  ;;  %v1763_v22 = vmul.f32 0.044715, %v1731_v24 }
 0x20c   :  { %v1797_v56 = vadd.f32 %v1765_v43, %v5314_v9  ;;  %v1828_v10 = vmul.f32 0.7978846, %v1796_v50 }
 0x20d   :  { %v1826_v54 = vmul.f32 0.7978846, %v1794_v19  ;;  %v1795_v1 = vadd.f32 %v1763_v22, %v5319_v23  ;;  %v5372_v19 = vpop.permute.xlu0 %2026 }
 0x20e   :  { %4352 = vtanh.f32 %v1828_v10  ;;  %v1829_v14 = vmul.f32 0.7978846, %v1797_v56 }
 0x20f   :  { %4354 = vtanh.f32 %v1826_v54  ;;  %v1827_v31 = vmul.f32 0.7978846, %v1795_v1 }
 0x210   :  { %4356 = vtanh.f32 %v1829_v14 }
 0x211   :  { %4358 = vtanh.f32 %v1827_v31 }
 0x213   :  { %v4088_v51 = vpop.f32.mrb[8].mxu0 }
 0x214   :  { %v5340_v40 = vadd.f32 %v4088_v51, %v5301_v15  ;;  %v1587_v25 = vpop.f32.mrb[9].mxu0 }
 0x215   :  { %v5343_v21 = vadd.f32 %v5301_v15, %v1587_v25  ;;  %v4089_v53 = vpop.f32.mrb[10].mxu0  ;;  %v5380_v25 = vpop.permute.xlu1 %2054 }
 0x216   :  { %v1704_v2 = vmul.f32 %v5340_v40, %v5340_v40  ;;  %v5348_v8 = vadd.f32 %v4089_v53, %v5301_v15  ;;  %v1590_v60 = vpop.f32.mrb[11].mxu0 }
 0x217   :  { %v1702_v11 = vmul.f32 %v5343_v21, %v5343_v21  ;;  %v5353_v16 = vadd.f32 %v5301_v15, %v1590_v60 }
 0x218   :  { %v4353_v61 = vpop.eup %4352  ;;  %v1736_v18 = vmul.f32 %v1704_v2, %v5340_v40  ;;  %v1705_v62 = vmul.f32 %v5348_v8, %v5348_v8 }
 0x219   :  { %v4355_v41 = vpop.eup %4354  ;;  %v1892_v32 = vadd.f32 1.0, %v4353_v61  ;;  %v1734_v0 = vmul.f32 %v1702_v11, %v5343_v21  ;;  %v1703_v63 = vmul.f32 %v5353_v16, %v5353_v16 }
 0x21a   :  { %v4357_v3 = vpop.eup %4356  ;;  %v1890_v5 = vadd.f32 1.0, %v4355_v41  ;;  %v1768_v6 = vmul.f32 0.044715, %v1736_v18  ;;  %v1737_v57 = vmul.f32 %v1705_v62, %v5348_v8  ;;  %v5389_v62 = vpop.permute.xlu0 %2131 }
 0x21b   :  { %v4359_v27 = vpop.eup %4358  ;;  %v1924_v38 = vmul.f32 0.5, %v1892_v32  ;;  %v1893_v13 = vadd.f32 1.0, %v4357_v3  ;;  %v1766_v45 = vmul.f32 0.044715, %v1734_v0  ;;  %v1735_v26 = vmul.f32 %v1703_v63, %v5353_v16 }
 0x21c   :  { %v1922_v59 = vmul.f32 0.5, %v1890_v5  ;;  %v1891_v48 = vadd.f32 1.0, %v4359_v27  ;;  %v1800_v36 = vadd.f32 %v1768_v6, %v5340_v40  ;;  %v1769_v35 = vmul.f32 0.044715, %v1737_v57 }
 0x21d   :  { %v1956_v30 = vmul.f32 %v1924_v38, %v5306_v46  ;;  %v1925_v37 = vmul.f32 0.5, %v1893_v13  ;;  %v1798_v34 = vadd.f32 %v1766_v45, %v5343_v21  ;;  %v1767_v44 = vmul.f32 0.044715, %v1735_v26  ;;  %v5401_v45 = vpop.permute.xlu1 %2061 }
 0x21e   :  { %v1954_v24 = vmul.f32 %v1922_v59, %v5309_v49  ;;  %v1923_v50 = vmul.f32 0.5, %v1891_v48  ;;  %v1801_v43 = vadd.f32 %v1769_v35, %v5348_v8  ;;  %v1832_v14 = vmul.f32 0.7978846, %v1800_v36 }
 0x21f   :  { %v2212_v22 = vmul.f32 %v5294_v4, %v1956_v30  ;;  %v1957_v56 = vmul.f32 %v1925_v37, %v5314_v9  ;;  %v1799_v10 = vadd.f32 %v1767_v44, %v5353_v16  ;;  %v1830_v54 = vmul.f32 0.7978846, %v1798_v34  ;;  %v4200_v9 = vld [vmem:[%s6190_s9] sm:$0xff]  }
 0x220   :  { %v2210_v46 = vmul.f32 %v5290_v58, %v1954_v24  ;;  %v1955_v1 = vmul.f32 %v1923_v50, %v5319_v23  ;;  %v1833_v31 = vmul.f32 0.7978846, %v1801_v43  ;;  %4114 = vmatprep.subr.bf16.mxu0 %v4200_v9 }
 0x221   :  { %v2254_v51 = vrot.slane %v2212_v22, 4  ;;  %v2213_v49 = vmul.f32 %v5324_v42, %v1957_v56  ;;  %4360 = vtanh.f32 %v1830_v54  ;;  %v1831_v53 = vmul.f32 0.7978846, %v1799_v10  ;;  %4115 = vmatpush3.bf16.msra.mxu0 %v4200_v9  ;;  %v5413_v56 = vpop.permute.xlu0 %2033 }
 0x222   :  { %v2242_v2 = vrot.slane %v2210_v46, 4  ;;  %v2211_v4 = vmul.f32 %v5292_v7, %v1955_v1 }
 0x223   :  { %v2255_v60 = vadd.f32 %v2254_v51, %v2212_v22  ;;  %v2260_v58 = vrot.slane %v2213_v49, 4  ;;  %4362 = vtanh.f32 %v1831_v53  ;;  %v4092_v23 = vpop.f32.mrb[12].mxu0 }
 0x224   :  { %v2243_v11 = vadd.f32 %v2242_v2, %v2210_v46  ;;  %v2248_v61 = vrot.slane %v2211_v4, 4  ;;  %v5387_v18 = vadd.f32 %v4092_v23, %v5301_v15  ;;  %v1603_v42 = vpop.f32.mrb[13].mxu0  ;;  %4364 = vtanh.f32 %v1832_v14 }
 0x225   :  { %v2256_v41 = vrot.slane %v2255_v60, 2  ;;  %v2261_v7 = vadd.f32 %v2260_v58, %v2213_v49  ;;  %v5392_v32 = vadd.f32 %v5301_v15, %v1603_v42  ;;  %v4093_v0 = vpop.f32.mrb[14].mxu0  ;;  %4366 = vtanh.f32 %v1833_v31  ;;  %v4201_v31 = vld [vmem:[%s6190_s9 + $0x8] sm:$0xff]  }
 0x226   :  { %v2244_v63 = vrot.slane %v2243_v11, 2  ;;  %v2249_v3 = vadd.f32 %v2248_v61, %v2211_v4  ;;  %v1708_v5 = vmul.f32 %v5387_v18, %v5387_v18  ;;  %v5397_v6 = vadd.f32 %v4093_v0, %v5301_v15  ;;  %v1606_v57 = vpop.f32.mrb[15].mxu0  ;;  %4116 = vmatprep.subr.bf16.mxu0 %v4201_v31 }
 0x227   :  { %v2257_v27 = vadd.f32 %v2256_v41, %v2255_v60  ;;  %v2262_v38 = vrot.slane %v2261_v7, 2  ;;  %v1706_v13 = vmul.f32 %v5392_v32, %v5392_v32  ;;  %v5404_v26 = vadd.f32 %v5301_v15, %v1606_v57  ;;  %4117 = vmatpush3.bf16.msra.mxu0 %v4201_v31 }
 0x228   :  { %v2245_v59 = vadd.f32 %v2244_v63, %v2243_v11  ;;  %v2250_v48 = vrot.slane %v2249_v3, 2  ;;  %v1740_v36 = vmul.f32 %v1708_v5, %v5387_v18  ;;  %v1709_v35 = vmul.f32 %v5397_v6, %v5397_v6  ;;  %v5421_v11 = vpop.permute.xlu1 %2110 }
 0x229   :  { %v2258_v30 = vrot.slane %v2257_v27, 1  ;;  %v2263_v37 = vadd.f32 %v2262_v38, %v2261_v7  ;;  %v1738_v34 = vmul.f32 %v1706_v13, %v5392_v32  ;;  %v1707_v44 = vmul.f32 %v5404_v26, %v5404_v26 }
 0x22a   :  { %v2246_v24 = vrot.slane %v2245_v59, 1  ;;  %v2251_v50 = vadd.f32 %v2250_v48, %v2249_v3  ;;  %v1772_v43 = vmul.f32 0.044715, %v1740_v36  ;;  %v1741_v22 = vmul.f32 %v1709_v35, %v5397_v6  ;;  %v5425_v36 = vpop.permute.xlu0 %2138 }
 0x22b   :  { %v4361_v10 = vpop.eup %4360  ;;  %v2259_v54 = vadd.f32 %v2258_v30, %v2257_v27  ;;  %v2264_v46 = vrot.slane %v2263_v37, 1  ;;  %v1770_v1 = vmul.f32 0.044715, %v1738_v34  ;;  %v1739_v14 = vmul.f32 %v1707_v44, %v5404_v26 }
 0x22c   :  { %v2247_v51 = vadd.f32 %v2246_v24, %v2245_v59  ;;  %v2252_v49 = vrot.slane %v2251_v50, 1  ;;  %v1894_v53 = vadd.f32 1.0, %v4361_v10  ;;  %v1804_v2 = vadd.f32 %v1772_v43, %v5387_v18 }
 0x22d   :  { %v4363_v4 = vpop.eup %4362  ;;  %v2449_v9 = vpack.c.bf16 %v2259_v54, %v2259_v54  ;;  %v2265_v60 = vadd.f32 %v2264_v46, %v2263_v37  ;;  %v1802_v58 = vadd.f32 %v1770_v1, %v5392_v32  ;;  %v1773_v23 = vmul.f32 0.044715, %v1741_v22  ;;  %v5430_v22 = vpop.permute.xlu1 %2166 }
 0x22e   :  { %v4365_v61 = vpop.eup %4364  ;;  %v2447_v42 = vpack.c.bf16 %v2247_v51, %v2247_v51  ;;  %v2253_v41 = vadd.f32 %v2252_v49, %v2251_v50  ;;  %v1926_v7 = vmul.f32 0.5, %v1894_v53  ;;  %v1895_v0 = vadd.f32 1.0, %v4363_v4 }
 0x22f   :  { %v4367_v63 = vpop.eup %4366  ;;  %v2540_v3 = vunpack.c.l.b16 %v2449_v9  ;;  %v2450_v5 = vpack.c.bf16 %v2265_v60, %v2265_v60  ;;  %v1834_v57 = vmul.f32 0.7978846, %v1802_v58  ;;  %v1805_v27 = vadd.f32 %v1773_v23, %v5397_v6  ;;  %v2041_v58 = vpop.permute.xlu0 %2040 }
 0x230   :  { %v2538_v38 = vunpack.c.l.b16 %v2447_v42  ;;  %v2448_v13 = vpack.c.bf16 %v2253_v41, %v2253_v41  ;;  %v1958_v59 = vmul.f32 %v1926_v7, %v5343_v21  ;;  %v1927_v48 = vmul.f32 0.5, %v1895_v0  ;;  %v4202_v41 = vld [vmem:[%s6190_s9 + $0x10] sm:$0xff]  }
 0x231   :  { %v2541_v35 = vunpack.c.l.b16 %v2450_v5  ;;  %4368 = vtanh.f32 %v1834_v57  ;;  %v1836_v30 = vmul.f32 0.7978846, %v1804_v2  ;;  %v1771_v37 = vmul.f32 0.044715, %v1739_v14  ;;  %4118 = vmatprep.subr.bf16.mxu0 %v4202_v41 }
 0x232   :  { %v2539_v34 = vunpack.c.l.b16 %v2448_v13  ;;  %v2214_v44 = vmul.f32 %v5337_v33, %v1958_v59  ;;  %v1959_v24 = vmul.f32 %v1927_v48, %v5353_v16  ;;  %v1896_v50 = vadd.f32 1.0, %v4365_v61  ;;  %4119 = vmatpush3.bf16.msra.mxu0 %v4202_v41 }
 0x233   :  { %4370 = vtanh.f32 %v1836_v30  ;;  %v1803_v43 = vadd.f32 %v1771_v37, %v5404_v26  ;;  %v1837_v10 = vmul.f32 0.7978846, %v1805_v27  ;;  %v1897_v21 = vadd.f32 1.0, %v4367_v63  ;;  %v4096_v54 = vpop.f32.mrb[16].mxu0 }
 0x234   :  { %v2571_v46 = vsel %vm2570_vm0, %v2539_v34, %v2538_v38  ;;  %v2266_v1 = vrot.slane %v2214_v44, 4  ;;  %v2215_v31 = vmul.f32 %v5372_v19, %v1959_v24  ;;  %v1928_v14 = vmul.f32 0.5, %v1896_v50  ;;  %v1619_v51 = vpop.f32.mrb[17].mxu0  ;;  %v4204_v24 = vld [vmem:[%s6190_s9 + $0x20] sm:$0xff]  }
 0x235   :  { %v2573_v33 = vsel %vm2572_vm1, %v2540_v3, %v2571_v46  ;;  %v1835_v49 = vmul.f32 0.7978846, %v1803_v43  ;;  %4372 = vtanh.f32 %v1837_v10  ;;  %v1929_v16 = vmul.f32 0.5, %v1897_v21  ;;  %v4097_v53 = vpop.f32.mrb[18].mxu0  ;;  %v5456_v3 = vpop.permute.xlu1 %2068 }
 0x236   :  { %v5436_v2 = vsel %vm2574_vm2, %v2541_v35, %v2573_v33  ;;  %v2267_v4 = vadd.f32 %v2266_v1, %v2214_v44  ;;  %v2272_v9 = vrot.slane %v2215_v31, 4  ;;  %v1960_v60 = vmul.f32 %v1928_v14, %v5340_v40  ;;  %v1622_v23 = vpop.f32.mrb[19].mxu0 }
 0x237   :  { %4374 = vtanh.f32 %v1835_v49  ;;  %v1961_v19 = vmul.f32 %v1929_v16, %v5348_v8  ;;  %v5441_v61 = vadd.f32 %v4096_v54, %v5301_v15  ;;  %v5444_v42 = vadd.f32 %v5301_v15, %v1619_v51  ;;  %v4203_v8 = vld [vmem:[%s6190_s9 + $0x18] sm:$0xff]  }
 0x238   :  { %v2268_v7 = vrot.slane %v2267_v4, 2  ;;  %v2273_v0 = vadd.f32 %v2272_v9, %v2215_v31  ;;  %v2216_v63 = vmul.f32 %v5413_v56, %v1960_v60  ;;  %v5451_v40 = vadd.f32 %v4097_v53, %v5301_v15  ;;  %4120 = vmatprep.subr.bf16.mxu0 %v4203_v8 }
 0x239   :  { %v2217_v5 = vmul.f32 %v2041_v58, %v1961_v19  ;;  %v1712_v57 = vmul.f32 %v5441_v61, %v5441_v61  ;;  %v1710_v27 = vmul.f32 %v5444_v42, %v5444_v42  ;;  %v5463_v38 = vadd.f32 %v5301_v15, %v1622_v23  ;;  %4121 = vmatpush3.bf16.msra.mxu0 %v4203_v8  ;;  %v5479_v23 = vpop.permute.xlu1 %2173 }
 0x23a   :  { %v2269_v56 = vadd.f32 %v2268_v7, %v2267_v4  ;;  %v2274_v13 = vrot.slane %v2273_v0, 2  ;;  %v2278_v59 = vrot.slane %v2216_v63, 4  ;;  %v1713_v48 = vmul.f32 %v5451_v40, %v5451_v40  ;;  %4122 = vmatprep.subr.bf16.mxu0 %v4204_v24 }
 0x23b   :  { %v4369_v35 = vpop.eup %4368  ;;  %v2284_v30 = vrot.slane %v2217_v5, 4  ;;  %v1744_v37 = vmul.f32 %v1712_v57, %v5441_v61  ;;  %v1742_v34 = vmul.f32 %v1710_v27, %v5444_v42  ;;  %v1711_v44 = vmul.f32 %v5463_v38, %v5463_v38 }
 0x23c   :  { %v2270_v50 = vrot.slane %v2269_v56, 1  ;;  %v2275_v43 = vadd.f32 %v2274_v13, %v2273_v0  ;;  %v1898_v10 = vadd.f32 1.0, %v4369_v35  ;;  %v2279_v21 = vadd.f32 %v2278_v59, %v2216_v63  ;;  %v4205_v63 = vld [vmem:[%s6190_s9 + $0x28] sm:$0xff]  }
 0x23d   :  { %v4371_v54 = vpop.eup %4370  ;;  %v2285_v46 = vadd.f32 %v2284_v30, %v2217_v5  ;;  %v1776_v1 = vmul.f32 0.044715, %v1744_v37  ;;  %v1774_v31 = vmul.f32 0.044715, %v1742_v34  ;;  %v1745_v14 = vmul.f32 %v1713_v48, %v5451_v40  ;;  %4123 = vmatpush3.bf16.msra.mxu0 %v4204_v24 }
 0x23e   :  { %v2271_v51 = vadd.f32 %v2270_v50, %v2269_v56  ;;  %v2276_v33 = vrot.slane %v2275_v43, 1  ;;  %v1930_v49 = vmul.f32 0.5, %v1898_v10  ;;  %v1900_v16 = vadd.f32 1.0, %v4371_v54  ;;  %4124 = vmatprep.subr.bf16.mxu0 %v4205_v63 }
 0x23f   :  { %v4373_v53 = vpop.eup %4372  ;;  %v2280_v4 = vrot.slane %v2279_v21, 2  ;;  %v2286_v9 = vrot.slane %v2285_v46, 2  ;;  %v5476_v60 = vadd.f32 %v1776_v1, %v5441_v61  ;;  %v1806_v58 = vadd.f32 %v1774_v31, %v5444_v42 }
 0x240   :  { %v2451_v19 = vpack.c.bf16 %v2271_v51, %v2271_v51  ;;  %v2277_v41 = vadd.f32 %v2276_v33, %v2275_v43  ;;  %v1962_v7 = vmul.f32 %v1930_v49, %v5392_v32  ;;  %v1932_v0 = vmul.f32 0.5, %v1900_v16  ;;  %v4206_v43 = vld [vmem:[%s6190_s9 + $0x30] sm:$0xff]  }
 0x241   :  { %v4375_v8 = vpop.eup %4374  ;;  %v2281_v5 = vadd.f32 %v2280_v4, %v2279_v21  ;;  %v1901_v57 = vadd.f32 1.0, %v4373_v53  ;;  %v2287_v27 = vadd.f32 %v2286_v9, %v2285_v46  ;;  %v1777_v56 = vmul.f32 0.044715, %v1745_v14  ;;  %v5499_v14 = vpop.permute.xlu1 %2075  ;;  %4125 = vmatpush3.bf16.msra.mxu0 %v4205_v63 }
 0x242   :  { %v5485_v13 = vunpack.c.l.b16 %v2451_v19  ;;  %v2452_v59 = vpack.c.bf16 %v2277_v41, %v2277_v41  ;;  %v2218_v48 = vmul.f32 %v5365_v28, %v1962_v7  ;;  %v1964_v35 = vmul.f32 %v1932_v0, %v5387_v18  ;;  %4126 = vmatprep.subr.bf16.mxu0 %v4206_v43 }
 0x243   :  { %v1899_v30 = vadd.f32 1.0, %v4375_v8  ;;  %v2282_v32 = vrot.slane %v2281_v5, 1  ;;  %v1933_v37 = vmul.f32 0.5, %v1901_v57  ;;  %v2288_v34 = vrot.slane %v2287_v27, 1  ;;  %v4100_v50 = vpop.f32.mrb[20].mxu0 }
 0x244   :  { %v5492_v10 = vunpack.c.l.b16 %v2452_v59  ;;  %v2290_v21 = vrot.slane %v2218_v48, 4  ;;  %v2220_v54 = vmul.f32 %v5401_v45, %v1964_v35  ;;  %v5496_v28 = vadd.f32 %v1777_v56, %v5451_v40  ;;  %v1635_v18 = vpop.f32.mrb[21].mxu0 }
 0x245   :  { %v1931_v24 = vmul.f32 0.5, %v1899_v30  ;;  %v2283_v46 = vadd.f32 %v2282_v32, %v2281_v5  ;;  %v1965_v1 = vmul.f32 %v1933_v37, %v5397_v6  ;;  %v2289_v31 = vadd.f32 %v2288_v34, %v2287_v27  ;;  %v4101_v51 = vpop.f32.mrb[22].mxu0  ;;  %v4207_v6 = vld [vmem:[%s6190_s9 + $0x38] sm:$0xff]   ;;  %4127 = vmatpush3.bf16.msra.mxu0 %v4206_v43 }
 0x246   :  { %v2291_v33 = vadd.f32 %v2290_v21, %v2218_v48  ;;  %v2302_v49 = vrot.slane %v2220_v54, 4  ;;  %v1743_v16 = vmul.f32 %v1711_v44, %v5463_v38  ;;  %v1838_v53 = vmul.f32 0.7978846, %v1806_v58  ;;  %v1638_v4 = vpop.f32.mrb[23].mxu0  ;;  %v5516_v48 = vpop.permute.xlu1 %2180  ;;  %4128 = vmatprep.subr.bf16.mxu0 %v4207_v6 }
 0x247   :  { %v1963_v45 = vmul.f32 %v1931_v24, %v5404_v26  ;;  %v2453_v9 = vpack.c.bf16 %v2283_v46, %v2283_v46  ;;  %v2221_v19 = vmul.f32 %v5456_v3, %v1965_v1  ;;  %v2454_v41 = vpack.c.bf16 %v2289_v31, %v2289_v31 }
 0x248   :  { %v2292_v7 = vrot.slane %v2291_v33, 2  ;;  %v2303_v0 = vadd.f32 %v2302_v49, %v2220_v54  ;;  %v1775_v8 = vmul.f32 0.044715, %v1743_v16  ;;  %4376 = vtanh.f32 %v1838_v53 }
 0x249   :  { %v2219_v44 = vmul.f32 %v5380_v25, %v1963_v45  ;;  %v5508_v58 = vunpack.c.l.b16 %v2453_v9  ;;  %v2308_v63 = vrot.slane %v2221_v19, 4  ;;  %v5510_v5 = vunpack.c.l.b16 %v2454_v41  ;;  %4129 = vmatpush3.bf16.msra.mxu0 %v4207_v6 }
 0x24a   :  { %v2293_v26 = vadd.f32 %v2292_v7, %v2291_v33  ;;  %v2304_v57 = vrot.slane %v2303_v0, 2  ;;  %v1807_v3 = vadd.f32 %v1775_v8, %v5463_v38  ;;  %v5514_v27 = vadd.f32 %v4100_v50, %v5301_v15  ;;  %v5536_v41 = vpop.permute.xlu1 %2082 }
 0x24b   :  { %v2296_v56 = vrot.slane %v2219_v44, 4  ;;  %v2309_v59 = vadd.f32 %v2308_v63, %v2221_v19  ;;  %v5519_v35 = vadd.f32 %v5301_v15, %v1635_v18  ;;  %v5522_v25 = vadd.f32 %v4101_v51, %v5301_v15 }
 0x24c   :  { %v2294_v30 = vrot.slane %v2293_v26, 1  ;;  %v2305_v32 = vadd.f32 %v2304_v57, %v2303_v0  ;;  %v1839_v37 = vmul.f32 0.7978846, %v1807_v3  ;;  %v1716_v34 = vmul.f32 %v5514_v27, %v5514_v27 }
 0x24d   :  { %v2297_v50 = vadd.f32 %v2296_v56, %v2219_v44  ;;  %v2310_v21 = vrot.slane %v2309_v59, 2  ;;  %v1714_v43 = vmul.f32 %v5519_v35, %v5519_v35  ;;  %v1717_v54 = vmul.f32 %v5522_v25, %v5522_v25 }
 0x24e   :  { %v2295_v18 = vadd.f32 %v2294_v30, %v2293_v26  ;;  %v2306_v24 = vrot.slane %v2305_v32, 1  ;;  %4378 = vtanh.f32 %v1839_v37  ;;  %v1748_v46 = vmul.f32 %v1716_v34, %v5514_v27 }
 0x24f   :  { %v2298_v1 = vrot.slane %v2297_v50, 2  ;;  %v2311_v31 = vadd.f32 %v2310_v21, %v2309_v59  ;;  %v1746_v51 = vmul.f32 %v1714_v43, %v5519_v35  ;;  %v1749_v33 = vmul.f32 %v1717_v54, %v5522_v25 }
 0x250   :  { %v2455_v49 = vpack.c.bf16 %v2295_v18, %v2295_v18  ;;  %v2307_v16 = vadd.f32 %v2306_v24, %v2305_v32  ;;  %v1780_v53 = vmul.f32 0.044715, %v1748_v46  ;;  %v5534_v45 = vadd.f32 %v5301_v15, %v1638_v4 }
 0x251   :  { %v2299_v9 = vadd.f32 %v2298_v1, %v2297_v50  ;;  %v2312_v19 = vrot.slane %v2311_v31, 1  ;;  %v1778_v7 = vmul.f32 0.044715, %v1746_v51  ;;  %v1781_v0 = vmul.f32 0.044715, %v1749_v33 }
 0x252   :  { %v4377_v8 = vpop.eup %4376  ;;  %v2546_v6 = vunpack.c.l.b16 %v2455_v49  ;;  %v2457_v44 = vpack.c.bf16 %v2307_v16, %v2307_v16  ;;  %v1812_v63 = vadd.f32 %v1780_v53, %v5514_v27  ;;  %v1715_v26 = vmul.f32 %v5534_v45, %v5534_v45  ;;  %v5546_v16 = vpop.permute.xlu1 %2187 }
 0x253   :  { %v2300_v57 = vrot.slane %v2299_v9, 1  ;;  %v2313_v3 = vadd.f32 %v2312_v19, %v2311_v31  ;;  %v1902_v56 = vadd.f32 1.0, %v4377_v8  ;;  %v1810_v4 = vadd.f32 %v1778_v7, %v5519_v35  ;;  %v4104_v59 = vpop.f32.mrb[24].mxu0 }
 0x254   :  { %v2548_v30 = vunpack.c.l.b16 %v2457_v44  ;;  %v1844_v32 = vmul.f32 0.7978846, %v1812_v63  ;;  %v1813_v37 = vadd.f32 %v1781_v0, %v5522_v25  ;;  %v1747_v34 = vmul.f32 %v1715_v26, %v5534_v45  ;;  %v1651_v50 = vpop.f32.mrb[25].mxu0 }
 0x255   :  { %v2301_v21 = vadd.f32 %v2300_v57, %v2299_v9  ;;  %v2458_v43 = vpack.c.bf16 %v2313_v3, %v2313_v3  ;;  %v1934_v54 = vmul.f32 0.5, %v1902_v56  ;;  %v1842_v18 = vmul.f32 0.7978846, %v1810_v4  ;;  %v4105_v24 = vpop.f32.mrb[26].mxu0 }
 0x256   :  { %4380 = vtanh.f32 %v1844_v32  ;;  %v1845_v46 = vmul.f32 0.7978846, %v1813_v37  ;;  %v1779_v1 = vmul.f32 0.044715, %v1747_v34  ;;  %v1840_v31 = vmul.f32 0.7978846, %v5476_v60 }
 0x257   :  { %v2456_v51 = vpack.c.bf16 %v2301_v21, %v2301_v21  ;;  %v2549_v33 = vunpack.c.l.b16 %v2458_v43  ;;  %v1966_v49 = vmul.f32 %v1934_v54, %v5444_v42  ;;  %4382 = vtanh.f32 %v1842_v18  ;;  %v1654_v53 = vpop.f32.mrb[27].mxu0 }
 0x258   :  { %v4379_v9 = vpop.eup %4378  ;;  %4384 = vtanh.f32 %v1845_v46  ;;  %v1811_v19 = vadd.f32 %v1779_v1, %v5534_v45  ;;  %v1841_v7 = vmul.f32 0.7978846, %v5496_v28  ;;  %v5551_v0 = vadd.f32 %v4104_v59, %v5301_v15 }
 0x259   :  { %v2547_v8 = vunpack.c.l.b16 %v2456_v51  ;;  %v2222_v60 = vmul.f32 %v5499_v14, %v1966_v49  ;;  %v1903_v44 = vadd.f32 1.0, %v4379_v9  ;;  %4386 = vtanh.f32 %v1840_v31 }
 0x25a   :  { %v1843_v42 = vmul.f32 0.7978846, %v1811_v19  ;;  %4388 = vtanh.f32 %v1841_v7  ;;  %v1720_v63 = vmul.f32 %v5551_v0, %v5551_v0  ;;  %v5557_v26 = vadd.f32 %v5301_v15, %v1651_v50 }
 0x25b   :  { %v2584_v57 = vsel %vm2570_vm0, %v2547_v8, %v2546_v6  ;;  %v2314_v3 = vrot.slane %v2222_v60, 4  ;;  %v1935_v28 = vmul.f32 0.5, %v1903_v44  ;;  %v5561_v56 = vadd.f32 %v4105_v24, %v5301_v15  ;;  %v5571_v6 = vpop.permute.xlu1 %2089 }
 0x25c   :  { %v2585_v4 = vsel %vm2572_vm1, %v2548_v30, %v2584_v57  ;;  %4390 = vtanh.f32 %v1843_v42  ;;  %v1752_v14 = vmul.f32 %v1720_v63, %v5551_v0  ;;  %v1718_v59 = vmul.f32 %v5557_v26, %v5557_v26 }
 0x25d   :  { %v5568_v32 = vsel %vm2574_vm2, %v2549_v33, %v2585_v4  ;;  %v2315_v37 = vadd.f32 %v2314_v3, %v2222_v60  ;;  %v1967_v34 = vmul.f32 %v1935_v28, %v5463_v38  ;;  %v1721_v50 = vmul.f32 %v5561_v56, %v5561_v56 }
 0x25e   :  { %v1784_v21 = vmul.f32 0.044715, %v1752_v14  ;;  %v1750_v30 = vmul.f32 %v1718_v59, %v5557_v26  ;;  %v5577_v43 = vadd.f32 %v5301_v15, %v1654_v53  ;;  %v2577_v54 = vsel %vm2576_vm3, %v5485_v13, %v5436_v2 }
 0x25f   :  { %v2316_v18 = vrot.slane %v2315_v37, 2  ;;  %v2223_v24 = vmul.f32 %v5536_v41, %v1967_v34  ;;  %v1753_v38 = vmul.f32 %v1721_v50, %v5561_v56  ;;  %v2579_v46 = vsel %vm2578_vm4, %v5492_v10, %v2577_v54  ;;  %v5601_v3 = vpop.permute.xlu1 %2194 }
 0x260   :  { %v4381_v1 = vpop.eup %4380  ;;  %v5587_v31 = vadd.f32 %v1784_v21, %v5551_v0  ;;  %v1782_v51 = vmul.f32 0.044715, %v1750_v30  ;;  %v1719_v15 = vmul.f32 %v5577_v43, %v5577_v43  ;;  %v2581_v33 = vsel %vm2580_vm5, %v5508_v58, %v2579_v46 }
 0x261   :  { %v4383_v2 = vpop.eup %4382  ;;  %v2317_v13 = vadd.f32 %v2316_v18, %v2315_v37  ;;  %v2320_v49 = vrot.slane %v2223_v24, 4  ;;  %v1908_v41 = vadd.f32 1.0, %v4381_v1  ;;  %v1785_v53 = vmul.f32 0.044715, %v1753_v38 }
 0x262   :  { %v4385_v9 = vpop.eup %4384  ;;  %v1906_v19 = vadd.f32 1.0, %v4383_v2  ;;  %v1814_v10 = vadd.f32 %v1782_v51, %v5557_v26  ;;  %v1751_v7 = vmul.f32 %v1719_v15, %v5577_v43  ;;  %v5595_v8 = vpop.f32.mrb[28].mxu0  ;;  %v5599_v60 = vsel %vm2582_vm6, %v5510_v5, %v2581_v33 }
 0x263   :  { %v4387_v44 = vpop.eup %4386  ;;  %v2318_v42 = vrot.slane %v2317_v13, 1  ;;  %v2321_v58 = vadd.f32 %v2320_v49, %v2223_v24  ;;  %v1940_v63 = vmul.f32 0.5, %v1908_v41  ;;  %v1909_v57 = vadd.f32 1.0, %v4385_v9  ;;  %v5603_v28 = vpop.f32.mrb[29].mxu0 }
 0x264   :  { %v4389_v4 = vpop.eup %4388  ;;  %v1938_v14 = vmul.f32 0.5, %v1906_v19  ;;  %v1904_v59 = vadd.f32 1.0, %v4387_v44  ;;  %v1846_v37 = vmul.f32 0.7978846, %v1814_v10  ;;  %v5606_v34 = vadd.f32 %v1785_v53, %v5561_v56  ;;  %v5608_v50 = vpop.f32.mrb[30].mxu0 }
 0x265   :  { %v2319_v5 = vadd.f32 %v2318_v42, %v2317_v13  ;;  %v2322_v21 = vrot.slane %v2321_v58, 2  ;;  %v1972_v30 = vmul.f32 %v1940_v63, %v5514_v27  ;;  %v1941_v54 = vmul.f32 0.5, %v1909_v57  ;;  %v5611_v18 = vpop.f32.mrb[31].mxu0  ;;  %v2097_v10 = vpop.permute.xlu1 %2096 }
 0x266   :  { %v4391_v24 = vpop.eup %4390  ;;  %v1970_v38 = vmul.f32 %v1938_v14, %v5519_v35  ;;  %v1936_v46 = vmul.f32 0.5, %v1904_v59  ;;  %v1905_v1 = vadd.f32 1.0, %v4389_v4  ;;  %4392 = vtanh.f32 %v1846_v37 }
 0x267   :  { %v2459_v51 = vpack.c.bf16 %v2319_v5, %v2319_v5  ;;  %v2323_v15 = vadd.f32 %v2322_v21, %v2321_v58  ;;  %v2228_v33 = vmul.f32 %v5334_v29, %v1972_v30  ;;  %v1973_v2 = vmul.f32 %v1941_v54, %v5522_v25 }
 0x268   :  { %v2226_v13 = vmul.f32 %v5296_v20, %v1970_v38  ;;  %v1907_v49 = vadd.f32 1.0, %v4391_v24  ;;  %v1968_v27 = vmul.f32 %v1936_v46, %v5441_v61  ;;  %v1937_v41 = vmul.f32 0.5, %v1905_v1 }
 0x269   :  { %v5618_v53 = vunpack.c.l.b16 %v2459_v51  ;;  %v2324_v9 = vrot.slane %v2323_v15, 1  ;;  %v2350_v19 = vrot.slane %v2228_v33, 4  ;;  %v2229_v35 = vmul.f32 %v5358_v12, %v1973_v2 }
 0x26a   :  { %v2338_v44 = vrot.slane %v2226_v13, 4  ;;  %v1939_v42 = vmul.f32 0.5, %v1907_v49  ;;  %v2224_v58 = vmul.f32 %v5571_v6, %v1968_v27  ;;  %v1969_v29 = vmul.f32 %v1937_v41, %v5451_v40 }
 0x26b   :  { %v2325_v25 = vadd.f32 %v2324_v9, %v2323_v15  ;;  %v2351_v63 = vadd.f32 %v2350_v19, %v2228_v33  ;;  %v2356_v20 = vrot.slane %v2229_v35, 4  ;;  %v1783_v57 = vmul.f32 0.044715, %v1751_v7 }
 0x26c   :  { %v2339_v4 = vadd.f32 %v2338_v44, %v2226_v13  ;;  %v1971_v61 = vmul.f32 %v1939_v42, %v5534_v45  ;;  %v2326_v14 = vrot.slane %v2224_v58, 4  ;;  %v2225_v59 = vmul.f32 %v2097_v10, %v1969_v29 }
 0x26d   :  { %v2460_v37 = vpack.c.bf16 %v2325_v25, %v2325_v25  ;;  %v2352_v5 = vrot.slane %v2351_v63, 2  ;;  %v2357_v21 = vadd.f32 %v2356_v20, %v2229_v35  ;;  %v1815_v12 = vadd.f32 %v1783_v57, %v5577_v43 }
 0x26e   :  { %v2340_v30 = vrot.slane %v2339_v4, 2  ;;  %v2227_v54 = vmul.f32 %v5421_v11, %v1971_v61  ;;  %v2327_v6 = vadd.f32 %v2326_v14, %v2224_v58  ;;  %v2332_v24 = vrot.slane %v2225_v59, 4  ;;  %v5635_v58 = vld [vmem:[%s6189_s8] ss:$0 sm:$0xff] }
 0x26f   :  { %v5626_v40 = vunpack.c.l.b16 %v2460_v37  ;;  %v2353_v38 = vadd.f32 %v2352_v5, %v2351_v63  ;;  %v2358_v46 = vrot.slane %v2357_v21, 2  ;;  %v1847_v7 = vmul.f32 0.7978846, %v1815_v12 }
 0x270   :  { %v4393_v1 = vpop.eup %4392  ;;  %v2341_v51 = vadd.f32 %v2340_v30, %v2339_v4  ;;  %v2344_v45 = vrot.slane %v2227_v54, 4  ;;  %v2328_v15 = vrot.slane %v2327_v6, 2  ;;  %v2333_v33 = vadd.f32 %v2332_v24, %v2225_v59 }
 0x271   :  { %v2354_v2 = vrot.slane %v2353_v38, 1  ;;  %v2359_v13 = vadd.f32 %v2358_v46, %v2357_v21  ;;  %v1910_v49 = vadd.f32 1.0, %v4393_v1  ;;  %4394 = vtanh.f32 %v1847_v7  ;;  %v5628_v27 = vpop.f32.mrb[32].mxu0 }
 0x272   :  { %v2342_v41 = vrot.slane %v2341_v51, 1  ;;  %v2345_v11 = vadd.f32 %v2344_v45, %v2227_v54  ;;  %v2329_v9 = vadd.f32 %v2328_v15, %v2327_v6  ;;  %v2334_v19 = vrot.slane %v2333_v33, 2  ;;  %v5630_v35 = vpop.f32.mrb[33].mxu0 }
 0x273   :  { %v2355_v10 = vadd.f32 %v2354_v2, %v2353_v38  ;;  %v2360_v44 = vrot.slane %v2359_v13, 1  ;;  %v1942_v42 = vmul.f32 0.5, %v1910_v49  ;;  %v5639_v29 = vadd.f32 %v5635_v58, %v5595_v8  ;;  %v5641_v25 = vpop.f32.mrb[34].mxu0 }
 0x274   :  { %v2343_v63 = vadd.f32 %v2342_v41, %v2341_v51  ;;  %v2346_v20 = vrot.slane %v2345_v11, 2  ;;  %v2330_v57 = vrot.slane %v2329_v9, 1  ;;  %v2335_v4 = vadd.f32 %v2334_v19, %v2333_v33  ;;  %v5643_v61 = vpop.f32.mrb[35].mxu0 }
 0x275   :  { %v2465_v14 = vpack.c.bf16 %v2355_v10, %v2355_v10  ;;  %v2361_v59 = vadd.f32 %v2360_v44, %v2359_v13  ;;  %v1974_v37 = vmul.f32 %v1942_v42, %v5557_v26  ;;  %v1724_v5 = vmul.f32 %v5639_v29, %v5639_v29 }
 0x276   :  { %v2463_v21 = vpack.c.bf16 %v2343_v63, %v2343_v63  ;;  %v2347_v12 = vadd.f32 %v2346_v20, %v2345_v11  ;;  %v2331_v30 = vadd.f32 %v2330_v57, %v2329_v9  ;;  %v2336_v8 = vrot.slane %v2335_v4, 1 }
 0x277   :  { %v2556_v54 = vunpack.c.l.b16 %v2465_v14  ;;  %v2466_v6 = vpack.c.bf16 %v2361_v59, %v2361_v59  ;;  %v2230_v24 = vmul.f32 %v5389_v62, %v1974_v37  ;;  %v1756_v38 = vmul.f32 %v1724_v5, %v5639_v29 }
 0x278   :  { %v2554_v46 = vunpack.c.l.b16 %v2463_v21  ;;  %v2348_v7 = vrot.slane %v2347_v12, 1  ;;  %v2461_v1 = vpack.c.bf16 %v2331_v30, %v2331_v30  ;;  %v2337_v51 = vadd.f32 %v2336_v8, %v2335_v4 }
 0x279   :  { %v2557_v45 = vunpack.c.l.b16 %v2466_v6  ;;  %v2362_v15 = vrot.slane %v2230_v24, 4  ;;  %v1788_v26 = vmul.f32 0.044715, %v1756_v38  ;;  %v5652_v33 = vadd.f32 %v5635_v58, %v5603_v28 }
 0x27a   :  { %v2349_v2 = vadd.f32 %v2348_v7, %v2347_v12  ;;  %v2552_v13 = vunpack.c.l.b16 %v2461_v1  ;;  %v2462_v49 = vpack.c.bf16 %v2337_v51, %v2337_v51  ;;  %v5656_v41 = vadd.f32 %v5635_v58, %v5608_v50 }
 0x27b   :  { %v4395_v62 = vpop.eup %4394  ;;  %v2363_v11 = vadd.f32 %v2362_v15, %v2230_v24  ;;  %v1820_v9 = vadd.f32 %v1788_v26, %v5639_v29  ;;  %v1722_v19 = vmul.f32 %v5652_v33, %v5652_v33  ;;  %v5663_v10 = vadd.f32 %v5635_v58, %v5611_v18 }
 0x27c   :  { %v2464_v28 = vpack.c.bf16 %v2349_v2, %v2349_v2  ;;  %v2553_v44 = vunpack.c.l.b16 %v2462_v49  ;;  %v1911_v42 = vadd.f32 1.0, %v4395_v62  ;;  %v1725_v63 = vmul.f32 %v5656_v41, %v5656_v41 }
 0x27d   :  { %v2364_v20 = vrot.slane %v2363_v11, 2  ;;  %v1852_v50 = vmul.f32 0.7978846, %v1820_v9  ;;  %v1754_v57 = vmul.f32 %v1722_v19, %v5652_v33  ;;  %v1723_v4 = vmul.f32 %v5663_v10, %v5663_v10 }
 0x27e   :  { %v2555_v14 = vunpack.c.l.b16 %v2464_v28  ;;  %v1943_v59 = vmul.f32 0.5, %v1911_v42  ;;  %v1757_v37 = vmul.f32 %v1725_v63, %v5656_v41  ;;  %v2587_v18 = vsel %vm2576_vm3, %v5618_v53, %v5568_v32 }
 0x27f   :  { %v2365_v5 = vadd.f32 %v2364_v20, %v2363_v11  ;;  %4396 = vtanh.f32 %v1852_v50  ;;  %v1786_v21 = vmul.f32 0.044715, %v1754_v57  ;;  %v1755_v12 = vmul.f32 %v1723_v4, %v5663_v10 }
 0x280   :  { %v2591_v30 = vsel %vm2570_vm0, %v2555_v14, %v2554_v46  ;;  %v1975_v8 = vmul.f32 %v1943_v59, %v5577_v43  ;;  %v1789_v6 = vmul.f32 0.044715, %v1757_v37  ;;  %v2588_v24 = vsel %vm2578_vm4, %v5626_v40, %v2587_v18  ;;  %v4466_v14 = vld [vmem:[%s6188_s2] sm:$0xff] }
 0x281   :  { %v2366_v38 = vrot.slane %v2365_v5, 1  ;;  %v1818_v7 = vadd.f32 %v1786_v21, %v5652_v33  ;;  %v1787_v1 = vmul.f32 0.044715, %v1755_v12  ;;  %v2589_v51 = vsel %vm2580_vm5, %v2552_v13, %v2588_v24  ;;  %v4468_v24 = vld [vmem:[%s6188_s2 + $0x8] sm:$0xff] }
 0x282   :  { %v2231_v32 = vmul.f32 %v5425_v36, %v1975_v8  ;;  %v1821_v53 = vadd.f32 %v1789_v6, %v5656_v41  ;;  %v2590_v15 = vsel %vm2582_vm6, %v2553_v44, %v2589_v51  ;;  %v1848_v46 = vmul.f32 0.7978846, %v5587_v31  ;;  %v4467_v8 = vld [vmem:[%s6188_s2 + $0x10] sm:$0xff] }
 0x283   :  { %v2367_v26 = vadd.f32 %v2366_v38, %v2365_v5  ;;  %v1850_v43 = vmul.f32 0.7978846, %v1818_v7  ;;  %v1819_v2 = vadd.f32 %v1787_v1, %v5663_v10  ;;  %v2605_v40 = vpack.c.b16 %v2590_v15, %v5599_v60 }
 0x284   :  { %v2368_v49 = vrot.slane %v2231_v32, 4  ;;  %v1853_v62 = vmul.f32 0.7978846, %v1821_v53  ;;  %4398 = vtanh.f32 %v1848_v46  ;;  %v2592_v11 = vsel %vm2572_vm1, %v2556_v54, %v2591_v30 }
 0x285   :  { %v2467_v13 = vpack.c.bf16 %v2367_v26, %v2367_v26  ;;  %4400 = vtanh.f32 %v1850_v43  ;;  %v1851_v36 = vmul.f32 0.7978846, %v1819_v2  ;;  %4130 = vmatprep.mubr.bf16.mxu0 %v2605_v40  ;;  %v2593_v9 = vsel %vm2574_vm2, %v2557_v45, %v2592_v11  ;;  %v4469_v2 = vld [vmem:[%s6188_s2 + $0x18] sm:$0xff] }
 0x286   :  { %v2369_v19 = vadd.f32 %v2368_v49, %v2231_v32  ;;  %4402 = vtanh.f32 %v1853_v62  ;;  %v1849_v31 = vmul.f32 0.7978846, %v5606_v34  ;;  %v5692_v28 = vadd.f32 %v5635_v58, %v5628_v27 }
 0x287   :  { %v2558_v60 = vunpack.c.l.b16 %v2467_v13  ;;  %4404 = vtanh.f32 %v1851_v36  ;;  %v5696_v44 = vadd.f32 %v5635_v58, %v5630_v35  ;;  %v5700_v54 = vadd.f32 %v5635_v58, %v5641_v25  ;;  %v2146_v13 = vpop.permute.xlu0 %2145 }
 0x288   :  { %v2370_v42 = vrot.slane %v2369_v19, 2  ;;  %4406 = vtanh.f32 %v1849_v31  ;;  %v1728_v45 = vmul.f32 %v5692_v28, %v5692_v28  ;;  %v5706_v34 = vadd.f32 %v5635_v58, %v5643_v61 }
 0x289   :  { %v4397_v27 = vpop.eup %4396  ;;  %v2594_v63 = vsel %vm2576_vm3, %v2558_v60, %v2593_v9  ;;  %v1726_v35 = vmul.f32 %v5696_v44, %v5696_v44  ;;  %v1729_v20 = vmul.f32 %v5700_v54, %v5700_v54  ;;  %v2435_v59 = vsel %vm2434_vm7, %v4466_v14, 0.0 }
 0x28a   :  { %v2371_v25 = vadd.f32 %v2370_v42, %v2369_v19  ;;  %v1916_v50 = vadd.f32 1.0, %v4397_v27  ;;  %v1760_v57 = vmul.f32 %v1728_v45, %v5692_v28  ;;  %v1727_v4 = vmul.f32 %v5706_v34, %v5706_v34  ;;  %2436 = vadd.xlane.f32.xlu0 %v2435_v59 }
 0x28b   :  { %v1758_v58 = vmul.f32 %v1726_v35, %v5696_v44  ;;  %v1761_v61 = vmul.f32 %v1729_v20, %v5700_v54  ;;  %v2441_v6 = vsel %vm2434_vm7, %v4467_v8, 0.0  ;;  %v2438_v38 = vsel %vm2434_vm7, %v4468_v24, 0.0 }
 0x28c   :  { %v2372_v37 = vrot.slane %v2371_v25, 1  ;;  %v1948_v18 = vmul.f32 0.5, %v1916_v50  ;;  %v1792_v5 = vmul.f32 0.044715, %v1760_v57  ;;  %v1759_v21 = vmul.f32 %v1727_v4, %v5706_v34  ;;  %2439 = vadd.xlane.f32.xlu1 %v2438_v38 }
 0x28d   :  { %v1790_v12 = vmul.f32 0.044715, %v1758_v58  ;;  %v1793_v30 = vmul.f32 0.044715, %v1761_v61  ;;  %v2444_v40 = vsel %vm2434_vm7, %v4469_v2, 0.0 }
 0x28e   :  { %v4399_v7 = vpop.eup %4398  ;;  %v2373_v1 = vadd.f32 %v2372_v37, %v2371_v25  ;;  %v1980_v51 = vmul.f32 %v1948_v18, %v5639_v29  ;;  %v1824_v32 = vadd.f32 %v1792_v5, %v5692_v28  ;;  %v1791_v53 = vmul.f32 0.044715, %v1759_v21  ;;  %2442 = vadd.xlane.f32.xlu0 %v2441_v6 }
 0x28f   :  { %v4401_v15 = vpop.eup %4400  ;;  %v1912_v46 = vadd.f32 1.0, %v4399_v7  ;;  %v1822_v26 = vadd.f32 %v1790_v12, %v5696_v44  ;;  %v1825_v43 = vadd.f32 %v1793_v30, %v5700_v54  ;;  %v2153_v30 = vpop.permute.xlu0 %2152 }
 0x290   :  { %v4403_v49 = vpop.eup %4402  ;;  %v2468_v62 = vpack.c.bf16 %v2373_v1, %v2373_v1  ;;  %v2236_v29 = vmul.f32 %v5479_v23, %v1980_v51  ;;  %v1914_v11 = vadd.f32 1.0, %v4401_v15  ;;  %v1823_v36 = vadd.f32 %v1791_v53, %v5706_v34 }
 0x291   :  { %v4405_v9 = vpop.eup %4404  ;;  %v1917_v19 = vadd.f32 1.0, %v4403_v49  ;;  %v1944_v31 = vmul.f32 0.5, %v1912_v46  ;;  %v1854_v60 = vmul.f32 0.7978846, %v1822_v26  ;;  %v1856_v42 = vmul.f32 0.7978846, %v1824_v32 }
 0x292   :  { %v4407_v45 = vpop.eup %4406  ;;  %v2559_v27 = vunpack.c.l.b16 %v2468_v62  ;;  %v2398_v35 = vrot.slane %v2236_v29, 4  ;;  %v1946_v20 = vmul.f32 0.5, %v1914_v11  ;;  %v1915_v25 = vadd.f32 1.0, %v4405_v9  ;;  %2445 = vadd.xlane.f32.xlu0 %v2444_v40 }
 0x293   :  { %v1949_v50 = vmul.f32 0.5, %v1917_v19  ;;  %v1976_v57 = vmul.f32 %v1944_v31, %v5551_v0  ;;  %v1913_v4 = vadd.f32 1.0, %v4407_v45  ;;  %4408 = vtanh.f32 %v1854_v60 }
 0x294   :  { %v2399_v23 = vadd.f32 %v2398_v35, %v2236_v29  ;;  %v1978_v58 = vmul.f32 %v1946_v20, %v5652_v33  ;;  %v1947_v61 = vmul.f32 0.5, %v1915_v25  ;;  %v5744_v14 = vsel %vm2578_vm4, %v2559_v27, %v2594_v63 }
 0x295   :  { %v1981_v59 = vmul.f32 %v1949_v50, %v5656_v41  ;;  %v2232_v37 = vmul.f32 %v2146_v13, %v1976_v57  ;;  %v1945_v18 = vmul.f32 0.5, %v1913_v4  ;;  %v1855_v5 = vmul.f32 0.7978846, %v1823_v36 }
 0x296   :  { %v2400_v21 = vrot.slane %v2399_v23, 2  ;;  %v2234_v12 = vmul.f32 %v5303_v55, %v1978_v58  ;;  %v1979_v0 = vmul.f32 %v1947_v61, %v5663_v10  ;;  %4410 = vtanh.f32 %v1856_v42 }
 0x297   :  { %v2237_v8 = vmul.f32 %v5516_v48, %v1981_v59  ;;  %v2374_v33 = vrot.slane %v2232_v37, 4  ;;  %v1977_v6 = vmul.f32 %v1945_v18, %v5561_v56  ;;  %4412 = vtanh.f32 %v1855_v5 }
 0x298   :  { %v2401_v63 = vadd.f32 %v2400_v21, %v2399_v23  ;;  %v2386_v24 = vrot.slane %v2234_v12, 4  ;;  %v2235_v41 = vmul.f32 %v5430_v22, %v1979_v0  ;;  %v1857_v38 = vmul.f32 0.7978846, %v1825_v43 }
 0x299   :  { %v2404_v7 = vrot.slane %v2237_v8, 4  ;;  %v2375_v1 = vadd.f32 %v2374_v33, %v2232_v37  ;;  %v2233_v51 = vmul.f32 %v2153_v30, %v1977_v6  ;;  %v2202_v6 = vpop.permute.xlu1 %2201 }
 0x29a   :  { %v2402_v32 = vrot.slane %v2401_v63, 1  ;;  %v2387_v55 = vadd.f32 %v2386_v24, %v2234_v12  ;;  %v2392_v53 = vrot.slane %v2235_v41, 4  ;;  %4414 = vtanh.f32 %v1857_v38 }
 0x29b   :  { %v2405_v10 = vadd.f32 %v2404_v7, %v2237_v8  ;;  %v2376_v15 = vrot.slane %v2375_v1, 2  ;;  %v2380_v46 = vrot.slane %v2233_v51, 4 }
 0x29c   :  { %v2403_v48 = vadd.f32 %v2402_v32, %v2401_v63  ;;  %v2388_v26 = vrot.slane %v2387_v55, 2  ;;  %v2393_v2 = vadd.f32 %v2392_v53, %v2235_v41 }
 0x29d   :  { %v4409_v56 = vpop.eup %4408  ;;  %v2406_v40 = vrot.slane %v2405_v10, 2  ;;  %v2377_v49 = vadd.f32 %v2376_v15, %v2375_v1  ;;  %v2381_v62 = vadd.f32 %v2380_v46, %v2233_v51 }
 0x29e   :  { %v2389_v29 = vadd.f32 %v2388_v26, %v2387_v55  ;;  %v2394_v22 = vrot.slane %v2393_v2, 2  ;;  %v1918_v43 = vadd.f32 1.0, %v4409_v56  ;;  %v2473_v19 = vpack.c.bf16 %v2403_v48, %v2403_v48 }
 0x29f   :  { %v2407_v11 = vadd.f32 %v2406_v40, %v2405_v10  ;;  %v2378_v13 = vrot.slane %v2377_v49, 1  ;;  %v2382_v36 = vrot.slane %v2381_v62, 2 }
 0x2a0   :  { %v4411_v9 = vpop.eup %4410  ;;  %v2390_v31 = vrot.slane %v2389_v29, 1  ;;  %v2395_v60 = vadd.f32 %v2394_v22, %v2393_v2  ;;  %v1950_v42 = vmul.f32 0.5, %v1918_v43  ;;  %v2564_v10 = vunpack.c.l.b16 %v2473_v19 }
 0x2a1   :  { %v4413_v45 = vpop.eup %4412  ;;  %v2408_v27 = vrot.slane %v2407_v11, 1  ;;  %v2379_v35 = vadd.f32 %v2378_v13, %v2377_v49  ;;  %v2383_v20 = vadd.f32 %v2382_v36, %v2381_v62  ;;  %v1920_v25 = vadd.f32 1.0, %v4411_v9  ;;  %v2209_v49 = vpop.permute.xlu1 %2208 }
 0x2a2   :  { %v2391_v50 = vadd.f32 %v2390_v31, %v2389_v29  ;;  %v2396_v57 = vrot.slane %v2395_v60, 1  ;;  %v1982_v4 = vmul.f32 %v1950_v42, %v5696_v44  ;;  %v1919_v23 = vadd.f32 1.0, %v4413_v45 }
 0x2a3   :  { %v2409_v58 = vadd.f32 %v2408_v27, %v2407_v11  ;;  %v2469_v61 = vpack.c.bf16 %v2379_v35, %v2379_v35  ;;  %v2384_v59 = vrot.slane %v2383_v20, 1  ;;  %v1952_v37 = vmul.f32 0.5, %v1920_v25 }
 0x2a4   :  { %v2471_v18 = vpack.c.bf16 %v2391_v50, %v2391_v50  ;;  %v2397_v5 = vadd.f32 %v2396_v57, %v2395_v60  ;;  %v2238_v21 = vmul.f32 %v5546_v16, %v1982_v4  ;;  %v1951_v12 = vmul.f32 0.5, %v1919_v23  ;;  %v4415_v0 = vpop.eup %4414 }
 0x2a5   :  { %v2474_v30 = vpack.c.bf16 %v2409_v58, %v2409_v58  ;;  %v2560_v8 = vunpack.c.l.b16 %v2469_v61  ;;  %v2385_v33 = vadd.f32 %v2384_v59, %v2383_v20  ;;  %v1984_v63 = vmul.f32 %v1952_v37, %v5692_v28 }
 0x2a6   :  { %v2472_v24 = vpack.c.bf16 %v2397_v5, %v2397_v5  ;;  %v2410_v41 = vrot.slane %v2238_v21, 4  ;;  %v1983_v44 = vmul.f32 %v1951_v12, %v5706_v34  ;;  %v2562_v38 = vunpack.c.l.b16 %v2471_v18 }
 0x2a7   :  { %v2596_v7 = vsel %vm2580_vm5, %v2560_v8, %v5744_v14  ;;  %v2470_v1 = vpack.c.bf16 %v2385_v33, %v2385_v33  ;;  %v2240_v51 = vmul.f32 %v2202_v6, %v1984_v63  ;;  %v1921_v53 = vadd.f32 1.0, %v4415_v0  ;;  %v3756_v63 = vld [vmem:[%s6191_s10] ss:$0 sm:$0xff] }
 0x2a8   :  { %v2563_v32 = vunpack.c.l.b16 %v2472_v24  ;;  %v2411_v16 = vadd.f32 %v2410_v41, %v2238_v21  ;;  %v2239_v55 = vmul.f32 %v5601_v3, %v1983_v44  ;;  %v2565_v15 = vunpack.c.l.b16 %v2474_v30 }
 0x2a9   :  { %v2561_v46 = vunpack.c.l.b16 %v2470_v1  ;;  %v2422_v48 = vrot.slane %v2240_v51, 4  ;;  %v1953_v34 = vmul.f32 0.5, %v1921_v53 }
 0x2aa   :  { %v2598_v28 = vsel %vm2570_vm0, %v2563_v32, %v2562_v38  ;;  %v2412_v26 = vrot.slane %v2411_v16, 2  ;;  %v2416_v2 = vrot.slane %v2239_v55, 4 }
 0x2ab   :  { %v2597_v56 = vsel %vm2582_vm6, %v2561_v46, %v2596_v7  ;;  %v2423_v40 = vadd.f32 %v2422_v48, %v2240_v51  ;;  %v2599_v14 = vsel %vm2572_vm1, %v2564_v10, %v2598_v28  ;;  %v1985_v22 = vmul.f32 %v1953_v34, %v5700_v54  ;;  %v4470_v46 = vld [vmem:[%s6213_s22] sm:$0xff]  ;;  %v4472_v34 = vld [vmem:[%s6213_s22 + $0x10] sm:$0xff] }
 0x2ac   :  { %v2413_v62 = vadd.f32 %v2412_v26, %v2411_v16  ;;  %v2417_v29 = vadd.f32 %v2416_v2, %v2239_v55  ;;  %v2600_v3 = vsel %vm2574_vm2, %v2565_v15, %v2599_v14  ;;  %v4471_v26 = vld [vmem:[%s6213_s22 + $0x8] sm:$0xff] }
 0x2ad   :  { %v2424_v43 = vrot.slane %v2423_v40, 2  ;;  %v2241_v36 = vmul.f32 %v2209_v49, %v1985_v22  ;;  %v4208_v49 = vld [vmem:[%s6192_s13 + $0x8] ss:$16 sps:$4 sm:$0xff]   ;;  %v4216_v22 = vld [vmem:[%s6192_s13 + $0x4c] ss:$16 sps:$4 sm:$0xff]  }
 0x2ae   :  { %v2414_v11 = vrot.slane %v2413_v62, 1  ;;  %v2418_v13 = vrot.slane %v2417_v29, 2 }
 0x2af   :  { %v2425_v9 = vadd.f32 %v2424_v43, %v2423_v40  ;;  %v2428_v60 = vrot.slane %v2241_v36, 4  ;;  %v4473_v40 = vld [vmem:[%s6213_s22 + $0x18] sm:$0xff] }
 0x2b0   :  { %v2415_v19 = vadd.f32 %v2414_v11, %v2413_v62  ;;  %v2419_v31 = vadd.f32 %v2418_v13, %v2417_v29  ;;  %v4210_v62 = vld [vmem:[%s6192_s13 + $0xc] ss:$16 sps:$4 sm:$0xff]   ;;  %v4214_v43 = vld [vmem:[%s6192_s13 + $0x48] ss:$16 sps:$4 sm:$0xff]   ;;  %v4226_v13 = vld [vmem:[%s6192_s13] ss:$16 sps:$4 sm:$0xff]  }
 0x2b1   :  { %v2426_v42 = vrot.slane %v2425_v9, 1  ;;  %v2429_v35 = vadd.f32 %v2428_v60, %v2241_v36  ;;  %v4213_v29 = vld [vmem:[%s6192_s13 + $0x2c] ss:$16 sps:$4 sm:$0xff]   ;;  %3046 = vmatprep.subr.bf16.mxu1 %v4210_v62  ;;  %v4228_v36 = vld [vmem:[%s6192_s13 + $0x4] ss:$16 sps:$4 sm:$0xff]  }
 0x2b2   :  { %v2475_v45 = vpack.c.bf16 %v2415_v19, %v2415_v19  ;;  %v2420_v27 = vrot.slane %v2419_v31, 1  ;;  %3047 = vmatpush1.bf16.msra.mxu1 %v4208_v49  ;;  %v4219_v11 = vld [vmem:[%s6192_s13 + $0x6c] ss:$16 sps:$4 sm:$0xff]   ;;  %2993 = vmatprep.subr.bf16.mxu0 %v4228_v36  ;;  %v4234_v60 = vld [vmem:[%s6192_s13 + $0x24] ss:$16 sps:$4 sm:$0xff]  }
 0x2b3   :  { %v2427_v20 = vadd.f32 %v2426_v42, %v2425_v9  ;;  %v2430_v57 = vrot.slane %v2429_v35, 2  ;;  %3048 = vmatprep.subr.bf16.mxu1 %v4213_v29  ;;  %v4217_v9 = vld [vmem:[%s6192_s13 + $0x68] ss:$16 sps:$4 sm:$0xff]   ;;  %v4222_v19 = vld [vmem:[%s6192_s13 + $0x8c] ss:$16 sps:$4 sm:$0xff]  }
 0x2b4   :  { %v2566_v25 = vunpack.c.l.b16 %v2475_v45  ;;  %v2421_v50 = vadd.f32 %v2420_v27, %v2419_v31  ;;  %v4232_v31 = vld [vmem:[%s6192_s13 + $0x20] ss:$16 sps:$4 sm:$0xff]   ;;  %v4220_v42 = vld [vmem:[%s6192_s13 + $0x88] ss:$16 sps:$4 sm:$0xff]   ;;  %v4225_v45 = vld [vmem:[%s6192_s13 + $0xac] ss:$16 sps:$4 sm:$0xff]  }
 0x2b5   :  { %v2477_v4 = vpack.c.bf16 %v2427_v20, %v2427_v20  ;;  %v2431_v58 = vadd.f32 %v2430_v57, %v2429_v35  ;;  %v4223_v27 = vld [vmem:[%s6192_s13 + $0xa8] ss:$16 sps:$4 sm:$0xff]   ;;  %v4231_v35 = vld [vmem:[%s6192_s13 + $0xcc] ss:$16 sps:$4 sm:$0xff]   ;;  %v3765_v29 = vld [vmem:[%s6193_s11] ss:$0 sm:$0xff] }
 0x2b6   :  { %v2476_v23 = vpack.c.bf16 %v2421_v50, %v2421_v50  ;;  %v2601_v54 = vsel %vm2576_vm3, %v2566_v25, %v2600_v3  ;;  %v4211_v3 = vld [vmem:[%s6192_s13 + $0x28] ss:$16 sps:$4 sm:$0xff]   ;;  %v3766_v36 = vld [vmem:[%s6194_s12] ss:$0 sm:$0xff] }
 0x2b7   :  { %v2432_v59 = vrot.slane %v2431_v58, 1  ;;  %v2568_v37 = vunpack.c.l.b16 %v2477_v4  ;;  %3049 = vmatpush1.bf16.msra.mxu1 %v4211_v3  ;;  %v4229_v20 = vld [vmem:[%s6192_s13 + $0xc8] ss:$16 sps:$4 sm:$0xff]  }
 0x2b8   :  { %v2567_v61 = vunpack.c.l.b16 %v2476_v23  ;;  %3050 = vmatprep.subr.bf16.mxu1 %v4216_v22 }
 0x2b9   :  { %v2433_v5 = vadd.f32 %v2432_v59, %v2431_v58 }
 0x2ba   :  { %v2602_v18 = vsel %vm2578_vm4, %v2567_v61, %v2601_v54 }
 0x2bb   :  { %v2603_v21 = vsel %vm2580_vm5, %v2568_v37, %v2602_v18  ;;  %v2478_v12 = vpack.c.bf16 %v2433_v5, %v2433_v5  ;;  %3051 = vmatpush1.bf16.msra.mxu1 %v4214_v43 }
 0x2bc   :  { %3052 = vmatprep.subr.bf16.mxu1 %v4219_v11 }
 0x2bd   :  { %v2569_v0 = vunpack.c.l.b16 %v2478_v12 }
 0x2bf   :  { %v2604_v30 = vsel %vm2582_vm6, %v2569_v0, %v2603_v21  ;;  %3053 = vmatpush1.bf16.msra.mxu1 %v4217_v9 }
 0x2c0   :  { %v2606_v8 = vpack.c.b16 %v2604_v30, %v2597_v56  ;;  %3054 = vmatprep.subr.bf16.mxu1 %v4222_v19 }
 0x2c2   :  { %4131 = vmatmul.mubr.bf16.vlgmr.msra.gmra.mrb[36].mxu0 %v2606_v8  ;;  %v4237_v8 = vld [vmem:[%s6192_s13 + $0x44] ss:$16 sps:$4 sm:$0xff]  }
 0x2c3   :  { %2994 = vmatpush1.bf16.msra.mxu0 %v4226_v13  ;;  %3055 = vmatpush1.bf16.msra.mxu1 %v4220_v42 }
 0x2c4   :  { %2995 = vmatprep.subr.bf16.mxu0 %v4234_v60  ;;  %3056 = vmatprep.subr.bf16.mxu1 %v4225_v45 }
 0x2c7   :  { %2996 = vmatpush1.bf16.msra.mxu0 %v4232_v31  ;;  %3057 = vmatpush1.bf16.msra.mxu1 %v4223_v27 }
 0x2c8   :  { %3058 = vmatprep.subr.bf16.mxu1 %v4231_v35  ;;  %2997 = vmatprep.subr.bf16.mxu0 %v4237_v8  ;;  %v4269_v8 = vld [vmem:[%s6215_s21 + $0xd8] sm:$0xff]  }
 0x2cb   :  { %3059 = vmatpush1.bf16.msra.mxu1 %v4229_v20 }
 0x317   :  { %v2437_v33 = vpop.xlane.xlu0 %2436 }
 0x318   :  { %v2502_v41 = vmul.f32 %v3756_v63, %v2437_v33  ;;  %v4235_v33 = vld [vmem:[%s6192_s13 + $0x40] ss:$16 sps:$4 sm:$0xff]  }
 0x319   :  { %v2440_v24 = vpop.xlane.xlu1 %2439  ;;  %2998 = vmatpush1.bf16.msra.mxu0 %v4235_v33  ;;  %v4270_v33 = vld [vmem:[%s6215_s21 + $0x18] sm:$0xff]  }
 0x31a   :  { %v2503_v1 = vmul.f32 %v3756_v63, %v2440_v24  ;;  %v4243_v24 = vld [vmem:[%s6192_s13 + $0x84] ss:$16 sps:$4 sm:$0xff]  }
 0x31b   :  { %v2443_v6 = vpop.xlane.xlu0 %2442 }
 0x31c   :  { %v2504_v38 = vmul.f32 %v3756_v63, %v2443_v6  ;;  %v4238_v6 = vld [vmem:[%s6192_s13 + $0x60] ss:$16 sps:$4 sm:$0xff]  }
 0x31f   :  { %v2446_v44 = vpop.xlane.xlu0 %2445 }
 0x320   :  { %v2505_v32 = vmul.f32 %v3756_v63, %v2446_v44  ;;  %v4240_v63 = vld [vmem:[%s6192_s13 + $0x64] ss:$16 sps:$4 sm:$0xff]   ;;  %v4246_v44 = vld [vmem:[%s6192_s13 + $0xec] ss:$16 sps:$4 sm:$0xff]  }
 0x321   :  { %2999 = vmatprep.subr.bf16.mxu0 %v4240_v63  ;;  %3060 = vmatprep.subr.bf16.mxu1 %v4246_v44  ;;  %v4272_v63 = vld [vmem:[%s6215_s21 + $0x60] sm:$0xff]  }
 0x322   :  { %3000 = vmatpush1.bf16.msra.mxu0 %v4238_v6  ;;  %v4271_v6 = vld [vmem:[%s6215_s21 + $0x98] sm:$0xff]   ;;  %v4275_v44 = vld [vmem:[%s6215_s21 + $0xa0] sm:$0xff]  }
 0x323   :  { %3001 = vmatprep.subr.bf16.mxu0 %v4243_v24  ;;  %v4273_v24 = vld [vmem:[%s6215_s21 + $0xe0] sm:$0xff]  }
 0x395   :  { %v4132_v7 = vpop.f32.mrb[36].mxu0 }
 0x396   :  { %v2691_v51 = vpop.f32.mrb[37].mxu0  ;;  %v2700_v10 = vadd.f32 %v4132_v7, %v2504_v38  ;;  %v4241_v38 = vld [vmem:[%s6192_s13 + $0x80] ss:$16 sps:$4 sm:$0xff]   ;;  %v4249_v7 = vld [vmem:[%s6192_s13 + $0xa4] ss:$16 sps:$4 sm:$0xff]  }
 0x397   :  { %v2692_v16 = vadd.f32 %v2691_v51, %v2502_v41  ;;  %v4133_v55 = vpop.f32.mrb[38].mxu0  ;;  %v4244_v41 = vld [vmem:[%s6192_s13 + $0xe8] ss:$16 sps:$4 sm:$0xff]   ;;  %3002 = vmatpush1.bf16.msra.mxu0 %v4241_v38  ;;  %v4247_v51 = vld [vmem:[%s6192_s13 + $0xa0] ss:$16 sps:$4 sm:$0xff]  }
 0x398   :  { %v2694_v53 = vpop.f32.mrb[39].mxu0  ;;  %v2703_v28 = vadd.f32 %v4133_v55, %v2505_v32  ;;  %v2708_v56 = vadd.f32 %v4472_v34, %v2700_v10  ;;  %3061 = vmatpush1.bf16.msra.mxu1 %v4244_v41  ;;  %3003 = vmatprep.subr.bf16.mxu0 %v4249_v7  ;;  %v4252_v32 = vld [vmem:[%s6192_s13 + $0xc4] ss:$16 sps:$4 sm:$0xff]   ;;  %v4276_v38 = vld [vmem:[%s6215_s21 + $0x68] sm:$0xff]  }
 0x399   :  { %v2695_v15 = vadd.f32 %v2694_v53, %v2503_v1  ;;  %v2706_v48 = vadd.f32 %v4470_v46, %v2692_v16  ;;  %v4475_v1 = vmov 0   ;;  %v4250_v16 = vld [vmem:[%s6192_s13 + $0xc0] ss:$16 sps:$4 sm:$0xff]   ;;  %v4255_v55 = vld [vmem:[%s6192_s13 + $0xe4] ss:$16 sps:$4 sm:$0xff]   ;;  %v4277_v7 = vld [vmem:[%s6215_s21 + $0xe8] sm:$0xff]  }
 0x39a   :  { %v2709_v14 = vadd.f32 %v4473_v40, %v2703_v28  ;;  %3025 = vmatprep.mubr.bf16.mxu0 %v4475_v1  ;;  %3078 = vmatprep.mubr.bf16.mxu1 %v4475_v1  ;;  %v4253_v53 = vld [vmem:[%s6192_s13 + $0xe0] ss:$16 sps:$4 sm:$0xff]  }
 0x39b   :  { %2712 = vadd.xlane.f32.xlu1 %v2706_v48  ;;  %v2707_v2 = vadd.f32 %v4471_v26, %v2695_v15  ;;  %3004 = vmatpush1.bf16.msra.mxu0 %v4247_v51  ;;  %v4274_v41 = vld [vmem:[%s6215_s21 + $0x20] sm:$0xff]   ;;  %v4279_v51 = vld [vmem:[%s6215_s21 + $0xa8] sm:$0xff]  }
 0x39c   :  { %3005 = vmatprep.subr.bf16.mxu0 %v4252_v32  ;;  %v4280_v32 = vld [vmem:[%s6215_s21 + $0x70] sm:$0xff]  }
 0x39d   :  { %2714 = vadd.xlane.f32.xlu0 %v2707_v2 }
 0x39f   :  { %2716 = vadd.xlane.f32.xlu1 %v2708_v56  ;;  %3006 = vmatpush1.bf16.msra.mxu0 %v4250_v16  ;;  %v4281_v16 = vld [vmem:[%s6215_s21 + $0xf0] sm:$0xff]  }
 0x3a0   :  { %3007 = vmatprep.subr.bf16.mxu0 %v4255_v55  ;;  %v4282_v55 = vld [vmem:[%s6215_s21 + $0x30] sm:$0xff]  }
 0x3a1   :  { %2718 = vadd.xlane.f32.xlu0 %v2709_v14 }
 0x3a3   :  { %3008 = vmatpush1.bf16.msra.mxu0 %v4253_v53  ;;  %v4283_v53 = vld [vmem:[%s6215_s21 + $0xb0] sm:$0xff]  }
 0x428   :  { %v2713_v25 = vpop.xlane.xlu1 %2712 }
 0x429   :  { %v2721_v50 = vmul.f32 0.0078125, %v2713_v25 }
 0x42a   :  { %v2715_v57 = vpop.xlane.xlu0 %2714 }
 0x42b   :  { %v5837_v4 = vsub.f32 %v2706_v48, %v2721_v50  ;;  %v2722_v23 = vmul.f32 0.0078125, %v2715_v57 }
 0x42c   :  { %v2717_v54 = vpop.xlane.xlu1 %2716 }
 0x42d   :  { %v5839_v58 = vsub.f32 %v2707_v2, %v2722_v23  ;;  %v2723_v61 = vmul.f32 0.0078125, %v2717_v54  ;;  %v2729_v59 = vmul.f32 %v5837_v4, %v5837_v4  ;;  %v4257_v23 = vld [vmem:[%s6215_s21 + $0xc0] sm:$0xff]  }
 0x42e   :  { %v2719_v37 = vpop.xlane.xlu0 %2718  ;;  %v4258_v54 = vld [vmem:[%s6215_s21] sm:$0xff]   ;;  %4018 = vmatprep.subr.bf16.mxu1 %v4257_v23 }
 0x42f   :  { %v5843_v18 = vsub.f32 %v2708_v56, %v2723_v61  ;;  %v2724_v5 = vmul.f32 0.0078125, %v2719_v37  ;;  %2733 = vadd.xlane.f32.xlu1 %v2729_v59  ;;  %v2730_v21 = vmul.f32 %v5839_v58, %v5839_v58  ;;  %v4260_v61 = vld [vmem:[%s6215_s21 + $0x48] sm:$0xff]  }
 0x430   :  { %v4261_v59 = vld [vmem:[%s6215_s21 + $0xc8] sm:$0xff]  }
 0x431   :  { %v5847_v12 = vsub.f32 %v2709_v14, %v2724_v5  ;;  %2735 = vadd.xlane.f32.xlu0 %v2730_v21  ;;  %v2731_v0 = vmul.f32 %v5843_v18, %v5843_v18  ;;  %v4262_v37 = vld [vmem:[%s6215_s21 + $0x8] sm:$0xff]   ;;  %v4264_v5 = vld [vmem:[%s6215_s21 + $0x50] sm:$0xff]  }
 0x432   :  { %v4265_v21 = vld [vmem:[%s6215_s21 + $0xd0] sm:$0xff]  }
 0x433   :  { %2737 = vadd.xlane.f32.xlu1 %v2731_v0  ;;  %v2732_v30 = vmul.f32 %v5847_v12, %v5847_v12  ;;  %v4267_v0 = vld [vmem:[%s6215_s21 + $0x90] sm:$0xff]  }
 0x435   :  { %2739 = vadd.xlane.f32.xlu0 %v2732_v30  ;;  %v4268_v30 = vld [vmem:[%s6215_s21 + $0x58] sm:$0xff]  }
 0x4bc   :  { %v2734_v10 = vpop.xlane.xlu1 %2733 }
 0x4bd   :  { %v2741_v15 = vmul.f32 0.0078125, %v2734_v10  ;;  %v4284_v10 = vld [vmem:[%s6215_s21 + $0x78] sm:$0xff]  }
 0x4be   :  { %v2736_v46 = vpop.xlane.xlu0 %2735 }
 0x4bf   :  { %v2745_v48 = vadd.f32 1e-05, %v2741_v15  ;;  %v2742_v28 = vmul.f32 0.0078125, %v2736_v46  ;;  %v4285_v15 = vld [vmem:[%s6215_s21 + $0xf8] sm:$0xff]  }
 0x4c0   :  { %v2738_v26 = vpop.xlane.xlu1 %2737  ;;  %v4286_v46 = vld [vmem:[%s6215_s21 + $0x38] sm:$0xff]  }
 0x4c1   :  { %4416 = vrsqrt.f32 %v2745_v48  ;;  %v2746_v2 = vadd.f32 1e-05, %v2742_v28  ;;  %v2743_v34 = vmul.f32 0.0078125, %v2738_v26  ;;  %v4287_v48 = vld [vmem:[%s6215_s21 + $0xb8] sm:$0xff]   ;;  %v2811_v28 = vld [vmem:[%s6196_s14] sm:$0xf] }
 0x4c2   :  { %v2740_v56 = vpop.xlane.xlu0 %2739  ;;  %v6017_v26 = vrot.slane %v2811_v28, %v4787_v17 }
 0x4c3   :  { %4418 = vrsqrt.f32 %v2746_v2  ;;  %v2747_v40 = vadd.f32 1e-05, %v2743_v34  ;;  %v2744_v14 = vmul.f32 0.0078125, %v2740_v56  ;;  %v6020_v2 = vrot.slane %v2811_v28, %v4982_v39 }
 0x4c4   :  { %v6023_v34 = vrot.slane %v2811_v28, %v4975_v52  ;;  %v6026_v56 = vrot.slane %v2811_v28, %v5036_v47 }
 0x4c5   :  { %4420 = vrsqrt.f32 %v2747_v40  ;;  %v2748_v49 = vadd.f32 1e-05, %v2744_v14 }
 0x4c7   :  { %4422 = vrsqrt.f32 %v2748_v49 }
 0x4cb   :  { %v4417_v62 = vpop.eup %4416 }
 0x4cc   :  { %v2753_v3 = vmul.f32 %v4417_v62, %v5837_v4  ;;  %v4256_v4 = vld [vmem:[%s6215_s21 + $0x40] sm:$0xff]  }
 0x4cd   :  { %v4419_v22 = vpop.eup %4418  ;;  %3990 = vmatprep.subr.bf16.mxu0 %v4256_v4 }
 0x4ce   :  { %v2754_v43 = vmul.f32 %v4419_v22, %v5839_v58  ;;  %v2763_v11 = vmul.f32 %v3765_v29, %v2753_v3  ;;  %v4259_v58 = vld [vmem:[%s6215_s21 + $0x80] sm:$0xff]  }
 0x4cf   :  { %v4421_v13 = vpop.eup %4420 }
 0x4d0   :  { %v2764_v9 = vmul.f32 %v3765_v29, %v2754_v43  ;;  %v5903_v31 = vadd.f32 %v3766_v36, %v2763_v11  ;;  %v2755_v42 = vmul.f32 %v4421_v13, %v5843_v18  ;;  %v4263_v18 = vld [vmem:[%s6215_s21 + $0x88] sm:$0xff]  }
 0x4d1   :  { %v4423_v19 = vpop.eup %4422 }
 0x4d2   :  { %v5905_v60 = vadd.f32 %v3766_v36, %v2764_v9  ;;  %v2756_v45 = vmul.f32 %v4423_v19, %v5847_v12  ;;  %v2765_v20 = vmul.f32 %v3765_v29, %v2755_v42  ;;  %v4266_v12 = vld [vmem:[%s6215_s21 + $0x10] sm:$0xff]  }
 0x4d4   :  { %v2777_v27 = vpack.c.bf16 %v5905_v60, %v5903_v31  ;;  %v2766_v35 = vmul.f32 %v3765_v29, %v2756_v45  ;;  %v5913_v50 = vadd.f32 %v3766_v36, %v2765_v20 }
 0x4d6   :  { %3026 = vmatmul.mubr.bf16.vlgmr.msra.gmra.mrb[40].mxu0 %v2777_v27  ;;  %3079 = vmatmul.mubr.bf16.vlgmr.msra.gmra.mrb[64].mxu1 %v2777_v27  ;;  %v5911_v25 = vadd.f32 %v3766_v36, %v2766_v35 }
 0x4d7   :  { %3035 = vmatprep.mubr.bf16.mxu0 %v4475_v1  ;;  %3088 = vmatprep.mubr.bf16.mxu1 %v4475_v1  ;;  %v4278_v1 = vld [vmem:[%s6215_s21 + $0x28] sm:$0xff]  }
 0x4d8   :  { %v2778_v57 = vpack.c.bf16 %v5911_v25, %v5913_v50  ;;  %3991 = vmatpush3.bf16.msra.mxu0 %v4258_v54  ;;  %4019 = vmatpush3.bf16.msra.mxu1 %v4259_v58 }
 0x4d9   :  { %3992 = vmatprep.subr.bf16.mxu0 %v4260_v61  ;;  %4020 = vmatprep.subr.bf16.mxu1 %v4261_v59 }
 0x4dc   :  { %3993 = vmatpush3.bf16.msra.mxu0 %v4262_v37  ;;  %4021 = vmatpush3.bf16.msra.mxu1 %v4263_v18 }
 0x4dd   :  { %3994 = vmatprep.subr.bf16.mxu0 %v4264_v5  ;;  %4022 = vmatprep.subr.bf16.mxu1 %v4265_v21 }
 0x4de   :  { %3036 = vmatmul.mubr.bf16.gmra.mrb[44].mxu0 %v2778_v57  ;;  %3089 = vmatmul.mubr.bf16.gmra.mrb[68].mxu1 %v2778_v57 }
 0x4e0   :  { %3995 = vmatpush3.bf16.msra.mxu0 %v4266_v12  ;;  %4023 = vmatpush3.bf16.msra.mxu1 %v4267_v0 }
 0x4e1   :  { %3996 = vmatprep.subr.bf16.mxu0 %v4268_v30  ;;  %4024 = vmatprep.subr.bf16.mxu1 %v4269_v8 }
 0x4e4   :  { %3997 = vmatpush3.bf16.msra.mxu0 %v4270_v33  ;;  %4025 = vmatpush3.bf16.msra.mxu1 %v4271_v6 }
 0x4e5   :  { %3998 = vmatprep.subr.bf16.mxu0 %v4272_v63  ;;  %4026 = vmatprep.subr.bf16.mxu1 %v4273_v24 }
 0x4e8   :  { %3999 = vmatpush3.bf16.msra.mxu0 %v4274_v41  ;;  %4027 = vmatpush3.bf16.msra.mxu1 %v4275_v44 }
 0x4e9   :  { %4000 = vmatprep.subr.bf16.mxu0 %v4276_v38  ;;  %4028 = vmatprep.subr.bf16.mxu1 %v4277_v7 }
 0x4ec   :  { %4001 = vmatpush3.bf16.msra.mxu0 %v4278_v1  ;;  %4029 = vmatpush3.bf16.msra.mxu1 %v4279_v51 }
 0x4ed   :  { %4002 = vmatprep.subr.bf16.mxu0 %v4280_v32  ;;  %4030 = vmatprep.subr.bf16.mxu1 %v4281_v16 }
 0x4f0   :  { %4003 = vmatpush3.bf16.msra.mxu0 %v4282_v55  ;;  %4031 = vmatpush3.bf16.msra.mxu1 %v4283_v53 }
 0x4f1   :  { %4004 = vmatprep.subr.bf16.mxu0 %v4284_v10  ;;  %4032 = vmatprep.subr.bf16.mxu1 %v4285_v15 }
 0x4f4   :  { %4005 = vmatpush3.bf16.msra.mxu0 %v4286_v46  ;;  %4033 = vmatpush3.bf16.msra.mxu1 %v4287_v48 }
 0x5a9   :  { %v3027_v40 = vpop.f32.mrb[40].mxu0  ;;  %v3080_v14 = vpop.f32.mrb[64].mxu1 }
 0x5aa   :  { %v6029_v49 = vadd.f32 %v3027_v40, %v6017_v26  ;;  %v6032_v62 = vadd.f32 %v3080_v14, %v6020_v2  ;;  %v3029_v29 = vpop.f32.mrb[41].mxu0  ;;  %v3082_v17 = vpop.f32.mrb[65].mxu1 }
 0x5ab   :  { %v6035_v3 = vadd.f32 %v3029_v29, %v6023_v34  ;;  %v6038_v39 = vadd.f32 %v3082_v17, %v6026_v56  ;;  %v3031_v52 = vpop.f32.mrb[42].mxu0  ;;  %v3084_v22 = vpop.f32.mrb[66].mxu1 }
 0x5ac   :  { %v3099_v47 = vmul.f32 %v6029_v49, %v6029_v49  ;;  %v3101_v43 = vmul.f32 %v6032_v62, %v6032_v62  ;;  %v6045_v11 = vadd.f32 %v3031_v52, %v6017_v26  ;;  %v6048_v13 = vadd.f32 %v3084_v22, %v6020_v2  ;;  %v3033_v36 = vpop.f32.mrb[43].mxu0  ;;  %v3086_v9 = vpop.f32.mrb[67].mxu1 }
 0x5ad   :  { %v3100_v19 = vmul.f32 %v6035_v3, %v6035_v3  ;;  %v3102_v42 = vmul.f32 %v6038_v39, %v6038_v39  ;;  %v6055_v45 = vadd.f32 %v3033_v36, %v6023_v34  ;;  %v6058_v27 = vadd.f32 %v3086_v9, %v6026_v56 }
 0x5ae   :  { %v3115_v35 = vmul.f32 %v3099_v47, %v6029_v49  ;;  %v3117_v20 = vmul.f32 %v3101_v43, %v6032_v62  ;;  %v3103_v57 = vmul.f32 %v6045_v11, %v6045_v11  ;;  %v3105_v4 = vmul.f32 %v6048_v13, %v6048_v13 }
 0x5af   :  { %v3116_v23 = vmul.f32 %v3100_v19, %v6035_v3  ;;  %v3118_v54 = vmul.f32 %v3102_v42, %v6038_v39  ;;  %v3104_v58 = vmul.f32 %v6055_v45, %v6055_v45  ;;  %v3106_v61 = vmul.f32 %v6058_v27, %v6058_v27 }
 0x5b0   :  { %v3131_v59 = vmul.f32 0.044715, %v3115_v35  ;;  %v3133_v37 = vmul.f32 0.044715, %v3117_v20  ;;  %v3119_v18 = vmul.f32 %v3103_v57, %v6045_v11  ;;  %v3121_v5 = vmul.f32 %v3105_v4, %v6048_v13 }
 0x5b1   :  { %v3132_v21 = vmul.f32 0.044715, %v3116_v23  ;;  %v3134_v12 = vmul.f32 0.044715, %v3118_v54  ;;  %v3120_v0 = vmul.f32 %v3104_v58, %v6055_v45  ;;  %v3122_v30 = vmul.f32 %v3106_v61, %v6058_v27  ;;  %v3037_v8 = vpop.f32.mrb[44].mxu0  ;;  %v3090_v33 = vpop.f32.mrb[68].mxu1 }
 0x5b2   :  { %v3147_v6 = vadd.f32 %v3131_v59, %v6029_v49  ;;  %v3149_v63 = vadd.f32 %v3133_v37, %v6032_v62  ;;  %v3135_v24 = vmul.f32 0.044715, %v3119_v18  ;;  %v3137_v41 = vmul.f32 0.044715, %v3121_v5  ;;  %v3039_v44 = vpop.f32.mrb[45].mxu0  ;;  %v3092_v38 = vpop.f32.mrb[69].mxu1 }
 0x5b3   :  { %v3148_v7 = vadd.f32 %v3132_v21, %v6035_v3  ;;  %v3150_v1 = vadd.f32 %v3134_v12, %v6038_v39  ;;  %v3136_v51 = vmul.f32 0.044715, %v3120_v0  ;;  %v3138_v32 = vmul.f32 0.044715, %v3122_v30  ;;  %v3041_v16 = vpop.f32.mrb[46].mxu0  ;;  %v3094_v55 = vpop.f32.mrb[70].mxu1 }
 0x5b4   :  { %v3163_v53 = vmul.f32 0.7978846, %v3147_v6  ;;  %v3165_v10 = vmul.f32 0.7978846, %v3149_v63  ;;  %v3151_v15 = vadd.f32 %v3135_v24, %v6045_v11  ;;  %v3153_v46 = vadd.f32 %v3137_v41, %v6048_v13  ;;  %v3043_v48 = vpop.f32.mrb[47].mxu0  ;;  %v3096_v28 = vpop.f32.mrb[71].mxu1 }
 0x5b5   :  { %v3164_v40 = vmul.f32 0.7978846, %v3148_v7  ;;  %v3166_v14 = vmul.f32 0.7978846, %v3150_v1  ;;  %v3152_v29 = vadd.f32 %v3136_v51, %v6055_v45  ;;  %v3154_v17 = vadd.f32 %v3138_v32, %v6058_v27 }
 0x5b6   :  { %4424 = vtanh.f32 %v3163_v53  ;;  %v3167_v52 = vmul.f32 0.7978846, %v3151_v15  ;;  %v3169_v22 = vmul.f32 0.7978846, %v3153_v46  ;;  %v6085_v47 = vadd.f32 %v3037_v8, %v6017_v26 }
 0x5b7   :  { %4426 = vtanh.f32 %v3165_v10  ;;  %v3168_v43 = vmul.f32 0.7978846, %v3152_v29  ;;  %v3170_v36 = vmul.f32 0.7978846, %v3154_v17  ;;  %v6088_v9 = vadd.f32 %v3090_v33, %v6020_v2 }
 0x5b8   :  { %4428 = vtanh.f32 %v3164_v40  ;;  %v3107_v19 = vmul.f32 %v6085_v47, %v6085_v47  ;;  %v6093_v42 = vadd.f32 %v3039_v44, %v6023_v34  ;;  %v6096_v35 = vadd.f32 %v3092_v38, %v6026_v56 }
 0x5b9   :  { %4430 = vtanh.f32 %v3166_v14  ;;  %v3109_v20 = vmul.f32 %v6088_v9, %v6088_v9  ;;  %v6101_v57 = vadd.f32 %v3041_v16, %v6017_v26  ;;  %v6104_v4 = vadd.f32 %v3094_v55, %v6020_v2 }
 0x5ba   :  { %4432 = vtanh.f32 %v3167_v52  ;;  %v3123_v23 = vmul.f32 %v3107_v19, %v6085_v47  ;;  %v3108_v54 = vmul.f32 %v6093_v42, %v6093_v42  ;;  %v3110_v58 = vmul.f32 %v6096_v35, %v6096_v35 }
 0x5bb   :  { %4434 = vtanh.f32 %v3169_v22  ;;  %v3125_v61 = vmul.f32 %v3109_v20, %v6088_v9  ;;  %v3111_v59 = vmul.f32 %v6101_v57, %v6101_v57  ;;  %v3113_v26 = vmul.f32 %v6104_v4, %v6104_v4 }
 0x5bc   :  { %4436 = vtanh.f32 %v3168_v43  ;;  %v3139_v2 = vmul.f32 0.044715, %v3123_v23  ;;  %v3124_v37 = vmul.f32 %v3108_v54, %v6093_v42  ;;  %v3126_v18 = vmul.f32 %v3110_v58, %v6096_v35 }
 0x5bd   :  { %4438 = vtanh.f32 %v3170_v36  ;;  %v3141_v5 = vmul.f32 0.044715, %v3125_v61  ;;  %v3127_v21 = vmul.f32 %v3111_v59, %v6101_v57  ;;  %v3129_v12 = vmul.f32 %v3113_v26, %v6104_v4 }
 0x5be   :  { %v3155_v0 = vadd.f32 %v3139_v2, %v6085_v47  ;;  %v3140_v30 = vmul.f32 0.044715, %v3124_v37  ;;  %v3142_v8 = vmul.f32 0.044715, %v3126_v18  ;;  %v6122_v33 = vadd.f32 %v3043_v48, %v6023_v34 }
 0x5bf   :  { %v3157_v6 = vadd.f32 %v3141_v5, %v6088_v9  ;;  %v3143_v63 = vmul.f32 0.044715, %v3127_v21  ;;  %v3145_v24 = vmul.f32 0.044715, %v3129_v12  ;;  %v6126_v41 = vadd.f32 %v3096_v28, %v6026_v56 }
 0x5c0   :  { %v4425_v44 = vpop.eup %4424  ;;  %v3171_v38 = vmul.f32 0.7978846, %v3155_v0  ;;  %v3156_v7 = vadd.f32 %v3140_v30, %v6093_v42  ;;  %v3158_v1 = vadd.f32 %v3142_v8, %v6096_v35  ;;  %v3112_v51 = vmul.f32 %v6122_v33, %v6122_v33 }
 0x5c1   :  { %v4427_v32 = vpop.eup %4426  ;;  %v3195_v16 = vadd.f32 1.0, %v4425_v44  ;;  %v3173_v34 = vmul.f32 0.7978846, %v3157_v6  ;;  %v3159_v55 = vadd.f32 %v3143_v63, %v6101_v57  ;;  %v3161_v53 = vadd.f32 %v3145_v24, %v6104_v4 }
 0x5c2   :  { %v4429_v10 = vpop.eup %4428  ;;  %v3197_v15 = vadd.f32 1.0, %v4427_v32  ;;  %4440 = vtanh.f32 %v3171_v38  ;;  %v3172_v56 = vmul.f32 0.7978846, %v3156_v7  ;;  %v3174_v46 = vmul.f32 0.7978846, %v3158_v1 }
 0x5c3   :  { %v4431_v48 = vpop.eup %4430  ;;  %v3211_v28 = vmul.f32 0.5, %v3195_v16  ;;  %4442 = vtanh.f32 %v3173_v34  ;;  %v3175_v40 = vmul.f32 0.7978846, %v3159_v55  ;;  %v3177_v14 = vmul.f32 0.7978846, %v3161_v53 }
 0x5c4   :  { %v4433_v29 = vpop.eup %4432  ;;  %v3213_v17 = vmul.f32 0.5, %v3197_v15  ;;  %4444 = vtanh.f32 %v3172_v56  ;;  %v3128_v52 = vmul.f32 %v3112_v51, %v6122_v33  ;;  %v3114_v22 = vmul.f32 %v6126_v41, %v6126_v41 }
 0x5c5   :  { %v4435_v43 = vpop.eup %4434  ;;  %v3227_v36 = vmul.f32 %v3211_v28, %v6029_v49  ;;  %v3199_v19 = vadd.f32 1.0, %v4433_v29  ;;  %4446 = vtanh.f32 %v3174_v46  ;;  %v3196_v20 = vadd.f32 1.0, %v4429_v10 }
 0x5c6   :  { %v4437_v23 = vpop.eup %4436  ;;  %v3229_v54 = vmul.f32 %v3213_v17, %v6032_v62  ;;  %v3201_v58 = vadd.f32 1.0, %v4435_v43  ;;  %4448 = vtanh.f32 %v3175_v40  ;;  %v3144_v61 = vmul.f32 0.044715, %v3128_v52 }
 0x5c7   :  { %v4439_v59 = vpop.eup %4438  ;;  %v3215_v26 = vmul.f32 0.5, %v3199_v19  ;;  %4450 = vtanh.f32 %v3177_v14  ;;  %v3130_v2 = vmul.f32 %v3114_v22, %v6126_v41  ;;  %v3200_v37 = vadd.f32 1.0, %v4437_v23 }
 0x5c8   :  { %v3217_v18 = vmul.f32 0.5, %v3201_v58  ;;  %v3160_v5 = vadd.f32 %v3144_v61, %v6122_v33  ;;  %v3212_v21 = vmul.f32 0.5, %v3196_v20  ;;  %v3198_v49 = vadd.f32 1.0, %v4431_v48 }
 0x5c9   :  { %v3231_v12 = vmul.f32 %v3215_v26, %v6045_v11  ;;  %v3146_v0 = vmul.f32 0.044715, %v3130_v2  ;;  %v3216_v30 = vmul.f32 0.5, %v3200_v37  ;;  %v3202_v8 = vadd.f32 1.0, %v4439_v59 }
 0x5ca   :  { %v3233_v62 = vmul.f32 %v3217_v18, %v6048_v13  ;;  %v3176_v6 = vmul.f32 0.7978846, %v3160_v5  ;;  %v3228_v63 = vmul.f32 %v3212_v21, %v6035_v3  ;;  %v3214_v24 = vmul.f32 0.5, %v3198_v49  ;;  %v3799_v49 = vld [vmem:[%s6197_s16] ss:$0 sm:$0xff] }
 0x5cb   :  { %v3243_v44 = vpack.c.bf16 %v3231_v12, %v3227_v36  ;;  %v3162_v38 = vadd.f32 %v3146_v0, %v6126_v41  ;;  %v3232_v7 = vmul.f32 %v3216_v30, %v6055_v45  ;;  %v3218_v1 = vmul.f32 0.5, %v3202_v8 }
 0x5cc   :  { %v4441_v51 = vpop.eup %4440  ;;  %v3245_v32 = vpack.c.bf16 %v3233_v62, %v3229_v54  ;;  %4452 = vtanh.f32 %v3176_v6  ;;  %v3230_v11 = vmul.f32 %v3214_v24, %v6038_v39 }
 0x5cd   :  { %v4443_v16 = vpop.eup %4442  ;;  %v3178_v34 = vmul.f32 0.7978846, %v3162_v38  ;;  %v3244_v55 = vpack.c.bf16 %v3232_v7, %v3228_v63  ;;  %v3234_v13 = vmul.f32 %v3218_v1, %v6058_v27  ;;  %v3203_v53 = vadd.f32 1.0, %v4441_v51 }
 0x5ce   :  { %v4445_v10 = vpop.eup %4444  ;;  %v3205_v3 = vadd.f32 1.0, %v4443_v16 }
 0x5cf   :  { %v4447_v15 = vpop.eup %4446  ;;  %4454 = vtanh.f32 %v3178_v34  ;;  %3546 = vmatprep.mubr.bf16.mxu0 %v3244_v55  ;;  %v3246_v56 = vpack.c.bf16 %v3234_v13, %v3230_v11  ;;  %v3219_v28 = vmul.f32 0.5, %v3203_v53  ;;  %v3204_v14 = vadd.f32 1.0, %v4445_v10 }
 0x5d0   :  { %v4449_v46 = vpop.eup %4448  ;;  %3547 = vmatmul.mubr.bf16.vlgmr.msra.gmra.mrb[48].mxu0 %v3243_v44  ;;  %v3221_v40 = vmul.f32 0.5, %v3205_v3  ;;  %v3206_v43 = vadd.f32 1.0, %v4447_v15 }
 0x5d1   :  { %v4451_v45 = vpop.eup %4450  ;;  %3595 = vmatprep.mubr.bf16.mxu1 %v3246_v56  ;;  %v3207_v48 = vadd.f32 1.0, %v4449_v46  ;;  %v3235_v27 = vmul.f32 %v3219_v28, %v6085_v47  ;;  %v3220_v23 = vmul.f32 0.5, %v3204_v14 }
 0x5d2   :  { %3596 = vmatmul.mubr.bf16.vlgmr.msra.gmra.mrb[72].mxu1 %v3245_v32  ;;  %v3209_v39 = vadd.f32 1.0, %v4451_v45  ;;  %v3237_v36 = vmul.f32 %v3221_v40, %v6088_v9  ;;  %v3222_v2 = vmul.f32 0.5, %v3206_v43 }
 0x5d3   :  { %v3223_v29 = vmul.f32 0.5, %v3207_v48  ;;  %v3236_v37 = vmul.f32 %v3220_v23, %v6093_v42 }
 0x5d4   :  { %v3225_v17 = vmul.f32 0.5, %v3209_v39  ;;  %v3238_v5 = vmul.f32 %v3222_v2, %v6096_v35 }
 0x5d5   :  { %v3239_v52 = vmul.f32 %v3223_v29, %v6101_v57 }
 0x5d6   :  { %v4453_v22 = vpop.eup %4452  ;;  %v3241_v19 = vmul.f32 %v3225_v17, %v6104_v4 }
 0x5d7   :  { %v3208_v20 = vadd.f32 1.0, %v4453_v22  ;;  %v3247_v54 = vpack.c.bf16 %v3239_v52, %v3235_v27 }
 0x5d8   :  { %v3249_v58 = vpack.c.bf16 %v3241_v19, %v3237_v36 }
 0x5d9   :  { %v4455_v61 = vpop.eup %4454  ;;  %v3224_v59 = vmul.f32 0.5, %v3208_v20 }
 0x5da   :  { %v3210_v26 = vadd.f32 1.0, %v4455_v61 }
 0x5db   :  { %v3240_v47 = vmul.f32 %v3224_v59, %v6122_v33 }
 0x5dc   :  { %v3226_v18 = vmul.f32 0.5, %v3210_v26 }
 0x5dd   :  { %v3248_v57 = vpack.c.bf16 %v3240_v47, %v3236_v37 }
 0x5de   :  { %v3242_v9 = vmul.f32 %v3226_v18, %v6126_v41 }
 0x5df   :  { %3554 = vmatprep.mubr.bf16.mxu0 %v3248_v57  ;;  %v3832_v57 = vld [vmem:[%s6198_s17] ss:$0 sm:$0xff] }
 0x5e0   :  { %v3250_v4 = vpack.c.bf16 %v3242_v9, %v3238_v5  ;;  %3555 = vmatmul.mubr.bf16.gmra.mrb[52].mxu0 %v3247_v54 }
 0x5e2   :  { %3603 = vmatprep.mubr.bf16.mxu1 %v3250_v4  ;;  %v3833_v4 = vld [vmem:[%s6199_s18] ss:$0 sm:$0xff] }
 0x5e3   :  { %3604 = vmatmul.mubr.bf16.gmra.mrb[76].mxu1 %v3249_v58 }
 0x6a3   :  { %v4006_v21 = vpop.f32.mrb[48].mxu0 }
 0x6a4   :  { %v4007_v12 = vpop.f32.mrb[49].mxu0 }
 0x6a5   :  { %v4034_v42 = vpop.f32.mrb[72].mxu1  ;;  %v4008_v0 = vadd.f32 %v4007_v12, %v4006_v21  ;;  %v4009_v33 = vpop.f32.mrb[50].mxu0 }
 0x6a6   :  { %v4035_v30 = vpop.f32.mrb[73].mxu1  ;;  %v4010_v8 = vpop.f32.mrb[51].mxu0 }
 0x6a7   :  { %v3549_v62 = vadd.f32 %v4008_v0, %v3799_v49  ;;  %v4036_v35 = vadd.f32 %v4035_v30, %v4034_v42  ;;  %v4037_v6 = vpop.f32.mrb[74].mxu1  ;;  %v4011_v41 = vadd.f32 %v4010_v8, %v4009_v33 }
 0x6a8   :  { %v4038_v63 = vpop.f32.mrb[75].mxu1 }
 0x6a9   :  { %v3598_v24 = vadd.f32 %v4036_v35, %v3549_v62  ;;  %v3552_v44 = vadd.f32 %v4011_v41, %v3799_v49  ;;  %v4039_v38 = vadd.f32 %v4038_v63, %v4037_v6 }
 0x6ab   :  { %v3601_v7 = vadd.f32 %v4039_v38, %v3552_v44  ;;  %v3612_v1 = vadd.f32 %v3598_v24, %v5903_v31 }
 0x6ad   :  { %3618 = vadd.xlane.f32.xlu1 %v3612_v1  ;;  %v3613_v51 = vadd.f32 %v3601_v7, %v5905_v60 }
 0x6af   :  { %3620 = vadd.xlane.f32.xlu0 %v3613_v51 }
 0x6b3   :  { %v4012_v32 = vpop.f32.mrb[52].mxu0 }
 0x6b4   :  { %v4013_v11 = vpop.f32.mrb[53].mxu0 }
 0x6b5   :  { %v4014_v16 = vadd.f32 %v4013_v11, %v4012_v32  ;;  %v4015_v34 = vpop.f32.mrb[54].mxu0 }
 0x6b6   :  { %v4040_v55 = vpop.f32.mrb[76].mxu1  ;;  %v4016_v13 = vpop.f32.mrb[55].mxu0 }
 0x6b7   :  { %v3557_v53 = vadd.f32 %v4014_v16, %v3799_v49  ;;  %v4041_v10 = vpop.f32.mrb[77].mxu1  ;;  %v4017_v3 = vadd.f32 %v4016_v13, %v4015_v34 }
 0x6b8   :  { %v4042_v15 = vadd.f32 %v4041_v10, %v4040_v55  ;;  %v4043_v56 = vpop.f32.mrb[78].mxu1 }
 0x6b9   :  { %v3560_v46 = vadd.f32 %v4017_v3, %v3799_v49  ;;  %v4044_v45 = vpop.f32.mrb[79].mxu1 }
 0x6ba   :  { %v3606_v48 = vadd.f32 %v4042_v15, %v3557_v53  ;;  %v4045_v28 = vadd.f32 %v4044_v45, %v4043_v56 }
 0x6bc   :  { %v3609_v31 = vadd.f32 %v4045_v28, %v3560_v46  ;;  %v3614_v39 = vadd.f32 %v3606_v48, %v5913_v50 }
 0x6be   :  { %3622 = vadd.xlane.f32.xlu1 %v3614_v39  ;;  %v3615_v60 = vadd.f32 %v3609_v31, %v5911_v25 }
 0x6c0   :  { %3624 = vadd.xlane.f32.xlu0 %v3615_v60 }
 0x73a   :  { %v3619_v40 = vpop.xlane.xlu1 %3618 }
 0x73b   :  { %v3626_v14 = vmul.f32 0.0078125, %v3619_v40 }
 0x73c   :  { %v3621_v29 = vpop.xlane.xlu0 %3620 }
 0x73d   :  { %v3630_v17 = vsub.f32 %v3612_v1, %v3626_v14  ;;  %v3627_v27 = vmul.f32 0.0078125, %v3621_v29 }
 0x73f   :  { %v3631_v52 = vsub.f32 %v3613_v51, %v3627_v27  ;;  %v3634_v22 = vmul.f32 %v3630_v17, %v3630_v17 }
 0x741   :  { %3638 = vadd.xlane.f32.xlu1 %v3634_v22  ;;  %v3635_v43 = vmul.f32 %v3631_v52, %v3631_v52 }
 0x743   :  { %3640 = vadd.xlane.f32.xlu0 %v3635_v43 }
 0x74b   :  { %v3623_v36 = vpop.xlane.xlu1 %3622 }
 0x74c   :  { %v3628_v19 = vmul.f32 0.0078125, %v3623_v36 }
 0x74d   :  { %v3625_v20 = vpop.xlane.xlu0 %3624 }
 0x74e   :  { %v3632_v23 = vsub.f32 %v3614_v39, %v3628_v19  ;;  %v3629_v54 = vmul.f32 0.0078125, %v3625_v20 }
 0x750   :  { %v3633_v50 = vsub.f32 %v3615_v60, %v3629_v54  ;;  %v3636_v58 = vmul.f32 %v3632_v23, %v3632_v23 }
 0x752   :  { %3642 = vadd.xlane.f32.xlu1 %v3636_v58  ;;  %v3637_v25 = vmul.f32 %v3633_v50, %v3633_v50 }
 0x754   :  { %3644 = vadd.xlane.f32.xlu0 %v3637_v25 }
 0x7ce   :  { %v3639_v61 = vpop.xlane.xlu1 %3638 }
 0x7cf   :  { %v3646_v59 = vmul.f32 0.0078125, %v3639_v61 }
 0x7d0   :  { %v3641_v26 = vpop.xlane.xlu0 %3640 }
 0x7d1   :  { %v3650_v2 = vadd.f32 1e-05, %v3646_v59  ;;  %v3647_v37 = vmul.f32 0.0078125, %v3641_v26 }
 0x7d3   :  { %4456 = vrsqrt.f32 %v3650_v2  ;;  %v3651_v47 = vadd.f32 1e-05, %v3647_v37 }
 0x7d5   :  { %4458 = vrsqrt.f32 %v3651_v47 }
 0x7dd   :  { %v4457_v18 = vpop.eup %4456 }
 0x7de   :  { %v3658_v5 = vmul.f32 %v4457_v18, %v3630_v17 }
 0x7df   :  { %v4459_v9 = vpop.eup %4458  ;;  %v3643_v21 = vpop.xlane.xlu1 %3642 }
 0x7e0   :  { %v3668_v49 = vmul.f32 %v3832_v57, %v3658_v5  ;;  %v3659_v12 = vmul.f32 %v4459_v9, %v3631_v52  ;;  %v3648_v42 = vmul.f32 0.0078125, %v3643_v21 }
 0x7e1   :  { %v3645_v0 = vpop.xlane.xlu0 %3644 }
 0x7e2   :  { %v3678_v33 = vadd.f32 %v3833_v4, %v3668_v49  ;;  %v3669_v30 = vmul.f32 %v3832_v57, %v3659_v12  ;;  %v3652_v8 = vadd.f32 1e-05, %v3648_v42  ;;  %v3649_v62 = vmul.f32 0.0078125, %v3645_v0 }
 0x7e4   :  { %3682 = vst [vmem:[%s6200_s19] sm:$0xff] %v3678_v33  ;;  %v3679_v35 = vadd.f32 %v3833_v4, %v3669_v30  ;;  %4460 = vrsqrt.f32 %v3652_v8  ;;  %v3653_v6 = vadd.f32 1e-05, %v3649_v62 }
 0x7e6   :  { %3683 = vst [vmem:[%s6200_s19 + $0x8] sm:$0xff] %v3679_v35  ;;  %4462 = vrsqrt.f32 %v3653_v6 }
 0x7ee   :  { %v4461_v41 = vpop.eup %4460 }
 0x7ef   :  { %v3660_v63 = vmul.f32 %v4461_v41, %v3632_v23 }
 0x7f0   :  { %v4463_v24 = vpop.eup %4462 }
 0x7f1   :  { %v3670_v44 = vmul.f32 %v3832_v57, %v3660_v63  ;;  %v3661_v38 = vmul.f32 %v4463_v24, %v3633_v50 }
 0x7f3   :  { %v3680_v7 = vadd.f32 %v3833_v4, %v3670_v44  ;;  %v3671_v1 = vmul.f32 %v3832_v57, %v3661_v38 }
 0x7f5   :  { %3684 = vst [vmem:[%s6200_s19 + $0x10] sm:$0xff] %v3680_v7  ;;  %v3681_v51 = vadd.f32 %v3833_v4, %v3671_v1 }
 0x7f7   :  { %3685 = vst [vmem:[%s6200_s19 + $0x18] sm:$0xff] %v3681_v51 }

</bundles_post_ra>
